<compile_context>
chip_gen: v5e
topology: v5e:2x2
jax: 0.10.0
libtpu: 0.0.40
codegen_flags: <defaults>
</compile_context>

<pallas_src>
import math

import jax
import jax.numpy as jnp
from jax import lax
from jax.experimental import pallas as pl
from jax.experimental.pallas import tpu as pltpu

DILATIONS = (6, 12, 18)


# ----------------------------------------------------------------------------
# Capability probes (run once at import; every failure falls back gracefully)
# ----------------------------------------------------------------------------
def _probe_single_buffer_mode():
    """Return a pl.Buffered(buffer_count=1) iff this JAX build supports single-
    buffered BlockSpecs end-to-end (construct + lower + run a tiny kernel)."""
    if not hasattr(pl, "Buffered"):
        return None
    try:
        buf1 = pl.Buffered(buffer_count=1)
    except Exception:
        try:
            buf1 = pl.Buffered(1)
        except Exception:
            return None
    try:
        def _k(x_ref, o_ref):
            o_ref[...] = x_ref[...] + 1.0

        fn = pl.pallas_call(
            _k,
            out_shape=jax.ShapeDtypeStruct((8, 128), jnp.float32),
            grid=(2,),
            in_specs=[pl.BlockSpec((8, 128), lambda i: (0, 0),
                                   pipeline_mode=buf1)],
            out_specs=pl.BlockSpec((8, 128), lambda i: (0, 0)))
        jax.block_until_ready(fn(jnp.zeros((8, 128), jnp.float32)))
        return buf1
    except Exception:
        return None


_BUF1 = _probe_single_buffer_mode()


def _vmem_capacity_bytes():
    """Physical VMEM per TensorCore; conservative 64 MiB fallback (valid as a
    *limit* on all of v5e/v6e/v7x, never over-subscribes v7x)."""
    try:
        return int(getattr(pltpu.get_tpu_info(), "vmem_capacity_bytes", 64 << 20))
    except Exception:
        return 64 << 20


# ----------------------------------------------------------------------------
# Fused ASPP Pallas kernel (one (n, z) output plane per grid point, kd innermost)
# ----------------------------------------------------------------------------
def make_aspp_kernel(H, W, Cin, Cout, dilations, compute_dtype):
    HW = H * W
    itemsize = jnp.dtype(compute_dtype).itemsize
    sub_rows = 8 * (4 // itemsize)      # sublane tile rows: 8 (f32) / 16 (bf16)

    def collapse(p):
        """(H, W, Cin) -> (H*W, Cin) in compute dtype, picking the cheapest path."""
        if W % sub_rows == 0:
            return p.reshape(HW, Cin)   # tile-aligned: pure relabel, no relayout
        if W % 8 == 0:
            # aligned for f32 only: exact f32 round-trip keeps the collapse a
            # plain 32-bit relayout (fallback path; unused at aligned W).
            return p.astype(jnp.float32).reshape(HW, Cin).astype(compute_dtype)
        return p.reshape(HW, Cin)       # let the compiler relayout

    def kernel(img_ref, xp6_ref, xp12_ref, xp18_ref,
               w6_ref, w12_ref, w18_ref, wa1_ref, wout_ref, bias_ref,
               o_ref, acc_ref, oacc_ref):
        kd = pl.program_id(2)           # depth tap 0..2 (innermost, "arbitrary")
        xp_refs = (xp6_ref, xp12_ref, xp18_ref)
        w_refs = (w6_ref, w12_ref, w18_ref)

        @pl.when(kd == 0)
        def _init():
            acc_ref[...] = jnp.zeros_like(acc_ref)
            # pooled->1x1->upsample branch, pre-projected through w_out: a
            # per-sample row broadcast over the plane.
            oacc_ref[...] = jnp.broadcast_to(img_ref[...], oacc_ref.shape)

        # Dilated 3x3x3 branches: chain the 9 (kh, kw) taps of this kd slice into
        # one sum, then a single accumulator read-modify-write per branch.
        for b, d in enumerate(dilations):
            xpr = xp_refs[b]
            psum = None
            for kh in range(3):
                for kw in range(3):
                    patch = collapse(xpr[kh * d:kh * d + H, kw * d:kw * d + W, :])
                    t = jnp.dot(patch, w_refs[b][kd, kh * 3 + kw],
                                preferred_element_type=jnp.float32)
                    psum = t if psum is None else psum + t
            acc_ref[b] += psum

        # 1x1x1 branch (center depth plane) fused straight into the output conv.
        @pl.when(kd == 1)
        def _a1():
            d0 = dilations[0]
            center = collapse(xp6_ref[d0:d0 + H, d0:d0 + W, :])
            a1 = jnp.dot(center, wa1_ref[...], preferred_element_type=jnp.float32)
            a1 = jnp.maximum(a1 + bias_ref[0], 0.0)
            oacc_ref[...] += jnp.dot(a1.astype(compute_dtype), wout_ref[0],
                                     preferred_element_type=jnp.float32)

        # Finalize: branch bias+ReLU, fused concat + final 1x1 conv + BN + ReLU.
        @pl.when(kd == pl.num_programs(2) - 1)
        def _fin():
            out = oacc_ref[...]
            for b in range(len(dilations)):
                br = jnp.maximum(acc_ref[b] + bias_ref[1 + b], 0.0)
                out = out + jnp.dot(br.astype(compute_dtype), wout_ref[1 + b],
                                    preferred_element_type=jnp.float32)
            out = jnp.maximum(out + bias_ref[4], 0.0)
            o_ref[...] = out.astype(o_ref.dtype)

    return kernel


def aspp_forward(x_ndhwc, kp, *, compute_dtype=jnp.bfloat16, out_dtype=jnp.float32):
    """x: (N, D, H, W, Cin) f32 -> (N, D, H, W, depth).  Set out_dtype=bf16 to
    halve output HBM writeback if downstream tolerates it."""
    N, D, H, W, Cin = x_ndhwc.shape
    Cout = kp["wa1"].shape[-1]
    HW = H * W

    # ---- pooled pathway: AdaptiveAvgPool3d(1) -> 1x1 CBR -> trilinear upsample.
    # A 1x1x1 source upsampled with align_corners is an exact broadcast, so the
    # whole branch is a per-sample row; fold its slice of w_out here (plain JAX,
    # negligible work).
    pooled = jnp.mean(x_ndhwc.astype(jnp.float32), axis=(1, 2, 3))        # (N, Cin)
    img = jnp.maximum(pooled @ kp["w_pool"] + kp["b_pool"], 0.0)          # (N, Cout)
    img_row = (img @ kp["wout_img"]).reshape(N, 1, Cout).astype(jnp.float32)

    # ---- per-branch zero padding (pad d for dilation d): each branch DMAs only
    # the (H+2d, W+2d) halo it needs instead of a shared pad-18 plane.
    xc = x_ndhwc.astype(compute_dtype)
    xps = [jnp.pad(xc, ((0, 0), (d, d), (d, d), (d, d), (0, 0))) for d in DILATIONS]

    kernel = make_aspp_kernel(H, W, Cin, Cout, DILATIONS, compute_dtype)

    def xp_spec(d):
        # Whole padded (H+2d, W+2d) plane; the depth tap is picked by the index_map.
        return pl.BlockSpec(
            (None, None, H + 2 * d, W + 2 * d, Cin),
            lambda n, z, kd, d=d: (n, z + kd * d, 0, 0, 0))

    def const_spec(shape, imap):
        # Grid-invariant operand: constant block index -> DMA'd into VMEM once.
        # Drop the second pipeline buffer when the JAX build supports it.
        if _BUF1 is not None:
            return pl.BlockSpec(shape, imap, pipeline_mode=_BUF1)
        return pl.BlockSpec(shape, imap)

    in_specs = [
        pl.BlockSpec((None, 1, Cout), lambda n, z, kd: (n, 0, 0)),      # pooled row
        xp_spec(DILATIONS[0]), xp_spec(DILATIONS[1]), xp_spec(DILATIONS[2]),
        const_spec((3, 9, Cin, Cout), lambda n, z, kd: (0, 0, 0, 0)),   # w6
        const_spec((3, 9, Cin, Cout), lambda n, z, kd: (0, 0, 0, 0)),   # w12
        const_spec((3, 9, Cin, Cout), lambda n, z, kd: (0, 0, 0, 0)),   # w18
        const_spec((Cin, Cout), lambda n, z, kd: (0, 0)),               # w_a1
        const_spec((4, Cout, Cout), lambda n, z, kd: (0, 0, 0)),        # w_out slices
        const_spec((5, 1, Cout), lambda n, z, kd: (0, 0, 0)),           # biases
    ]
    out_specs = pl.BlockSpec((None, None, HW, Cout), lambda n, z, kd: (n, z, 0, 0))

    # ---- VMEM budget: double-buffered planes/output + resident weights + f32
    # accumulators, 2x headroom, capped at 0.85x this chip's physical VMEM.
    bpe_c = jnp.dtype(compute_dtype).itemsize
    bpe_o = jnp.dtype(out_dtype).itemsize
    xp_bytes = sum((H + 2 * d) * (W + 2 * d) * Cin for d in DILATIONS) * bpe_c
    wt_bytes = (3 * 3 * 9 * Cin * Cout + Cin * Cout + 4 * Cout * Cout) * bpe_c
    misc_bytes = (5 * Cout + Cout) * 4
    wt_copies = 1 if _BUF1 is not None else 2
    est = (2 * xp_bytes + wt_copies * wt_bytes + 2 * misc_bytes
           + 2 * HW * Cout * bpe_o + 4 * HW * Cout * 4)
    cap = _vmem_capacity_bytes()
    vmem_limit = int(min(max(2 * est, 32 << 20), (cap * 85) // 100))

    out = pl.pallas_call(
        kernel,
        out_shape=jax.ShapeDtypeStruct((N, D, HW, Cout), out_dtype),
        grid_spec=pltpu.PrefetchScalarGridSpec(
            num_scalar_prefetch=0,
            grid=(N, D, 3),              # kd MUST stay innermost (accumulator init)
            in_specs=in_specs,
            out_specs=out_specs,
            scratch_shapes=[pltpu.VMEM((3, HW, Cout), jnp.float32),
                            pltpu.VMEM((HW, Cout), jnp.float32)],
        ),
        compiler_params=pltpu.CompilerParams(
            dimension_semantics=("parallel", "parallel", "arbitrary"),
            vmem_limit_bytes=vmem_limit),
    )(img_row, xps[0], xps[1], xps[2], kp["w6"], kp["w12"], kp["w18"],
      kp["wa1"], kp["wout_br"], kp["bias"])

    return out.reshape(N, D, H, W, Cout)


# ----------------------------------------------------------------------------
# Parameter construction (deterministic, kaiming-normal like the PyTorch init)
# ----------------------------------------------------------------------------
def kaiming_normal(key, shape):
    fan_in = 1
    for s in shape[1:]:
        fan_in *= s
    std = math.sqrt(2.0 / fan_in)
    return std * jax.random.normal(key, shape, dtype=jnp.float32)


def make_bn_fold(cout, eps=1e-5):
    gamma = jnp.ones((cout,), jnp.float32)
    beta = jnp.zeros((cout,), jnp.float32)
    r_mean = jnp.zeros((cout,), jnp.float32)
    r_var = jnp.ones((cout,), jnp.float32)
    scale = gamma / jnp.sqrt(r_var + eps)
    bias = beta - r_mean * scale
    return scale, bias


def _attach_bn(p, depth):
    for name in ("pool", "a1", "a6", "a12", "a18", "out"):
        s, b = make_bn_fold(depth)
        p[f"s_{name}"], p[f"b_{name}"] = s, b
    return p


def init_aspp_params(key, in_channel, depth):
    keys = jax.random.split(key, 6)
    p = {
        "wc_pool": kaiming_normal(keys[0], (depth, in_channel, 1, 1, 1)),
        "wc_a1": kaiming_normal(keys[1], (depth, in_channel, 1, 1, 1)),
        "wc_a6": kaiming_normal(keys[2], (depth, in_channel, 3, 3, 3)),
        "wc_a12": kaiming_normal(keys[3], (depth, in_channel, 3, 3, 3)),
        "wc_a18": kaiming_normal(keys[4], (depth, in_channel, 3, 3, 3)),
        "wc_out": kaiming_normal(keys[5], (depth, depth * 5, 1, 1, 1)),
    }
    return _attach_bn(p, depth)


def make_structured_params(in_channel, depth):
    """One-hot tap weights: any tap mis-indexing produces an O(1) error."""
    z3 = jnp.zeros((depth, in_channel, 3, 3, 3), jnp.float32)
    z1 = jnp.zeros((depth, in_channel, 1, 1, 1), jnp.float32)
    p = {
        "wc_pool": z1, "wc_a1": z1,
        "wc_a6": z3.at[0, 1, 0, 0, 2].set(1.0),    # out0 <- in1, tap (kd=0,kh=0,kw=2)
        "wc_a12": z3.at[1, 0, 1, 1, 0].set(1.0),   # out1 <- in0, tap (1,1,0)
        "wc_a18": z3.at[2, 2, 1, 1, 1].set(1.0),   # out2 <- in2, center tap
    }
    wout = jnp.zeros((depth, depth * 5, 1, 1, 1), jnp.float32)
    wout = wout.at[0, 2 * depth + 0, 0, 0, 0].set(1.0)   # a6 slice
    wout = wout.at[1, 3 * depth + 1, 0, 0, 0].set(1.0)   # a12 slice
    wout = wout.at[2, 4 * depth + 2, 0, 0, 0].set(1.0)   # a18 slice
    p["wc_out"] = wout
    return _attach_bn(p, depth)


def prepare_kernel_params(p, compute_dtype=jnp.bfloat16):
    """Fold eval-mode BN scales into weights; lay weights out for the kernel."""
    depth = p["wc_a1"].shape[0]

    def mat_1x1(w):  # (Cout, Cin, 1,1,1) -> (Cin, Cout)
        return jnp.transpose(w.reshape(w.shape[0], w.shape[1]), (1, 0))

    def mat_3x3(w, scale):  # (Cout, Cin, 3,3,3) -> (3, 9, Cin, Cout), taps (kd, kh*3+kw)
        cout, cin = w.shape[0], w.shape[1]
        m = jnp.transpose(w, (2, 3, 4, 1, 0)).reshape(3, 9, cin, cout)
        return (m * scale[None, None, None, :]).astype(compute_dtype)

    kp = {}
    kp["w_pool"] = mat_1x1(p["wc_pool"]) * p["s_pool"][None, :]
    kp["b_pool"] = p["b_pool"]

    w_out = mat_1x1(p["wc_out"]) * p["s_out"][None, :]          # (5*depth, depth)
    kp["wout_img"] = w_out[:depth]                              # pooled-branch slice
    kp["wout_br"] = jnp.stack(
        [w_out[(i + 1) * depth:(i + 2) * depth] for i in range(4)]
    ).astype(compute_dtype)                                     # a1, a6, a12, a18

    kp["wa1"] = (mat_1x1(p["wc_a1"]) * p["s_a1"][None, :]).astype(compute_dtype)
    kp["w6"] = mat_3x3(p["wc_a6"], p["s_a6"])
    kp["w12"] = mat_3x3(p["wc_a12"], p["s_a12"])
    kp["w18"] = mat_3x3(p["wc_a18"], p["s_a18"])

    kp["bias"] = jnp.stack(
        [p["b_a1"], p["b_a6"], p["b_a12"], p["b_a18"], p["b_out"]]
    ).reshape(5, 1, depth).astype(jnp.float32)
    return kp


# ----------------------------------------------------------------------------
# Pure-JAX reference (NCDHW, mirrors the PyTorch module with eval-mode BN)
# ----------------------------------------------------------------------------
def ref_cbr(x, w, scale, bias, dilation=1, padding=0):
    y = lax.conv_general_dilated(
        x, w, window_strides=(1, 1, 1),
        padding=[(padding, padding)] * 3,
        rhs_dilation=(dilation,) * 3,
        dimension_numbers=("NCDHW", "OIDHW", "NCDHW"),
        precision=lax.Precision.HIGHEST)
    y = y * scale[None, :, None, None, None] + bias[None, :, None, None, None]
    return jnp.maximum(y, 0.0)


def ref_aspp(x_ncdhw, p):
    N, C, D, H, W = x_ncdhw.shape
    pooled = jnp.mean(x_ncdhw, axis=(2, 3, 4), keepdims=True)
    img = ref_cbr(pooled, p["wc_pool"], p["s_pool"], p["b_pool"])
    img = jnp.broadcast_to(img, (N, img.shape[1], D, H, W))
    a1 = ref_cbr(x_ncdhw, p["wc_a1"], p["s_a1"], p["b_a1"])
    a6 = ref_cbr(x_ncdhw, p["wc_a6"], p["s_a6"], p["b_a6"], dilation=6, padding=6)
    a12 = ref_cbr(x_ncdhw, p["wc_a12"], p["s_a12"], p["b_a12"], dilation=12, padding=12)
    a18 = ref_cbr(x_ncdhw, p["wc_a18"], p["s_a18"], p["b_a18"], dilation=18, padding=18)
    cat = jnp.concatenate([img, a1, a6, a12, a18], axis=1)
    return ref_cbr(cat, p["wc_out"], p["s_out"], p["b_out"])


# ----------------------------------------------------------------------------
if __name__ == "__main__":
    key = jax.random.PRNGKey(0)
    k_x, k_p = jax.random.split(key)

    # Small shapes consistent with the module (in_channel -> depth); W chosen as
    # a multiple of the bf16 sublane tile so the patch collapse is relayout-free.
    N, Cin, D, H, W = 2, 16, 8, 8, 16
    depth = 16

    x_ncdhw = jax.random.normal(k_x, (N, Cin, D, H, W), dtype=jnp.float32)
    x_ndhwc = jnp.transpose(x_ncdhw, (0, 2, 3, 4, 1))

    fwd = jax.jit(aspp_forward)

    # --- random-weight end-to-end check (bf16 MXU tolerance, relative) -------
    params = init_aspp_params(k_p, Cin, depth)
    kparams = prepare_kernel_params(params)
    out_ndhwc = jax.block_until_ready(fwd(x_ndhwc, kparams))
    out_ncdhw = jnp.transpose(out_ndhwc, (0, 4, 1, 2, 3))
    ref = jax.block_until_ready(ref_aspp(x_ncdhw, params))
    assert out_ncdhw.shape == (N, depth, D, H, W)
    err = float(jnp.max(jnp.abs(out_ncdhw - ref)))
    scale = float(jnp.max(jnp.abs(ref))) + 1.0
    assert err / scale < 5e-2, f"random-weight mismatch: max abs err = {err}"

    # --- structured one-hot tap check (tight tolerance; catches mis-indexing) -
    x_q = x_ncdhw.astype(jnp.bfloat16).astype(jnp.float32)  # bf16-exact inputs
    sparams = make_structured_params(Cin, depth)
    skparams = prepare_kernel_params(sparams)
    out_s = jax.block_until_ready(fwd(jnp.transpose(x_q, (0, 2, 3, 4, 1)), skparams))
    out_s = jnp.transpose(out_s, (0, 4, 1, 2, 3))
    ref_s = jax.block_until_ready(ref_aspp(x_q, sparams))
    err_s = float(jnp.max(jnp.abs(out_s - ref_s)))
    assert err_s < 1e-3, f"structured tap check failed: max abs err = {err_s}"

    print("KERNEL_OK")
</pallas_src>

<mosaic_0001>
module attributes {stable_mosaic.version = 11 : i64} {
  func.func @_k(%arg0: i32, %arg1: memref<8x128xf32, #tpu.memory_space<vmem>>, %arg2: memref<8x128xf32, #tpu.memory_space<vmem>>) attributes {dimension_semantics = [#tpu.dimension_semantics<arbitrary>], iteration_bounds = array<i64: 2>, scalar_prefetch = 0 : i64, scratch_operands = 0 : i64, tpu.core_type = #tpu.core_type<tc>, window_params = [{pipeline_mode = #tpu.pipeline_mode<synchronous>, transform_indices = @transform_0, window_bounds = array<i64: 8, 128>}, {pipeline_mode = #tpu.pipeline_mode<synchronous>, transform_indices = @transform_1, window_bounds = array<i64: 8, 128>}]} {
    %c0 = arith.constant 0 : index
    %c0_0 = arith.constant 0 : index
    %0 = vector.load %arg1[%c0, %c0_0] : memref<8x128xf32, #tpu.memory_space<vmem>>, vector<8x128xf32>
    %cst = arith.constant 1.000000e+00 : f32
    %1 = vector.broadcast %cst : f32 to vector<8x128xf32>
    %2 = arith.addf %0, %1 : vector<8x128xf32>
    %c0_1 = arith.constant 0 : index
    %c0_2 = arith.constant 0 : index
    %3 = vector.load %arg2[%c0_1, %c0_2] : memref<8x128xf32, #tpu.memory_space<vmem>>, vector<8x128xf32>
    tpu.vector_store %arg2[%c0_1, %c0_2], %2 {strides = array<i32>} : memref<8x128xf32, #tpu.memory_space<vmem>>, vector<8x128xf32>,
    return
  }
  func.func @transform_0(%arg0: i32) -> (i32, i32) {
    %c0_i32 = arith.constant 0 : i32
    %c0_i32_0 = arith.constant 0 : i32
    %c0_i32_1 = arith.constant 0 : i32
    return %c0_i32, %c0_i32_0 : i32, i32
  }
  func.func @transform_1(%arg0: i32) -> (i32, i32) {
    %c0_i32 = arith.constant 0 : i32
    %c0_i32_0 = arith.constant 0 : i32
    %c0_i32_1 = arith.constant 0 : i32
    return %c0_i32, %c0_i32_0 : i32, i32
  }
}

module attributes {stable_mosaic.version = 11 : i64} {
  func.func @kernel(%arg0: i32, %arg1: i32, %arg2: i32, %arg3: memref<1x1x16xf32, #tpu.memory_space<vmem>>, %arg4: memref<1x1x20x28x16xbf16, #tpu.memory_space<vmem>>, %arg5: memref<1x1x32x40x16xbf16, #tpu.memory_space<vmem>>, %arg6: memref<1x1x44x52x16xbf16, #tpu.memory_space<vmem>>, %arg7: memref<3x9x16x16xbf16, #tpu.memory_space<vmem>>, %arg8: memref<3x9x16x16xbf16, #tpu.memory_space<vmem>>, %arg9: memref<3x9x16x16xbf16, #tpu.memory_space<vmem>>, %arg10: memref<16x16xbf16, #tpu.memory_space<vmem>>, %arg11: memref<4x16x16xbf16, #tpu.memory_space<vmem>>, %arg12: memref<5x1x16xf32, #tpu.memory_space<vmem>>, %arg13: memref<1x1x128x16xf32, #tpu.memory_space<vmem>>, %arg14: memref<3x128x16xf32, #tpu.memory_space<vmem>>, %arg15: memref<128x16xf32, #tpu.memory_space<vmem>>) attributes {dimension_semantics = [#tpu.dimension_semantics<parallel>, #tpu.dimension_semantics<parallel>, #tpu.dimension_semantics<arbitrary>], iteration_bounds = array<i64: 2, 8, 3>, scalar_prefetch = 0 : i64, scratch_operands = 2 : i64, tpu.core_type = #tpu.core_type<tc>, window_params = [{transform_indices = @transform_0, window_bounds = array<i64: 1, 1, 16>}, {transform_indices = @transform_1, window_bounds = array<i64: 1, 1, 20, 28, 16>}, {transform_indices = @transform_2, window_bounds = array<i64: 1, 1, 32, 40, 16>}, {transform_indices = @transform_3, window_bounds = array<i64: 1, 1, 44, 52, 16>}, {pipeline_mode = #tpu.pipeline_mode<synchronous>, transform_indices = @transform_4, window_bounds = array<i64: 3, 9, 16, 16>}, {pipeline_mode = #tpu.pipeline_mode<synchronous>, transform_indices = @transform_5, window_bounds = array<i64: 3, 9, 16, 16>}, {pipeline_mode = #tpu.pipeline_mode<synchronous>, transform_indices = @transform_6, window_bounds = array<i64: 3, 9, 16, 16>}, {pipeline_mode = #tpu.pipeline_mode<synchronous>, transform_indices = @transform_7, window_bounds = array<i64: 16, 16>}, {pipeline_mode = #tpu.pipeline_mode<synchronous>, transform_indices = @transform_8, window_bounds = array<i64: 4, 16, 16>}, {pipeline_mode = #tpu.pipeline_mode<synchronous>, transform_indices = @transform_9, window_bounds = array<i64: 5, 1, 16>}, {transform_indices = @transform_10, window_bounds = array<i64: 1, 1, 128, 16>}]} {
    %c0_i32 = arith.constant 0 : i32
    %0 = arith.cmpi eq, %arg2, %c0_i32 : i32
    %1 = arith.extui %0 : i1 to i32
    %c0_i32_0 = arith.constant 0 : i32
    %2 = arith.cmpi ne, %1, %c0_i32_0 : i32
    scf.if %2 {
      %cst_250 = arith.constant 0.000000e+00 : f32
      %240 = vector.broadcast %cst_250 : f32 to vector<3x128x16xf32>
      %c0_251 = arith.constant 0 : index
      %c0_252 = arith.constant 0 : index
      %c0_253 = arith.constant 0 : index
      %241 = vector.load %arg14[%c0_251, %c0_252, %c0_253] : memref<3x128x16xf32, #tpu.memory_space<vmem>>, vector<3x128x16xf32>
      tpu.vector_store %arg14[%c0_251, %c0_252, %c0_253], %240 {strides = array<i32>} : memref<3x128x16xf32, #tpu.memory_space<vmem>>, vector<3x128x16xf32>,
      %c0_254 = arith.constant 0 : index
      %c0_255 = arith.constant 0 : index
      %c0_256 = arith.constant 0 : index
      %242 = vector.load %arg3[%c0_254, %c0_255, %c0_256] : memref<1x1x16xf32, #tpu.memory_space<vmem>>, vector<1x1x16xf32>
      %243 = vector.shape_cast %242 : vector<1x1x16xf32> to vector<1x16xf32>
      %244 = vector.shape_cast %243 : vector<1x16xf32> to vector<1x16xf32>
      %245 = vector.broadcast %244 : vector<1x16xf32> to vector<128x16xf32>
      %c0_257 = arith.constant 0 : index
      %c0_258 = arith.constant 0 : index
      %246 = vector.load %arg15[%c0_257, %c0_258] : memref<128x16xf32, #tpu.memory_space<vmem>>, vector<128x16xf32>
      tpu.vector_store %arg15[%c0_257, %c0_258], %245 {strides = array<i32>} : memref<128x16xf32, #tpu.memory_space<vmem>>, vector<128x16xf32>,
    } else {
    }
    %c0 = arith.constant 0 : index
    %c0_1 = arith.constant 0 : index
    %c0_2 = arith.constant 0 : index
    %c0_3 = arith.constant 0 : index
    %c0_4 = arith.constant 0 : index
    %3 = vector.load %arg4[%c0, %c0_1, %c0_2, %c0_3, %c0_4] : memref<1x1x20x28x16xbf16, #tpu.memory_space<vmem>>, vector<1x1x8x16x16xbf16>
    %4 = vector.shape_cast %3 : vector<1x1x8x16x16xbf16> to vector<8x16x16xbf16>
    %5 = vector.shape_cast %4 : vector<8x16x16xbf16> to vector<128x16xbf16>
    %6 = arith.index_cast %arg2 : i32 to index
    %c0_5 = arith.constant 0 : index
    %c0_6 = arith.constant 0 : index
    %c0_7 = arith.constant 0 : index
    %7 = vector.load %arg7[%6, %c0_5, %c0_6, %c0_7] : memref<3x9x16x16xbf16, #tpu.memory_space<vmem>>, vector<1x1x16x16xbf16>
    %8 = vector.shape_cast %7 : vector<1x1x16x16xbf16> to vector<16x16xbf16>
    %cst = arith.constant dense<0.000000e+00> : vector<128x16xf32>
    %9 = tpu.matmul %5, %8, %cst {dimension_numbers = #tpu.dot_dimension_numbers<[1], [0], [0], [1], [0, 0, 1, 1], [], []>} : vector<128x16xbf16>, vector<16x16xbf16>, vector<128x16xf32> -> vector<128x16xf32>
    %c0_8 = arith.constant 0 : index
    %c0_9 = arith.constant 0 : index
    %c0_10 = arith.constant 0 : index
    %c6 = arith.constant 6 : index
    %c0_11 = arith.constant 0 : index
    %10 = vector.load %arg4[%c0_8, %c0_9, %c0_10, %c6, %c0_11] : memref<1x1x20x28x16xbf16, #tpu.memory_space<vmem>>, vector<1x1x8x16x16xbf16>
    %11 = vector.shape_cast %10 : vector<1x1x8x16x16xbf16> to vector<8x16x16xbf16>
    %12 = vector.shape_cast %11 : vector<8x16x16xbf16> to vector<128x16xbf16>
    %13 = arith.index_cast %arg2 : i32 to index
    %c1 = arith.constant 1 : index
    %c0_12 = arith.constant 0 : index
    %c0_13 = arith.constant 0 : index
    %14 = vector.load %arg7[%13, %c1, %c0_12, %c0_13] : memref<3x9x16x16xbf16, #tpu.memory_space<vmem>>, vector<1x1x16x16xbf16>
    %15 = vector.shape_cast %14 : vector<1x1x16x16xbf16> to vector<16x16xbf16>
    %cst_14 = arith.constant dense<0.000000e+00> : vector<128x16xf32>
    %16 = tpu.matmul %12, %15, %cst_14 {dimension_numbers = #tpu.dot_dimension_numbers<[1], [0], [0], [1], [0, 0, 1, 1], [], []>} : vector<128x16xbf16>, vector<16x16xbf16>, vector<128x16xf32> -> vector<128x16xf32>
    %17 = arith.addf %9, %16 : vector<128x16xf32>
    %c0_15 = arith.constant 0 : index
    %c0_16 = arith.constant 0 : index
    %c0_17 = arith.constant 0 : index
    %c12 = arith.constant 12 : index
    %c0_18 = arith.constant 0 : index
    %18 = vector.load %arg4[%c0_15, %c0_16, %c0_17, %c12, %c0_18] : memref<1x1x20x28x16xbf16, #tpu.memory_space<vmem>>, vector<1x1x8x16x16xbf16>
    %19 = vector.shape_cast %18 : vector<1x1x8x16x16xbf16> to vector<8x16x16xbf16>
    %20 = vector.shape_cast %19 : vector<8x16x16xbf16> to vector<128x16xbf16>
    %21 = arith.index_cast %arg2 : i32 to index
    %c2 = arith.constant 2 : index
    %c0_19 = arith.constant 0 : index
    %c0_20 = arith.constant 0 : index
    %22 = vector.load %arg7[%21, %c2, %c0_19, %c0_20] : memref<3x9x16x16xbf16, #tpu.memory_space<vmem>>, vector<1x1x16x16xbf16>
    %23 = vector.shape_cast %22 : vector<1x1x16x16xbf16> to vector<16x16xbf16>
    %cst_21 = arith.constant dense<0.000000e+00> : vector<128x16xf32>
    %24 = tpu.matmul %20, %23, %cst_21 {dimension_numbers = #tpu.dot_dimension_numbers<[1], [0], [0], [1], [0, 0, 1, 1], [], []>} : vector<128x16xbf16>, vector<16x16xbf16>, vector<128x16xf32> -> vector<128x16xf32>
    %25 = arith.addf %17, %24 : vector<128x16xf32>
    %c0_22 = arith.constant 0 : index
    %c0_23 = arith.constant 0 : index
    %c6_24 = arith.constant 6 : index
    %c0_25 = arith.constant 0 : index
    %c0_26 = arith.constant 0 : index
    %26 = vector.load %arg4[%c0_22, %c0_23, %c6_24, %c0_25, %c0_26] : memref<1x1x20x28x16xbf16, #tpu.memory_space<vmem>>, vector<1x1x8x16x16xbf16>
    %27 = vector.shape_cast %26 : vector<1x1x8x16x16xbf16> to vector<8x16x16xbf16>
    %28 = vector.shape_cast %27 : vector<8x16x16xbf16> to vector<128x16xbf16>
    %29 = arith.index_cast %arg2 : i32 to index
    %c3 = arith.constant 3 : index
    %c0_27 = arith.constant 0 : index
    %c0_28 = arith.constant 0 : index
    %30 = vector.load %arg7[%29, %c3, %c0_27, %c0_28] : memref<3x9x16x16xbf16, #tpu.memory_space<vmem>>, vector<1x1x16x16xbf16>
    %31 = vector.shape_cast %30 : vector<1x1x16x16xbf16> to vector<16x16xbf16>
    %cst_29 = arith.constant dense<0.000000e+00> : vector<128x16xf32>
    %32 = tpu.matmul %28, %31, %cst_29 {dimension_numbers = #tpu.dot_dimension_numbers<[1], [0], [0], [1], [0, 0, 1, 1], [], []>} : vector<128x16xbf16>, vector<16x16xbf16>, vector<128x16xf32> -> vector<128x16xf32>
    %33 = arith.addf %25, %32 : vector<128x16xf32>
    %c0_30 = arith.constant 0 : index
    %c0_31 = arith.constant 0 : index
    %c6_32 = arith.constant 6 : index
    %c6_33 = arith.constant 6 : index
    %c0_34 = arith.constant 0 : index
    %34 = vector.load %arg4[%c0_30, %c0_31, %c6_32, %c6_33, %c0_34] : memref<1x1x20x28x16xbf16, #tpu.memory_space<vmem>>, vector<1x1x8x16x16xbf16>
    %35 = vector.shape_cast %34 : vector<1x1x8x16x16xbf16> to vector<8x16x16xbf16>
    %36 = vector.shape_cast %35 : vector<8x16x16xbf16> to vector<128x16xbf16>
    %37 = arith.index_cast %arg2 : i32 to index
    %c4 = arith.constant 4 : index
    %c0_35 = arith.constant 0 : index
    %c0_36 = arith.constant 0 : index
    %38 = vector.load %arg7[%37, %c4, %c0_35, %c0_36] : memref<3x9x16x16xbf16, #tpu.memory_space<vmem>>, vector<1x1x16x16xbf16>
    %39 = vector.shape_cast %38 : vector<1x1x16x16xbf16> to vector<16x16xbf16>
    %cst_37 = arith.constant dense<0.000000e+00> : vector<128x16xf32>
    %40 = tpu.matmul %36, %39, %cst_37 {dimension_numbers = #tpu.dot_dimension_numbers<[1], [0], [0], [1], [0, 0, 1, 1], [], []>} : vector<128x16xbf16>, vector<16x16xbf16>, vector<128x16xf32> -> vector<128x16xf32>
    %41 = arith.addf %33, %40 : vector<128x16xf32>
    %c0_38 = arith.constant 0 : index
    %c0_39 = arith.constant 0 : index
    %c6_40 = arith.constant 6 : index
    %c12_41 = arith.constant 12 : index
    %c0_42 = arith.constant 0 : index
    %42 = vector.load %arg4[%c0_38, %c0_39, %c6_40, %c12_41, %c0_42] : memref<1x1x20x28x16xbf16, #tpu.memory_space<vmem>>, vector<1x1x8x16x16xbf16>
    %43 = vector.shape_cast %42 : vector<1x1x8x16x16xbf16> to vector<8x16x16xbf16>
    %44 = vector.shape_cast %43 : vector<8x16x16xbf16> to vector<128x16xbf16>
    %45 = arith.index_cast %arg2 : i32 to index
    %c5 = arith.constant 5 : index
    %c0_43 = arith.constant 0 : index
    %c0_44 = arith.constant 0 : index
    %46 = vector.load %arg7[%45, %c5, %c0_43, %c0_44] : memref<3x9x16x16xbf16, #tpu.memory_space<vmem>>, vector<1x1x16x16xbf16>
    %47 = vector.shape_cast %46 : vector<1x1x16x16xbf16> to vector<16x16xbf16>
    %cst_45 = arith.constant dense<0.000000e+00> : vector<128x16xf32>
    %48 = tpu.matmul %44, %47, %cst_45 {dimension_numbers = #tpu.dot_dimension_numbers<[1], [0], [0], [1], [0, 0, 1, 1], [], []>} : vector<128x16xbf16>, vector<16x16xbf16>, vector<128x16xf32> -> vector<128x16xf32>
    %49 = arith.addf %41, %48 : vector<128x16xf32>
    %c0_46 = arith.constant 0 : index
    %c0_47 = arith.constant 0 : index
    %c12_48 = arith.constant 12 : index
    %c0_49 = arith.constant 0 : index
    %c0_50 = arith.constant 0 : index
    %50 = vector.load %arg4[%c0_46, %c0_47, %c12_48, %c0_49, %c0_50] : memref<1x1x20x28x16xbf16, #tpu.memory_space<vmem>>, vector<1x1x8x16x16xbf16>
    %51 = vector.shape_cast %50 : vector<1x1x8x16x16xbf16> to vector<8x16x16xbf16>
    %52 = vector.shape_cast %51 : vector<8x16x16xbf16> to vector<128x16xbf16>
    %53 = arith.index_cast %arg2 : i32 to index
    %c6_51 = arith.constant 6 : index
    %c0_52 = arith.constant 0 : index
    %c0_53 = arith.constant 0 : index
    %54 = vector.load %arg7[%53, %c6_51, %c0_52, %c0_53] : memref<3x9x16x16xbf16, #tpu.memory_space<vmem>>, vector<1x1x16x16xbf16>
    %55 = vector.shape_cast %54 : vector<1x1x16x16xbf16> to vector<16x16xbf16>
    %cst_54 = arith.constant dense<0.000000e+00> : vector<128x16xf32>
    %56 = tpu.matmul %52, %55, %cst_54 {dimension_numbers = #tpu.dot_dimension_numbers<[1], [0], [0], [1], [0, 0, 1, 1], [], []>} : vector<128x16xbf16>, vector<16x16xbf16>, vector<128x16xf32> -> vector<128x16xf32>
    %57 = arith.addf %49, %56 : vector<128x16xf32>
    %c0_55 = arith.constant 0 : index
    %c0_56 = arith.constant 0 : index
    %c12_57 = arith.constant 12 : index
    %c6_58 = arith.constant 6 : index
    %c0_59 = arith.constant 0 : index
    %58 = vector.load %arg4[%c0_55, %c0_56, %c12_57, %c6_58, %c0_59] : memref<1x1x20x28x16xbf16, #tpu.memory_space<vmem>>, vector<1x1x8x16x16xbf16>
    %59 = vector.shape_cast %58 : vector<1x1x8x16x16xbf16> to vector<8x16x16xbf16>
    %60 = vector.shape_cast %59 : vector<8x16x16xbf16> to vector<128x16xbf16>
    %61 = arith.index_cast %arg2 : i32 to index
    %c7 = arith.constant 7 : index
    %c0_60 = arith.constant 0 : index
    %c0_61 = arith.constant 0 : index
    %62 = vector.load %arg7[%61, %c7, %c0_60, %c0_61] : memref<3x9x16x16xbf16, #tpu.memory_space<vmem>>, vector<1x1x16x16xbf16>
    %63 = vector.shape_cast %62 : vector<1x1x16x16xbf16> to vector<16x16xbf16>
    %cst_62 = arith.constant dense<0.000000e+00> : vector<128x16xf32>
    %64 = tpu.matmul %60, %63, %cst_62 {dimension_numbers = #tpu.dot_dimension_numbers<[1], [0], [0], [1], [0, 0, 1, 1], [], []>} : vector<128x16xbf16>, vector<16x16xbf16>, vector<128x16xf32> -> vector<128x16xf32>
    %65 = arith.addf %57, %64 : vector<128x16xf32>
    %c0_63 = arith.constant 0 : index
    %c0_64 = arith.constant 0 : index
    %c12_65 = arith.constant 12 : index
    %c12_66 = arith.constant 12 : index
    %c0_67 = arith.constant 0 : index
    %66 = vector.load %arg4[%c0_63, %c0_64, %c12_65, %c12_66, %c0_67] : memref<1x1x20x28x16xbf16, #tpu.memory_space<vmem>>, vector<1x1x8x16x16xbf16>
    %67 = vector.shape_cast %66 : vector<1x1x8x16x16xbf16> to vector<8x16x16xbf16>
    %68 = vector.shape_cast %67 : vector<8x16x16xbf16> to vector<128x16xbf16>
    %69 = arith.index_cast %arg2 : i32 to index
    %c8 = arith.constant 8 : index
    %c0_68 = arith.constant 0 : index
    %c0_69 = arith.constant 0 : index
    %70 = vector.load %arg7[%69, %c8, %c0_68, %c0_69] : memref<3x9x16x16xbf16, #tpu.memory_space<vmem>>, vector<1x1x16x16xbf16>
    %71 = vector.shape_cast %70 : vector<1x1x16x16xbf16> to vector<16x16xbf16>
    %cst_70 = arith.constant dense<0.000000e+00> : vector<128x16xf32>
    %72 = tpu.matmul %68, %71, %cst_70 {dimension_numbers = #tpu.dot_dimension_numbers<[1], [0], [0], [1], [0, 0, 1, 1], [], []>} : vector<128x16xbf16>, vector<16x16xbf16>, vector<128x16xf32> -> vector<128x16xf32>
    %73 = arith.addf %65, %72 : vector<128x16xf32>
    %c0_71 = arith.constant 0 : index
    %c0_72 = arith.constant 0 : index
    %c0_73 = arith.constant 0 : index
    %74 = vector.load %arg14[%c0_71, %c0_72, %c0_73] : memref<3x128x16xf32, #tpu.memory_space<vmem>>, vector<1x128x16xf32>
    %75 = vector.shape_cast %74 : vector<1x128x16xf32> to vector<128x16xf32>
    %76 = arith.addf %75, %73 : vector<128x16xf32>
    %c0_74 = arith.constant 0 : index
    %c0_75 = arith.constant 0 : index
    %c0_76 = arith.constant 0 : index
    %77 = vector.load %arg14[%c0_74, %c0_75, %c0_76] : memref<3x128x16xf32, #tpu.memory_space<vmem>>, vector<1x128x16xf32>
    %78 = vector.shape_cast %77 : vector<1x128x16xf32> to vector<128x16xf32>
    %79 = vector.shape_cast %76 : vector<128x16xf32> to vector<1x128x16xf32>
    tpu.vector_store %arg14[%c0_74, %c0_75, %c0_76], %79 {strides = array<i32>} : memref<3x128x16xf32, #tpu.memory_space<vmem>>, vector<1x128x16xf32>,
    %c0_77 = arith.constant 0 : index
    %c0_78 = arith.constant 0 : index
    %c0_79 = arith.constant 0 : index
    %c0_80 = arith.constant 0 : index
    %c0_81 = arith.constant 0 : index
    %80 = vector.load %arg5[%c0_77, %c0_78, %c0_79, %c0_80, %c0_81] : memref<1x1x32x40x16xbf16, #tpu.memory_space<vmem>>, vector<1x1x8x16x16xbf16>
    %81 = vector.shape_cast %80 : vector<1x1x8x16x16xbf16> to vector<8x16x16xbf16>
    %82 = vector.shape_cast %81 : vector<8x16x16xbf16> to vector<128x16xbf16>
    %83 = arith.index_cast %arg2 : i32 to index
    %c0_82 = arith.constant 0 : index
    %c0_83 = arith.constant 0 : index
    %c0_84 = arith.constant 0 : index
    %84 = vector.load %arg8[%83, %c0_82, %c0_83, %c0_84] : memref<3x9x16x16xbf16, #tpu.memory_space<vmem>>, vector<1x1x16x16xbf16>
    %85 = vector.shape_cast %84 : vector<1x1x16x16xbf16> to vector<16x16xbf16>
    %cst_85 = arith.constant dense<0.000000e+00> : vector<128x16xf32>
    %86 = tpu.matmul %82, %85, %cst_85 {dimension_numbers = #tpu.dot_dimension_numbers<[1], [0], [0], [1], [0, 0, 1, 1], [], []>} : vector<128x16xbf16>, vector<16x16xbf16>, vector<128x16xf32> -> vector<128x16xf32>
    %c0_86 = arith.constant 0 : index
    %c0_87 = arith.constant 0 : index
    %c0_88 = arith.constant 0 : index
    %c12_89 = arith.constant 12 : index
    %c0_90 = arith.constant 0 : index
    %87 = vector.load %arg5[%c0_86, %c0_87, %c0_88, %c12_89, %c0_90] : memref<1x1x32x40x16xbf16, #tpu.memory_space<vmem>>, vector<1x1x8x16x16xbf16>
    %88 = vector.shape_cast %87 : vector<1x1x8x16x16xbf16> to vector<8x16x16xbf16>
    %89 = vector.shape_cast %88 : vector<8x16x16xbf16> to vector<128x16xbf16>
    %90 = arith.index_cast %arg2 : i32 to index
    %c1_91 = arith.constant 1 : index
    %c0_92 = arith.constant 0 : index
    %c0_93 = arith.constant 0 : index
    %91 = vector.load %arg8[%90, %c1_91, %c0_92, %c0_93] : memref<3x9x16x16xbf16, #tpu.memory_space<vmem>>, vector<1x1x16x16xbf16>
    %92 = vector.shape_cast %91 : vector<1x1x16x16xbf16> to vector<16x16xbf16>
    %cst_94 = arith.constant dense<0.000000e+00> : vector<128x16xf32>
    %93 = tpu.matmul %89, %92, %cst_94 {dimension_numbers = #tpu.dot_dimension_numbers<[1], [0], [0], [1], [0, 0, 1, 1], [], []>} : vector<128x16xbf16>, vector<16x16xbf16>, vector<128x16xf32> -> vector<128x16xf32>
    %94 = arith.addf %86, %93 : vector<128x16xf32>
    %c0_95 = arith.constant 0 : index
    %c0_96 = arith.constant 0 : index
    %c0_97 = arith.constant 0 : index
    %c24 = arith.constant 24 : index
    %c0_98 = arith.constant 0 : index
    %95 = vector.load %arg5[%c0_95, %c0_96, %c0_97, %c24, %c0_98] : memref<1x1x32x40x16xbf16, #tpu.memory_space<vmem>>, vector<1x1x8x16x16xbf16>
    %96 = vector.shape_cast %95 : vector<1x1x8x16x16xbf16> to vector<8x16x16xbf16>
    %97 = vector.shape_cast %96 : vector<8x16x16xbf16> to vector<128x16xbf16>
    %98 = arith.index_cast %arg2 : i32 to index
    %c2_99 = arith.constant 2 : index
    %c0_100 = arith.constant 0 : index
    %c0_101 = arith.constant 0 : index
    %99 = vector.load %arg8[%98, %c2_99, %c0_100, %c0_101] : memref<3x9x16x16xbf16, #tpu.memory_space<vmem>>, vector<1x1x16x16xbf16>
    %100 = vector.shape_cast %99 : vector<1x1x16x16xbf16> to vector<16x16xbf16>
    %cst_102 = arith.constant dense<0.000000e+00> : vector<128x16xf32>
    %101 = tpu.matmul %97, %100, %cst_102 {dimension_numbers = #tpu.dot_dimension_numbers<[1], [0], [0], [1], [0, 0, 1, 1], [], []>} : vector<128x16xbf16>, vector<16x16xbf16>, vector<128x16xf32> -> vector<128x16xf32>
    %102 = arith.addf %94, %101 : vector<128x16xf32>
    %c0_103 = arith.constant 0 : index
    %c0_104 = arith.constant 0 : index
    %c12_105 = arith.constant 12 : index
    %c0_106 = arith.constant 0 : index
    %c0_107 = arith.constant 0 : index
    %103 = vector.load %arg5[%c0_103, %c0_104, %c12_105, %c0_106, %c0_107] : memref<1x1x32x40x16xbf16, #tpu.memory_space<vmem>>, vector<1x1x8x16x16xbf16>
    %104 = vector.shape_cast %103 : vector<1x1x8x16x16xbf16> to vector<8x16x16xbf16>
    %105 = vector.shape_cast %104 : vector<8x16x16xbf16> to vector<128x16xbf16>
    %106 = arith.index_cast %arg2 : i32 to index
    %c3_108 = arith.constant 3 : index
    %c0_109 = arith.constant 0 : index
    %c0_110 = arith.constant 0 : index
    %107 = vector.load %arg8[%106, %c3_108, %c0_109, %c0_110] : memref<3x9x16x16xbf16, #tpu.memory_space<vmem>>, vector<1x1x16x16xbf16>
    %108 = vector.shape_cast %107 : vector<1x1x16x16xbf16> to vector<16x16xbf16>
    %cst_111 = arith.constant dense<0.000000e+00> : vector<128x16xf32>
    %109 = tpu.matmul %105, %108, %cst_111 {dimension_numbers = #tpu.dot_dimension_numbers<[1], [0], [0], [1], [0, 0, 1, 1], [], []>} : vector<128x16xbf16>, vector<16x16xbf16>, vector<128x16xf32> -> vector<128x16xf32>
    %110 = arith.addf %102, %109 : vector<128x16xf32>
    %c0_112 = arith.constant 0 : index
    %c0_113 = arith.constant 0 : index
    %c12_114 = arith.constant 12 : index
    %c12_115 = arith.constant 12 : index
    %c0_116 = arith.constant 0 : index
    %111 = vector.load %arg5[%c0_112, %c0_113, %c12_114, %c12_115, %c0_116] : memref<1x1x32x40x16xbf16, #tpu.memory_space<vmem>>, vector<1x1x8x16x16xbf16>
    %112 = vector.shape_cast %111 : vector<1x1x8x16x16xbf16> to vector<8x16x16xbf16>
    %113 = vector.shape_cast %112 : vector<8x16x16xbf16> to vector<128x16xbf16>
    %114 = arith.index_cast %arg2 : i32 to index
    %c4_117 = arith.constant 4 : index
    %c0_118 = arith.constant 0 : index
    %c0_119 = arith.constant 0 : index
    %115 = vector.load %arg8[%114, %c4_117, %c0_118, %c0_119] : memref<3x9x16x16xbf16, #tpu.memory_space<vmem>>, vector<1x1x16x16xbf16>
    %116 = vector.shape_cast %115 : vector<1x1x16x16xbf16> to vector<16x16xbf16>
    %cst_120 = arith.constant dense<0.000000e+00> : vector<128x16xf32>
    %117 = tpu.matmul %113, %116, %cst_120 {dimension_numbers = #tpu.dot_dimension_numbers<[1], [0], [0], [1], [0, 0, 1, 1], [], []>} : vector<128x16xbf16>, vector<16x16xbf16>, vector<128x16xf32> -> vector<128x16xf32>
    %118 = arith.addf %110, %117 : vector<128x16xf32>
    %c0_121 = arith.constant 0 : index
    %c0_122 = arith.constant 0 : index
    %c12_123 = arith.constant 12 : index
    %c24_124 = arith.constant 24 : index
    %c0_125 = arith.constant 0 : index
    %119 = vector.load %arg5[%c0_121, %c0_122, %c12_123, %c24_124, %c0_125] : memref<1x1x32x40x16xbf16, #tpu.memory_space<vmem>>, vector<1x1x8x16x16xbf16>
    %120 = vector.shape_cast %119 : vector<1x1x8x16x16xbf16> to vector<8x16x16xbf16>
    %121 = vector.shape_cast %120 : vector<8x16x16xbf16> to vector<128x16xbf16>
    %122 = arith.index_cast %arg2 : i32 to index
    %c5_126 = arith.constant 5 : index
    %c0_127 = arith.constant 0 : index
    %c0_128 = arith.constant 0 : index
    %123 = vector.load %arg8[%122, %c5_126, %c0_127, %c0_128] : memref<3x9x16x16xbf16, #tpu.memory_space<vmem>>, vector<1x1x16x16xbf16>
    %124 = vector.shape_cast %123 : vector<1x1x16x16xbf16> to vector<16x16xbf16>
    %cst_129 = arith.constant dense<0.000000e+00> : vector<128x16xf32>
    %125 = tpu.matmul %121, %124, %cst_129 {dimension_numbers = #tpu.dot_dimension_numbers<[1], [0], [0], [1], [0, 0, 1, 1], [], []>} : vector<128x16xbf16>, vector<16x16xbf16>, vector<128x16xf32> -> vector<128x16xf32>
    %126 = arith.addf %118, %125 : vector<128x16xf32>
    %c0_130 = arith.constant 0 : index
    %c0_131 = arith.constant 0 : index
    %c24_132 = arith.constant 24 : index
    %c0_133 = arith.constant 0 : index
    %c0_134 = arith.constant 0 : index
    %127 = vector.load %arg5[%c0_130, %c0_131, %c24_132, %c0_133, %c0_134] : memref<1x1x32x40x16xbf16, #tpu.memory_space<vmem>>, vector<1x1x8x16x16xbf16>
    %128 = vector.shape_cast %127 : vector<1x1x8x16x16xbf16> to vector<8x16x16xbf16>
    %129 = vector.shape_cast %128 : vector<8x16x16xbf16> to vector<128x16xbf16>
    %130 = arith.index_cast %arg2 : i32 to index
    %c6_135 = arith.constant 6 : index
    %c0_136 = arith.constant 0 : index
    %c0_137 = arith.constant 0 : index
    %131 = vector.load %arg8[%130, %c6_135, %c0_136, %c0_137] : memref<3x9x16x16xbf16, #tpu.memory_space<vmem>>, vector<1x1x16x16xbf16>
    %132 = vector.shape_cast %131 : vector<1x1x16x16xbf16> to vector<16x16xbf16>
    %cst_138 = arith.constant dense<0.000000e+00> : vector<128x16xf32>
    %133 = tpu.matmul %129, %132, %cst_138 {dimension_numbers = #tpu.dot_dimension_numbers<[1], [0], [0], [1], [0, 0, 1, 1], [], []>} : vector<128x16xbf16>, vector<16x16xbf16>, vector<128x16xf32> -> vector<128x16xf32>
    %134 = arith.addf %126, %133 : vector<128x16xf32>
    %c0_139 = arith.constant 0 : index
    %c0_140 = arith.constant 0 : index
    %c24_141 = arith.constant 24 : index
    %c12_142 = arith.constant 12 : index
    %c0_143 = arith.constant 0 : index
    %135 = vector.load %arg5[%c0_139, %c0_140, %c24_141, %c12_142, %c0_143] : memref<1x1x32x40x16xbf16, #tpu.memory_space<vmem>>, vector<1x1x8x16x16xbf16>
    %136 = vector.shape_cast %135 : vector<1x1x8x16x16xbf16> to vector<8x16x16xbf16>
    %137 = vector.shape_cast %136 : vector<8x16x16xbf16> to vector<128x16xbf16>
    %138 = arith.index_cast %arg2 : i32 to index
    %c7_144 = arith.constant 7 : index
    %c0_145 = arith.constant 0 : index
    %c0_146 = arith.constant 0 : index
    %139 = vector.load %arg8[%138, %c7_144, %c0_145, %c0_146] : memref<3x9x16x16xbf16, #tpu.memory_space<vmem>>, vector<1x1x16x16xbf16>
    %140 = vector.shape_cast %139 : vector<1x1x16x16xbf16> to vector<16x16xbf16>
    %cst_147 = arith.constant dense<0.000000e+00> : vector<128x16xf32>
    %141 = tpu.matmul %137, %140, %cst_147 {dimension_numbers = #tpu.dot_dimension_numbers<[1], [0], [0], [1], [0, 0, 1, 1], [], []>} : vector<128x16xbf16>, vector<16x16xbf16>, vector<128x16xf32> -> vector<128x16xf32>
    %142 = arith.addf %134, %141 : vector<128x16xf32>
    %c0_148 = arith.constant 0 : index
    %c0_149 = arith.constant 0 : index
    %c24_150 = arith.constant 24 : index
    %c24_151 = arith.constant 24 : index
    %c0_152 = arith.constant 0 : index
    %143 = vector.load %arg5[%c0_148, %c0_149, %c24_150, %c24_151, %c0_152] : memref<1x1x32x40x16xbf16, #tpu.memory_space<vmem>>, vector<1x1x8x16x16xbf16>
    %144 = vector.shape_cast %143 : vector<1x1x8x16x16xbf16> to vector<8x16x16xbf16>
    %145 = vector.shape_cast %144 : vector<8x16x16xbf16> to vector<128x16xbf16>
    %146 = arith.index_cast %arg2 : i32 to index
    %c8_153 = arith.constant 8 : index
    %c0_154 = arith.constant 0 : index
    %c0_155 = arith.constant 0 : index
    %147 = vector.load %arg8[%146, %c8_153, %c0_154, %c0_155] : memref<3x9x16x16xbf16, #tpu.memory_space<vmem>>, vector<1x1x16x16xbf16>
    %148 = vector.shape_cast %147 : vector<1x1x16x16xbf16> to vector<16x16xbf16>
    %cst_156 = arith.constant dense<0.000000e+00> : vector<128x16xf32>
    %149 = tpu.matmul %145, %148, %cst_156 {dimension_numbers = #tpu.dot_dimension_numbers<[1], [0], [0], [1], [0, 0, 1, 1], [], []>} : vector<128x16xbf16>, vector<16x16xbf16>, vector<128x16xf32> -> vector<128x16xf32>
    %150 = arith.addf %142, %149 : vector<128x16xf32>
    %c1_157 = arith.constant 1 : index
    %c0_158 = arith.constant 0 : index
    %c0_159 = arith.constant 0 : index
    %151 = vector.load %arg14[%c1_157, %c0_158, %c0_159] : memref<3x128x16xf32, #tpu.memory_space<vmem>>, vector<1x128x16xf32>
    %152 = vector.shape_cast %151 : vector<1x128x16xf32> to vector<128x16xf32>
    %153 = arith.addf %152, %150 : vector<128x16xf32>
    %c1_160 = arith.constant 1 : index
    %c0_161 = arith.constant 0 : index
    %c0_162 = arith.constant 0 : index
    %154 = vector.load %arg14[%c1_160, %c0_161, %c0_162] : memref<3x128x16xf32, #tpu.memory_space<vmem>>, vector<1x128x16xf32>
    %155 = vector.shape_cast %154 : vector<1x128x16xf32> to vector<128x16xf32>
    %156 = vector.shape_cast %153 : vector<128x16xf32> to vector<1x128x16xf32>
    tpu.vector_store %arg14[%c1_160, %c0_161, %c0_162], %156 {strides = array<i32>} : memref<3x128x16xf32, #tpu.memory_space<vmem>>, vector<1x128x16xf32>,
    %c0_163 = arith.constant 0 : index
    %c0_164 = arith.constant 0 : index
    %c0_165 = arith.constant 0 : index
    %c0_166 = arith.constant 0 : index
    %c0_167 = arith.constant 0 : index
    %157 = vector.load %arg6[%c0_163, %c0_164, %c0_165, %c0_166, %c0_167] : memref<1x1x44x52x16xbf16, #tpu.memory_space<vmem>>, vector<1x1x8x16x16xbf16>
    %158 = vector.shape_cast %157 : vector<1x1x8x16x16xbf16> to vector<8x16x16xbf16>
    %159 = vector.shape_cast %158 : vector<8x16x16xbf16> to vector<128x16xbf16>
    %160 = arith.index_cast %arg2 : i32 to index
    %c0_168 = arith.constant 0 : index
    %c0_169 = arith.constant 0 : index
    %c0_170 = arith.constant 0 : index
    %161 = vector.load %arg9[%160, %c0_168, %c0_169, %c0_170] : memref<3x9x16x16xbf16, #tpu.memory_space<vmem>>, vector<1x1x16x16xbf16>
    %162 = vector.shape_cast %161 : vector<1x1x16x16xbf16> to vector<16x16xbf16>
    %cst_171 = arith.constant dense<0.000000e+00> : vector<128x16xf32>
    %163 = tpu.matmul %159, %162, %cst_171 {dimension_numbers = #tpu.dot_dimension_numbers<[1], [0], [0], [1], [0, 0, 1, 1], [], []>} : vector<128x16xbf16>, vector<16x16xbf16>, vector<128x16xf32> -> vector<128x16xf32>
    %c0_172 = arith.constant 0 : index
    %c0_173 = arith.constant 0 : index
    %c0_174 = arith.constant 0 : index
    %c18 = arith.constant 18 : index
    %c0_175 = arith.constant 0 : index
    %164 = vector.load %arg6[%c0_172, %c0_173, %c0_174, %c18, %c0_175] : memref<1x1x44x52x16xbf16, #tpu.memory_space<vmem>>, vector<1x1x8x16x16xbf16>
    %165 = vector.shape_cast %164 : vector<1x1x8x16x16xbf16> to vector<8x16x16xbf16>
    %166 = vector.shape_cast %165 : vector<8x16x16xbf16> to vector<128x16xbf16>
    %167 = arith.index_cast %arg2 : i32 to index
    %c1_176 = arith.constant 1 : index
    %c0_177 = arith.constant 0 : index
    %c0_178 = arith.constant 0 : index
    %168 = vector.load %arg9[%167, %c1_176, %c0_177, %c0_178] : memref<3x9x16x16xbf16, #tpu.memory_space<vmem>>, vector<1x1x16x16xbf16>
    %169 = vector.shape_cast %168 : vector<1x1x16x16xbf16> to vector<16x16xbf16>
    %cst_179 = arith.constant dense<0.000000e+00> : vector<128x16xf32>
    %170 = tpu.matmul %166, %169, %cst_179 {dimension_numbers = #tpu.dot_dimension_numbers<[1], [0], [0], [1], [0, 0, 1, 1], [], []>} : vector<128x16xbf16>, vector<16x16xbf16>, vector<128x16xf32> -> vector<128x16xf32>
    %171 = arith.addf %163, %170 : vector<128x16xf32>
    %c0_180 = arith.constant 0 : index
    %c0_181 = arith.constant 0 : index
    %c0_182 = arith.constant 0 : index
    %c36 = arith.constant 36 : index
    %c0_183 = arith.constant 0 : index
    %172 = vector.load %arg6[%c0_180, %c0_181, %c0_182, %c36, %c0_183] : memref<1x1x44x52x16xbf16, #tpu.memory_space<vmem>>, vector<1x1x8x16x16xbf16>
    %173 = vector.shape_cast %172 : vector<1x1x8x16x16xbf16> to vector<8x16x16xbf16>
    %174 = vector.shape_cast %173 : vector<8x16x16xbf16> to vector<128x16xbf16>
    %175 = arith.index_cast %arg2 : i32 to index
    %c2_184 = arith.constant 2 : index
    %c0_185 = arith.constant 0 : index
    %c0_186 = arith.constant 0 : index
    %176 = vector.load %arg9[%175, %c2_184, %c0_185, %c0_186] : memref<3x9x16x16xbf16, #tpu.memory_space<vmem>>, vector<1x1x16x16xbf16>
    %177 = vector.shape_cast %176 : vector<1x1x16x16xbf16> to vector<16x16xbf16>
    %cst_187 = arith.constant dense<0.000000e+00> : vector<128x16xf32>
    %178 = tpu.matmul %174, %177, %cst_187 {dimension_numbers = #tpu.dot_dimension_numbers<[1], [0], [0], [1], [0, 0, 1, 1], [], []>} : vector<128x16xbf16>, vector<16x16xbf16>, vector<128x16xf32> -> vector<128x16xf32>
    %179 = arith.addf %171, %178 : vector<128x16xf32>
    %c0_188 = arith.constant 0 : index
    %c0_189 = arith.constant 0 : index
    %c18_190 = arith.constant 18 : index
    %c0_191 = arith.constant 0 : index
    %c0_192 = arith.constant 0 : index
    %180 = vector.load %arg6[%c0_188, %c0_189, %c18_190, %c0_191, %c0_192] : memref<1x1x44x52x16xbf16, #tpu.memory_space<vmem>>, vector<1x1x8x16x16xbf16>
    %181 = vector.shape_cast %180 : vector<1x1x8x16x16xbf16> to vector<8x16x16xbf16>
    %182 = vector.shape_cast %181 : vector<8x16x16xbf16> to vector<128x16xbf16>
    %183 = arith.index_cast %arg2 : i32 to index
    %c3_193 = arith.constant 3 : index
    %c0_194 = arith.constant 0 : index
    %c0_195 = arith.constant 0 : index
    %184 = vector.load %arg9[%183, %c3_193, %c0_194, %c0_195] : memref<3x9x16x16xbf16, #tpu.memory_space<vmem>>, vector<1x1x16x16xbf16>
    %185 = vector.shape_cast %184 : vector<1x1x16x16xbf16> to vector<16x16xbf16>
    %cst_196 = arith.constant dense<0.000000e+00> : vector<128x16xf32>
    %186 = tpu.matmul %182, %185, %cst_196 {dimension_numbers = #tpu.dot_dimension_numbers<[1], [0], [0], [1], [0, 0, 1, 1], [], []>} : vector<128x16xbf16>, vector<16x16xbf16>, vector<128x16xf32> -> vector<128x16xf32>
    %187 = arith.addf %179, %186 : vector<128x16xf32>
    %c0_197 = arith.constant 0 : index
    %c0_198 = arith.constant 0 : index
    %c18_199 = arith.constant 18 : index
    %c18_200 = arith.constant 18 : index
    %c0_201 = arith.constant 0 : index
    %188 = vector.load %arg6[%c0_197, %c0_198, %c18_199, %c18_200, %c0_201] : memref<1x1x44x52x16xbf16, #tpu.memory_space<vmem>>, vector<1x1x8x16x16xbf16>
    %189 = vector.shape_cast %188 : vector<1x1x8x16x16xbf16> to vector<8x16x16xbf16>
    %190 = vector.shape_cast %189 : vector<8x16x16xbf16> to vector<128x16xbf16>
    %191 = arith.index_cast %arg2 : i32 to index
    %c4_202 = arith.constant 4 : index
    %c0_203 = arith.constant 0 : index
    %c0_204 = arith.constant 0 : index
    %192 = vector.load %arg9[%191, %c4_202, %c0_203, %c0_204] : memref<3x9x16x16xbf16, #tpu.memory_space<vmem>>, vector<1x1x16x16xbf16>
    %193 = vector.shape_cast %192 : vector<1x1x16x16xbf16> to vector<16x16xbf16>
    %cst_205 = arith.constant dense<0.000000e+00> : vector<128x16xf32>
    %194 = tpu.matmul %190, %193, %cst_205 {dimension_numbers = #tpu.dot_dimension_numbers<[1], [0], [0], [1], [0, 0, 1, 1], [], []>} : vector<128x16xbf16>, vector<16x16xbf16>, vector<128x16xf32> -> vector<128x16xf32>
    %195 = arith.addf %187, %194 : vector<128x16xf32>
    %c0_206 = arith.constant 0 : index
    %c0_207 = arith.constant 0 : index
    %c18_208 = arith.constant 18 : index
    %c36_209 = arith.constant 36 : index
    %c0_210 = arith.constant 0 : index
    %196 = vector.load %arg6[%c0_206, %c0_207, %c18_208, %c36_209, %c0_210] : memref<1x1x44x52x16xbf16, #tpu.memory_space<vmem>>, vector<1x1x8x16x16xbf16>
    %197 = vector.shape_cast %196 : vector<1x1x8x16x16xbf16> to vector<8x16x16xbf16>
    %198 = vector.shape_cast %197 : vector<8x16x16xbf16> to vector<128x16xbf16>
    %199 = arith.index_cast %arg2 : i32 to index
    %c5_211 = arith.constant 5 : index
    %c0_212 = arith.constant 0 : index
    %c0_213 = arith.constant 0 : index
    %200 = vector.load %arg9[%199, %c5_211, %c0_212, %c0_213] : memref<3x9x16x16xbf16, #tpu.memory_space<vmem>>, vector<1x1x16x16xbf16>
    %201 = vector.shape_cast %200 : vector<1x1x16x16xbf16> to vector<16x16xbf16>
    %cst_214 = arith.constant dense<0.000000e+00> : vector<128x16xf32>
    %202 = tpu.matmul %198, %201, %cst_214 {dimension_numbers = #tpu.dot_dimension_numbers<[1], [0], [0], [1], [0, 0, 1, 1], [], []>} : vector<128x16xbf16>, vector<16x16xbf16>, vector<128x16xf32> -> vector<128x16xf32>
    %203 = arith.addf %195, %202 : vector<128x16xf32>
    %c0_215 = arith.constant 0 : index
    %c0_216 = arith.constant 0 : index
    %c36_217 = arith.constant 36 : index
    %c0_218 = arith.constant 0 : index
    %c0_219 = arith.constant 0 : index
    %204 = vector.load %arg6[%c0_215, %c0_216, %c36_217, %c0_218, %c0_219] : memref<1x1x44x52x16xbf16, #tpu.memory_space<vmem>>, vector<1x1x8x16x16xbf16>
    %205 = vector.shape_cast %204 : vector<1x1x8x16x16xbf16> to vector<8x16x16xbf16>
    %206 = vector.shape_cast %205 : vector<8x16x16xbf16> to vector<128x16xbf16>
    %207 = arith.index_cast %arg2 : i32 to index
    %c6_220 = arith.constant 6 : index
    %c0_221 = arith.constant 0 : index
    %c0_222 = arith.constant 0 : index
    %208 = vector.load %arg9[%207, %c6_220, %c0_221, %c0_222] : memref<3x9x16x16xbf16, #tpu.memory_space<vmem>>, vector<1x1x16x16xbf16>
    %209 = vector.shape_cast %208 : vector<1x1x16x16xbf16> to vector<16x16xbf16>
    %cst_223 = arith.constant dense<0.000000e+00> : vector<128x16xf32>
    %210 = tpu.matmul %206, %209, %cst_223 {dimension_numbers = #tpu.dot_dimension_numbers<[1], [0], [0], [1], [0, 0, 1, 1], [], []>} : vector<128x16xbf16>, vector<16x16xbf16>, vector<128x16xf32> -> vector<128x16xf32>
    %211 = arith.addf %203, %210 : vector<128x16xf32>
    %c0_224 = arith.constant 0 : index
    %c0_225 = arith.constant 0 : index
    %c36_226 = arith.constant 36 : index
    %c18_227 = arith.constant 18 : index
    %c0_228 = arith.constant 0 : index
    %212 = vector.load %arg6[%c0_224, %c0_225, %c36_226, %c18_227, %c0_228] : memref<1x1x44x52x16xbf16, #tpu.memory_space<vmem>>, vector<1x1x8x16x16xbf16>
    %213 = vector.shape_cast %212 : vector<1x1x8x16x16xbf16> to vector<8x16x16xbf16>
    %214 = vector.shape_cast %213 : vector<8x16x16xbf16> to vector<128x16xbf16>
    %215 = arith.index_cast %arg2 : i32 to index
    %c7_229 = arith.constant 7 : index
    %c0_230 = arith.constant 0 : index
    %c0_231 = arith.constant 0 : index
    %216 = vector.load %arg9[%215, %c7_229, %c0_230, %c0_231] : memref<3x9x16x16xbf16, #tpu.memory_space<vmem>>, vector<1x1x16x16xbf16>
    %217 = vector.shape_cast %216 : vector<1x1x16x16xbf16> to vector<16x16xbf16>
    %cst_232 = arith.constant dense<0.000000e+00> : vector<128x16xf32>
    %218 = tpu.matmul %214, %217, %cst_232 {dimension_numbers = #tpu.dot_dimension_numbers<[1], [0], [0], [1], [0, 0, 1, 1], [], []>} : vector<128x16xbf16>, vector<16x16xbf16>, vector<128x16xf32> -> vector<128x16xf32>
    %219 = arith.addf %211, %218 : vector<128x16xf32>
    %c0_233 = arith.constant 0 : index
    %c0_234 = arith.constant 0 : index
    %c36_235 = arith.constant 36 : index
    %c36_236 = arith.constant 36 : index
    %c0_237 = arith.constant 0 : index
    %220 = vector.load %arg6[%c0_233, %c0_234, %c36_235, %c36_236, %c0_237] : memref<1x1x44x52x16xbf16, #tpu.memory_space<vmem>>, vector<1x1x8x16x16xbf16>
    %221 = vector.shape_cast %220 : vector<1x1x8x16x16xbf16> to vector<8x16x16xbf16>
    %222 = vector.shape_cast %221 : vector<8x16x16xbf16> to vector<128x16xbf16>
    %223 = arith.index_cast %arg2 : i32 to index
    %c8_238 = arith.constant 8 : index
    %c0_239 = arith.constant 0 : index
    %c0_240 = arith.constant 0 : index
    %224 = vector.load %arg9[%223, %c8_238, %c0_239, %c0_240] : memref<3x9x16x16xbf16, #tpu.memory_space<vmem>>, vector<1x1x16x16xbf16>
    %225 = vector.shape_cast %224 : vector<1x1x16x16xbf16> to vector<16x16xbf16>
    %cst_241 = arith.constant dense<0.000000e+00> : vector<128x16xf32>
    %226 = tpu.matmul %222, %225, %cst_241 {dimension_numbers = #tpu.dot_dimension_numbers<[1], [0], [0], [1], [0, 0, 1, 1], [], []>} : vector<128x16xbf16>, vector<16x16xbf16>, vector<128x16xf32> -> vector<128x16xf32>
    %227 = arith.addf %219, %226 : vector<128x16xf32>
    %c2_242 = arith.constant 2 : index
    %c0_243 = arith.constant 0 : index
    %c0_244 = arith.constant 0 : index
    %228 = vector.load %arg14[%c2_242, %c0_243, %c0_244] : memref<3x128x16xf32, #tpu.memory_space<vmem>>, vector<1x128x16xf32>
    %229 = vector.shape_cast %228 : vector<1x128x16xf32> to vector<128x16xf32>
    %230 = arith.addf %229, %227 : vector<128x16xf32>
    %c2_245 = arith.constant 2 : index
    %c0_246 = arith.constant 0 : index
    %c0_247 = arith.constant 0 : index
    %231 = vector.load %arg14[%c2_245, %c0_246, %c0_247] : memref<3x128x16xf32, #tpu.memory_space<vmem>>, vector<1x128x16xf32>
    %232 = vector.shape_cast %231 : vector<1x128x16xf32> to vector<128x16xf32>
    %233 = vector.shape_cast %230 : vector<128x16xf32> to vector<1x128x16xf32>
    tpu.vector_store %arg14[%c2_245, %c0_246, %c0_247], %233 {strides = array<i32>} : memref<3x128x16xf32, #tpu.memory_space<vmem>>, vector<1x128x16xf32>,
    %c1_i32 = arith.constant 1 : i32
    %234 = arith.cmpi eq, %arg2, %c1_i32 : i32
    %235 = arith.extui %234 : i1 to i32
    %c0_i32_248 = arith.constant 0 : i32
    %236 = arith.cmpi ne, %235, %c0_i32_248 : i32
    scf.if %236 {
      %c0_250 = arith.constant 0 : index
      %c0_251 = arith.constant 0 : index
      %c6_252 = arith.constant 6 : index
      %c6_253 = arith.constant 6 : index
      %c0_254 = arith.constant 0 : index
      %240 = vector.load %arg4[%c0_250, %c0_251, %c6_252, %c6_253, %c0_254] : memref<1x1x20x28x16xbf16, #tpu.memory_space<vmem>>, vector<1x1x8x16x16xbf16>
      %241 = vector.shape_cast %240 : vector<1x1x8x16x16xbf16> to vector<8x16x16xbf16>
      %242 = vector.shape_cast %241 : vector<8x16x16xbf16> to vector<128x16xbf16>
      %c0_255 = arith.constant 0 : index
      %c0_256 = arith.constant 0 : index
      %243 = vector.load %arg10[%c0_255, %c0_256] : memref<16x16xbf16, #tpu.memory_space<vmem>>, vector<16x16xbf16>
      %cst_257 = arith.constant dense<0.000000e+00> : vector<128x16xf32>
      %244 = tpu.matmul %242, %243, %cst_257 {dimension_numbers = #tpu.dot_dimension_numbers<[1], [0], [0], [1], [0, 0, 1, 1], [], []>} : vector<128x16xbf16>, vector<16x16xbf16>, vector<128x16xf32> -> vector<128x16xf32>
      %c0_258 = arith.constant 0 : index
      %c0_259 = arith.constant 0 : index
      %c0_260 = arith.constant 0 : index
      %245 = vector.load %arg12[%c0_258, %c0_259, %c0_260] : memref<5x1x16xf32, #tpu.memory_space<vmem>>, vector<1x1x16xf32>
      %246 = vector.shape_cast %245 : vector<1x1x16xf32> to vector<1x16xf32>
      %247 = vector.broadcast %246 : vector<1x16xf32> to vector<128x16xf32>
      %248 = arith.addf %244, %247 : vector<128x16xf32>
      %cst_261 = arith.constant 0.000000e+00 : f32
      %249 = vector.broadcast %cst_261 : f32 to vector<128x16xf32>
      %250 = arith.maximumf %248, %249 : vector<128x16xf32>
      %c0_262 = arith.constant 0 : index
      %c0_263 = arith.constant 0 : index
      %251 = vector.load %arg15[%c0_262, %c0_263] : memref<128x16xf32, #tpu.memory_space<vmem>>, vector<128x16xf32>
      %252 = arith.truncf %250 : vector<128x16xf32> to vector<128x16xbf16>
      %c0_264 = arith.constant 0 : index
      %c0_265 = arith.constant 0 : index
      %c0_266 = arith.constant 0 : index
      %253 = vector.load %arg11[%c0_264, %c0_265, %c0_266] : memref<4x16x16xbf16, #tpu.memory_space<vmem>>, vector<1x16x16xbf16>
      %254 = vector.shape_cast %253 : vector<1x16x16xbf16> to vector<16x16xbf16>
      %cst_267 = arith.constant dense<0.000000e+00> : vector<128x16xf32>
      %255 = tpu.matmul %252, %254, %cst_267 {dimension_numbers = #tpu.dot_dimension_numbers<[1], [0], [0], [1], [0, 0, 1, 1], [], []>} : vector<128x16xbf16>, vector<16x16xbf16>, vector<128x16xf32> -> vector<128x16xf32>
      %256 = arith.addf %251, %255 : vector<128x16xf32>
      %c0_268 = arith.constant 0 : index
      %c0_269 = arith.constant 0 : index
      %257 = vector.load %arg15[%c0_268, %c0_269] : memref<128x16xf32, #tpu.memory_space<vmem>>, vector<128x16xf32>
      tpu.vector_store %arg15[%c0_268, %c0_269], %256 {strides = array<i32>} : memref<128x16xf32, #tpu.memory_space<vmem>>, vector<128x16xf32>,
    } else {
    }
    %c2_i32 = arith.constant 2 : i32
    %237 = arith.cmpi eq, %arg2, %c2_i32 : i32
    %238 = arith.extui %237 : i1 to i32
    %c0_i32_249 = arith.constant 0 : i32
    %239 = arith.cmpi ne, %238, %c0_i32_249 : i32
    scf.if %239 {
      %c0_250 = arith.constant 0 : index
      %c0_251 = arith.constant 0 : index
      %240 = vector.load %arg15[%c0_250, %c0_251] : memref<128x16xf32, #tpu.memory_space<vmem>>, vector<128x16xf32>
      %c0_252 = arith.constant 0 : index
      %c0_253 = arith.constant 0 : index
      %c0_254 = arith.constant 0 : index
      %241 = vector.load %arg14[%c0_252, %c0_253, %c0_254] : memref<3x128x16xf32, #tpu.memory_space<vmem>>, vector<1x128x16xf32>
      %242 = vector.shape_cast %241 : vector<1x128x16xf32> to vector<128x16xf32>
      %c1_255 = arith.constant 1 : index
      %c0_256 = arith.constant 0 : index
      %c0_257 = arith.constant 0 : index
      %243 = vector.load %arg12[%c1_255, %c0_256, %c0_257] : memref<5x1x16xf32, #tpu.memory_space<vmem>>, vector<1x1x16xf32>
      %244 = vector.shape_cast %243 : vector<1x1x16xf32> to vector<1x16xf32>
      %245 = vector.broadcast %244 : vector<1x16xf32> to vector<128x16xf32>
      %246 = arith.addf %242, %245 : vector<128x16xf32>
      %cst_258 = arith.constant 0.000000e+00 : f32
      %247 = vector.broadcast %cst_258 : f32 to vector<128x16xf32>
      %248 = arith.maximumf %246, %247 : vector<128x16xf32>
      %249 = arith.truncf %248 : vector<128x16xf32> to vector<128x16xbf16>
      %c1_259 = arith.constant 1 : index
      %c0_260 = arith.constant 0 : index
      %c0_261 = arith.constant 0 : index
      %250 = vector.load %arg11[%c1_259, %c0_260, %c0_261] : memref<4x16x16xbf16, #tpu.memory_space<vmem>>, vector<1x16x16xbf16>
      %251 = vector.shape_cast %250 : vector<1x16x16xbf16> to vector<16x16xbf16>
      %cst_262 = arith.constant dense<0.000000e+00> : vector<128x16xf32>
      %252 = tpu.matmul %249, %251, %cst_262 {dimension_numbers = #tpu.dot_dimension_numbers<[1], [0], [0], [1], [0, 0, 1, 1], [], []>} : vector<128x16xbf16>, vector<16x16xbf16>, vector<128x16xf32> -> vector<128x16xf32>
      %253 = arith.addf %240, %252 : vector<128x16xf32>
      %c1_263 = arith.constant 1 : index
      %c0_264 = arith.constant 0 : index
      %c0_265 = arith.constant 0 : index
      %254 = vector.load %arg14[%c1_263, %c0_264, %c0_265] : memref<3x128x16xf32, #tpu.memory_space<vmem>>, vector<1x128x16xf32>
      %255 = vector.shape_cast %254 : vector<1x128x16xf32> to vector<128x16xf32>
      %c2_266 = arith.constant 2 : index
      %c0_267 = arith.constant 0 : index
      %c0_268 = arith.constant 0 : index
      %256 = vector.load %arg12[%c2_266, %c0_267, %c0_268] : memref<5x1x16xf32, #tpu.memory_space<vmem>>, vector<1x1x16xf32>
      %257 = vector.shape_cast %256 : vector<1x1x16xf32> to vector<1x16xf32>
      %258 = vector.broadcast %257 : vector<1x16xf32> to vector<128x16xf32>
      %259 = arith.addf %255, %258 : vector<128x16xf32>
      %cst_269 = arith.constant 0.000000e+00 : f32
      %260 = vector.broadcast %cst_269 : f32 to vector<128x16xf32>
      %261 = arith.maximumf %259, %260 : vector<128x16xf32>
      %262 = arith.truncf %261 : vector<128x16xf32> to vector<128x16xbf16>
      %c2_270 = arith.constant 2 : index
      %c0_271 = arith.constant 0 : index
      %c0_272 = arith.constant 0 : index
      %263 = vector.load %arg11[%c2_270, %c0_271, %c0_272] : memref<4x16x16xbf16, #tpu.memory_space<vmem>>, vector<1x16x16xbf16>
      %264 = vector.shape_cast %263 : vector<1x16x16xbf16> to vector<16x16xbf16>
      %cst_273 = arith.constant dense<0.000000e+00> : vector<128x16xf32>
      %265 = tpu.matmul %262, %264, %cst_273 {dimension_numbers = #tpu.dot_dimension_numbers<[1], [0], [0], [1], [0, 0, 1, 1], [], []>} : vector<128x16xbf16>, vector<16x16xbf16>, vector<128x16xf32> -> vector<128x16xf32>
      %266 = arith.addf %253, %265 : vector<128x16xf32>
      %c2_274 = arith.constant 2 : index
      %c0_275 = arith.constant 0 : index
      %c0_276 = arith.constant 0 : index
      %267 = vector.load %arg14[%c2_274, %c0_275, %c0_276] : memref<3x128x16xf32, #tpu.memory_space<vmem>>, vector<1x128x16xf32>
      %268 = vector.shape_cast %267 : vector<1x128x16xf32> to vector<128x16xf32>
      %c3_277 = arith.constant 3 : index
      %c0_278 = arith.constant 0 : index
      %c0_279 = arith.constant 0 : index
      %269 = vector.load %arg12[%c3_277, %c0_278, %c0_279] : memref<5x1x16xf32, #tpu.memory_space<vmem>>, vector<1x1x16xf32>
      %270 = vector.shape_cast %269 : vector<1x1x16xf32> to vector<1x16xf32>
      %271 = vector.broadcast %270 : vector<1x16xf32> to vector<128x16xf32>
      %272 = arith.addf %268, %271 : vector<128x16xf32>
      %cst_280 = arith.constant 0.000000e+00 : f32
      %273 = vector.broadcast %cst_280 : f32 to vector<128x16xf32>
      %274 = arith.maximumf %272, %273 : vector<128x16xf32>
      %275 = arith.truncf %274 : vector<128x16xf32> to vector<128x16xbf16>
      %c3_281 = arith.constant 3 : index
      %c0_282 = arith.constant 0 : index
      %c0_283 = arith.constant 0 : index
      %276 = vector.load %arg11[%c3_281, %c0_282, %c0_283] : memref<4x16x16xbf16, #tpu.memory_space<vmem>>, vector<1x16x16xbf16>
      %277 = vector.shape_cast %276 : vector<1x16x16xbf16> to vector<16x16xbf16>
      %cst_284 = arith.constant dense<0.000000e+00> : vector<128x16xf32>
      %278 = tpu.matmul %275, %277, %cst_284 {dimension_numbers = #tpu.dot_dimension_numbers<[1], [0], [0], [1], [0, 0, 1, 1], [], []>} : vector<128x16xbf16>, vector<16x16xbf16>, vector<128x16xf32> -> vector<128x16xf32>
      %279 = arith.addf %266, %278 : vector<128x16xf32>
      %c4_285 = arith.constant 4 : index
      %c0_286 = arith.constant 0 : index
      %c0_287 = arith.constant 0 : index
      %280 = vector.load %arg12[%c4_285, %c0_286, %c0_287] : memref<5x1x16xf32, #tpu.memory_space<vmem>>, vector<1x1x16xf32>
      %281 = vector.shape_cast %280 : vector<1x1x16xf32> to vector<1x16xf32>
      %282 = vector.broadcast %281 : vector<1x16xf32> to vector<128x16xf32>
      %283 = arith.addf %279, %282 : vector<128x16xf32>
      %cst_288 = arith.constant 0.000000e+00 : f32
      %284 = vector.broadcast %cst_288 : f32 to vector<128x16xf32>
      %285 = arith.maximumf %283, %284 : vector<128x16xf32>
      %c0_289 = arith.constant 0 : index
      %c0_290 = arith.constant 0 : index
      %c0_291 = arith.constant 0 : index
      %c0_292 = arith.constant 0 : index
      %286 = vector.load %arg13[%c0_289, %c0_290, %c0_291, %c0_292] : memref<1x1x128x16xf32, #tpu.memory_space<vmem>>, vector<1x1x128x16xf32>
      %287 = vector.shape_cast %286 : vector<1x1x128x16xf32> to vector<128x16xf32>
      %288 = vector.shape_cast %285 : vector<128x16xf32> to vector<1x1x128x16xf32>
      tpu.vector_store %arg13[%c0_289, %c0_290, %c0_291, %c0_292], %288 {strides = array<i32>} : memref<1x1x128x16xf32, #tpu.memory_space<vmem>>, vector<1x1x128x16xf32>,
    } else {
    }
    return
  }
  func.func @transform_0(%arg0: i32, %arg1: i32, %arg2: i32) -> (i32, i32, i32) {
    %c0_i32 = arith.constant 0 : i32
    %c0_i32_0 = arith.constant 0 : i32
    %c0_i32_1 = arith.constant 0 : i32
    return %arg0, %c0_i32, %c0_i32_0 : i32, i32, i32
  }
  func.func @transform_1(%arg0: i32, %arg1: i32, %arg2: i32) -> (i32, i32, i32, i32, i32) {
    %c6_i32 = arith.constant 6 : i32
    %0 = arith.muli %arg2, %c6_i32 : i32
    %1 = arith.addi %arg1, %0 : i32
    %c0_i32 = arith.constant 0 : i32
    %c0_i32_0 = arith.constant 0 : i32
    %c0_i32_1 = arith.constant 0 : i32
    %c0_i32_2 = arith.constant 0 : i32
    return %arg0, %1, %c0_i32, %c0_i32_0, %c0_i32_1 : i32, i32, i32, i32, i32
  }
  func.func @transform_2(%arg0: i32, %arg1: i32, %arg2: i32) -> (i32, i32, i32, i32, i32) {
    %c12_i32 = arith.constant 12 : i32
    %0 = arith.muli %arg2, %c12_i32 : i32
    %1 = arith.addi %arg1, %0 : i32
    %c0_i32 = arith.constant 0 : i32
    %c0_i32_0 = arith.constant 0 : i32
    %c0_i32_1 = arith.constant 0 : i32
    %c0_i32_2 = arith.constant 0 : i32
    return %arg0, %1, %c0_i32, %c0_i32_0, %c0_i32_1 : i32, i32, i32, i32, i32
  }
  func.func @transform_3(%arg0: i32, %arg1: i32, %arg2: i32) -> (i32, i32, i32, i32, i32) {
    %c18_i32 = arith.constant 18 : i32
    %0 = arith.muli %arg2, %c18_i32 : i32
    %1 = arith.addi %arg1, %0 : i32
    %c0_i32 = arith.constant 0 : i32
    %c0_i32_0 = arith.constant 0 : i32
    %c0_i32_1 = arith.constant 0 : i32
    %c0_i32_2 = arith.constant 0 : i32
    return %arg0, %1, %c0_i32, %c0_i32_0, %c0_i32_1 : i32, i32, i32, i32, i32
  }
  func.func @transform_4(%arg0: i32, %arg1: i32, %arg2: i32) -> (i32, i32, i32, i32) {
    %c0_i32 = arith.constant 0 : i32
    %c0_i32_0 = arith.constant 0 : i32
    %c0_i32_1 = arith.constant 0 : i32
    %c0_i32_2 = arith.constant 0 : i32
    %c0_i32_3 = arith.constant 0 : i32
    return %c0_i32, %c0_i32_0, %c0_i32_1, %c0_i32_2 : i32, i32, i32, i32
  }
  func.func @transform_5(%arg0: i32, %arg1: i32, %arg2: i32) -> (i32, i32, i32, i32) {
    %c0_i32 = arith.constant 0 : i32
    %c0_i32_0 = arith.constant 0 : i32
    %c0_i32_1 = arith.constant 0 : i32
    %c0_i32_2 = arith.constant 0 : i32
    %c0_i32_3 = arith.constant 0 : i32
    return %c0_i32, %c0_i32_0, %c0_i32_1, %c0_i32_2 : i32, i32, i32, i32
  }
  func.func @transform_6(%arg0: i32, %arg1: i32, %arg2: i32) -> (i32, i32, i32, i32) {
    %c0_i32 = arith.constant 0 : i32
    %c0_i32_0 = arith.constant 0 : i32
    %c0_i32_1 = arith.constant 0 : i32
    %c0_i32_2 = arith.constant 0 : i32
    %c0_i32_3 = arith.constant 0 : i32
    return %c0_i32, %c0_i32_0, %c0_i32_1, %c0_i32_2 : i32, i32, i32, i32
  }
  func.func @transform_7(%arg0: i32, %arg1: i32, %arg2: i32) -> (i32, i32) {
    %c0_i32 = arith.constant 0 : i32
    %c0_i32_0 = arith.constant 0 : i32
    %c0_i32_1 = arith.constant 0 : i32
    return %c0_i32, %c0_i32_0 : i32, i32
  }
  func.func @transform_8(%arg0: i32, %arg1: i32, %arg2: i32) -> (i32, i32, i32) {
    %c0_i32 = arith.constant 0 : i32
    %c0_i32_0 = arith.constant 0 : i32
    %c0_i32_1 = arith.constant 0 : i32
    %c0_i32_2 = arith.constant 0 : i32
    return %c0_i32, %c0_i32_0, %c0_i32_1 : i32, i32, i32
  }
  func.func @transform_9(%arg0: i32, %arg1: i32, %arg2: i32) -> (i32, i32, i32) {
    %c0_i32 = arith.constant 0 : i32
    %c0_i32_0 = arith.constant 0 : i32
    %c0_i32_1 = arith.constant 0 : i32
    %c0_i32_2 = arith.constant 0 : i32
    return %c0_i32, %c0_i32_0, %c0_i32_1 : i32, i32, i32
  }
  func.func @transform_10(%arg0: i32, %arg1: i32, %arg2: i32) -> (i32, i32, i32, i32) {
    %c0_i32 = arith.constant 0 : i32
    %c0_i32_0 = arith.constant 0 : i32
    %c0_i32_1 = arith.constant 0 : i32
    return %arg0, %arg1, %c0_i32, %c0_i32_0 : i32, i32, i32, i32
  }
}

</mosaic_0001>

<bundles_post_ra>
// kernel: tpu_custom_call.1
= control target key start
LH: loop header
LB: loop body
LE: loop exit
PB: predicated region body
PF: predicated region fallthrough
CT: control target
= control target key end

     0   :  { %6 = vsyncpa [#allocation3], 0  ;;  %s287_s0 = inlined_call_operand.hbm [shape: f32[8,128], index: 0, kind: input, shape index: {}]   ;;  %s288_s1 = inlined_call_operand.hbm [shape: f32[8,128], index: 1, kind: output, shape index: {}]  }
   0x1   :  { %7 = vsyncpa [#allocation4], 0  ;;  %s270_s6 = smov 0  }
   0x2 LB: > { %s149_s7 = sadd.s32 4294967295, %s256_s6   ;;  %p150_p0 = scmp.ge.s32.totalorder %s256_s6, 1  ;;  %s256_s6 = sphi %s270_s6, %s13_s6  }
   0x3   : > { %p60_p1 = scmp.lt.s32.totalorder %s256_s6, 3  ;;  %s72_s10 = sshll.u32 %s287_s0, 4  ;;  %s73_s10 = int_to_ptr.hbm [resolvable:$true] %s72_s10 }
   0x4   : > { %p170_p3 = scmp.eq.s32.totalorder %s149_s7, 0  ;;  %s258_s11 = smov [#allocation2]  }
   0x5   : > { %p61_p2 = pnand %p150_p0, %p60_p1  ;;  %s74_s12 = sshll.u32 %s258_s11, 4  ;;  %s75_s12 = int_to_ptr.vmem [resolvable:$true] %s74_s12 }
   0x7   : > { %p166_p4 = pneg %p61_p2  ;;  %87 = sbr.rel (%p61_p2) target bundleno = 20 (0x14), region = 24 }
   0x9   : > { %p167_p5 = pnand %p170_p3, %p166_p4 }
   0xb   : > { %169 = dma.hbm_to_vmem [thread:$0]  (!%p167_p5), %s73_s10, 128, %s75_s12, [#allocation3]  }
   0xc   : > { %247 = dma.done.wait (%p170_p3), [#allocation3], 128  }
   0xd   : > { %249 = vsyncadd (%p170_p3), [#allocation3], 4294967168  ;;  %s259_s13 = smov [#allocation5]   ;;  %s109_s17 = sshll.u32 %s288_s1, 4  ;;  %v98_v0 = vld [vmem:[#allocation2] sm:$0xff]  ;;  %s110_s17 = int_to_ptr.hbm [resolvable:$true] %s109_s17 }
   0xe   : > { %s107_s14 = sshll.u32 %s259_s13, 4  ;;  %p172_p6 = scmp.eq.s32.totalorder %s149_s7, 1  ;;  %v99_v1 = vadd.f32 1.0, %v98_v0  ;;  %s108_s14 = int_to_ptr.vmem [resolvable:$true] %s107_s14 }
  0x10   : > { %100 = vst [vmem:[#allocation5] sm:$0xff] %v99_v1 }
  0x11   : > { %163 = dma.vmem_to_hbm [thread:$0]  (%p172_p6), %s108_s14, 128, %s110_s17, [#allocation4]  }
  0x12   : > { %251 = dma.done.wait (%p172_p6), [#allocation4], 128  }
  0x13   : > { %253 = vsyncadd (%p172_p6), [#allocation4], 4294967168 }
  0x14 PF: > { %s13_s6 = sadd.s32 1, %s256_s6  }
  0x15   : > { %p10_p7 = scmp.ge.s32.totalorder %s13_s6, 4  }
  0x17   :  { %12 = sbr.rel (!%p10_p7) target bundleno = 2 (0x2), region = 53 }
  0x1c   :  { %123 = vsyncpa [#allocation3], 1 }
  0x1d   :  { %125 = vsyncpa [#allocation3 + $0x1], 1 }
  0x1e   :  { %126 = vsyncpa [#allocation4], 1 }
  0x1f   :  { %128 = vsyncpa [#allocation4 + $0x1], 1 }

// kernel: aspp_forward.1
= control target key start
LH: loop header
LB: loop body
LE: loop exit
PB: predicated region body
PF: predicated region fallthrough
CT: control target
= control target key end

     0   :  { %s10986_s0 = inlined_call_operand.vmem [shape: f32[2,1,16], index: 0, kind: input, shape index: {}]   ;;  %s10987_s1 = inlined_call_operand.vmem [shape: bf16[2,20,20,28,16], index: 1, kind: input, shape index: {}]   ;;  %s10988_s2 = inlined_call_operand.vmem [shape: bf16[2,32,32,40,16], index: 2, kind: input, shape index: {}]   ;;  %s10989_s3 = inlined_call_operand.vmem [shape: bf16[2,44,44,52,16], index: 3, kind: input, shape index: {}]   ;;  %s10990_s4 = inlined_call_operand.vmem [shape: bf16[3,9,16,16], index: 4, kind: input, shape index: {}]   ;;  %s10991_s5 = inlined_call_operand.vmem [shape: bf16[3,9,16,16], index: 5, kind: input, shape index: {}]   ;;  %s10992_s6 = inlined_call_operand.vmem [shape: bf16[3,9,16,16], index: 6, kind: input, shape index: {}]   ;;  %s10993_s7 = inlined_call_operand.vmem [shape: bf16[16,16], index: 7, kind: input, shape index: {}]   ;;  %s10994_s8 = inlined_call_operand.vmem [shape: bf16[4,16,16], index: 8, kind: input, shape index: {}]   ;;  %s10995_s9 = inlined_call_operand.vmem [shape: f32[5,1,16], index: 9, kind: input, shape index: {}]   ;;  %s10996_s10 = inlined_call_operand.hbm [shape: f32[2,8,128,16], index: 10, kind: output, shape index: {}]  }
   0x1   :  { %11015 = sst [smem:[#allocation21_spill]] %s10994_s8 }
   0x2   :  { %11016 = sst [smem:[#allocation22_spill]] %s10995_s9 }
   0x3   :  { %11017 = sst [smem:[#allocation23_spill]] %s10996_s10 }
   0x4   :  { %15 = vsyncpa [#allocation5], 0 }
   0x5   :  { %17 = vsyncpa [#allocation5 + $0x1], 0  ;;  %s8899_s13 = smov 0   ;;  %s8901_s14 = smov 0  }
   0x6   :  { %s8903_s15 = smov 0   ;;  %s8905_s16 = smov 0  }
   0x7   :  { %s8907_s17 = smov 0   ;;  %s8909_s18 = smov 0  }
   0x8   :  { %s8911_s19 = smov 0   ;;  %s8913_s20 = smov 0  }
   0x9   :  { %s8915_s21 = smov 0   ;;  %s8917_s22 = smov 0  }
   0xa LB: > { %11018 = sst [smem:[#allocation7_spill]] %s8803_s13  ;;  %s7097_s23 = sadd.s32 4294967295, %s8839_s22   ;;  %s8839_s22 = sphi %s8917_s22, %s23_s22   ;;  %s8835_s21 = sphi %s8915_s21, %s11062_s21   ;;  %s8831_s20 = sphi %s8913_s20, %s11061_s20   ;;  %s8827_s19 = sphi %s8911_s19, %s11060_s19   ;;  %s8823_s18 = sphi %s8909_s18, %s11059_s18   ;;  %s8819_s17 = sphi %s8907_s17, %s11058_s17   ;;  %s8815_s16 = sphi %s8905_s16, %s11057_s16   ;;  %s8811_s15 = sphi %s8903_s15, %s11056_s15   ;;  %s8807_s14 = sphi %s8901_s14, %s11055_s14   ;;  %s8803_s13 = sphi %s8899_s13, %s11054_s13  }
   0xb   : > { %11019 = sst [smem:[#allocation8_spill]] %s8807_s14  ;;  %s7098_s24 = sadd.s32 4294967294, %s8839_s22  }
   0xc   : > { %11020 = sst [smem:[#allocation9_spill]] %s8811_s15  ;;  %s35_s25 = sadd.s32 1, %s8827_s19 }
   0xd   : > { %11021 = sst [smem:[#allocation10_spill]] %s8823_s18  ;;  %p36_p0 = scmp.ge.s32.totalorder %s35_s25, 3 }
   0xe   : > { %11022 = sst [smem:[#allocation11_spill]] %s8827_s19  ;;  %s38_s26 = sadd.s32 1, %s8831_s20 }
   0xf   : > { %11023 = sst [smem:[#allocation12_spill]] %s8831_s20  ;;  %s42_s27 = sadd.s32 1, %s8835_s21 }
  0x10   : > { %11024 = sst [smem:[#allocation13_spill]] %s8835_s21  ;;  %p309_p1 = scmp.ne.s32.totalorder %s8811_s15, %s8807_s14 }
  0x11   : > { %11025 = sst [smem:[#allocation14_spill]] %s8839_s22  ;;  %s11064_s25 = smov (%p36_p0, %s35_s25), 0 }
  0x12   : > { %11026 = sst [smem:[#allocation15_spill]] %s11064_s25  ;;  %s11066_s26 = smov (!%p36_p0, %s38_s26), %s8831_s20 }
  0x13   : > { %p310_p2 = scmp.eq.s32.totalorder %s7097_s23, 47  ;;  %p315_p3 = scmp.ne.s32.totalorder %s8807_s14, %s8803_s13 }
  0x14   : > { %p40_p4 = scmp.ge.s32.totalorder %s11066_s26, 8  ;;  %p316_p5 = scmp.eq.s32.totalorder %s7098_s24, 47 }
  0x15   : > { %p8961_p6 = por %p310_p2, %p309_p1  ;;  %p7101_p8 = scmp.ge.s32.totalorder %s8839_s22, 1 }
  0x16   : > { %s11068_s26 = smov (%p40_p4, %s11066_s26), 0  ;;  %s11070_s27 = smov (!%p40_p4, %s42_s27), %s8835_s21 }
  0x17   : > { %s11027_s28 = scalar_select %p8961_p6, 1, 0 }
  0x18   : > { %11029 = sst [smem:[#allocation17_spill]] %s11068_s26  ;;  %p8968_p7 = por %p316_p5, %p315_p3 }
  0x19   : > { %11028 = sst [smem:[#allocation16_spill]] %s11027_s28  ;;  %p44_p9 = scmp.ge.s32.totalorder %s11070_s27, 2 }
  0x1a   : > { %s11030_s29 = scalar_select %p8968_p7, 1, 0 }
  0x1b   : > { %p406_p10 = scmp.lt.s32.totalorder %s8839_s22, 49  ;;  %s295_s30 = ssub.s32 %s8831_s20, %s11068_s26 }
  0x1c   : > { %11031 = sst [smem:[#allocation18_spill]] %s11030_s29  ;;  %s11072_s27 = smov (%p44_p9, %s11070_s27), 0 }
  0x1d   : > { %11032 = sst [smem:[#allocation19_spill]] %s11072_s27  ;;  %p407_p11 = pnand %p7101_p8, %p406_p10 }
  0x1e   : > { %s294_s11 = ssub.s32 %s8835_s21, %s11072_s27  ;;  %s299_s23 = sadd.s32 1, %s8811_s15 }
  0x1f   : > { %s296_s12 = sor.u32 %s295_s30, %s294_s11  ;;  %s11002_s26 = sand.u32 (!%p407_p11), 1, %s8807_s14  }
  0x20   : > { %p297_p12 = scmp.eq.s32.totalorder %s296_s12, 0  ;;  %410 = sbr.rel (%p407_p11) target bundleno = 1749 (0x6d5), region = 60 }
  0x21   : > { %p475_p13 = scmp.lt.s32.totalorder (!%p407_p11), %s8823_s18, 1  ;;  %s8988_s25 = sshll.u32 (!%p407_p11), %s11002_s26, 7 }
  0x22   : > { %s8982_s24 = scalar_select %p297_p12, %s8811_s15, %s299_s23  }
  0x23   : > { %s478_s27 = smul.u32 (!%p407_p11), 6, %s8815_s16  ;;  %p7106_p3 = scmp.ne.s32.totalorder (!%p407_p11), %s8815_s16, 0 }
  0x24   : > { %11033 = sst [smem:[#allocation20_spill]] %s8982_s24  ;;  %s491_s30 = smul.u32 (!%p407_p11), 12, %s8815_s16 }
  0x25   : > { %s8993_s11 = scalar_select %p475_p13, %s8823_s18, 1 }
  0x26   : > { %s479_s12 = sadd.s32 %s8819_s17, %s478_s27  ;;  %s492_s23 = sadd.s32 %s8819_s17, %s491_s30 }
  0x27   : > { %p482_p0 = scmp.lt.s32.totalorder %s479_s12, 19  ;;  %s8628_s24 = smul.u32 1600, %s8993_s11 }
  0x28   : > { %p495_p1 = scmp.lt.s32.totalorder %s492_s23, 31  ;;  %s8630_s13 = smul.u32 5120, %s8993_s11 }
  0x29   : > { %s11074_s12 = smov (!%p482_p0, %s479_s12), 19  ;;  %s504_s10 = smul.u32 18, %s8815_s16 }
  0x2a   : > { %s11076_s23 = smov (!%p495_p1, %s492_s23), 31  ;;  %s8627_s26 = smul.u32 80, %s11074_s12 }
  0x2b   : > { %s8629_s15 = smul.u32 160, %s11076_s23  ;;  %s505_s19 = sadd.s32 %s8819_s17, %s504_s10 }
  0x2c   : > { %s486_s29 = sadd.s32 %s8628_s24, %s8627_s26  ;;  %p508_p2 = scmp.lt.s32.totalorder %s505_s19, 43 }
  0x2d   : > { %s7103_s22 = sshll.u32 %s486_s29, 2  ;;  %s499_s20 = sadd.s32 %s8630_s13, %s8629_s15 }
  0x2e   : > { %s9007_s28 = scalar_lea.vmem %s10987_s1, %s7103_s22  ;;  %s7104_s21 = sshll.u32 %s499_s20, 2 }
  0x2f   : > { %s9013_s9 = scalar_lea.vmem %s10988_s2, %s7104_s21  ;;  %s8632_s12 = smul.u32 13552, %s8993_s11 }
  0x30   : > { %s11078_s19 = smov (!%p508_p2, %s505_s19), 43  ;;  %s9022_s22 = scalar_lea.vmem [#allocation4], %s8988_s25 }
  0x31   : > { %s8631_s26 = smul.u32 308, %s11078_s19  ;;  %s11034_s13 = scalar_lea.vmem (!%p7106_p3), %s10986_s0, %s8993_s11 }
  0x32   : > { %521 = sbr.rel (%p7106_p3) target bundleno = 120 (0x78), region = 64 }
  0x33   : > { %s512_s24 = sadd.s32 %s8632_s12, %s8631_s26 }
  0x34   : > { %s7105_s29 = sshll.u32 %s512_s24, 2 }
  0x35   : > { %s9019_s27 = scalar_lea.vmem %s10989_s3, %s7105_s29 }
  0x37   : > { %vm522_vm0 = vcmask 130048   ;;  %v8841_v0 = vmov 0.0   ;;  %v8723_v1 = vld [vmem:[%s11034_s13] ss:$0 sm:$0xff] }
  0x38   : > { %523 = vst.msk [vmem:[#allocation2] sm:$0xff] %vm522_vm0, %v8841_v0 }
  0x39   : > { %524 = vst.msk [vmem:[#allocation2 + $0x8] sm:$0xff] %vm522_vm0, %v8841_v0 }
  0x3a   : > { %525 = vst.msk [vmem:[#allocation2 + $0x10] sm:$0xff] %vm522_vm0, %v8841_v0 }
  0x3b   : > { %526 = vst.msk [vmem:[#allocation2 + $0x18] sm:$0xff] %vm522_vm0, %v8841_v0 }
  0x3c   : > { %527 = vst.msk [vmem:[#allocation2 + $0x20] sm:$0xff] %vm522_vm0, %v8841_v0 }
  0x3d   : > { %528 = vst.msk [vmem:[#allocation2 + $0x28] sm:$0xff] %vm522_vm0, %v8841_v0 }
  0x3e   : > { %529 = vst.msk [vmem:[#allocation2 + $0x30] sm:$0xff] %vm522_vm0, %v8841_v0 }
  0x3f   : > { %530 = vst.msk [vmem:[#allocation2 + $0x38] sm:$0xff] %vm522_vm0, %v8841_v0 }
  0x40   : > { %531 = vst.msk [vmem:[#allocation2 + $0x40] sm:$0xff] %vm522_vm0, %v8841_v0 }
  0x41   : > { %532 = vst.msk [vmem:[#allocation2 + $0x48] sm:$0xff] %vm522_vm0, %v8841_v0 }
  0x42   : > { %533 = vst.msk [vmem:[#allocation2 + $0x50] sm:$0xff] %vm522_vm0, %v8841_v0 }
  0x43   : > { %534 = vst.msk [vmem:[#allocation2 + $0x58] sm:$0xff] %vm522_vm0, %v8841_v0 }
  0x44   : > { %535 = vst.msk [vmem:[#allocation2 + $0x60] sm:$0xff] %vm522_vm0, %v8841_v0 }
  0x45   : > { %536 = vst.msk [vmem:[#allocation2 + $0x68] sm:$0xff] %vm522_vm0, %v8841_v0 }
  0x46   : > { %537 = vst.msk [vmem:[#allocation2 + $0x70] sm:$0xff] %vm522_vm0, %v8841_v0 }
  0x47   : > { %538 = vst.msk [vmem:[#allocation2 + $0x78] sm:$0xff] %vm522_vm0, %v8841_v0 }
  0x48   : > { %539 = vst.msk [vmem:[#allocation2 + $0x80] sm:$0xff] %vm522_vm0, %v8841_v0 }
  0x49   : > { %540 = vst.msk [vmem:[#allocation2 + $0x88] sm:$0xff] %vm522_vm0, %v8841_v0 }
  0x4a   : > { %541 = vst.msk [vmem:[#allocation2 + $0x90] sm:$0xff] %vm522_vm0, %v8841_v0 }
  0x4b   : > { %542 = vst.msk [vmem:[#allocation2 + $0x98] sm:$0xff] %vm522_vm0, %v8841_v0 }
  0x4c   : > { %543 = vst.msk [vmem:[#allocation2 + $0xa0] sm:$0xff] %vm522_vm0, %v8841_v0 }
  0x4d   : > { %544 = vst.msk [vmem:[#allocation2 + $0xa8] sm:$0xff] %vm522_vm0, %v8841_v0 }
  0x4e   : > { %545 = vst.msk [vmem:[#allocation2 + $0xb0] sm:$0xff] %vm522_vm0, %v8841_v0 }
  0x4f   : > { %546 = vst.msk [vmem:[#allocation2 + $0xb8] sm:$0xff] %vm522_vm0, %v8841_v0 }
  0x50   : > { %547 = vst.msk [vmem:[#allocation2 + $0xc0] sm:$0xff] %vm522_vm0, %v8841_v0 }
  0x51   : > { %548 = vst.msk [vmem:[#allocation2 + $0xc8] sm:$0xff] %vm522_vm0, %v8841_v0 }
  0x52   : > { %549 = vst.msk [vmem:[#allocation2 + $0xd0] sm:$0xff] %vm522_vm0, %v8841_v0 }
  0x53   : > { %550 = vst.msk [vmem:[#allocation2 + $0xd8] sm:$0xff] %vm522_vm0, %v8841_v0 }
  0x54   : > { %551 = vst.msk [vmem:[#allocation2 + $0xe0] sm:$0xff] %vm522_vm0, %v8841_v0 }
  0x55   : > { %552 = vst.msk [vmem:[#allocation2 + $0xe8] sm:$0xff] %vm522_vm0, %v8841_v0 }
  0x56   : > { %553 = vst.msk [vmem:[#allocation2 + $0xf0] sm:$0xff] %vm522_vm0, %v8841_v0 }
  0x57   : > { %554 = vst.msk [vmem:[#allocation2 + $0xf8] sm:$0xff] %vm522_vm0, %v8841_v0 }
  0x58   : > { %555 = vst.msk [vmem:[#allocation2 + $0x100] sm:$0xff] %vm522_vm0, %v8841_v0 }
  0x59   : > { %556 = vst.msk [vmem:[#allocation2 + $0x108] sm:$0xff] %vm522_vm0, %v8841_v0 }
  0x5a   : > { %557 = vst.msk [vmem:[#allocation2 + $0x110] sm:$0xff] %vm522_vm0, %v8841_v0 }
  0x5b   : > { %558 = vst.msk [vmem:[#allocation2 + $0x118] sm:$0xff] %vm522_vm0, %v8841_v0 }
  0x5c   : > { %559 = vst.msk [vmem:[#allocation2 + $0x120] sm:$0xff] %vm522_vm0, %v8841_v0 }
  0x5d   : > { %560 = vst.msk [vmem:[#allocation2 + $0x128] sm:$0xff] %vm522_vm0, %v8841_v0 }
  0x5e   : > { %561 = vst.msk [vmem:[#allocation2 + $0x130] sm:$0xff] %vm522_vm0, %v8841_v0 }
  0x5f   : > { %562 = vst.msk [vmem:[#allocation2 + $0x138] sm:$0xff] %vm522_vm0, %v8841_v0 }
  0x60   : > { %563 = vst.msk [vmem:[#allocation2 + $0x140] sm:$0xff] %vm522_vm0, %v8841_v0 }
  0x61   : > { %564 = vst.msk [vmem:[#allocation2 + $0x148] sm:$0xff] %vm522_vm0, %v8841_v0 }
  0x62   : > { %565 = vst.msk [vmem:[#allocation2 + $0x150] sm:$0xff] %vm522_vm0, %v8841_v0 }
  0x63   : > { %566 = vst.msk [vmem:[#allocation2 + $0x158] sm:$0xff] %vm522_vm0, %v8841_v0 }
  0x64   : > { %567 = vst.msk [vmem:[#allocation2 + $0x160] sm:$0xff] %vm522_vm0, %v8841_v0 }
  0x65   : > { %568 = vst.msk [vmem:[#allocation2 + $0x168] sm:$0xff] %vm522_vm0, %v8841_v0 }
  0x66   : > { %569 = vst.msk [vmem:[#allocation2 + $0x170] sm:$0xff] %vm522_vm0, %v8841_v0 }
  0x67   : > { %570 = vst.msk [vmem:[#allocation2 + $0x178] sm:$0xff] %vm522_vm0, %v8841_v0 }
  0x68   : > { %575 = vst.msk [vmem:[#allocation3] sm:$0xff] %vm522_vm0, %v8723_v1 }
  0x69   : > { %576 = vst.msk [vmem:[#allocation3 + $0x8] sm:$0xff] %vm522_vm0, %v8723_v1 }
  0x6a   : > { %577 = vst.msk [vmem:[#allocation3 + $0x10] sm:$0xff] %vm522_vm0, %v8723_v1 }
  0x6b   : > { %578 = vst.msk [vmem:[#allocation3 + $0x18] sm:$0xff] %vm522_vm0, %v8723_v1 }
  0x6c   : > { %579 = vst.msk [vmem:[#allocation3 + $0x20] sm:$0xff] %vm522_vm0, %v8723_v1 }
  0x6d   : > { %580 = vst.msk [vmem:[#allocation3 + $0x28] sm:$0xff] %vm522_vm0, %v8723_v1 }
  0x6e   : > { %581 = vst.msk [vmem:[#allocation3 + $0x30] sm:$0xff] %vm522_vm0, %v8723_v1 }
  0x6f   : > { %582 = vst.msk [vmem:[#allocation3 + $0x38] sm:$0xff] %vm522_vm0, %v8723_v1 }
  0x70   : > { %583 = vst.msk [vmem:[#allocation3 + $0x40] sm:$0xff] %vm522_vm0, %v8723_v1 }
  0x71   : > { %584 = vst.msk [vmem:[#allocation3 + $0x48] sm:$0xff] %vm522_vm0, %v8723_v1 }
  0x72   : > { %585 = vst.msk [vmem:[#allocation3 + $0x50] sm:$0xff] %vm522_vm0, %v8723_v1 }
  0x73   : > { %586 = vst.msk [vmem:[#allocation3 + $0x58] sm:$0xff] %vm522_vm0, %v8723_v1 }
  0x74   : > { %587 = vst.msk [vmem:[#allocation3 + $0x60] sm:$0xff] %vm522_vm0, %v8723_v1 }
  0x75   : > { %588 = vst.msk [vmem:[#allocation3 + $0x68] sm:$0xff] %vm522_vm0, %v8723_v1 }
  0x76   : > { %589 = vst.msk [vmem:[#allocation3 + $0x70] sm:$0xff] %vm522_vm0, %v8723_v1 }
  0x77   : > { %590 = vst.msk [vmem:[#allocation3 + $0x78] sm:$0xff] %vm522_vm0, %v8723_v1 }
  0x78 PF: > { %s9095_s14 = smul.u32 72, %s8815_s16  ;;  %v592_v2 = vld [vmem:[%s9007_s28 + $0x4] sm:$0xf]  ;;  %v612_v3 = vld [vmem:[%s9007_s28] sm:$0x8]  ;;  %vm652_vm1 = vcmask 1040384  }
  0x79   : > { %v613_v4 = vld [vmem:[%s9007_s28 + $0x8] sm:$0x7]  ;;  %vm653_vm2 = vcmask 1044484   ;;  %v7108_v5 = vrot.slane %v612_v3, 11  ;;  %v657_v6 = vrot.slane %v592_v2, 7  ;;  %vm746_vm3 = vcmask 130048  }
  0x7a   : > { %s9104_s19 = scalar_lea.vmem %s10990_s4, %s9095_s14  ;;  %vm9106_vm4 = vmor %vm652_vm1, %vm653_vm2  ;;  %v660_v8 = vrot.slane %v613_v4, 7  ;;  %v604_v9 = vld [vmem:[%s9007_s28 + $0x64] sm:$0xf]  ;;  %v624_v10 = vld [vmem:[%s9007_s28 + $0x60] sm:$0x8]  ;;  %vm979_vm5 = vcmask 1041408   ;;  %s9252_s30 = scalar_lea.vmem %s10991_s5, %s9095_s14 }
  0x7b   : > { %v8498_v11 = vld [vmem:[%s9104_s19 + $0x8] sm:$0xff]  ;;  %v8497_v12 = vld [vmem:[%s9104_s19] sm:$0xff]  ;;  %v9115_v13 = vld [vmem:[%s9104_s19 + $0x10] sm:$0xff]  ;;  %v658_v14 = vsel %vm9106_vm4, %v7108_v5, %v657_v6  ;;  %v659_v15 = vrot.slane %v657_v6, 4  ;;  %v7114_v16 = vrot.slane %v624_v10, 11  ;;  %v699_v17 = vrot.slane %v604_v9, 7  ;;  %s9743_s12 = scalar_lea.vmem %s10992_s6, %s9095_s14 }
  0x7c   : > { %v716_v18 = vunpack.c.l.b16 %v658_v14  ;;  %v625_v19 = vld [vmem:[%s9007_s28 + $0x68] sm:$0x7]  ;;  %v8488_v20 = vld [vmem:[%s9007_s28] sm:$0xff]  ;;  %vm980_vm6 = vcmask 1045508   ;;  %778 = vmatpush.bf16.msra.mxu0 %v8498_v11  ;;  %8619 = vmatpush.bf16.msra.mxu3 %v8498_v11  ;;  %v933_v27 = vld [vmem:[%s9007_s28 + $0xc] sm:$0x3] }
  0x7d   : > { %v931_v21 = vld [vmem:[%s9007_s28 + $0x4] sm:$0xc]  ;;  %v661_v22 = vsel %vm9106_vm4, %v659_v15, %v660_v8  ;;  %v700_v23 = vsel %vm9106_vm4, %v7114_v16, %v699_v17  ;;  %v701_v24 = vrot.slane %v699_v17, 4  ;;  %v702_v25 = vrot.slane %v625_v19, 7  ;;  %v932_v26 = vld [vmem:[%s9007_s28 + $0x8] sm:$0xf]  ;;  %vm9129_vm7 = vmor %vm979_vm5, %vm980_vm6  ;;  %889 = vmatpush.bf16.msra.mxu1 %v8497_v12  ;;  %1104 = vmatpush.bf16.msra.mxu2 %v9115_v13 }
  0x7e   : > { %v717_v29 = vunpack.c.l.b16 %v661_v22  ;;  %v728_v30 = vunpack.c.l.b16 %v700_v23  ;;  %v7175_v31 = vrot.slane %v931_v21, 10  ;;  %v984_v32 = vrot.slane %v932_v26, 6  ;;  %v8519_v33 = vld [vmem:[%s9104_s19 + $0x30] sm:$0xff]  ;;  %v8509_v34 = vld [vmem:[%s9104_s19 + $0x20] sm:$0xff]  ;;  %v8510_v35 = vld [vmem:[%s9104_s19 + $0x28] sm:$0xff]  ;;  %p8378_p4 = scmp.ne.s32.totalorder %s8815_s16, 1 }
  0x7f   : > { %v703_v36 = vsel %vm9106_vm4, %v701_v24, %v702_v25  ;;  %v987_v37 = vrot.slane %v933_v27, 6  ;;  %v594_v38 = vld [vmem:[%s9007_s28 + $0x14] sm:$0xf]  ;;  %v614_v39 = vld [vmem:[%s9007_s28 + $0x10] sm:$0x8]  ;;  %vm4134_vm8 = vcmask 1042432  }
  0x80   : > { %8620 = vmatpush.bf16.msrb.mxu3 %v8497_v12  ;;  %v732_v40 = vpack.c.b16 %v717_v29, %v716_v18  ;;  %v729_v41 = vunpack.c.l.b16 %v703_v36  ;;  %v985_v42 = vsel %vm9129_vm7, %v7175_v31, %v984_v32  ;;  %v986_v43 = vrot.slane %v984_v32, 4  ;;  %1489 = vmatpush.bf16.msrb.mxu0 %v8509_v34  ;;  %v615_v44 = vld [vmem:[%s9007_s28 + $0x18] sm:$0x7]  ;;  %v606_v45 = vld [vmem:[%s9007_s28 + $0x74] sm:$0xf]  ;;  %s11041_s29 = sld [smem:[#allocation21_spill]] (!%p8378_p4) }
  0x81   : > { %1874 = vmatpush.bf16.msrb.mxu2 %v8519_v33  ;;  %7167 = vmatmul.msk.bf16.vlgmr.msra.gmra.mxu1 %vm746_vm3, %v8488_v20  ;;  %v1043_v46 = vunpack.c.l.b16 %v985_v42  ;;  %v664_v47 = vrot.slane %v594_v38, 7  ;;  %v626_v48 = vld [vmem:[%s9007_s28 + $0x70] sm:$0x8]  ;;  %v627_v51 = vld [vmem:[%s9007_s28 + $0x78] sm:$0x7]  ;;  %v706_v52 = vrot.slane %v606_v45, 7 }
  0x82   : > { %7123 = vmatmul.msk.bf16.vlgmr.msra.gmra.mxu0 %vm746_vm3, %v732_v40  ;;  %v738_v49 = vpack.c.b16 %v729_v41, %v728_v30  ;;  %v988_v50 = vsel %vm9129_vm7, %v986_v43, %v987_v37  ;;  %1717 = vmatpush.bf16.msrb.mxu1 %v8510_v35  ;;  %v7109_v54 = vrot.slane %v614_v39, 11  ;;  %v667_v56 = vrot.slane %v615_v44, 7  ;;  %v935_v57 = vld [vmem:[%s9007_s28 + $0x18] sm:$0xf]  ;;  %v934_v59 = vld [vmem:[%s9007_s28 + $0x14] sm:$0xc] }
  0x83   : > { %v1044_v53 = vunpack.c.l.b16 %v988_v50  ;;  %v666_v55 = vrot.slane %v664_v47, 4  ;;  %v7115_v58 = vrot.slane %v626_v48, 11  ;;  %v708_v61 = vrot.slane %v706_v52, 4  ;;  %v936_v63 = vld [vmem:[%s9007_s28 + $0x1c] sm:$0x3]  ;;  %v8489_v16 = vld [vmem:[%s9007_s28 + $0x10] sm:$0xff] }
  0x84   : > { %7129 = vmatmul.msk.bf16.vlgmr.msra.gmra.mxu3 %vm746_vm3, %v738_v49  ;;  %v709_v62 = vrot.slane %v627_v51, 7  ;;  %v991_v0 = vrot.slane %v935_v57, 6  ;;  %v665_v1 = vsel %vm9106_vm4, %v7109_v54, %v664_v47  ;;  %v7176_v3 = vrot.slane %v934_v59, 10  ;;  %v596_v15 = vld [vmem:[%s9007_s28 + $0x24] sm:$0xf]  ;;  %s11042_s8 = sld [smem:[#allocation22_spill]] (!%p8378_p4) }
  0x85   : > { %v1059_v60 = vpack.c.b16 %v1044_v53, %v1043_v46  ;;  %8621 = vmatpush.bf16.msra.mxu3 %v9115_v13  ;;  %v668_v2 = vsel %vm9106_vm4, %v666_v55, %v667_v56  ;;  %v994_v5 = vrot.slane %v936_v63, 6  ;;  %v707_v6 = vsel %vm9106_vm4, %v7115_v58, %v706_v52  ;;  %v616_v22 = vld [vmem:[%s9007_s28 + $0x20] sm:$0x8]  ;;  %v617_v23 = vld [vmem:[%s9007_s28 + $0x28] sm:$0x7] }
  0x86   : > { %v993_v4 = vrot.slane %v991_v0, 4  ;;  %v710_v8 = vsel %vm9106_vm4, %v708_v61, %v709_v62  ;;  %v718_v9 = vunpack.c.l.b16 %v665_v1  ;;  %v719_v10 = vunpack.c.l.b16 %v668_v2  ;;  %v938_v24 = vld [vmem:[%s9007_s28 + $0x28] sm:$0xf]  ;;  %v937_v31 = vld [vmem:[%s9007_s28 + $0x24] sm:$0xc]  ;;  %v8508_v61 = vld [vmem:[%s9104_s19 + $0x18] sm:$0xff] }
  0x87   : > { %7190 = vmatmul.msk.bf16.vlgmr.msra.gmra.mxu2 %vm746_vm3, %v1059_v60  ;;  %v730_v11 = vunpack.c.l.b16 %v707_v6  ;;  %v731_v12 = vunpack.c.l.b16 %v710_v8  ;;  %v992_v13 = vsel %vm9129_vm7, %v7176_v3, %v991_v0  ;;  %v671_v20 = vrot.slane %v596_v15, 7  ;;  %v939_v32 = vld [vmem:[%s9007_s28 + $0x2c] sm:$0x3]  ;;  %v598_v42 = vld [vmem:[%s9007_s28 + $0x34] sm:$0xf]  ;;  %v8490_v43 = vld [vmem:[%s9007_s28 + $0x20] sm:$0xff] }
  0x88   : > { %v995_v14 = vsel %vm9129_vm7, %v993_v4, %v994_v5  ;;  %v733_v17 = vpack.c.b16 %v719_v10, %v718_v9  ;;  %v1045_v18 = vunpack.c.l.b16 %v992_v13  ;;  %v7110_v26 = vrot.slane %v616_v22, 11  ;;  %v8494_v48 = vld [vmem:[%s9007_s28 + $0x60] sm:$0xff]  ;;  %v618_v49 = vld [vmem:[%s9007_s28 + $0x30] sm:$0x8]  ;;  %v619_v50 = vld [vmem:[%s9007_s28 + $0x38] sm:$0x7] }
  0x89   : > { %v1046_v19 = vunpack.c.l.b16 %v995_v14  ;;  %v739_v21 = vpack.c.b16 %v731_v12, %v730_v11  ;;  %v673_v27 = vrot.slane %v671_v20, 4  ;;  %v674_v29 = vrot.slane %v617_v23, 7  ;;  %v941_v51 = vld [vmem:[%s9007_s28 + $0x38] sm:$0xf]  ;;  %v940_v57 = vld [vmem:[%s9007_s28 + $0x34] sm:$0xc] }
  0x8a   : > { %v998_v30 = vrot.slane %v938_v24, 6  ;;  %v672_v33 = vsel %vm9106_vm4, %v7110_v26, %v671_v20  ;;  %v7177_v35 = vrot.slane %v937_v31, 10  ;;  %v1001_v37 = vrot.slane %v939_v32, 6  ;;  %v942_v58 = vld [vmem:[%s9007_s28 + $0x3c] sm:$0x3]  ;;  %v8491_v6 = vld [vmem:[%s9007_s28 + $0x30] sm:$0xff] }
  0x8b   : > { %v1060_v25 = vpack.c.b16 %v1046_v19, %v1045_v18  ;;  %v675_v34 = vsel %vm9106_vm4, %v673_v27, %v674_v29  ;;  %v720_v38 = vunpack.c.l.b16 %v672_v33  ;;  %v678_v47 = vrot.slane %v598_v42, 7  ;;  %v600_v5 = vld [vmem:[%s9007_s28 + $0x44] sm:$0xf]  ;;  %v950_v9 = vld [vmem:[%s9007_s28 + $0x68] sm:$0xf]  ;;  %v8495_v13 = vld [vmem:[%s9007_s28 + $0x70] sm:$0xff] }
  0x8c   : > { %v1000_v36 = vrot.slane %v998_v30, 4  ;;  %v721_v39 = vunpack.c.l.b16 %v675_v34  ;;  %v999_v40 = vsel %vm9129_vm7, %v7177_v35, %v998_v30  ;;  %v7111_v53 = vrot.slane %v618_v49, 11  ;;  %v620_v14 = vld [vmem:[%s9007_s28 + $0x40] sm:$0x8]  ;;  %v621_v15 = vld [vmem:[%s9007_s28 + $0x48] sm:$0x7] }
  0x8d   : > { %v1047_v45 = vunpack.c.l.b16 %v999_v40  ;;  %v680_v54 = vrot.slane %v678_v47, 4  ;;  %v681_v55 = vrot.slane %v619_v50, 7  ;;  %v1005_v56 = vrot.slane %v941_v51, 6  ;;  %v949_v18 = vld [vmem:[%s9007_s28 + $0x64] sm:$0xc] }
  0x8e   : > { %v1002_v41 = vsel %vm9129_vm7, %v1000_v36, %v1001_v37  ;;  %v734_v44 = vpack.c.b16 %v721_v39, %v720_v38  ;;  %v679_v59 = vsel %vm9106_vm4, %v7111_v53, %v678_v47  ;;  %v7178_v62 = vrot.slane %v940_v57, 10  ;;  %v951_v19 = vld [vmem:[%s9007_s28 + $0x6c] sm:$0x3]  ;;  %v943_v24 = vld [vmem:[%s9007_s28 + $0x44] sm:$0xc] }
  0x8f   : > { %v1048_v46 = vunpack.c.l.b16 %v1002_v41  ;;  %v682_v60 = vsel %vm9106_vm4, %v680_v54, %v681_v55  ;;  %v1007_v63 = vrot.slane %v1005_v56, 4  ;;  %v1008_v0 = vrot.slane %v942_v58, 6  ;;  %v945_v26 = vld [vmem:[%s9007_s28 + $0x4c] sm:$0x3]  ;;  %v953_v47 = vld [vmem:[%s9007_s28 + $0x78] sm:$0xf] }
  0x90   : > { %v722_v1 = vunpack.c.l.b16 %v679_v59  ;;  %v723_v2 = vunpack.c.l.b16 %v682_v60  ;;  %v1006_v3 = vsel %vm9129_vm7, %v7178_v62, %v1005_v56  ;;  %v685_v12 = vrot.slane %v600_v5, 7  ;;  %v623_v53 = vld [vmem:[%s9007_s28 + $0x58] sm:$0x7]  ;;  %v952_v56 = vld [vmem:[%s9007_s28 + $0x74] sm:$0xc] }
  0x91   : > { %7168 = vmatmul.msk.bf16.gmra.mxu1 %vm746_vm3, %v8489_v16  ;;  %v1061_v52 = vpack.c.b16 %v1048_v46, %v1047_v45  ;;  %v1009_v4 = vsel %vm9129_vm7, %v1007_v63, %v1008_v0  ;;  %v1049_v10 = vunpack.c.l.b16 %v1006_v3  ;;  %v944_v16 = vld [vmem:[%s9007_s28 + $0x48] sm:$0xf]  ;;  %v688_v23 = vrot.slane %v621_v15, 7  ;;  %v8492_v45 = vld [vmem:[%s9007_s28 + $0x40] sm:$0xff]  ;;  %v947_v54 = vld [vmem:[%s9007_s28 + $0x58] sm:$0xf] }
  0x92   : > { %7124 = vmatmul.msk.bf16.gmra.mxu0 %vm746_vm3, %v733_v17  ;;  %v735_v8 = vpack.c.b16 %v723_v2, %v722_v1  ;;  %v1050_v11 = vunpack.c.l.b16 %v1009_v4  ;;  %v1026_v17 = vrot.slane %v950_v9, 6  ;;  %v687_v22 = vrot.slane %v685_v12, 4  ;;  %v954_v57 = vld [vmem:[%s9007_s28 + $0x7c] sm:$0x3]  ;;  %v946_v62 = vld [vmem:[%s9007_s28 + $0x54] sm:$0xc] }
  0x93   : > { %v7181_v27 = vrot.slane %v949_v18, 10  ;;  %v1029_v30 = vrot.slane %v951_v19, 6  ;;  %v7179_v33 = vrot.slane %v943_v24, 10  ;;  %v1015_v35 = vrot.slane %v945_v26, 6  ;;  %v948_v0 = vld [vmem:[%s9007_s28 + $0x5c] sm:$0x3] }
  0x94   : > { %7130 = vmatmul.msk.bf16.gmra.mxu3 %vm746_vm3, %v739_v21  ;;  %v1062_v20 = vpack.c.b16 %v1050_v11, %v1049_v10  ;;  %v7112_v21 = vrot.slane %v620_v14, 11  ;;  %v1028_v29 = vrot.slane %v1026_v17, 4  ;;  %v689_v32 = vsel %vm9106_vm4, %v687_v22, %v688_v23  ;;  %v8521_v9 = vld [vmem:[%s9104_s19 + $0x40] sm:$0xff]  ;;  %v7309_v18 = vld [vmem:[%s9007_s28 + $0x68] sm:$0xf]  ;;  %v8493_v24 = vld [vmem:[%s9007_s28 + $0x50] sm:$0xff] }
  0x95   : > { %v1027_v36 = vsel %vm9129_vm7, %v7181_v27, %v1026_v17  ;;  %v725_v39 = vunpack.c.l.b16 %v689_v32  ;;  %v1033_v55 = vrot.slane %v953_v47, 6  ;;  %v1019_v63 = vrot.slane %v947_v54, 6  ;;  %2330 = vmatpush.bf16.msra.mxu0 %v8521_v9  ;;  %v7262_v23 = vld [vmem:[%s9007_s28 + $0x64] sm:$0xf]  ;;  %v7310_v32 = vld [vmem:[%s9007_s28 + $0x6c] sm:$0x3] }
  0x96   : > { %v686_v31 = vsel %vm9106_vm4, %v7112_v21, %v685_v12  ;;  %v1030_v37 = vsel %vm9129_vm7, %v1028_v29, %v1029_v30  ;;  %v1055_v42 = vunpack.c.l.b16 %v1027_v36  ;;  %v7182_v1 = vrot.slane %v952_v56, 10 }
  0x97   : > { %7191 = vmatmul.msk.bf16.gmra.mxu2 %vm746_vm3, %v1060_v25  ;;  %v1012_v25 = vrot.slane %v944_v16, 6  ;;  %v724_v38 = vunpack.c.l.b16 %v686_v31  ;;  %v1035_v2 = vrot.slane %v1033_v55, 4  ;;  %v1036_v3 = vrot.slane %v954_v57, 6  ;;  %v7308_v31 = vld [vmem:[%s9007_s28 + $0x64] sm:$0xc] }
  0x98   : > { %v7180_v10 = vrot.slane %v946_v62, 10  ;;  %v1021_v11 = vrot.slane %v1019_v63, 4  ;;  %v1022_v12 = vrot.slane %v948_v0, 6  ;;  %v1034_v14 = vsel %vm9129_vm7, %v7182_v1, %v1033_v55  ;;  %v7311_v57 = vld [vmem:[%s9007_s28 + $0x74] sm:$0xc]  ;;  %v8511_v1 = vld [vmem:[%s9007_s28 + $0xc0] sm:$0xff] }
  0x99   : > { %v1014_v34 = vrot.slane %v1012_v25, 4  ;;  %v1013_v40 = vsel %vm9129_vm7, %v7179_v33, %v1012_v25  ;;  %v736_v46 = vpack.c.b16 %v725_v39, %v724_v38  ;;  %v1037_v15 = vsel %vm9129_vm7, %v1035_v2, %v1036_v3 }
  0x9a   : > { %v1020_v19 = vsel %vm9129_vm7, %v7180_v10, %v1019_v63  ;;  %v1057_v21 = vunpack.c.l.b16 %v1034_v14  ;;  %v1058_v22 = vunpack.c.l.b16 %v1037_v15  ;;  %v1597_v26 = vrot.slane %v7309_v18, 6  ;;  %v7315_v14 = vld [vmem:[%s9007_s28 + $0x88] sm:$0xf]  ;;  %v7268_v15 = vld [vmem:[%s9007_s28 + $0x84] sm:$0xf] }
  0x9b   : > { %v1016_v41 = vsel %vm9129_vm7, %v1014_v34, %v1015_v35  ;;  %v1053_v27 = vunpack.c.l.b16 %v1020_v19  ;;  %v1369_v30 = vrot.slane %v7262_v23, 7  ;;  %v7261_v34 = vld [vmem:[%s9007_s28 + $0x60] sm:$0x8]  ;;  %v7263_v35 = vld [vmem:[%s9007_s28 + $0x68] sm:$0x7]  ;;  %v7332_v36 = vrot.slane %v7308_v31, 10 }
  0x9c   : > { %v1052_v49 = vunpack.c.l.b16 %v1016_v41  ;;  %v1066_v33 = vpack.c.b16 %v1058_v22, %v1057_v21  ;;  %v1600_v38 = vrot.slane %v7310_v32, 6  ;;  %v7333_v62 = vrot.slane %v7311_v57, 10  ;;  %v7316_v21 = vld [vmem:[%s9007_s28 + $0x8c] sm:$0x3]  ;;  %v8501_v22 = vld [vmem:[%s9007_s28 + $0x70] sm:$0xff] }
  0x9d   : > { %v1371_v41 = vrot.slane %v1369_v30, 4  ;;  %v1611_v18 = vrot.slane %v7315_v14, 6  ;;  %v1383_v19 = vrot.slane %v7268_v15, 7  ;;  %v7267_v23 = vld [vmem:[%s9007_s28 + $0x80] sm:$0x8]  ;;  %vm4135_vm9 = vcmask 1046532  }
  0x9e   : > { %v7274_v14 = vld [vmem:[%s9007_s28 + $0xa4] sm:$0xf]  ;;  %vm9946_vm10 = vmor %vm4134_vm8, %vm4135_vm9 }
  0x9f   : > { %v1385_v31 = vrot.slane %v1383_v19, 4 }
  0xa1   : > { %7169 = vmatmul.msk.bf16.gmra.mxu1 %vm746_vm3, %v8490_v43  ;;  %v1056_v43 = vunpack.c.l.b16 %v1030_v37  ;;  %v1599_v37 = vrot.slane %v1597_v26, 4 }
  0xa2   : > { %7125 = vmatmul.msk.bf16.gmra.mxu0 %vm746_vm3, %v734_v44  ;;  %v602_v44 = vld [vmem:[%s9007_s28 + $0x54] sm:$0xf] }
  0xa3   : > { %v692_v50 = vrot.slane %v602_v44, 7  ;;  %v1065_v51 = vpack.c.b16 %v1056_v43, %v1055_v42  ;;  %v1372_v42 = vrot.slane %v7263_v35, 7  ;;  %v1598_v43 = vsel %vm9129_vm7, %v7332_v36, %v1597_v26 }
  0xa4   : > { %7173 = vmatmul.msk.bf16.vlgmr.msrb.gmra.mxu3 %vm746_vm3, %v8494_v48  ;;  %v1051_v48 = vunpack.c.l.b16 %v1013_v40  ;;  %v7285_v40 = vrot.slane %v7261_v34, 11  ;;  %v1601_v44 = vsel %vm9129_vm7, %v1599_v37, %v1600_v38  ;;  %v1656_v47 = vunpack.c.l.b16 %v1598_v43 }
  0xa5   : > { %1261 = vmatpush.bf16.msrb.mxu3 %v8508_v61  ;;  %v694_v60 = vrot.slane %v692_v50, 4  ;;  %v695_v61 = vrot.slane %v623_v53, 7  ;;  %v1613_v26 = vrot.slane %v1611_v18, 4 }
  0xa6   : > { %v1063_v58 = vpack.c.b16 %v1052_v49, %v1051_v48  ;;  %v1657_v48 = vunpack.c.l.b16 %v1601_v44 }
  0xa7   : > { %7192 = vmatmul.msk.bf16.gmra.mxu2 %vm746_vm3, %v1061_v52  ;;  %v622_v52 = vld [vmem:[%s9007_s28 + $0x50] sm:$0x8]  ;;  %v696_v5 = vsel %vm9106_vm4, %v694_v60, %v695_v61  ;;  %v7266_v61 = vld [vmem:[%s9007_s28 + $0x78] sm:$0x7] }
  0xa8   : > { %v7113_v59 = vrot.slane %v622_v52, 11  ;;  %v727_v17 = vunpack.c.l.b16 %v696_v5  ;;  %v7265_v52 = vld [vmem:[%s9007_s28 + $0x74] sm:$0xf]  ;;  %v1672_v53 = vpack.c.b16 %v1657_v48, %v1656_v47  ;;  %v7264_v60 = vld [vmem:[%s9007_s28 + $0x70] sm:$0x8] }
  0xa9   : > { %v1376_v56 = vrot.slane %v7265_v52, 7  ;;  %v7286_v2 = vrot.slane %v7264_v60, 11  ;;  %v8502_v52 = vld [vmem:[%s9007_s28 + $0x80] sm:$0xff] }
  0xaa   : > { %v693_v4 = vsel %vm9106_vm4, %v7113_v59, %v692_v50  ;;  %v8500_v59 = vld [vmem:[%s9007_s28 + $0x60] sm:$0xff] }
  0xab   : > { %v726_v16 = vunpack.c.l.b16 %v693_v4  ;;  %v1378_v3 = vrot.slane %v1376_v56, 4  ;;  %v1379_v4 = vrot.slane %v7266_v61, 7 }
  0xad   : > { %v737_v25 = vpack.c.b16 %v727_v17, %v726_v16  ;;  %v1380_v9 = vsel %vm9106_vm4, %v1378_v3, %v1379_v4 }
  0xb1   : > { %7170 = vmatmul.msk.bf16.gmra.mxu1 %vm746_vm3, %v8491_v6  ;;  %v8520_v6 = vld [vmem:[%s9104_s19 + $0x38] sm:$0xff] }
  0xb2   : > { %7126 = vmatmul.msk.bf16.gmra.mxu0 %vm746_vm3, %v735_v8  ;;  %v8531_v8 = vld [vmem:[%s9252_s30] sm:$0xff] }
  0xb3   : > { %2744 = vmatpush.bf16.msra.mxu2 %v8531_v8  ;;  %v1377_v8 = vsel %vm9106_vm4, %v7286_v2, %v1376_v56 }
  0xb4   : > { %7174 = vmatmul.msk.bf16.gmra.mxu3 %vm746_vm3, %v8495_v13  ;;  %v8532_v13 = vld [vmem:[%s9252_s30 + $0x8] sm:$0xff] }
  0xb5   : > { %2625 = vmatpush.bf16.msra.mxu1 %v8532_v13  ;;  %v1431_v13 = vunpack.c.l.b16 %v1380_v9 }
  0xb7   : > { %7193 = vmatmul.msk.bf16.gmra.mxu2 %vm746_vm3, %v1062_v20  ;;  %v1023_v20 = vsel %vm9129_vm7, %v1021_v11, %v1022_v12  ;;  %v1430_v12 = vunpack.c.l.b16 %v1377_v8 }
  0xb8   : > { %v1054_v29 = vunpack.c.l.b16 %v1023_v20  ;;  %v7314_v20 = vld [vmem:[%s9007_s28 + $0x84] sm:$0xc] }
  0xb9   : > { %v1445_v17 = vpack.c.b16 %v1431_v13, %v1430_v12  ;;  %v7321_v13 = vld [vmem:[%s9007_s28 + $0xa8] sm:$0xf] }
  0xba   : > { %v1064_v39 = vpack.c.b16 %v1054_v29, %v1053_v27  ;;  %v1614_v27 = vrot.slane %v7316_v21, 6  ;;  %v8512_v29 = vld [vmem:[%s9007_s28 + $0xd0] sm:$0xff]  ;;  %v1397_v21 = vrot.slane %v7274_v14, 7 }
  0xbc   : > { %v1615_v34 = vsel %vm9129_vm7, %v1613_v26, %v1614_v27  ;;  %v7273_v26 = vld [vmem:[%s9007_s28 + $0xa0] sm:$0x8]  ;;  %v7275_v27 = vld [vmem:[%s9007_s28 + $0xa8] sm:$0x7] }
  0xbd   : > { %v1661_v38 = vunpack.c.l.b16 %v1615_v34  ;;  %v8514_v34 = vld [vmem:[%s9007_s28 + $0xf0] sm:$0xff] }
  0xc1   : > { %7171 = vmatmul.msk.bf16.gmra.mxu1 %vm746_vm3, %v8492_v45  ;;  %v1370_v45 = vsel %vm9106_vm4, %v7285_v40, %v1369_v30  ;;  %v7287_v30 = vrot.slane %v7267_v23, 11  ;;  %v7322_v23 = vld [vmem:[%s9007_s28 + $0xac] sm:$0x3] }
  0xc2   : > { %7127 = vmatmul.msk.bf16.gmra.mxu0 %vm746_vm3, %v736_v46  ;;  %v1373_v46 = vsel %vm9106_vm4, %v1371_v41, %v1372_v42  ;;  %v1428_v49 = vunpack.c.l.b16 %v1370_v45  ;;  %v7318_v41 = vld [vmem:[%s9007_s28 + $0x98] sm:$0xf]  ;;  %v7271_v42 = vld [vmem:[%s9007_s28 + $0x94] sm:$0xf] }
  0xc3   : > { %v1429_v50 = vunpack.c.l.b16 %v1373_v46  ;;  %v1384_v35 = vsel %vm9106_vm4, %v7287_v30, %v1383_v19  ;;  %v1618_v46 = vrot.slane %v7318_v41, 6  ;;  %v1390_v48 = vrot.slane %v7271_v42, 7 }
  0xc4   : > { %7196 = vmatmul.msk.bf16.vlgmr.msra.gmra.mxu3 %vm746_vm3, %v1065_v51  ;;  %v7312_v51 = vld [vmem:[%s9007_s28 + $0x78] sm:$0xf] }
  0xc5   : > { %2102 = vmatpush.bf16.msra.mxu3 %v8520_v6  ;;  %v1444_v54 = vpack.c.b16 %v1429_v50, %v1428_v49  ;;  %v1604_v55 = vrot.slane %v7312_v51, 6  ;;  %v7317_v49 = vld [vmem:[%s9007_s28 + $0x94] sm:$0xc]  ;;  %v7319_v50 = vld [vmem:[%s9007_s28 + $0x9c] sm:$0x3]  ;;  %v1620_v56 = vrot.slane %v1618_v46, 4 }
  0xc6   : > { %v1621_v57 = vrot.slane %v7319_v50, 6  ;;  %v1392_v60 = vrot.slane %v1390_v48, 4 }
  0xc7   : > { %7194 = vmatmul.msk.bf16.gmra.mxu2 %vm746_vm3, %v1063_v58  ;;  %v7313_v58 = vld [vmem:[%s9007_s28 + $0x7c] sm:$0x3]  ;;  %v1606_v63 = vrot.slane %v1604_v55, 4  ;;  %v1605_v5 = vsel %vm9129_vm7, %v7333_v62, %v1604_v55  ;;  %v7335_v55 = vrot.slane %v7317_v49, 10 }
  0xc8   : > { %v1607_v0 = vrot.slane %v7313_v58, 6  ;;  %v1658_v10 = vunpack.c.l.b16 %v1605_v5  ;;  %v8513_v58 = vld [vmem:[%s9007_s28 + $0xe0] sm:$0xff] }
  0xca   : > { %v1608_v6 = vsel %vm9129_vm7, %v1606_v63, %v1607_v0  ;;  %v1619_v63 = vsel %vm9129_vm7, %v7335_v55, %v1618_v46  ;;  %v1622_v0 = vsel %vm9129_vm7, %v1620_v56, %v1621_v57 }
  0xcb   : > { %v1659_v11 = vunpack.c.l.b16 %v1608_v6  ;;  %v1662_v6 = vunpack.c.l.b16 %v1619_v63  ;;  %v1663_v8 = vunpack.c.l.b16 %v1622_v0  ;;  %v8504_v0 = vld [vmem:[%s9007_s28 + $0xa0] sm:$0xff] }
  0xcd   : > { %v1673_v16 = vpack.c.b16 %v1659_v11, %v1658_v10  ;;  %v1675_v15 = vpack.c.b16 %v1663_v8, %v1662_v6 }
  0xd1   : > { %7172 = vmatmul.msk.bf16.gmra.mxu1 %vm746_vm3, %v8493_v24  ;;  %v7269_v24 = vld [vmem:[%s9007_s28 + $0x88] sm:$0x7] }
  0xd2   : > { %7128 = vmatmul.msk.bf16.gmra.mxu0 %vm746_vm3, %v737_v25  ;;  %v7334_v25 = vrot.slane %v7314_v20, 10  ;;  %v1386_v32 = vrot.slane %v7269_v24, 7 }
  0xd4   : > { %7197 = vmatmul.msk.bf16.gmra.mxu3 %vm746_vm3, %v1066_v33  ;;  %v1612_v33 = vsel %vm9129_vm7, %v7334_v25, %v1611_v18  ;;  %v1387_v36 = vsel %vm9106_vm4, %v1385_v31, %v1386_v32  ;;  %v1625_v18 = vrot.slane %v7321_v13, 6  ;;  %v8503_v25 = vld [vmem:[%s9007_s28 + $0x90] sm:$0xff]  ;;  %v1628_v32 = vrot.slane %v7322_v23, 6 }
  0xd5   : > { %v1660_v37 = vunpack.c.l.b16 %v1612_v33  ;;  %v1433_v40 = vunpack.c.l.b16 %v1387_v36  ;;  %v1399_v36 = vrot.slane %v1397_v21, 4 }
  0xd6   : > { %v1627_v31 = vrot.slane %v1625_v18, 4 }
  0xd7   : > { %7195 = vmatmul.msk.bf16.gmra.mxu2 %vm746_vm3, %v1064_v39  ;;  %v1432_v39 = vunpack.c.l.b16 %v1384_v35  ;;  %v1674_v43 = vpack.c.b16 %v1661_v38, %v1660_v37  ;;  %v7289_v35 = vrot.slane %v7273_v26, 11  ;;  %v1400_v37 = vrot.slane %v7275_v27, 7 }
  0xd9   : > { %v1446_v45 = vpack.c.b16 %v1433_v40, %v1432_v39  ;;  %v1629_v40 = vsel %vm9129_vm7, %v1627_v31, %v1628_v32  ;;  %v7327_v32 = vld [vmem:[%s9007_s28 + $0xc8] sm:$0xf] }
  0xe1   : > { %7347 = vmatmul.msk.bf16.vlgmr.msrb.gmra.mxu1 %vm746_vm3, %v1672_v53  ;;  %v7270_v53 = vld [vmem:[%s9007_s28 + $0x90] sm:$0x8] }
  0xe2   : > { %7300 = vmatmul.msk.bf16.vlgmr.msrb.gmra.mxu0 %vm746_vm3, %v1444_v54  ;;  %v7272_v54 = vld [vmem:[%s9007_s28 + $0x98] sm:$0x7] }
  0xe3   : > { %v1393_v61 = vrot.slane %v7272_v54, 7 }
  0xe4   : > { %7253 = vmatmul.msk.bf16.vlgmr.msrb.gmra.mxu3 %vm746_vm3, %v8500_v59  ;;  %v7288_v59 = vrot.slane %v7270_v53, 11  ;;  %v7277_v53 = vld [vmem:[%s9007_s28 + $0xb4] sm:$0xf] }
  0xe5   : > { %v1394_v4 = vsel %vm9106_vm4, %v1392_v60, %v1393_v61  ;;  %v1404_v60 = vrot.slane %v7277_v53, 7  ;;  %v7323_v61 = vld [vmem:[%s9007_s28 + $0xb4] sm:$0xc] }
  0xe6   : > { %v1391_v3 = vsel %vm9106_vm4, %v7288_v59, %v1390_v48  ;;  %v1435_v11 = vunpack.c.l.b16 %v1394_v4 }
  0xe7   : > { %7410 = vmatmul.msk.bf16.vlgmr.msrb.gmra.mxu2 %vm746_vm3, %v8511_v1  ;;  %v1434_v10 = vunpack.c.l.b16 %v1391_v3  ;;  %v7278_v3 = vld [vmem:[%s9007_s28 + $0xb8] sm:$0x7]  ;;  %v1406_v13 = vrot.slane %v1404_v60, 4 }
  0xe8   : > { %v1407_v14 = vrot.slane %v7278_v3, 7 }
  0xf1   : > { %7348 = vmatmul.msk.bf16.gmra.mxu1 %vm746_vm3, %v1673_v16 }
  0xf2   : > { %7301 = vmatmul.msk.bf16.gmra.mxu0 %vm746_vm3, %v1445_v17  ;;  %v1447_v17 = vpack.c.b16 %v1435_v11, %v1434_v10  ;;  %v8515_v10 = vld [vmem:[%s9007_s28 + $0x100] sm:$0xff] }
  0xf4   : > { %7254 = vmatmul.msk.bf16.gmra.mxu3 %vm746_vm3, %v8501_v22  ;;  %v7320_v22 = vld [vmem:[%s9007_s28 + $0xa4] sm:$0xc] }
  0xf5   : > { %v7336_v30 = vrot.slane %v7320_v22, 10  ;;  %v1408_v22 = vsel %vm9106_vm4, %v1406_v13, %v1407_v14  ;;  %v7330_v14 = vld [vmem:[%s9007_s28 + $0xd8] sm:$0xf] }
  0xf7   : > { %7411 = vmatmul.msk.bf16.gmra.mxu2 %vm746_vm3, %v8512_v29  ;;  %v1626_v39 = vsel %vm9129_vm7, %v7336_v30, %v1625_v18  ;;  %v1439_v30 = vunpack.c.l.b16 %v1408_v22 }
  0xf8   : > { %v1664_v46 = vunpack.c.l.b16 %v1626_v39 }
  0xfe   : > { %v891_v44 = vpop.f32.mrf.mxu1 }
  0xff   : > { %v780_v47 = vpop.f32.mrf.mxu0 }
 0x100   : > { %v892_v51 = vadd.f32 %v891_v44, %v780_v47  ;;  %v1401_v44 = vsel %vm9106_vm4, %v1399_v36, %v1400_v37  ;;  %v1665_v47 = vunpack.c.l.b16 %v1629_v40 }
 0x101   : > { %7349 = vmatmul.msk.bf16.gmra.mxu1 %vm746_vm3, %v1674_v43  ;;  %v1398_v43 = vsel %vm9106_vm4, %v7289_v35, %v1397_v21  ;;  %v1437_v50 = vunpack.c.l.b16 %v1401_v44 }
 0x102   : > { %7302 = vmatmul.msk.bf16.gmra.mxu0 %vm746_vm3, %v1446_v45  ;;  %v1436_v49 = vunpack.c.l.b16 %v1398_v43  ;;  %v1676_v54 = vpack.c.b16 %v1665_v47, %v1664_v46  ;;  %v7328_v43 = vld [vmem:[%s9007_s28 + $0xcc] sm:$0x3]  ;;  %v8505_v46 = vld [vmem:[%s9007_s28 + $0xb0] sm:$0xff]  ;;  %v7279_v47 = vld [vmem:[%s9007_s28 + $0xc0] sm:$0x8] }
 0x103   : > { %v1642_v53 = vrot.slane %v7328_v43, 6 }
 0x104   : > { %7255 = vmatmul.msk.bf16.gmra.mxu3 %vm746_vm3, %v8502_v52  ;;  %v7324_v52 = vld [vmem:[%s9007_s28 + $0xb8] sm:$0xf]  ;;  %v1448_v56 = vpack.c.b16 %v1437_v50, %v1436_v49 }
 0x105   : > { %v1632_v57 = vrot.slane %v7324_v52, 6 }
 0x106   : > { %v893_v62 = vpop.f32.mrf.mxu1 }
 0x107   : > { %7412 = vmatmul.msk.bf16.gmra.mxu2 %vm746_vm3, %v8513_v58  ;;  %v9347_v1 = vpop.f32.mrf.mxu3  ;;  %v782_v2 = vpop.f32.mrf.mxu0  ;;  %v1634_v6 = vrot.slane %v1632_v57, 4 }
 0x108   : > { %v894_v5 = vadd.f32 %v893_v62, %v782_v2  ;;  %v7325_v62 = vld [vmem:[%s9007_s28 + $0xbc] sm:$0x3]  ;;  %v7276_v2 = vld [vmem:[%s9007_s28 + $0xb0] sm:$0x8] }
 0x109   : > { %v1635_v8 = vrot.slane %v7325_v62, 6  ;;  %v7290_v11 = vrot.slane %v7276_v2, 11 }
 0x10a   : > { %v1106_v9 = vpop.f32.mrf.mxu2 }
 0x10b   : > { %v9353_v12 = vadd.f32 %v1106_v9, %v892_v51  ;;  %v1405_v21 = vsel %vm9106_vm4, %v7290_v11, %v1404_v60 }
 0x10e   : > { %v896_v16 = vpop.f32.mrf.mxu1 }
 0x10f   : > { %v9357_v19 = vpop.f32.mrf.mxu3  ;;  %v785_v20 = vpop.f32.mrf.mxu0 }
 0x110   : > { %v897_v24 = vadd.f32 %v896_v16, %v785_v20 }
 0x111   : > { %7350 = vmatmul.msk.bf16.gmra.mxu1 %vm746_vm3, %v1675_v15 }
 0x112   : > { %v1108_v29 = vpop.f32.mrf.mxu2  ;;  %7303 = vmatmul.msk.bf16.gmra.mxu0 %vm746_vm3, %v1447_v17  ;;  %v1636_v17 = vsel %vm9129_vm7, %v1634_v6, %v1635_v8 }
 0x113   : > { %v9366_v33 = vadd.f32 %v1108_v29, %v894_v5  ;;  %v7337_v5 = vrot.slane %v7323_v61, 10  ;;  %v1667_v26 = vunpack.c.l.b16 %v1636_v17  ;;  %v1438_v29 = vunpack.c.l.b16 %v1405_v21 }
 0x114   : > { %7256 = vmatmul.msk.bf16.gmra.mxu3 %vm746_vm3, %v8503_v25 }
 0x115   : > { %v1633_v16 = vsel %vm9129_vm7, %v7337_v5, %v1632_v57  ;;  %v1449_v37 = vpack.c.b16 %v1439_v30, %v1438_v29  ;;  %v8506_v29 = vld [vmem:[%s9007_s28 + $0xc0] sm:$0xff]  ;;  %v7282_v30 = vld [vmem:[%s9007_s28 + $0xd0] sm:$0x8] }
 0x116   : > { %v898_v38 = vpop.f32.mrf.mxu1  ;;  %v1666_v25 = vunpack.c.l.b16 %v1633_v16 }
 0x117   : > { %7413 = vmatmul.msk.bf16.gmra.mxu2 %vm746_vm3, %v8514_v34  ;;  %v9375_v41 = vpop.f32.mrf.mxu3  ;;  %v787_v42 = vpop.f32.mrf.mxu0  ;;  %v7280_v34 = vld [vmem:[%s9007_s28 + $0xc4] sm:$0xf] }
 0x118   : > { %v899_v45 = vadd.f32 %v898_v38, %v787_v42  ;;  %v1677_v35 = vpack.c.b16 %v1667_v26, %v1666_v25  ;;  %v1411_v40 = vrot.slane %v7280_v34, 7  ;;  %v7326_v42 = vld [vmem:[%s9007_s28 + $0xc4] sm:$0xc]  ;;  %v7331_v25 = vld [vmem:[%s9007_s28 + $0xdc] sm:$0x3] }
 0x119   : > { %v7338_v50 = vrot.slane %v7326_v42, 10 }
 0x11a   : > { %v1111_v48 = vpop.f32.mrf.mxu2  ;;  %v1413_v57 = vrot.slane %v1411_v40, 4 }
 0x11b   : > { %v9381_v51 = vadd.f32 %v1111_v48, %v897_v24  ;;  %v7281_v48 = vld [vmem:[%s9007_s28 + $0xc8] sm:$0x7] }
 0x11e   : > { %v901_v55 = vpop.f32.mrf.mxu1 }
 0x11f   : > { %v9385_v58 = vpop.f32.mrf.mxu3  ;;  %v790_v59 = vpop.f32.mrf.mxu0 }
 0x120   : > { %v902_v63 = vadd.f32 %v901_v55, %v790_v59  ;;  %v8516_v55 = vld [vmem:[%s9007_s28 + $0x110] sm:$0xff]  ;;  %v1414_v59 = vrot.slane %v7281_v48, 7 }
 0x121   : > { %7351 = vmatmul.msk.bf16.gmra.mxu1 %vm746_vm3, %v1676_v54 }
 0x122   : > { %v1113_v4 = vpop.f32.mrf.mxu2  ;;  %7304 = vmatmul.msk.bf16.gmra.mxu0 %vm746_vm3, %v1448_v56  ;;  %v7291_v56 = vrot.slane %v7279_v47, 11  ;;  %v1415_v2 = vsel %vm9106_vm4, %v1413_v57, %v1414_v59 }
 0x123   : > { %v9394_v9 = vadd.f32 %v1113_v4, %v899_v45  ;;  %v1441_v11 = vunpack.c.l.b16 %v1415_v2 }
 0x124   : > { %7257 = vmatmul.msk.bf16.gmra.mxu3 %vm746_vm3, %v8504_v0  ;;  %v1412_v0 = vsel %vm9106_vm4, %v7291_v56, %v1411_v40 }
 0x126   : > { %v903_v15 = vpop.f32.mrf.mxu1 }
 0x127   : > { %7414 = vmatmul.msk.bf16.gmra.mxu2 %vm746_vm3, %v8515_v10  ;;  %v921_v18 = vpop.f32.mrf.mxu3  ;;  %v792_v20 = vpop.f32.mrf.mxu0  ;;  %v1440_v10 = vunpack.c.l.b16 %v1412_v0 }
 0x128   : > { %v9408_v23 = vadd.f32 %v921_v18, %v9347_v1  ;;  %v904_v24 = vadd.f32 %v903_v15, %v792_v20  ;;  %v1639_v1 = vrot.slane %v7327_v32, 6  ;;  %v7283_v15 = vld [vmem:[%s9007_s28 + $0xd4] sm:$0xf]  ;;  %v7284_v32 = vld [vmem:[%s9007_s28 + $0xd8] sm:$0x7] }
 0x129   : > { %v1450_v18 = vpack.c.b16 %v1441_v11, %v1440_v10  ;;  %v1418_v22 = vrot.slane %v7283_v15, 7  ;;  %v2456_v15 = vld [vmem:[%s9013_s9 + $0x4] sm:$0xc] }
 0x12a   : > { %v1116_v27 = vpop.f32.mrf.mxu2  ;;  %v1641_v52 = vrot.slane %v1639_v1, 4  ;;  %v1640_v60 = vsel %vm9129_vm7, %v7338_v50, %v1639_v1  ;;  %v8541_v50 = vld [vmem:[%s9252_s30 + $0x10] sm:$0xff] }
 0x12b   : > { %v9410_v31 = vadd.f32 %v1116_v27, %v902_v63  ;;  %v1668_v5 = vunpack.c.l.b16 %v1640_v60  ;;  %v1420_v40 = vrot.slane %v1418_v22, 4  ;;  %2883 = vmatpush.bf16.msrb.mxu3 %v8541_v50 }
 0x12c   : > { %v1643_v61 = vsel %vm9129_vm7, %v1641_v52, %v1642_v53 }
 0x12d   : > { %v1669_v6 = vunpack.c.l.b16 %v1643_v61  ;;  %v2457_v61 = vld [vmem:[%s9013_s9 + $0x8] sm:$0xf] }
 0x12e   : > { %v906_v36 = vpop.f32.mrf.mxu1 }
 0x12f   : > { %v923_v38 = vpop.f32.mrf.mxu3  ;;  %v795_v39 = vpop.f32.mrf.mxu0  ;;  %v1678_v16 = vpack.c.b16 %v1669_v6, %v1668_v5  ;;  %v8560_v5 = vld [vmem:[%s9252_s30 + $0x28] sm:$0xff]  ;;  %v8550_v6 = vld [vmem:[%s9252_s30 + $0x18] sm:$0xff] }
 0x130   : > { %v9417_v44 = vadd.f32 %v923_v38, %v9357_v19  ;;  %v907_v45 = vadd.f32 %v906_v36, %v795_v39  ;;  %v8517_v38 = vld [vmem:[%s9007_s28 + $0x120] sm:$0xff]  ;;  %v7292_v39 = vrot.slane %v7282_v30, 11  ;;  %3421 = vmatpush.bf16.msrb.mxu2 %v8560_v5  ;;  %3039 = vmatpush.bf16.msrb.mxu0 %v8550_v6  ;;  %v7422_v6 = vld [vmem:[%s9007_s28 + $0xd4] sm:$0xf] }
 0x131   : > { %7352 = vmatmul.msk.bf16.gmra.mxu1 %vm746_vm3, %v1677_v35 }
 0x132   : > { %v1118_v49 = vpop.f32.mrf.mxu2  ;;  %7305 = vmatmul.msk.bf16.gmra.mxu0 %vm746_vm3, %v1449_v37  ;;  %v1649_v37 = vrot.slane %v7331_v25, 6  ;;  %v1419_v48 = vsel %vm9106_vm4, %v7292_v39, %v1418_v22  ;;  %v7418_v22 = vld [vmem:[%s9007_s28 + $0xc0] sm:$0x8] }
 0x133   : > { %v9424_v54 = vadd.f32 %v1118_v49, %v904_v24  ;;  %v7329_v24 = vld [vmem:[%s9007_s28 + $0xd4] sm:$0xc]  ;;  %v1442_v59 = vunpack.c.l.b16 %v1419_v48 }
 0x134   : > { %7258 = vmatmul.msk.bf16.gmra.mxu3 %vm746_vm3, %v8505_v46  ;;  %v7339_v35 = vrot.slane %v7329_v24, 10 }
 0x136   : > { %v908_v19 = vpop.f32.mrf.mxu1 }
 0x137   : > { %7415 = vmatmul.msk.bf16.gmra.mxu2 %vm746_vm3, %v8516_v55  ;;  %v926_v62 = vpop.f32.mrf.mxu3  ;;  %v797_v63 = vpop.f32.mrf.mxu0 }
 0x138   : > { %v9438_v3 = vadd.f32 %v926_v62, %v9375_v41  ;;  %v909_v4 = vadd.f32 %v908_v19, %v797_v63  ;;  %v1646_v41 = vrot.slane %v7330_v14, 6  ;;  %v7466_v62 = vld [vmem:[%s9007_s28 + $0xc8] sm:$0xf] }
 0x139   : > { %v2210_v14 = vrot.slane %v7466_v62, 6 }
 0x13a   : > { %v1121_v8 = vpop.f32.mrf.mxu2  ;;  %v1648_v36 = vrot.slane %v1646_v41, 4  ;;  %v1647_v43 = vsel %vm9129_vm7, %v7339_v35, %v1646_v41  ;;  %v8507_v41 = vld [vmem:[%s9007_s28 + $0xd0] sm:$0xff] }
 0x13b   : > { %v9440_v13 = vadd.f32 %v1121_v8, %v907_v45  ;;  %v1670_v55 = vunpack.c.l.b16 %v1647_v43  ;;  %v8551_v8 = vld [vmem:[%s9252_s30 + $0x20] sm:$0xff] }
 0x13c   : > { %v1650_v45 = vsel %vm9129_vm7, %v1648_v36, %v1649_v37  ;;  %3266 = vmatpush.bf16.msrb.mxu1 %v8551_v8  ;;  %v2212_v36 = vrot.slane %v2210_v14, 4 }
 0x13d   : > { %v1671_v56 = vunpack.c.l.b16 %v1650_v45 }
 0x13e   : > { %v911_v17 = vpop.f32.mrf.mxu1 }
 0x13f   : > { %v928_v20 = vpop.f32.mrf.mxu3  ;;  %v800_v21 = vpop.f32.mrf.mxu0  ;;  %v1679_v63 = vpack.c.b16 %v1671_v56, %v1670_v55 }
 0x140   : > { %v9447_v26 = vadd.f32 %v928_v20, %v9385_v58  ;;  %v912_v27 = vadd.f32 %v911_v17, %v800_v21  ;;  %v1421_v58 = vrot.slane %v7284_v32, 7  ;;  %v7465_v20 = vld [vmem:[%s9007_s28 + $0xc4] sm:$0xc]  ;;  %v7467_v21 = vld [vmem:[%s9007_s28 + $0xcc] sm:$0x3] }
 0x141   : > { %7353 = vmatmul.msk.bf16.gmra.mxu1 %vm746_vm3, %v1678_v16  ;;  %v2458_v16 = vld [vmem:[%s9013_s9 + $0xc] sm:$0x3]  ;;  %v7489_v35 = vrot.slane %v7465_v20, 10  ;;  %v2213_v37 = vrot.slane %v7467_v21, 6  ;;  %v7468_v20 = vld [vmem:[%s9007_s28 + $0xd4] sm:$0xc] }
 0x142   : > { %v1123_v34 = vpop.f32.mrf.mxu2  ;;  %7306 = vmatmul.msk.bf16.gmra.mxu0 %vm746_vm3, %v1450_v18  ;;  %v1422_v49 = vsel %vm9106_vm4, %v1420_v40, %v1421_v58  ;;  %v2509_v32 = vrot.slane %v2458_v16, 6  ;;  %v2461_v16 = vld [vmem:[%s9013_s9 + $0x20] sm:$0x3]  ;;  %v7470_v21 = vld [vmem:[%s9007_s28 + $0xdc] sm:$0x3] }
 0x143   : > { %v9454_v1 = vadd.f32 %v1123_v34, %v909_v4  ;;  %v1443_v19 = vunpack.c.l.b16 %v1422_v49  ;;  %v2506_v4 = vrot.slane %v2457_v61, 6  ;;  %v8518_v34 = vld [vmem:[%s9007_s28 + $0x130] sm:$0xff]  ;;  %v2214_v48 = vsel %vm9129_vm7, %v2212_v36, %v2213_v37 }
 0x144   : > { %7259 = vmatmul.msk.bf16.gmra.mxu3 %vm746_vm3, %v8506_v29  ;;  %v7513_v29 = vrot.slane %v2456_v15, 10  ;;  %v2270_v61 = vunpack.c.l.b16 %v2214_v48  ;;  %v2459_v15 = vld [vmem:[%s9013_s9 + $0x18] sm:$0xc]  ;;  %v7490_v36 = vrot.slane %v7468_v20, 10  ;;  %v2220_v37 = vrot.slane %v7470_v21, 6 }
 0x145   : > { %v1451_v2 = vpack.c.b16 %v1443_v19, %v1442_v59  ;;  %v2508_v30 = vrot.slane %v2506_v4, 4  ;;  %v2462_v20 = vld [vmem:[%s9013_s9 + $0x2c] sm:$0xc] }
 0x146   : > { %v913_v42 = vpop.f32.mrf.mxu1 }
 0x147   : > { %7416 = vmatmul.msk.bf16.gmra.mxu2 %vm746_vm3, %v8517_v38  ;;  %v1136_v46 = vpop.f32.mrf.mxu3  ;;  %v802_v47 = vpop.f32.mrf.mxu0  ;;  %v7442_v38 = vrot.slane %v7418_v22, 11  ;;  %v2510_v43 = vsel %vm9129_vm7, %v2508_v30, %v2509_v32  ;;  %v7421_v22 = vld [vmem:[%s9007_s28 + $0xd0] sm:$0x8]  ;;  %v2516_v32 = vrot.slane %v2461_v16, 6 }
 0x148   : > { %v9469_v52 = vadd.f32 %v1136_v46, %v9408_v23  ;;  %v914_v53 = vadd.f32 %v913_v42, %v802_v47  ;;  %v7419_v23 = vld [vmem:[%s9007_s28 + $0xc4] sm:$0xf]  ;;  %v2507_v42 = vsel %vm9129_vm7, %v7513_v29, %v2506_v4  ;;  %v2211_v47 = vsel %vm9129_vm7, %v7489_v35, %v2210_v14 }
 0x149   : > { %v1982_v24 = vrot.slane %v7419_v23, 7  ;;  %v2564_v56 = vunpack.c.l.b16 %v2507_v42  ;;  %v2269_v19 = vunpack.c.l.b16 %v2211_v47  ;;  %v7514_v29 = vrot.slane %v2459_v15, 10  ;;  %v8522_v35 = vld [vmem:[%s9013_s9] sm:$0xff] }
 0x14a   : > { %v1126_v57 = vpop.f32.mrf.mxu2 }
 0x14b   : > { %v9471_v60 = vadd.f32 %v1126_v57, %v912_v27  ;;  %v7420_v27 = vld [vmem:[%s9007_s28 + $0xc8] sm:$0x7]  ;;  %v1984_v39 = vrot.slane %v1982_v24, 4  ;;  %v2565_v57 = vunpack.c.l.b16 %v2510_v43  ;;  %v2285_v5 = vpack.c.b16 %v2270_v61, %v2269_v19 }
 0x14c   : > { %v1985_v40 = vrot.slane %v7420_v27, 7  ;;  %v7423_v27 = vld [vmem:[%s9007_s28 + $0xd8] sm:$0x7] }
 0x14e   : > { %v916_v0 = vpop.f32.mrf.mxu1  ;;  %v1986_v55 = vsel %vm9106_vm4, %v1984_v39, %v1985_v40  ;;  %v1992_v40 = vrot.slane %v7423_v27, 7  ;;  %v7424_v27 = vld [vmem:[%s9007_s28 + $0xe0] sm:$0x8] }
 0x14f   : > { %v1138_v10 = vpop.f32.mrf.mxu3  ;;  %v805_v11 = vpop.f32.mrf.mxu0  ;;  %v2042_v23 = vunpack.c.l.b16 %v1986_v55 }
 0x150   : > { %v9482_v17 = vadd.f32 %v1138_v10, %v9417_v44  ;;  %v917_v18 = vadd.f32 %v916_v0, %v805_v11  ;;  %v7469_v0 = vld [vmem:[%s9007_s28 + $0xd8] sm:$0xf] }
 0x151   : > { %7354 = vmatmul.msk.bf16.gmra.mxu1 %vm746_vm3, %v1679_v63  ;;  %v2460_v63 = vld [vmem:[%s9013_s9 + $0x1c] sm:$0xf]  ;;  %v2217_v14 = vrot.slane %v7469_v0, 6 }
 0x152   : > { %v1128_v25 = vpop.f32.mrf.mxu2  ;;  %7307 = vmatmul.msk.bf16.gmra.mxu0 %vm746_vm3, %v1451_v2  ;;  %v2580_v2 = vpack.c.b16 %v2565_v57, %v2564_v56  ;;  %v2513_v8 = vrot.slane %v2460_v63, 6 }
 0x153   : > { %v9491_v44 = vadd.f32 %v1128_v25, %v914_v53  ;;  %v1983_v53 = vsel %vm9106_vm4, %v7442_v38, %v1982_v24  ;;  %v1989_v24 = vrot.slane %v7422_v6, 7  ;;  %v7443_v38 = vrot.slane %v7421_v22, 11 }
 0x154   : > { %7260 = vmatmul.msk.bf16.gmra.mxu3 %vm746_vm3, %v8507_v41  ;;  %v2515_v30 = vrot.slane %v2513_v8, 4  ;;  %v2514_v42 = vsel %vm9129_vm7, %v7514_v29, %v2513_v8  ;;  %v2218_v47 = vsel %vm9129_vm7, %v7490_v36, %v2217_v14  ;;  %v7515_v36 = vrot.slane %v2462_v20, 10 }
 0x155   : > { %v1991_v39 = vrot.slane %v1989_v24, 4  ;;  %v2566_v56 = vunpack.c.l.b16 %v2514_v42  ;;  %v2271_v61 = vunpack.c.l.b16 %v2218_v47 }
 0x156   : > { %v918_v58 = vpop.f32.mrf.mxu1  ;;  %v2517_v43 = vsel %vm9129_vm7, %v2515_v30, %v2516_v32 }
 0x157   : > { %7417 = vmatmul.msk.bf16.gmra.mxu2 %vm746_vm3, %v8518_v34  ;;  %v1141_v45 = vpop.f32.mrf.mxu3  ;;  %v807_v46 = vpop.f32.mrf.mxu0  ;;  %v1993_v55 = vsel %vm9106_vm4, %v1991_v39, %v1992_v40  ;;  %v2567_v57 = vunpack.c.l.b16 %v2517_v43  ;;  %v7444_v43 = vrot.slane %v7424_v27, 11  ;;  %v2465_v27 = vld [vmem:[%s9013_s9 + $0x40] sm:$0xc] }
 0x158   : > { %v9505_v49 = vadd.f32 %v1141_v45, %v9438_v3  ;;  %v919_v50 = vadd.f32 %v918_v58, %v807_v46  ;;  %v2041_v3 = vunpack.c.l.b16 %v1983_v53  ;;  %v1990_v53 = vsel %vm9106_vm4, %v7443_v38, %v1989_v24  ;;  %v7471_v24 = vld [vmem:[%s9007_s28 + $0xe4] sm:$0xc]  ;;  %v8523_v38 = vld [vmem:[%s9013_s9 + $0x14] sm:$0xff] }
 0x159   : > { %v2043_v0 = vunpack.c.l.b16 %v1990_v53  ;;  %v7491_v39 = vrot.slane %v7471_v24, 10 }
 0x15a   : > { %v1131_v59 = vpop.f32.mrf.mxu2  ;;  %v2057_v41 = vpack.c.b16 %v2042_v23, %v2041_v3  ;;  %v2463_v3 = vld [vmem:[%s9013_s9 + $0x30] sm:$0xf] }
 0x15b   : > { %v9511_v62 = vadd.f32 %v1131_v59, %v917_v18 }
 0x15e   : > { %v1719_v4 = vpop.f32.mrf.mxu1 }
 0x15f   : > { %v1143_v10 = vpop.f32.mrf.mxu3  ;;  %v1491_v11 = vpop.f32.mrf.mxu0 }
 0x160   : > { %v9519_v18 = vadd.f32 %v1143_v10, %v9447_v26  ;;  %v2219_v26 = vrot.slane %v2217_v14, 4  ;;  %v7425_v14 = vld [vmem:[%s9007_s28 + $0xe4] sm:$0xf] }
 0x161   : > { %7528 = vmatmul.msk.bf16.vlgmr.msra.gmra.mxu1 %vm746_vm3, %v2580_v2  ;;  %v7472_v2 = vld [vmem:[%s9007_s28 + $0xe8] sm:$0xf]  ;;  %v1996_v29 = vrot.slane %v7425_v14, 7 }
 0x162   : > { %v1133_v25 = vpop.f32.mrf.mxu2  ;;  %7504 = vmatmul.msk.bf16.vlgmr.msra.gmra.mxu0 %vm746_vm3, %v2285_v5  ;;  %v2221_v48 = vsel %vm9129_vm7, %v2219_v26, %v2220_v37  ;;  %v2581_v5 = vpack.c.b16 %v2567_v57, %v2566_v56 }
 0x163   : > { %v9527_v34 = vadd.f32 %v1133_v25, %v919_v50  ;;  %v2272_v63 = vunpack.c.l.b16 %v2221_v48  ;;  %v7473_v25 = vld [vmem:[%s9007_s28 + $0xec] sm:$0x3] }
 0x164   : > { %7457 = vmatmul.msk.bf16.vlgmr.msra.gmra.mxu3 %vm746_vm3, %v2057_v41  ;;  %v2224_v41 = vrot.slane %v7472_v2, 6  ;;  %v2227_v42 = vrot.slane %v7473_v25, 6 }
 0x165   : > { %v2286_v10 = vpack.c.b16 %v2272_v63, %v2271_v61 }
 0x166   : > { %v1721_v58 = vpop.f32.mrf.mxu1  ;;  %v2226_v40 = vrot.slane %v2224_v41, 4 }
 0x167   : > { %7572 = vmatmul.msk.bf16.vlgmr.msra.gmra.mxu2 %vm746_vm3, %v8522_v35  ;;  %v1263_v45 = vpop.f32.mrf.mxu3  ;;  %v1493_v46 = vpop.f32.mrf.mxu0  ;;  %v7426_v35 = vld [vmem:[%s9007_s28 + $0xe8] sm:$0x7] }
 0x168   : > { %v1303_v50 = vadd.f32 %v1263_v45, %v9353_v12  ;;  %v2044_v12 = vunpack.c.l.b16 %v1993_v55  ;;  %v1998_v45 = vrot.slane %v1996_v29, 4  ;;  %v1999_v47 = vrot.slane %v7426_v35, 7  ;;  %v7476_v35 = vld [vmem:[%s9007_s28 + $0xfc] sm:$0x3] }
 0x169   : > { %v2228_v57 = vsel %vm9129_vm7, %v2226_v40, %v2227_v42  ;;  %v7516_v40 = vrot.slane %v2465_v27, 10 }
 0x16a   : > { %v1531_v59 = vadd.f32 %v1491_v11, %v1303_v50  ;;  %v1876_v19 = vpop.f32.mrf.mxu2  ;;  %v2520_v11 = vrot.slane %v2463_v3, 6  ;;  %v2058_v22 = vpack.c.b16 %v2044_v12, %v2043_v0  ;;  %v2000_v61 = vsel %vm9106_vm4, %v1998_v45, %v1999_v47 }
 0x16b   : > { %v2274_v2 = vunpack.c.l.b16 %v2228_v57 }
 0x16c   : > { %v1759_v23 = vadd.f32 %v1719_v4, %v1531_v59  ;;  %v2464_v4 = vld [vmem:[%s9013_s9 + $0x34] sm:$0x3]  ;;  %v2522_v26 = vrot.slane %v2520_v11, 4  ;;  %v2521_v50 = vsel %vm9129_vm7, %v7515_v36, %v2520_v11  ;;  %v7475_v11 = vld [vmem:[%s9007_s28 + $0xf8] sm:$0xf] }
 0x16d   : > { %v2523_v37 = vrot.slane %v2464_v4, 6  ;;  %v2568_v63 = vunpack.c.l.b16 %v2521_v50  ;;  %v2231_v25 = vrot.slane %v7475_v11, 6  ;;  %v7427_v36 = vld [vmem:[%s9007_s28 + $0xf0] sm:$0x8]  ;;  %v2234_v50 = vrot.slane %v7476_v35, 6 }
 0x16e   : > { %v9547_v6 = vadd.f32 %v1876_v19, %v1759_v23  ;;  %v1724_v8 = vpop.f32.mrf.mxu1  ;;  %v1997_v19 = vsel %vm9106_vm4, %v7444_v43, %v1996_v29  ;;  %v8524_v43 = vld [vmem:[%s9013_s9 + $0x28] sm:$0xff] }
 0x16f   : > { %v1265_v15 = vpop.f32.mrf.mxu3  ;;  %v1496_v16 = vpop.f32.mrf.mxu0  ;;  %v2524_v53 = vsel %vm9129_vm7, %v2522_v26, %v2523_v37  ;;  %v2045_v14 = vunpack.c.l.b16 %v1997_v19  ;;  %v2233_v47 = vrot.slane %v2231_v25, 4 }
 0x170   : > { %v1304_v21 = vadd.f32 %v1265_v15, %v9366_v33  ;;  %v2569_v3 = vunpack.c.l.b16 %v2524_v53  ;;  %v7445_v53 = vrot.slane %v7427_v36, 11  ;;  %v2468_v36 = vld [vmem:[%s9013_s9 + $0x54] sm:$0xc] }
 0x171   : > { %7529 = vmatmul.msk.bf16.gmra.mxu1 %vm746_vm3, %v2581_v5  ;;  %v2466_v5 = vld [vmem:[%s9013_s9 + $0x44] sm:$0xf] }
 0x172   : > { %v1532_v30 = vadd.f32 %v1493_v46, %v1304_v21  ;;  %v1878_v32 = vpop.f32.mrf.mxu2  ;;  %7505 = vmatmul.msk.bf16.gmra.mxu0 %vm746_vm3, %v2286_v10  ;;  %v2582_v15 = vpack.c.b16 %v2569_v3, %v2568_v63  ;;  %v7428_v21 = vld [vmem:[%s9007_s28 + $0xf4] sm:$0xf]  ;;  %v2235_v3 = vsel %vm9129_vm7, %v2233_v47, %v2234_v50  ;;  %v7517_v47 = vrot.slane %v2468_v36, 10 }
 0x173   : > { %v2003_v26 = vrot.slane %v7428_v21, 7  ;;  %v2276_v11 = vunpack.c.l.b16 %v2235_v3 }
 0x174   : > { %v1760_v33 = vadd.f32 %v1721_v58, %v1532_v30  ;;  %7458 = vmatmul.msk.bf16.gmra.mxu3 %vm746_vm3, %v2058_v22  ;;  %v2225_v58 = vsel %vm9129_vm7, %v7491_v39, %v2224_v41  ;;  %v7429_v39 = vld [vmem:[%s9007_s28 + $0xf8] sm:$0x7] }
 0x175   : > { %v2273_v12 = vunpack.c.l.b16 %v2225_v58  ;;  %v2006_v58 = vrot.slane %v7429_v39, 7  ;;  %v7479_v39 = vld [vmem:[%s9007_s28 + $0x10c] sm:$0x3] }
 0x176   : > { %v9561_v48 = vadd.f32 %v1878_v32, %v1760_v33  ;;  %v1726_v46 = vpop.f32.mrf.mxu1  ;;  %v7474_v32 = vld [vmem:[%s9007_s28 + $0xf4] sm:$0xc] }
 0x177   : > { %7573 = vmatmul.msk.bf16.gmra.mxu2 %vm746_vm3, %v8523_v38  ;;  %v1268_v55 = vpop.f32.mrf.mxu3  ;;  %v1498_v56 = vpop.f32.mrf.mxu0  ;;  %v2287_v4 = vpack.c.b16 %v2274_v2, %v2273_v12  ;;  %v7492_v45 = vrot.slane %v7474_v32, 10 }
 0x178   : > { %v1305_v59 = vadd.f32 %v1268_v55, %v9381_v51  ;;  %v2046_v51 = vunpack.c.l.b16 %v2000_v61  ;;  %v2005_v55 = vrot.slane %v2003_v26, 4 }
 0x17a   : > { %v1533_v23 = vadd.f32 %v1496_v16, %v1305_v59  ;;  %v1881_v0 = vpop.f32.mrf.mxu2  ;;  %v2527_v16 = vrot.slane %v2466_v5, 6  ;;  %v2059_v30 = vpack.c.b16 %v2046_v51, %v2045_v14  ;;  %v2007_v12 = vsel %vm9106_vm4, %v2005_v55, %v2006_v58 }
 0x17c   : > { %v1761_v10 = vadd.f32 %v1724_v8, %v1533_v23  ;;  %v2467_v8 = vld [vmem:[%s9013_s9 + $0x48] sm:$0x3]  ;;  %v2529_v42 = vrot.slane %v2527_v16, 4  ;;  %v2528_v59 = vsel %vm9129_vm7, %v7516_v40, %v2527_v16  ;;  %v7430_v40 = vld [vmem:[%s9007_s28 + $0x100] sm:$0x8] }
 0x17d   : > { %v2530_v33 = vrot.slane %v2467_v8, 6  ;;  %v2570_v2 = vunpack.c.l.b16 %v2528_v59  ;;  %v7478_v16 = vld [vmem:[%s9007_s28 + $0x108] sm:$0xf]  ;;  %v2241_v59 = vrot.slane %v7479_v39, 6 }
 0x17e   : > { %v9579_v41 = vadd.f32 %v1881_v0, %v1761_v10  ;;  %v1729_v20 = vpop.f32.mrf.mxu1  ;;  %v2004_v0 = vsel %vm9106_vm4, %v7445_v53, %v2003_v26  ;;  %v2238_v35 = vrot.slane %v7478_v16, 6  ;;  %v8525_v53 = vld [vmem:[%s9013_s9 + $0x3c] sm:$0xff] }
 0x17f   : > { %v1270_v22 = vpop.f32.mrf.mxu3  ;;  %v1501_v24 = vpop.f32.mrf.mxu0  ;;  %v2531_v19 = vsel %vm9129_vm7, %v2529_v42, %v2530_v33  ;;  %v2047_v21 = vunpack.c.l.b16 %v2004_v0 }
 0x180   : > { %v1306_v29 = vadd.f32 %v1270_v22, %v9394_v9  ;;  %v2571_v5 = vunpack.c.l.b16 %v2531_v19  ;;  %v2240_v58 = vrot.slane %v2238_v35, 4  ;;  %v7446_v19 = vrot.slane %v7430_v40, 11  ;;  %v2471_v40 = vld [vmem:[%s9013_s9 + $0x68] sm:$0xc] }
 0x181   : > { %7530 = vmatmul.msk.bf16.gmra.mxu1 %vm746_vm3, %v2582_v15  ;;  %v2469_v15 = vld [vmem:[%s9013_s9 + $0x58] sm:$0xf] }
 0x182   : > { %v1534_v37 = vadd.f32 %v1498_v56, %v1306_v29  ;;  %v1883_v38 = vpop.f32.mrf.mxu2  ;;  %7506 = vmatmul.msk.bf16.gmra.mxu0 %vm746_vm3, %v2287_v4  ;;  %v2583_v22 = vpack.c.b16 %v2571_v5, %v2570_v2  ;;  %v7431_v29 = vld [vmem:[%s9007_s28 + $0x104] sm:$0xf]  ;;  %v2242_v5 = vsel %vm9129_vm7, %v2240_v58, %v2241_v59  ;;  %v7518_v58 = vrot.slane %v2471_v40, 10 }
 0x183   : > { %v2010_v42 = vrot.slane %v7431_v29, 7  ;;  %v2278_v16 = vunpack.c.l.b16 %v2242_v5 }
 0x184   : > { %v1762_v9 = vadd.f32 %v1726_v46, %v1534_v37  ;;  %7459 = vmatmul.msk.bf16.gmra.mxu3 %vm746_vm3, %v2059_v30  ;;  %v2232_v46 = vsel %vm9129_vm7, %v7492_v45, %v2231_v25  ;;  %v7432_v45 = vld [vmem:[%s9007_s28 + $0x108] sm:$0x7] }
 0x185   : > { %v2275_v51 = vunpack.c.l.b16 %v2232_v46  ;;  %v2013_v46 = vrot.slane %v7432_v45, 7  ;;  %v7482_v45 = vld [vmem:[%s9007_s28 + $0x11c] sm:$0x3] }
 0x186   : > { %v9593_v57 = vadd.f32 %v1883_v38, %v1762_v9  ;;  %v1731_v56 = vpop.f32.mrf.mxu1  ;;  %v7477_v38 = vld [vmem:[%s9007_s28 + $0x104] sm:$0xc] }
 0x187   : > { %7574 = vmatmul.msk.bf16.gmra.mxu2 %vm746_vm3, %v8524_v43  ;;  %v1273_v61 = vpop.f32.mrf.mxu3  ;;  %v1503_v63 = vpop.f32.mrf.mxu0  ;;  %v2288_v8 = vpack.c.b16 %v2276_v11, %v2275_v51  ;;  %v7493_v55 = vrot.slane %v7477_v38, 10 }
 0x188   : > { %v1307_v23 = vadd.f32 %v1273_v61, %v9410_v31  ;;  %v2048_v31 = vunpack.c.l.b16 %v2007_v12  ;;  %v2012_v61 = vrot.slane %v2010_v42, 4 }
 0x18a   : > { %v1535_v10 = vadd.f32 %v1501_v24, %v1307_v23  ;;  %v1886_v14 = vpop.f32.mrf.mxu2  ;;  %v2534_v24 = vrot.slane %v2469_v15, 6  ;;  %v2060_v37 = vpack.c.b16 %v2048_v31, %v2047_v21  ;;  %v2014_v51 = vsel %vm9106_vm4, %v2012_v61, %v2013_v46 }
 0x18c   : > { %v1763_v4 = vadd.f32 %v1729_v20, %v1535_v10  ;;  %v2470_v20 = vld [vmem:[%s9013_s9 + $0x5c] sm:$0x3]  ;;  %v2536_v50 = vrot.slane %v2534_v24, 4  ;;  %v2535_v23 = vsel %vm9129_vm7, %v7517_v47, %v2534_v24  ;;  %v7481_v24 = vld [vmem:[%s9007_s28 + $0x118] sm:$0xf] }
 0x18d   : > { %v2537_v9 = vrot.slane %v2470_v20, 6  ;;  %v2572_v11 = vunpack.c.l.b16 %v2535_v23  ;;  %v2245_v39 = vrot.slane %v7481_v24, 6  ;;  %v7433_v47 = vld [vmem:[%s9007_s28 + $0x110] sm:$0x8]  ;;  %v2248_v23 = vrot.slane %v7482_v45, 6 }
 0x18e   : > { %v9611_v25 = vadd.f32 %v1886_v14, %v1763_v4  ;;  %v1734_v27 = vpop.f32.mrf.mxu1  ;;  %v2011_v14 = vsel %vm9106_vm4, %v7446_v19, %v2010_v42  ;;  %v8526_v19 = vld [vmem:[%s9013_s9 + $0x50] sm:$0xff] }
 0x18f   : > { %v1275_v30 = vpop.f32.mrf.mxu3  ;;  %v1506_v32 = vpop.f32.mrf.mxu0  ;;  %v2538_v0 = vsel %vm9129_vm7, %v2536_v50, %v2537_v9  ;;  %v2049_v29 = vunpack.c.l.b16 %v2011_v14  ;;  %v2247_v46 = vrot.slane %v2245_v39, 4 }
 0x190   : > { %v1308_v26 = vadd.f32 %v1275_v30, %v9424_v54  ;;  %v2573_v15 = vunpack.c.l.b16 %v2538_v0  ;;  %v7447_v0 = vrot.slane %v7433_v47, 11  ;;  %v2474_v47 = vld [vmem:[%s9013_s9 + $0x7c] sm:$0xc] }
 0x191   : > { %7531 = vmatmul.msk.bf16.gmra.mxu1 %vm746_vm3, %v2583_v22  ;;  %v2472_v22 = vld [vmem:[%s9013_s9 + $0x6c] sm:$0xf] }
 0x192   : > { %v1536_v33 = vadd.f32 %v1503_v63, %v1308_v26  ;;  %v1888_v43 = vpop.f32.mrf.mxu2  ;;  %7507 = vmatmul.msk.bf16.gmra.mxu0 %vm746_vm3, %v2288_v8  ;;  %v2584_v30 = vpack.c.b16 %v2573_v15, %v2572_v11  ;;  %v7434_v26 = vld [vmem:[%s9007_s28 + $0x114] sm:$0xf]  ;;  %v2249_v15 = vsel %vm9129_vm7, %v2247_v46, %v2248_v23  ;;  %v7519_v46 = vrot.slane %v2474_v47, 10 }
 0x193   : > { %v2017_v50 = vrot.slane %v7434_v26, 7  ;;  %v2280_v24 = vunpack.c.l.b16 %v2249_v15 }
 0x194   : > { %v1764_v54 = vadd.f32 %v1731_v56, %v1536_v33  ;;  %7460 = vmatmul.msk.bf16.gmra.mxu3 %vm746_vm3, %v2060_v37  ;;  %v2239_v56 = vsel %vm9129_vm7, %v7493_v55, %v2238_v35  ;;  %v7435_v55 = vld [vmem:[%s9007_s28 + $0x118] sm:$0x7] }
 0x195   : > { %v2277_v31 = vunpack.c.l.b16 %v2239_v56  ;;  %v2020_v56 = vrot.slane %v7435_v55, 7  ;;  %v7485_v55 = vld [vmem:[%s9007_s28 + $0x12c] sm:$0x3] }
 0x196   : > { %v9625_v3 = vadd.f32 %v1888_v43, %v1764_v54  ;;  %v1736_v63 = vpop.f32.mrf.mxu1  ;;  %v7480_v43 = vld [vmem:[%s9007_s28 + $0x114] sm:$0xc] }
 0x197   : > { %7575 = vmatmul.msk.bf16.gmra.mxu2 %vm746_vm3, %v8525_v53  ;;  %v1278_v12 = vpop.f32.mrf.mxu3  ;;  %v1508_v2 = vpop.f32.mrf.mxu0  ;;  %v2289_v20 = vpack.c.b16 %v2278_v16, %v2277_v31  ;;  %v7494_v61 = vrot.slane %v7480_v43, 10 }
 0x198   : > { %v1309_v10 = vadd.f32 %v1278_v12, %v9440_v13  ;;  %v2050_v13 = vunpack.c.l.b16 %v2014_v51  ;;  %v2019_v12 = vrot.slane %v2017_v50, 4 }
 0x19a   : > { %v1537_v4 = vadd.f32 %v1506_v32, %v1309_v10  ;;  %v1891_v21 = vpop.f32.mrf.mxu2  ;;  %v2541_v32 = vrot.slane %v2472_v22, 6  ;;  %v2061_v33 = vpack.c.b16 %v2050_v13, %v2049_v29  ;;  %v2021_v31 = vsel %vm9106_vm4, %v2019_v12, %v2020_v56 }
 0x19c   : > { %v1765_v8 = vadd.f32 %v1734_v27, %v1537_v4  ;;  %v2473_v27 = vld [vmem:[%s9013_s9 + $0x70] sm:$0x3]  ;;  %v2543_v59 = vrot.slane %v2541_v32, 4  ;;  %v2542_v10 = vsel %vm9129_vm7, %v7518_v58, %v2541_v32  ;;  %v7484_v32 = vld [vmem:[%s9007_s28 + $0x128] sm:$0xf] }
 0x19d   : > { %v2544_v54 = vrot.slane %v2473_v27, 6  ;;  %v2574_v16 = vunpack.c.l.b16 %v2542_v10  ;;  %v2252_v45 = vrot.slane %v7484_v32, 6  ;;  %v7436_v58 = vld [vmem:[%s9007_s28 + $0x120] sm:$0x8]  ;;  %v2255_v10 = vrot.slane %v7485_v55, 6 }
 0x19e   : > { %v9643_v35 = vadd.f32 %v1891_v21, %v1765_v8  ;;  %v1739_v36 = vpop.f32.mrf.mxu1  ;;  %v2018_v21 = vsel %vm9106_vm4, %v7447_v0, %v2017_v50  ;;  %v8527_v0 = vld [vmem:[%s9013_s9 + $0x64] sm:$0xff] }
 0x19f   : > { %v1280_v37 = vpop.f32.mrf.mxu3  ;;  %v1511_v38 = vpop.f32.mrf.mxu0  ;;  %v2545_v14 = vsel %vm9129_vm7, %v2543_v59, %v2544_v54  ;;  %v2051_v26 = vunpack.c.l.b16 %v2018_v21  ;;  %v2254_v56 = vrot.slane %v2252_v45, 4 }
 0x1a0   : > { %v1310_v42 = vadd.f32 %v1280_v37, %v9454_v1  ;;  %v2575_v22 = vunpack.c.l.b16 %v2545_v14  ;;  %v7448_v14 = vrot.slane %v7436_v58, 11  ;;  %v2477_v58 = vld [vmem:[%s9013_s9 + $0x90] sm:$0xc] }
 0x1a1   : > { %7532 = vmatmul.msk.bf16.gmra.mxu1 %vm746_vm3, %v2584_v30  ;;  %v2475_v30 = vld [vmem:[%s9013_s9 + $0x80] sm:$0xf] }
 0x1a2   : > { %v1538_v9 = vadd.f32 %v1508_v2, %v1310_v42  ;;  %v1893_v53 = vpop.f32.mrf.mxu2  ;;  %7508 = vmatmul.msk.bf16.gmra.mxu0 %vm746_vm3, %v2289_v20  ;;  %v2585_v37 = vpack.c.b16 %v2575_v22, %v2574_v16  ;;  %v7437_v42 = vld [vmem:[%s9007_s28 + $0x124] sm:$0xf]  ;;  %v2256_v22 = vsel %vm9129_vm7, %v2254_v56, %v2255_v10  ;;  %v7520_v56 = vrot.slane %v2477_v58, 10 }
 0x1a3   : > { %v2024_v59 = vrot.slane %v7437_v42, 7  ;;  %v2282_v32 = vunpack.c.l.b16 %v2256_v22 }
 0x1a4   : > { %v1766_v1 = vadd.f32 %v1736_v63, %v1538_v9  ;;  %7461 = vmatmul.msk.bf16.gmra.mxu3 %vm746_vm3, %v2061_v33  ;;  %v2246_v63 = vsel %vm9129_vm7, %v7494_v61, %v2245_v39  ;;  %v7438_v61 = vld [vmem:[%s9007_s28 + $0x128] sm:$0x7] }
 0x1a5   : > { %v2279_v13 = vunpack.c.l.b16 %v2246_v63  ;;  %v2027_v63 = vrot.slane %v7438_v61, 7  ;;  %v7488_v61 = vld [vmem:[%s9007_s28 + $0x13c] sm:$0x3] }
 0x1a6   : > { %v9657_v5 = vadd.f32 %v1893_v53, %v1766_v1  ;;  %v1741_v2 = vpop.f32.mrf.mxu1  ;;  %v7483_v53 = vld [vmem:[%s9007_s28 + $0x124] sm:$0xc] }
 0x1a7   : > { %7576 = vmatmul.msk.bf16.gmra.mxu2 %vm746_vm3, %v8526_v19  ;;  %v1283_v51 = vpop.f32.mrf.mxu3  ;;  %v1513_v11 = vpop.f32.mrf.mxu0  ;;  %v2290_v27 = vpack.c.b16 %v2280_v24, %v2279_v13  ;;  %v7495_v12 = vrot.slane %v7483_v53, 10 }
 0x1a8   : > { %v1311_v4 = vadd.f32 %v1283_v51, %v9471_v60  ;;  %v2052_v60 = vunpack.c.l.b16 %v2021_v31  ;;  %v2026_v51 = vrot.slane %v2024_v59, 4 }
 0x1aa   : > { %v1539_v8 = vadd.f32 %v1511_v38, %v1311_v4  ;;  %v1896_v29 = vpop.f32.mrf.mxu2  ;;  %v2548_v38 = vrot.slane %v2475_v30, 6  ;;  %v2062_v9 = vpack.c.b16 %v2052_v60, %v2051_v26  ;;  %v2028_v13 = vsel %vm9106_vm4, %v2026_v51, %v2027_v63 }
 0x1ac   : > { %v1767_v20 = vadd.f32 %v1739_v36, %v1539_v8  ;;  %v2476_v36 = vld [vmem:[%s9013_s9 + $0x84] sm:$0x3]  ;;  %v2550_v23 = vrot.slane %v2548_v38, 4  ;;  %v2549_v4 = vsel %vm9129_vm7, %v7519_v46, %v2548_v38  ;;  %v7487_v38 = vld [vmem:[%s9007_s28 + $0x138] sm:$0xf] }
 0x1ad   : > { %v2551_v1 = vrot.slane %v2476_v36, 6  ;;  %v2576_v24 = vunpack.c.l.b16 %v2549_v4  ;;  %v2259_v55 = vrot.slane %v7487_v38, 6  ;;  %v7439_v46 = vld [vmem:[%s9007_s28 + $0x130] sm:$0x8] }
 0x1ae   : > { %v9675_v39 = vadd.f32 %v1896_v29, %v1767_v20  ;;  %v1744_v40 = vpop.f32.mrf.mxu1  ;;  %v2025_v29 = vsel %vm9106_vm4, %v7448_v14, %v2024_v59  ;;  %v8528_v14 = vld [vmem:[%s9013_s9 + $0x78] sm:$0xff] }
 0x1af   : > { %v1285_v33 = vpop.f32.mrf.mxu3  ;;  %v1516_v43 = vpop.f32.mrf.mxu0  ;;  %v2552_v21 = vsel %vm9129_vm7, %v2550_v23, %v2551_v1  ;;  %v2053_v42 = vunpack.c.l.b16 %v2025_v29  ;;  %v2261_v63 = vrot.slane %v2259_v55, 4 }
 0x1b0   : > { %v1312_v50 = vadd.f32 %v1285_v33, %v9491_v44  ;;  %v2577_v30 = vunpack.c.l.b16 %v2552_v21  ;;  %v7449_v21 = vrot.slane %v7439_v46, 11 }
 0x1b1   : > { %7533 = vmatmul.msk.bf16.gmra.mxu1 %vm746_vm3, %v2585_v37  ;;  %v2478_v37 = vld [vmem:[%s9013_s9 + $0x94] sm:$0xf] }
 0x1b2   : > { %v1540_v54 = vadd.f32 %v1513_v11, %v1312_v50  ;;  %v1898_v19 = vpop.f32.mrf.mxu2  ;;  %7509 = vmatmul.msk.bf16.gmra.mxu0 %vm746_vm3, %v2290_v27  ;;  %v2586_v33 = vpack.c.b16 %v2577_v30, %v2576_v24  ;;  %v7440_v50 = vld [vmem:[%s9007_s28 + $0x134] sm:$0xf] }
 0x1b3   : > { %v2031_v23 = vrot.slane %v7440_v50, 7 }
 0x1b4   : > { %v1768_v44 = vadd.f32 %v1741_v2, %v1540_v54  ;;  %7462 = vmatmul.msk.bf16.gmra.mxu3 %vm746_vm3, %v2062_v9  ;;  %v2253_v2 = vsel %vm9129_vm7, %v7495_v12, %v2252_v45  ;;  %v7441_v12 = vld [vmem:[%s9007_s28 + $0x138] sm:$0x7] }
 0x1b5   : > { %v2281_v60 = vunpack.c.l.b16 %v2253_v2  ;;  %v2034_v2 = vrot.slane %v7441_v12, 7 }
 0x1b6   : > { %v9689_v15 = vadd.f32 %v1898_v19, %v1768_v44  ;;  %v1746_v11 = vpop.f32.mrf.mxu1  ;;  %v7486_v19 = vld [vmem:[%s9007_s28 + $0x134] sm:$0xc] }
 0x1b7   : > { %7577 = vmatmul.msk.bf16.gmra.mxu2 %vm746_vm3, %v8527_v0  ;;  %v1288_v31 = vpop.f32.mrf.mxu3  ;;  %v1518_v16 = vpop.f32.mrf.mxu0  ;;  %v2291_v36 = vpack.c.b16 %v2282_v32, %v2281_v60  ;;  %v7496_v51 = vrot.slane %v7486_v19, 10  ;;  %v2032_v60 = vsel %vm9106_vm4, %v7449_v21, %v2031_v23  ;;  %v8579_v19 = vld [vmem:[%s9252_s30 + $0x40] sm:$0xff] }
 0x1b8   : > { %v1313_v8 = vadd.f32 %v1288_v31, %v9511_v62  ;;  %v2054_v62 = vunpack.c.l.b16 %v2028_v13  ;;  %v2033_v31 = vrot.slane %v2031_v23, 4  ;;  %v2055_v50 = vunpack.c.l.b16 %v2032_v60  ;;  %v7690_v23 = vld [vmem:[%s9013_s9 + $0xf4] sm:$0xc]  ;;  %3959 = vmatpush.bf16.msra.mxu1 %v8579_v19 }
 0x1b9   : > { %v2260_v24 = vsel %vm9129_vm7, %v7496_v51, %v2259_v55  ;;  %v8529_v51 = vld [vmem:[%s9013_s9 + $0x8c] sm:$0xff] }
 0x1ba   : > { %v1541_v20 = vadd.f32 %v1516_v43, %v1313_v8  ;;  %v1901_v26 = vpop.f32.mrf.mxu2  ;;  %v2555_v43 = vrot.slane %v2478_v37, 6  ;;  %v2063_v54 = vpack.c.b16 %v2054_v62, %v2053_v42  ;;  %v2035_v32 = vsel %vm9106_vm4, %v2033_v31, %v2034_v2 }
 0x1bb   : > { %v2283_v38 = vunpack.c.l.b16 %v2260_v24  ;;  %v7694_v24 = vld [vmem:[%s9013_s9 + $0x10c] sm:$0xf] }
 0x1bc   : > { %v1769_v27 = vadd.f32 %v1744_v40, %v1541_v20  ;;  %v2479_v40 = vld [vmem:[%s9013_s9 + $0x98] sm:$0x3]  ;;  %v2557_v10 = vrot.slane %v2555_v43, 4  ;;  %v2556_v8 = vsel %vm9129_vm7, %v7520_v56, %v2555_v43  ;;  %v8569_v20 = vld [vmem:[%s9252_s30 + $0x30] sm:$0xff]  ;;  %v2056_v43 = vunpack.c.l.b16 %v2035_v32 }
 0x1bd   : > { %v2558_v44 = vrot.slane %v2479_v40, 6  ;;  %v2578_v37 = vunpack.c.l.b16 %v2556_v8  ;;  %3577 = vmatpush.bf16.msra.mxu3 %v8569_v20  ;;  %v8542_v32 = vld [vmem:[%s9013_s9 + $0xf0] sm:$0xff] }
 0x1be   : > { %v9707_v45 = vadd.f32 %v1901_v26, %v1769_v27  ;;  %v1749_v47 = vpop.f32.mrf.mxu1  ;;  %v2064_v12 = vpack.c.b16 %v2056_v43, %v2055_v50 }
 0x1bf   : > { %v1290_v9 = vpop.f32.mrf.mxu3  ;;  %v1521_v53 = vpop.f32.mrf.mxu0  ;;  %v2559_v29 = vsel %vm9129_vm7, %v2557_v10, %v2558_v44  ;;  %v7714_v10 = vrot.slane %v7690_v23, 10  ;;  %v2388_v23 = vld [vmem:[#allocation2] sm:$0xff] }
 0x1c0   : > { %v1314_v59 = vadd.f32 %v1290_v9, %v9527_v34  ;;  %v2262_v34 = vrot.slane %v7488_v61, 6  ;;  %v2579_v27 = vunpack.c.l.b16 %v2559_v29 }
 0x1c1   : > { %7534 = vmatmul.msk.bf16.gmra.mxu1 %vm746_vm3, %v2586_v33 }
 0x1c2   : > { %v1542_v1 = vadd.f32 %v1518_v16, %v1314_v59  ;;  %v1903_v0 = vpop.f32.mrf.mxu2  ;;  %7510 = vmatmul.msk.bf16.gmra.mxu0 %vm746_vm3, %v2291_v36  ;;  %v2263_v30 = vsel %vm9129_vm7, %v2261_v63, %v2262_v34  ;;  %v7691_v36 = vld [vmem:[%s9013_s9 + $0xf8] sm:$0xf]  ;;  %v2587_v9 = vpack.c.b16 %v2579_v27, %v2578_v37  ;;  %v8590_v59 = vld [vmem:[%s9743_s12 + $0x8] sm:$0xff]  ;;  %v3154_v37 = vrot.slane %v7694_v24, 6 }
 0x1c3   : > { %v2284_v33 = vunpack.c.l.b16 %v2263_v30  ;;  %v3147_v40 = vrot.slane %v7691_v36, 6  ;;  %4258 = vmatpush.bf16.msra.mxu2 %v8590_v59 }
 0x1c4   : > { %v1770_v4 = vadd.f32 %v1746_v11, %v1542_v1  ;;  %7463 = vmatmul.msk.bf16.gmra.mxu3 %vm746_vm3, %v2063_v54  ;;  %v8570_v54 = vld [vmem:[%s9252_s30 + $0x38] sm:$0xff]  ;;  %v3156_v43 = vrot.slane %v3154_v37, 4 }
 0x1c5   : > { %v2292_v58 = vpack.c.b16 %v2284_v33, %v2283_v38  ;;  %v7692_v1 = vld [vmem:[%s9013_s9 + $0xfc] sm:$0x3]  ;;  %3804 = vmatpush.bf16.msra.mxu0 %v8570_v54  ;;  %v3149_v44 = vrot.slane %v3147_v40, 4  ;;  %v7695_v38 = vld [vmem:[%s9013_s9 + $0x110] sm:$0x3] }
 0x1c6   : > { %v9721_v22 = vadd.f32 %v1903_v0, %v1770_v4  ;;  %v1751_v16 = vpop.f32.mrf.mxu1  ;;  %v3148_v4 = vsel %vm9129_vm7, %v7714_v10, %v3147_v40  ;;  %v8533_v33 = vld [vmem:[%s9013_s9 + $0xc] sm:$0xff]  ;;  %v7697_v10 = vld [vmem:[%s9013_s9 + $0x120] sm:$0xf] }
 0x1c7   : > { %7578 = vmatmul.msk.bf16.gmra.mxu2 %vm746_vm3, %v8528_v14  ;;  %v1293_v13 = vpop.f32.mrf.mxu3  ;;  %v1523_v11 = vpop.f32.mrf.mxu0  ;;  %v3150_v14 = vrot.slane %v7692_v1, 6  ;;  %v3205_v8 = vunpack.c.l.b16 %v3148_v4 }
 0x1c8   : > { %v1315_v26 = vadd.f32 %v1293_v13, %v9469_v52 }
 0x1c9   : > { %v3151_v21 = vsel %vm9129_vm7, %v3149_v44, %v3150_v14 }
 0x1ca   : > { %v1543_v42 = vadd.f32 %v1521_v53, %v1315_v26  ;;  %v1906_v62 = vpop.f32.mrf.mxu2  ;;  %v3206_v29 = vunpack.c.l.b16 %v3151_v21  ;;  %v7696_v21 = vld [vmem:[%s9013_s9 + $0x11c] sm:$0xc] }
 0x1cc   : > { %v1771_v52 = vadd.f32 %v1749_v47, %v1543_v42  ;;  %v3221_v20 = vpack.c.b16 %v3206_v29, %v3205_v8  ;;  %v2389_v8 = vld [vmem:[#allocation2 + $0x8] sm:$0xff] }
 0x1ce   : > { %v9745_v55 = vadd.f32 %v1906_v62, %v1771_v52  ;;  %v1754_v53 = vpop.f32.mrf.mxu1  ;;  %v7693_v62 = vld [vmem:[%s9013_s9 + $0x108] sm:$0xc] }
 0x1cf   : > { %v1295_v61 = vpop.f32.mrf.mxu3  ;;  %v1526_v46 = vpop.f32.mrf.mxu0  ;;  %v7715_v50 = vrot.slane %v7693_v62, 10 }
 0x1d0   : > { %v1316_v0 = vadd.f32 %v1295_v61, %v9482_v17 }
 0x1d1   : > { %7535 = vmatmul.msk.bf16.gmra.mxu1 %vm746_vm3, %v2587_v9  ;;  %v3157_v9 = vrot.slane %v7695_v38, 6 }
 0x1d2   : > { %v1544_v47 = vadd.f32 %v1523_v11, %v1316_v0  ;;  %v1908_v56 = vpop.f32.mrf.mxu2  ;;  %7511 = vmatmul.msk.bf16.gmra.mxu0 %vm746_vm3, %v2292_v58 }
 0x1d3   : > { %v3158_v54 = vsel %vm9129_vm7, %v3156_v43, %v3157_v9  ;;  %v7700_v9 = vld [vmem:[%s9013_s9 + $0x134] sm:$0xf] }
 0x1d4   : > { %v1772_v63 = vadd.f32 %v1751_v16, %v1544_v47  ;;  %7464 = vmatmul.msk.bf16.gmra.mxu3 %vm746_vm3, %v2064_v12  ;;  %v3208_v0 = vunpack.c.l.b16 %v3158_v54  ;;  %v3168_v54 = vrot.slane %v7700_v9, 6 }
 0x1d6   : > { %v9757_v34 = vadd.f32 %v1908_v56, %v1772_v63  ;;  %v1756_v17 = vpop.f32.mrf.mxu1  ;;  %v8543_v63 = vld [vmem:[%s9013_s9 + $0x104] sm:$0xff] }
 0x1d7   : > { %7579 = vmatmul.msk.bf16.gmra.mxu2 %vm746_vm3, %v8529_v51  ;;  %v1298_v31 = vpop.f32.mrf.mxu3  ;;  %v1528_v2 = vpop.f32.mrf.mxu0 }
 0x1d8   : > { %v1317_v16 = vadd.f32 %v1298_v31, %v9505_v49  ;;  %v7698_v31 = vld [vmem:[%s9013_s9 + $0x124] sm:$0x3] }
 0x1da   : > { %v1545_v13 = vadd.f32 %v1526_v46, %v1317_v16  ;;  %v1911_v11 = vpop.f32.mrf.mxu2  ;;  %v8534_v16 = vld [vmem:[%s9013_s9 + $0x20] sm:$0xff] }
 0x1dc   : > { %v1773_v30 = vadd.f32 %v1754_v53, %v1545_v13  ;;  %v8552_v53 = vld [vmem:[%s9013_s9 + $0xfc] sm:$0xff] }
 0x1de   : > { %v9766_v26 = vadd.f32 %v1911_v11, %v1773_v30  ;;  %v2627_v60 = vpop.f32.mrf.mxu1  ;;  %v7716_v11 = vrot.slane %v7696_v21, 10  ;;  %v3164_v30 = vrot.slane %v7698_v31, 6 }
 0x1df   : > { %v1300_v27 = vpop.f32.mrf.mxu3  ;;  %v2332_v42 = vpop.f32.mrf.mxu0 }
 0x1e0   : > { %v1318_v49 = vadd.f32 %v1300_v27, %v9519_v18  ;;  %v3155_v18 = vsel %vm9129_vm7, %v7715_v50, %v3154_v37 }
 0x1e1   : > { %7729 = vmatmul.msk.bf16.vlgmr.msrb.gmra.mxu1 %vm746_vm3, %v3221_v20  ;;  %v3207_v1 = vunpack.c.l.b16 %v3155_v18  ;;  %v8544_v18 = vld [vmem:[%s9013_s9 + $0x118] sm:$0xff] }
 0x1e2   : > { %v1546_v36 = vadd.f32 %v1528_v2, %v1318_v49  ;;  %v1913_v52 = vpop.f32.mrf.mxu2  ;;  %7682 = vmatmul.msk.bf16.vlgmr.msrb.gmra.mxu0 %vm746_vm3, %v8542_v32  ;;  %v2390_v49 = vld [vmem:[#allocation2 + $0x10] sm:$0xff] }
 0x1e3   : > { %v3222_v14 = vpack.c.b16 %v3208_v0, %v3207_v1  ;;  %v8535_v1 = vld [vmem:[%s9013_s9 + $0x34] sm:$0xff]  ;;  %v2391_v0 = vld [vmem:[#allocation2 + $0x18] sm:$0xff] }
 0x1e4   : > { %v1774_v58 = vadd.f32 %v1756_v17, %v1546_v36  ;;  %7619 = vmatmul.msk.bf16.vlgmr.msrb.gmra.mxu3 %vm746_vm3, %v8533_v33  ;;  %v3161_v17 = vrot.slane %v7697_v10, 6 }
 0x1e6   : > { %v9777_v40 = vadd.f32 %v1913_v52, %v1774_v58  ;;  %v2629_v59 = vpop.f32.mrf.mxu1  ;;  %v3163_v24 = vrot.slane %v3161_v17, 4  ;;  %v3162_v37 = vsel %vm9129_vm7, %v7716_v11, %v3161_v17 }
 0x1e7   : > { %7792 = vmatmul.msk.bf16.vlgmr.msrb.gmra.mxu2 %vm746_vm3, %v8552_v53  ;;  %v2104_v19 = vpop.f32.mrf.mxu3  ;;  %v2334_v61 = vpop.f32.mrf.mxu0  ;;  %v3209_v33 = vunpack.c.l.b16 %v3162_v37  ;;  %v8545_v37 = vld [vmem:[%s9013_s9 + $0x12c] sm:$0xff] }
 0x1e8   : > { %v2144_v46 = vadd.f32 %v2104_v19, %v9547_v6  ;;  %v3165_v27 = vsel %vm9129_vm7, %v3163_v24, %v3164_v30  ;;  %v7703_v30 = vld [vmem:[%s9013_s9 + $0x148] sm:$0xf] }
 0x1e9   : > { %v3210_v36 = vunpack.c.l.b16 %v3165_v27  ;;  %v3175_v27 = vrot.slane %v7703_v30, 6 }
 0x1ea   : > { %v2372_v12 = vadd.f32 %v2332_v42, %v2144_v46  ;;  %v2746_v47 = vpop.f32.mrf.mxu2  ;;  %v7701_v46 = vld [vmem:[%s9013_s9 + $0x138] sm:$0x3] }
 0x1eb   : > { %v9785_v56 = vadd.f32 %v2746_v47, %v2627_v60  ;;  %v8553_v60 = vld [vmem:[%s9013_s9 + $0x110] sm:$0xff]  ;;  %v3223_v58 = vpack.c.b16 %v3210_v36, %v3209_v33  ;;  %v8536_v33 = vld [vmem:[%s9013_s9 + $0x48] sm:$0xff]  ;;  %v2393_v36 = vld [vmem:[#allocation2 + $0x28] sm:$0xff] }
 0x1ec   : > { %v2404_v44 = vadd.f32 %v2388_v23, %v2372_v12 }
 0x1ee   : > { %2420 = vst.msk [vmem:[#allocation2] sm:$0xff] %vm746_vm3, %v2404_v44  ;;  %v2632_v51 = vpop.f32.mrf.mxu1  ;;  %v3170_v44 = vrot.slane %v3168_v54, 4 }
 0x1ef   : > { %v2106_v6 = vpop.f32.mrf.mxu3  ;;  %v2337_v4 = vpop.f32.mrf.mxu0 }
 0x1f0   : > { %v2145_v2 = vadd.f32 %v2106_v6, %v9561_v48 }
 0x1f1   : > { %7730 = vmatmul.msk.bf16.gmra.mxu1 %vm746_vm3, %v3222_v14  ;;  %v3171_v14 = vrot.slane %v7701_v46, 6 }
 0x1f2   : > { %v2373_v29 = vadd.f32 %v2334_v61, %v2145_v2  ;;  %v2748_v13 = vpop.f32.mrf.mxu2  ;;  %7683 = vmatmul.msk.bf16.gmra.mxu0 %vm746_vm3, %v8543_v63  ;;  %v7699_v61 = vld [vmem:[%s9013_s9 + $0x130] sm:$0xc]  ;;  %v8554_v63 = vld [vmem:[%s9013_s9 + $0x124] sm:$0xff] }
 0x1f3   : > { %v9796_v20 = vadd.f32 %v2748_v13, %v2629_v59  ;;  %v7717_v10 = vrot.slane %v7699_v61, 10 }
 0x1f4   : > { %v2405_v32 = vadd.f32 %v2389_v8, %v2373_v29  ;;  %7620 = vmatmul.msk.bf16.gmra.mxu3 %vm746_vm3, %v8534_v16  ;;  %v2392_v16 = vld [vmem:[#allocation2 + $0x20] sm:$0xff] }
 0x1f5   : > { %v3169_v6 = vsel %vm9129_vm7, %v7717_v10, %v3168_v54 }
 0x1f6   : > { %2421 = vst.msk [vmem:[#allocation2 + $0x8] sm:$0xff] %vm746_vm3, %v2405_v32  ;;  %v2634_v48 = vpop.f32.mrf.mxu1  ;;  %v3211_v8 = vunpack.c.l.b16 %v3169_v6  ;;  %v8546_v6 = vld [vmem:[%s9013_s9 + $0x140] sm:$0xff] }
 0x1f7   : > { %7793 = vmatmul.msk.bf16.gmra.mxu2 %vm746_vm3, %v8553_v60  ;;  %v2109_v42 = vpop.f32.mrf.mxu3  ;;  %v2339_v62 = vpop.f32.mrf.mxu0 }
 0x1f8   : > { %v2146_v38 = vadd.f32 %v2109_v42, %v9579_v41 }
 0x1fa   : > { %v2374_v52 = vadd.f32 %v2337_v4, %v2146_v38  ;;  %v2751_v50 = vpop.f32.mrf.mxu2  ;;  %v3172_v4 = vsel %vm9129_vm7, %v3170_v44, %v3171_v14  ;;  %v7704_v38 = vld [vmem:[%s9013_s9 + $0x14c] sm:$0x3]  ;;  %v7706_v14 = vld [vmem:[%s9013_s9 + $0x15c] sm:$0xf] }
 0x1fb   : > { %v9807_v43 = vadd.f32 %v2751_v50, %v2632_v51  ;;  %v3212_v29 = vunpack.c.l.b16 %v3172_v4  ;;  %v3182_v4 = vrot.slane %v7706_v14, 6 }
 0x1fc   : > { %v2406_v53 = vadd.f32 %v2390_v49, %v2374_v52 }
 0x1fd   : > { %v3224_v32 = vpack.c.b16 %v3212_v29, %v3211_v8  ;;  %v8537_v8 = vld [vmem:[%s9013_s9 + $0x5c] sm:$0xff]  ;;  %v2395_v29 = vld [vmem:[#allocation2 + $0x38] sm:$0xff] }
 0x1fe   : > { %2422 = vst.msk [vmem:[#allocation2 + $0x10] sm:$0xff] %vm746_vm3, %v2406_v53  ;;  %v2637_v59 = vpop.f32.mrf.mxu1  ;;  %v3177_v53 = vrot.slane %v3175_v27, 4 }
 0x1ff   : > { %v2111_v41 = vpop.f32.mrf.mxu3  ;;  %v2342_v19 = vpop.f32.mrf.mxu0 }
 0x200   : > { %v2147_v23 = vadd.f32 %v2111_v41, %v9593_v57 }
 0x201   : > { %7731 = vmatmul.msk.bf16.gmra.mxu1 %vm746_vm3, %v3223_v58  ;;  %v3178_v58 = vrot.slane %v7704_v38, 6 }
 0x202   : > { %v2375_v12 = vadd.f32 %v2339_v62, %v2147_v23  ;;  %v2753_v47 = vpop.f32.mrf.mxu2  ;;  %7684 = vmatmul.msk.bf16.gmra.mxu0 %vm746_vm3, %v8544_v18  ;;  %v7702_v62 = vld [vmem:[%s9013_s9 + $0x144] sm:$0xc]  ;;  %v8555_v18 = vld [vmem:[%s9013_s9 + $0x138] sm:$0xff] }
 0x203   : > { %v9818_v51 = vadd.f32 %v2753_v47, %v2634_v48  ;;  %v7718_v9 = vrot.slane %v7702_v62, 10 }
 0x204   : > { %v2407_v17 = vadd.f32 %v2391_v0, %v2375_v12  ;;  %7621 = vmatmul.msk.bf16.gmra.mxu3 %vm746_vm3, %v8535_v1  ;;  %v2394_v1 = vld [vmem:[#allocation2 + $0x30] sm:$0xff] }
 0x205   : > { %v3176_v41 = vsel %vm9129_vm7, %v7718_v9, %v3175_v27 }
 0x206   : > { %2423 = vst.msk [vmem:[#allocation2 + $0x18] sm:$0xff] %vm746_vm3, %v2407_v17  ;;  %v2639_v57 = vpop.f32.mrf.mxu1  ;;  %v3213_v0 = vunpack.c.l.b16 %v3176_v41  ;;  %v8547_v41 = vld [vmem:[%s9013_s9 + $0x154] sm:$0xff] }
 0x207   : > { %7794 = vmatmul.msk.bf16.gmra.mxu2 %vm746_vm3, %v8554_v63  ;;  %v2114_v21 = vpop.f32.mrf.mxu3  ;;  %v2344_v31 = vpop.f32.mrf.mxu0 }
 0x208   : > { %v2148_v2 = vadd.f32 %v2114_v21, %v9611_v25 }
 0x20a   : > { %v2376_v13 = vadd.f32 %v2342_v19, %v2148_v2  ;;  %v2756_v11 = vpop.f32.mrf.mxu2  ;;  %v3179_v19 = vsel %vm9129_vm7, %v3177_v53, %v3178_v58  ;;  %v7707_v2 = vld [vmem:[%s9013_s9 + $0x160] sm:$0x3]  ;;  %v7709_v58 = vld [vmem:[%s9013_s9 + $0x170] sm:$0xf] }
 0x20b   : > { %v9829_v24 = vadd.f32 %v2756_v11, %v2637_v59  ;;  %v3214_v12 = vunpack.c.l.b16 %v3179_v19  ;;  %v3189_v19 = vrot.slane %v7709_v58, 6 }
 0x20c   : > { %v2408_v60 = vadd.f32 %v2392_v16, %v2376_v13 }
 0x20d   : > { %v3225_v17 = vpack.c.b16 %v3214_v12, %v3213_v0  ;;  %v8538_v0 = vld [vmem:[%s9013_s9 + $0x70] sm:$0xff]  ;;  %v2397_v12 = vld [vmem:[#allocation2 + $0x48] sm:$0xff] }
 0x20e   : > { %2424 = vst.msk [vmem:[#allocation2 + $0x20] sm:$0xff] %vm746_vm3, %v2408_v60  ;;  %v2642_v48 = vpop.f32.mrf.mxu1  ;;  %v3184_v60 = vrot.slane %v3182_v4, 4 }
 0x20f   : > { %v2116_v25 = vpop.f32.mrf.mxu3  ;;  %v2347_v42 = vpop.f32.mrf.mxu0 }
 0x210   : > { %v2149_v49 = vadd.f32 %v2116_v25, %v9625_v3 }
 0x211   : > { %7732 = vmatmul.msk.bf16.gmra.mxu1 %vm746_vm3, %v3224_v32  ;;  %v3185_v32 = vrot.slane %v7707_v2, 6 }
 0x212   : > { %v2377_v52 = vadd.f32 %v2344_v31, %v2149_v49  ;;  %v2758_v50 = vpop.f32.mrf.mxu2  ;;  %7685 = vmatmul.msk.bf16.gmra.mxu0 %vm746_vm3, %v8545_v37  ;;  %v7705_v31 = vld [vmem:[%s9013_s9 + $0x158] sm:$0xc]  ;;  %v8556_v37 = vld [vmem:[%s9013_s9 + $0x14c] sm:$0xff] }
 0x213   : > { %v9840_v59 = vadd.f32 %v2758_v50, %v2639_v57  ;;  %v7719_v30 = vrot.slane %v7705_v31, 10 }
 0x214   : > { %v2409_v54 = vadd.f32 %v2393_v36, %v2377_v52  ;;  %7622 = vmatmul.msk.bf16.gmra.mxu3 %vm746_vm3, %v8536_v33  ;;  %v2396_v33 = vld [vmem:[#allocation2 + $0x40] sm:$0xff] }
 0x215   : > { %v3183_v25 = vsel %vm9129_vm7, %v7719_v30, %v3182_v4 }
 0x216   : > { %2425 = vst.msk [vmem:[#allocation2 + $0x28] sm:$0xff] %vm746_vm3, %v2409_v54  ;;  %v2644_v3 = vpop.f32.mrf.mxu1  ;;  %v3215_v36 = vunpack.c.l.b16 %v3183_v25  ;;  %v8548_v25 = vld [vmem:[%s9013_s9 + $0x168] sm:$0xff] }
 0x217   : > { %7795 = vmatmul.msk.bf16.gmra.mxu2 %vm746_vm3, %v8555_v18  ;;  %v2119_v61 = vpop.f32.mrf.mxu3  ;;  %v2349_v46 = vpop.f32.mrf.mxu0 }
 0x218   : > { %v2150_v23 = vadd.f32 %v2119_v61, %v9643_v35 }
 0x21a   : > { %v2378_v47 = vadd.f32 %v2347_v42, %v2150_v23  ;;  %v2761_v10 = vpop.f32.mrf.mxu2  ;;  %v3186_v42 = vsel %vm9129_vm7, %v3184_v60, %v3185_v32  ;;  %v7710_v23 = vld [vmem:[%s9013_s9 + $0x174] sm:$0x3]  ;;  %v7712_v32 = vld [vmem:[%s9013_s9 + $0x184] sm:$0xf] }
 0x21b   : > { %v9851_v44 = vadd.f32 %v2761_v10, %v2642_v48  ;;  %v3216_v52 = vunpack.c.l.b16 %v3186_v42  ;;  %v3196_v42 = vrot.slane %v7712_v32, 6  ;;  %v7863_v32 = vld [vmem:[%s9013_s9 + $0x1e4] sm:$0xc] }
 0x21c   : > { %v2410_v63 = vadd.f32 %v2394_v1, %v2378_v47 }
 0x21d   : > { %v3226_v54 = vpack.c.b16 %v3216_v52, %v3215_v36  ;;  %v8539_v36 = vld [vmem:[%s9013_s9 + $0x84] sm:$0xff] }
 0x21e   : > { %2426 = vst.msk [vmem:[#allocation2 + $0x30] sm:$0xff] %vm746_vm3, %v2410_v63  ;;  %v2647_v57 = vpop.f32.mrf.mxu1  ;;  %v3191_v63 = vrot.slane %v3189_v19, 4  ;;  %v2399_v52 = vld [vmem:[#allocation2 + $0x58] sm:$0xff] }
 0x21f   : > { %v2121_v35 = vpop.f32.mrf.mxu3  ;;  %v2352_v21 = vpop.f32.mrf.mxu0 }
 0x220   : > { %v2151_v16 = vadd.f32 %v2121_v35, %v9657_v5 }
 0x221   : > { %7733 = vmatmul.msk.bf16.gmra.mxu1 %vm746_vm3, %v3225_v17  ;;  %v3192_v17 = vrot.slane %v7710_v23, 6 }
 0x222   : > { %v2379_v13 = vadd.f32 %v2349_v46, %v2151_v16  ;;  %v2763_v11 = vpop.f32.mrf.mxu2  ;;  %7686 = vmatmul.msk.bf16.gmra.mxu0 %vm746_vm3, %v8546_v6  ;;  %v7708_v46 = vld [vmem:[%s9013_s9 + $0x16c] sm:$0xc]  ;;  %v8557_v6 = vld [vmem:[%s9013_s9 + $0x160] sm:$0xff] }
 0x223   : > { %v9862_v48 = vadd.f32 %v2763_v11, %v2644_v3  ;;  %v7720_v14 = vrot.slane %v7708_v46, 10 }
 0x224   : > { %v2411_v27 = vadd.f32 %v2395_v29, %v2379_v13  ;;  %7623 = vmatmul.msk.bf16.gmra.mxu3 %vm746_vm3, %v8537_v8  ;;  %v2398_v8 = vld [vmem:[#allocation2 + $0x50] sm:$0xff] }
 0x225   : > { %v3190_v35 = vsel %vm9129_vm7, %v7720_v14, %v3189_v19 }
 0x226   : > { %2427 = vst.msk [vmem:[#allocation2 + $0x38] sm:$0xff] %vm746_vm3, %v2411_v27  ;;  %v2649_v5 = vpop.f32.mrf.mxu1  ;;  %v3217_v29 = vunpack.c.l.b16 %v3190_v35 }
 0x227   : > { %7796 = vmatmul.msk.bf16.gmra.mxu2 %vm746_vm3, %v8556_v37  ;;  %v2124_v62 = vpop.f32.mrf.mxu3  ;;  %v2354_v38 = vpop.f32.mrf.mxu0 }
 0x228   : > { %v2152_v49 = vadd.f32 %v2124_v62, %v9675_v39 }
 0x22a   : > { %v2380_v50 = vadd.f32 %v2352_v21, %v2152_v49  ;;  %v2766_v9 = vpop.f32.mrf.mxu2  ;;  %v3193_v21 = vsel %vm9129_vm7, %v3191_v63, %v3192_v17  ;;  %v7713_v49 = vld [vmem:[%s9013_s9 + $0x188] sm:$0x3] }
 0x22b   : > { %v9873_v53 = vadd.f32 %v2766_v9, %v2647_v57  ;;  %v3218_v13 = vunpack.c.l.b16 %v3193_v21  ;;  %v8601_v21 = vld [vmem:[%s9743_s12 + $0x20] sm:$0xff] }
 0x22c   : > { %v2412_v18 = vadd.f32 %v2396_v33, %v2380_v50  ;;  %4971 = vmatpush.bf16.msrb.mxu2 %v8601_v21 }
 0x22d   : > { %v3227_v27 = vpack.c.b16 %v3218_v13, %v3217_v29  ;;  %v4087_v13 = vld [vmem:[%s9019_s27 + $0xc] sm:$0xf] }
 0x22e   : > { %2428 = vst.msk [vmem:[#allocation2 + $0x40] sm:$0xff] %vm746_vm3, %v2412_v18  ;;  %v2652_v3 = vpop.f32.mrf.mxu1  ;;  %v3198_v18 = vrot.slane %v3196_v42, 4 }
 0x22f   : > { %v2126_v39 = vpop.f32.mrf.mxu3  ;;  %v2357_v61 = vpop.f32.mrf.mxu0 }
 0x230   : > { %v2153_v1 = vadd.f32 %v2126_v39, %v9689_v15 }
 0x231   : > { %7734 = vmatmul.msk.bf16.gmra.mxu1 %vm746_vm3, %v3226_v54  ;;  %v3199_v54 = vrot.slane %v7713_v49, 6 }
 0x232   : > { %v2381_v47 = vadd.f32 %v2354_v38, %v2153_v1  ;;  %v2768_v10 = vpop.f32.mrf.mxu2  ;;  %7687 = vmatmul.msk.bf16.gmra.mxu0 %vm746_vm3, %v8547_v41  ;;  %v7711_v38 = vld [vmem:[%s9013_s9 + $0x180] sm:$0xc]  ;;  %v8558_v41 = vld [vmem:[%s9013_s9 + $0x174] sm:$0xff] }
 0x233   : > { %v9884_v57 = vadd.f32 %v2768_v10, %v2649_v5  ;;  %v7721_v58 = vrot.slane %v7711_v38, 10  ;;  %v8589_v1 = vld [vmem:[%s9743_s12] sm:$0xff] }
 0x234   : > { %v2413_v4 = vadd.f32 %v2397_v12, %v2381_v47  ;;  %7624 = vmatmul.msk.bf16.gmra.mxu3 %vm746_vm3, %v8538_v0  ;;  %v2400_v12 = vld [vmem:[#allocation2 + $0x60] sm:$0xff] }
 0x235   : > { %v3197_v39 = vsel %vm9129_vm7, %v7721_v58, %v3196_v42  ;;  %4377 = vmatpush.bf16.msrb.mxu3 %v8589_v1  ;;  %v4139_v42 = vrot.slane %v4087_v13, 5  ;;  %v7868_v13 = vld [vmem:[%s9013_s9 + $0x200] sm:$0x3] }
 0x236   : > { %2429 = vst.msk [vmem:[#allocation2 + $0x48] sm:$0xff] %vm746_vm3, %v2413_v4  ;;  %v2654_v15 = vpop.f32.mrf.mxu1  ;;  %v3219_v47 = vunpack.c.l.b16 %v3197_v39  ;;  %v7864_v4 = vld [vmem:[%s9013_s9 + $0x1e8] sm:$0xf] }
 0x237   : > { %7797 = vmatmul.msk.bf16.gmra.mxu2 %vm746_vm3, %v8557_v6  ;;  %v2129_v31 = vpop.f32.mrf.mxu3  ;;  %v2359_v2 = vpop.f32.mrf.mxu0  ;;  %v3685_v29 = vrot.slane %v7864_v4, 6 }
 0x238   : > { %v2154_v16 = vadd.f32 %v2129_v31, %v9707_v45  ;;  %v8591_v31 = vld [vmem:[%s9743_s12 + $0x10] sm:$0xff] }
 0x239   : > { %4588 = vmatpush.bf16.msrb.mxu0 %v8591_v31  ;;  %v3687_v38 = vrot.slane %v3685_v29, 4 }
 0x23a   : > { %v2382_v11 = vadd.f32 %v2357_v61, %v2154_v16  ;;  %v2771_v30 = vpop.f32.mrf.mxu2  ;;  %v3200_v61 = vsel %vm9129_vm7, %v3198_v18, %v3199_v54 }
 0x23b   : > { %v9895_v60 = vadd.f32 %v2771_v30, %v2652_v3  ;;  %v3220_v10 = vunpack.c.l.b16 %v3200_v61  ;;  %v8540_v30 = vld [vmem:[%s9013_s9 + $0x98] sm:$0xff] }
 0x23c   : > { %v2414_v37 = vadd.f32 %v2398_v8, %v2382_v11 }
 0x23d   : > { %v3228_v35 = vpack.c.b16 %v3220_v10, %v3219_v47 }
 0x23e   : > { %2430 = vst.msk [vmem:[#allocation2 + $0x50] sm:$0xff] %vm746_vm3, %v2414_v37  ;;  %v2657_v5 = vpop.f32.mrf.mxu1  ;;  %v7865_v37 = vld [vmem:[%s9013_s9 + $0x1ec] sm:$0x3] }
 0x23f   : > { %v2131_v45 = vpop.f32.mrf.mxu3  ;;  %v2362_v62 = vpop.f32.mrf.mxu0  ;;  %v3688_v49 = vrot.slane %v7865_v37, 6 }
 0x240   : > { %v2155_v33 = vadd.f32 %v2131_v45, %v9721_v22 }
 0x241   : > { %7735 = vmatmul.msk.bf16.gmra.mxu1 %vm746_vm3, %v3227_v27  ;;  %v2401_v27 = vld [vmem:[#allocation2 + $0x68] sm:$0xff] }
 0x242   : > { %v2383_v50 = vadd.f32 %v2359_v2, %v2155_v33  ;;  %v2773_v9 = vpop.f32.mrf.mxu2  ;;  %7688 = vmatmul.msk.bf16.gmra.mxu0 %vm746_vm3, %v8548_v25  ;;  %v8600_v2 = vld [vmem:[%s9743_s12 + $0x18] sm:$0xff]  ;;  %v4086_v33 = vld [vmem:[%s9019_s27 + $0x8] sm:$0xe] }
 0x243   : > { %v9906_v3 = vadd.f32 %v2773_v9, %v2654_v15  ;;  %v8549_v15 = vld [vmem:[%s9013_s9 + $0x17c] sm:$0xff]  ;;  %4744 = vmatpush.bf16.msrb.mxu1 %v8600_v2  ;;  %v7974_v9 = vrot.slane %v4086_v33, 9 }
 0x244   : > { %v2415_v19 = vadd.f32 %v2399_v52, %v2383_v50  ;;  %7625 = vmatmul.msk.bf16.gmra.mxu3 %vm746_vm3, %v8539_v36  ;;  %v4088_v52 = vld [vmem:[%s9019_s27 + $0x10] sm:$0x1] }
 0x245   : > { %v4140_v10 = vsel %vm9946_vm10, %v7974_v9, %v4139_v42 }
 0x246   : > { %2431 = vst.msk [vmem:[#allocation2 + $0x58] sm:$0xff] %vm746_vm3, %v2415_v19  ;;  %v2659_v22 = vpop.f32.mrf.mxu1  ;;  %v4141_v19 = vrot.slane %v4139_v42, 4 }
 0x247   : > { %7798 = vmatmul.msk.bf16.gmra.mxu2 %vm746_vm3, %v8558_v41  ;;  %v2134_v46 = vpop.f32.mrf.mxu3  ;;  %v2364_v23 = vpop.f32.mrf.mxu0  ;;  %v3689_v41 = vsel %vm9129_vm7, %v3687_v38, %v3688_v49  ;;  %v4089_v38 = vld [vmem:[%s9019_s27 + $0x24] sm:$0xe]  ;;  %v4091_v49 = vld [vmem:[%s9019_s27 + $0x2c] sm:$0x1] }
 0x248   : > { %v2156_v0 = vadd.f32 %v2134_v46, %v9745_v55  ;;  %v2402_v46 = vld [vmem:[#allocation2 + $0x70] sm:$0xff] }
 0x24a   : > { %v2384_v14 = vadd.f32 %v2362_v62, %v2156_v0  ;;  %v2776_v63 = vpop.f32.mrf.mxu2  ;;  %v8559_v62 = vld [vmem:[%s9013_s9 + $0x188] sm:$0xff] }
 0x24b   : > { %v9918_v17 = vadd.f32 %v2776_v63, %v2657_v5  ;;  %v7867_v63 = vld [vmem:[%s9013_s9 + $0x1fc] sm:$0xf] }
 0x24c   : > { %v2416_v6 = vadd.f32 %v2400_v12, %v2384_v14  ;;  %v3744_v12 = vunpack.c.l.b16 %v3689_v41  ;;  %v3692_v2 = vrot.slane %v7867_v63, 6  ;;  %v4149_v41 = vrot.slane %v4091_v49, 5 }
 0x24e   : > { %2432 = vst.msk [vmem:[#allocation2 + $0x60] sm:$0xff] %vm746_vm3, %v2416_v6  ;;  %v2662_v55 = vpop.f32.mrf.mxu1  ;;  %v8571_v6 = vld [vmem:[%s9013_s9 + $0x1ec] sm:$0xff]  ;;  %v3694_v42 = vrot.slane %v3692_v2, 4 }
 0x24f   : > { %v2136_v16 = vpop.f32.mrf.mxu3  ;;  %v2367_v8 = vpop.f32.mrf.mxu0 }
 0x250   : > { %v2157_v11 = vadd.f32 %v2136_v16, %v9757_v34  ;;  %v7887_v34 = vrot.slane %v7863_v32, 10 }
 0x251   : > { %7736 = vmatmul.msk.bf16.gmra.mxu1 %vm746_vm3, %v3228_v35  ;;  %v4197_v35 = vunpack.c.l.b16 %v4140_v10 }
 0x252   : > { %v2385_v5 = vadd.f32 %v2364_v23, %v2157_v11  ;;  %v2778_v25 = vpop.f32.mrf.mxu2  ;;  %7689 = vmatmul.msk.bf16.gmra.mxu0 %vm746_vm3, %v8549_v15  ;;  %v3686_v54 = vsel %vm9129_vm7, %v7887_v34, %v3685_v29  ;;  %v7866_v29 = vld [vmem:[%s9013_s9 + $0x1f8] sm:$0xc]  ;;  %v2403_v11 = vld [vmem:[#allocation2 + $0x78] sm:$0xff] }
 0x253   : > { %v9933_v45 = vadd.f32 %v2778_v25, %v2659_v22  ;;  %v4142_v22 = vrot.slane %v4088_v52, 5  ;;  %v3743_v0 = vunpack.c.l.b16 %v3686_v54  ;;  %v7888_v25 = vrot.slane %v7866_v29, 10 }
 0x254   : > { %v2417_v36 = vadd.f32 %v2401_v27, %v2385_v5  ;;  %7626 = vmatmul.msk.bf16.gmra.mxu3 %vm746_vm3, %v8540_v30  ;;  %v4090_v30 = vld [vmem:[%s9019_s27 + $0x28] sm:$0xf] }
 0x255   : > { %v3759_v15 = vpack.c.b16 %v3744_v12, %v3743_v0  ;;  %v4146_v34 = vrot.slane %v4090_v30, 5  ;;  %v7870_v12 = vld [vmem:[%s9013_s9 + $0x210] sm:$0xf] }
 0x256   : > { %2433 = vst.msk [vmem:[#allocation2 + $0x68] sm:$0xff] %vm746_vm3, %v2417_v36  ;;  %v2664_v50 = vpop.f32.mrf.mxu1 }
 0x257   : > { %7799 = vmatmul.msk.bf16.gmra.mxu2 %vm746_vm3, %v8559_v62  ;;  %v2139_v58 = vpop.f32.mrf.mxu3  ;;  %v2369_v18 = vpop.f32.mrf.mxu0  ;;  %v3695_v62 = vrot.slane %v7868_v13, 6  ;;  %v4148_v54 = vrot.slane %v4146_v34, 4 }
 0x258   : > { %v2158_v39 = vadd.f32 %v2139_v58, %v9766_v26  ;;  %v4143_v26 = vsel %vm9946_vm10, %v4141_v19, %v4142_v22 }
 0x259   : > { %v4198_v21 = vunpack.c.l.b16 %v4143_v26  ;;  %v3696_v9 = vsel %vm9129_vm7, %v3694_v42, %v3695_v62  ;;  %v4150_v0 = vsel %vm9946_vm10, %v4148_v54, %v4149_v41 }
 0x25a   : > { %v2386_v23 = vadd.f32 %v2367_v8, %v2158_v39  ;;  %v2781_v1 = vpop.f32.mrf.mxu2  ;;  %v8561_v8 = vld [vmem:[%s9013_s9 + $0x1e0] sm:$0xff] }
 0x25b   : > { %v9950_v47 = vadd.f32 %v2781_v1, %v2662_v55  ;;  %v4213_v27 = vpack.c.b16 %v4198_v21, %v4197_v35  ;;  %v4200_v35 = vunpack.c.l.b16 %v4150_v0  ;;  %v3699_v21 = vrot.slane %v7870_v12, 6 }
 0x25c   : > { %v2418_v14 = vadd.f32 %v2402_v46, %v2386_v23  ;;  %v3746_v46 = vunpack.c.l.b16 %v3696_v9 }
 0x25d   : > { %v3701_v30 = vrot.slane %v3699_v21, 4 }
 0x25e   : > { %2434 = vst.msk [vmem:[#allocation2 + $0x70] sm:$0xff] %vm746_vm3, %v2418_v14  ;;  %v3268_v4 = vpop.f32.mrf.mxu1 }
 0x25f   : > { %v2141_v55 = vpop.f32.mrf.mxu3  ;;  %v3041_v31 = vpop.f32.mrf.mxu0 }
 0x260   : > { %v2159_v16 = vadd.f32 %v2141_v55, %v9777_v40  ;;  %v8562_v55 = vld [vmem:[%s9013_s9 + $0x1f4] sm:$0xff] }
 0x261   : > { %7965 = vmatmul.msk.bf16.vlgmr.msra.gmra.mxu1 %vm746_vm3, %v8571_v6 }
 0x262   : > { %v2387_v32 = vadd.f32 %v2369_v18, %v2159_v16  ;;  %v2783_v37 = vpop.f32.mrf.mxu2  ;;  %7902 = vmatmul.msk.bf16.vlgmr.msra.gmra.mxu0 %vm746_vm3, %v3759_v15  ;;  %v7975_v18 = vrot.slane %v4089_v38, 9  ;;  %v4093_v16 = vld [vmem:[%s9019_s27 + $0x44] sm:$0xf] }
 0x263   : > { %v9966_v5 = vadd.f32 %v2783_v37, %v2664_v50  ;;  %v3693_v50 = vsel %vm9129_vm7, %v7888_v25, %v3692_v2  ;;  %v7871_v2 = vld [vmem:[%s9013_s9 + $0x214] sm:$0x3]  ;;  %v4094_v25 = vld [vmem:[%s9019_s27 + $0x48] sm:$0x1] }
 0x264   : > { %v2419_v40 = vadd.f32 %v2403_v11, %v2387_v32  ;;  %7855 = vmatmul.msk.bf16.vlgmr.msra.gmra.mxu3 %vm746_vm3, %v8561_v8  ;;  %v3745_v39 = vunpack.c.l.b16 %v3693_v50  ;;  %v4147_v1 = vsel %vm9946_vm10, %v7975_v18, %v4146_v34  ;;  %v3702_v32 = vrot.slane %v7871_v2, 6 }
 0x265   : > { %v4199_v15 = vunpack.c.l.b16 %v4147_v1  ;;  %v4156_v50 = vrot.slane %v4094_v25, 5 }
 0x266   : > { %2435 = vst.msk [vmem:[#allocation2 + $0x78] sm:$0xff] %vm746_vm3, %v2419_v40  ;;  %v3270_v33 = vpop.f32.mrf.mxu1  ;;  %v3760_v14 = vpack.c.b16 %v3746_v46, %v3745_v39  ;;  %v3703_v49 = vsel %vm9129_vm7, %v3701_v30, %v3702_v32  ;;  %v7873_v39 = vld [vmem:[%s9013_s9 + $0x224] sm:$0xf] }
 0x267   : > { %7989 = vmatmul.msk.bf16.vlgmr.msra.gmra.mxu2 %vm746_vm3, %v4213_v27  ;;  %v2885_v36 = vpop.f32.mrf.mxu3  ;;  %v3043_v52 = vpop.f32.mrf.mxu0  ;;  %v4214_v13 = vpack.c.b16 %v4200_v35, %v4199_v15  ;;  %v4092_v27 = vld [vmem:[%s9019_s27 + $0x40] sm:$0xe]  ;;  %v3748_v54 = vunpack.c.l.b16 %v3703_v49  ;;  %v7874_v35 = vld [vmem:[%s9013_s9 + $0x228] sm:$0x3] }
 0x268   : > { %v2925_v58 = vadd.f32 %v2885_v36, %v9785_v56  ;;  %v8572_v56 = vld [vmem:[%s9013_s9 + $0x200] sm:$0xff]  ;;  %v7976_v36 = vrot.slane %v4092_v27, 9 }
 0x269   : > { %v7872_v15 = vld [vmem:[%s9013_s9 + $0x220] sm:$0xc] }
 0x26a   : > { %v3081_v19 = vadd.f32 %v3041_v31, %v2925_v58  ;;  %v3423_v22 = vpop.f32.mrf.mxu2  ;;  %v7869_v31 = vld [vmem:[%s9013_s9 + $0x20c] sm:$0xc]  ;;  %v7890_v2 = vrot.slane %v7872_v15, 10 }
 0x26b   : > { %v7889_v11 = vrot.slane %v7869_v31, 10 }
 0x26c   : > { %v3308_v23 = vadd.f32 %v3268_v4, %v3081_v19 }
 0x26d   : > { %v3700_v38 = vsel %vm9129_vm7, %v7889_v11, %v3699_v21  ;;  %v4096_v21 = vld [vmem:[%s9019_s27 + $0x60] sm:$0xf]  ;;  %v4097_v11 = vld [vmem:[%s9019_s27 + $0x64] sm:$0x1] }
 0x26e   : > { %v9984_v10 = vadd.f32 %v3423_v22, %v3308_v23  ;;  %v3273_v26 = vpop.f32.mrf.mxu1  ;;  %v3747_v18 = vunpack.c.l.b16 %v3700_v38  ;;  %v4163_v38 = vrot.slane %v4097_v11, 5 }
 0x26f   : > { %v2887_v63 = vpop.f32.mrf.mxu3  ;;  %v3046_v6 = vpop.f32.mrf.mxu0 }
 0x270   : > { %v2926_v4 = vadd.f32 %v2887_v63, %v9796_v20  ;;  %v4153_v20 = vrot.slane %v4093_v16, 5  ;;  %v3761_v1 = vpack.c.b16 %v3748_v54, %v3747_v18  ;;  %v3706_v63 = vrot.slane %v7873_v39, 6  ;;  %v7876_v18 = vld [vmem:[%s9013_s9 + $0x238] sm:$0xf] }
 0x271   : > { %7966 = vmatmul.msk.bf16.gmra.mxu1 %vm746_vm3, %v8572_v56 }
 0x272   : > { %v3082_v8 = vadd.f32 %v3043_v52, %v2926_v4  ;;  %v3425_v29 = vpop.f32.mrf.mxu2  ;;  %7903 = vmatmul.msk.bf16.gmra.mxu0 %vm746_vm3, %v3760_v14  ;;  %v4155_v52 = vrot.slane %v4153_v20, 4  ;;  %v4154_v19 = vsel %vm9946_vm10, %v7976_v36, %v4153_v20  ;;  %v3708_v16 = vrot.slane %v3706_v63, 4 }
 0x273   : > { %v4201_v56 = vunpack.c.l.b16 %v4154_v19  ;;  %v3707_v27 = vsel %vm9129_vm7, %v7890_v2, %v3706_v63  ;;  %v4099_v63 = vld [vmem:[%s9019_s27 + $0x7c] sm:$0xf]  ;;  %v4100_v2 = vld [vmem:[%s9019_s27 + $0x80] sm:$0x1] }
 0x274   : > { %v3309_v37 = vadd.f32 %v3270_v33, %v3082_v8  ;;  %7856 = vmatmul.msk.bf16.gmra.mxu3 %vm746_vm3, %v8562_v55  ;;  %v4157_v22 = vsel %vm9946_vm10, %v4155_v52, %v4156_v50  ;;  %v3709_v8 = vrot.slane %v7874_v35, 6  ;;  %v3749_v36 = vunpack.c.l.b16 %v3707_v27 }
 0x275   : > { %v4202_v14 = vunpack.c.l.b16 %v4157_v22  ;;  %v4170_v27 = vrot.slane %v4100_v2, 5 }
 0x276   : > { %v9996_v42 = vadd.f32 %v3425_v29, %v3309_v37  ;;  %v3275_v62 = vpop.f32.mrf.mxu1  ;;  %v3710_v25 = vsel %vm9129_vm7, %v3708_v16, %v3709_v8 }
 0x277   : > { %7990 = vmatmul.msk.bf16.gmra.mxu2 %vm746_vm3, %v4214_v13  ;;  %v2890_v40 = vpop.f32.mrf.mxu3  ;;  %v3048_v34 = vpop.f32.mrf.mxu0  ;;  %v4215_v31 = vpack.c.b16 %v4202_v14, %v4201_v56  ;;  %v4095_v13 = vld [vmem:[%s9019_s27 + $0x5c] sm:$0xe]  ;;  %v3750_v52 = vunpack.c.l.b16 %v3710_v25  ;;  %v7875_v56 = vld [vmem:[%s9013_s9 + $0x234] sm:$0xc] }
 0x278   : > { %v2927_v33 = vadd.f32 %v2890_v40, %v9807_v43  ;;  %v8573_v43 = vld [vmem:[%s9013_s9 + $0x214] sm:$0xff]  ;;  %v7977_v40 = vrot.slane %v4095_v13, 9  ;;  %v7877_v14 = vld [vmem:[%s9013_s9 + $0x23c] sm:$0x3]  ;;  %v7891_v35 = vrot.slane %v7875_v56, 10 }
 0x279   : > { %v3762_v19 = vpack.c.b16 %v3750_v52, %v3749_v36  ;;  %v7879_v36 = vld [vmem:[%s9013_s9 + $0x24c] sm:$0xf] }
 0x27a   : > { %v3083_v9 = vadd.f32 %v3046_v6, %v2927_v33  ;;  %v3428_v58 = vpop.f32.mrf.mxu2  ;;  %v8563_v6 = vld [vmem:[%s9013_s9 + $0x208] sm:$0xff] }
 0x27c   : > { %v3310_v41 = vadd.f32 %v3273_v26, %v3083_v9 }
 0x27e   : > { %v10010_v46 = vadd.f32 %v3428_v58, %v3310_v41  ;;  %v3278_v23 = vpop.f32.mrf.mxu1 }
 0x27f   : > { %v2892_v0 = vpop.f32.mrf.mxu3  ;;  %v3051_v12 = vpop.f32.mrf.mxu0 }
 0x280   : > { %v2928_v26 = vadd.f32 %v2892_v0, %v9818_v51  ;;  %v4160_v51 = vrot.slane %v4096_v21, 5  ;;  %v3713_v0 = vrot.slane %v7876_v18, 6 }
 0x281   : > { %7967 = vmatmul.msk.bf16.gmra.mxu1 %vm746_vm3, %v8573_v43 }
 0x282   : > { %v3084_v4 = vadd.f32 %v3048_v34, %v2928_v26  ;;  %v3430_v55 = vpop.f32.mrf.mxu2  ;;  %7904 = vmatmul.msk.bf16.gmra.mxu0 %vm746_vm3, %v3761_v1  ;;  %v4162_v34 = vrot.slane %v4160_v51, 4  ;;  %v4161_v9 = vsel %vm9946_vm10, %v7977_v40, %v4160_v51  ;;  %v3715_v21 = vrot.slane %v3713_v0, 4 }
 0x283   : > { %v4203_v43 = vunpack.c.l.b16 %v4161_v9  ;;  %v3714_v13 = vsel %vm9129_vm7, %v7891_v35, %v3713_v0  ;;  %v4102_v0 = vld [vmem:[%s9019_s27 + $0x98] sm:$0xf]  ;;  %v4103_v35 = vld [vmem:[%s9019_s27 + $0x9c] sm:$0x1] }
 0x284   : > { %v3311_v29 = vadd.f32 %v3275_v62, %v3084_v4  ;;  %7857 = vmatmul.msk.bf16.gmra.mxu3 %vm746_vm3, %v8563_v6  ;;  %v4164_v58 = vsel %vm9946_vm10, %v4162_v34, %v4163_v38  ;;  %v3716_v4 = vrot.slane %v7877_v14, 6  ;;  %v3751_v40 = vunpack.c.l.b16 %v3714_v13 }
 0x285   : > { %v4204_v1 = vunpack.c.l.b16 %v4164_v58  ;;  %v4177_v13 = vrot.slane %v4103_v35, 5 }
 0x286   : > { %v10022_v30 = vadd.f32 %v3430_v55, %v3311_v29  ;;  %v3280_v32 = vpop.f32.mrf.mxu1  ;;  %v3717_v11 = vsel %vm9129_vm7, %v3715_v21, %v3716_v4 }
 0x287   : > { %7991 = vmatmul.msk.bf16.gmra.mxu2 %vm746_vm3, %v4215_v31  ;;  %v2895_v37 = vpop.f32.mrf.mxu3  ;;  %v3053_v20 = vpop.f32.mrf.mxu0  ;;  %v4216_v15 = vpack.c.b16 %v4204_v1, %v4203_v43  ;;  %v4098_v31 = vld [vmem:[%s9019_s27 + $0x78] sm:$0xe]  ;;  %v3752_v34 = vunpack.c.l.b16 %v3717_v11  ;;  %v7878_v43 = vld [vmem:[%s9013_s9 + $0x248] sm:$0xc]  ;;  %v7880_v1 = vld [vmem:[%s9013_s9 + $0x250] sm:$0x3] }
 0x288   : > { %v2929_v62 = vadd.f32 %v2895_v37, %v9829_v24  ;;  %v8574_v24 = vld [vmem:[%s9013_s9 + $0x228] sm:$0xff]  ;;  %v7978_v37 = vrot.slane %v4098_v31, 9  ;;  %v7892_v14 = vrot.slane %v7878_v43, 10 }
 0x289   : > { %v3763_v9 = vpack.c.b16 %v3752_v34, %v3751_v40  ;;  %v7882_v40 = vld [vmem:[%s9013_s9 + $0x260] sm:$0xf] }
 0x28a   : > { %v3085_v49 = vadd.f32 %v3051_v12, %v2929_v62  ;;  %v3433_v33 = vpop.f32.mrf.mxu2  ;;  %v8564_v12 = vld [vmem:[%s9013_s9 + $0x21c] sm:$0xff] }
 0x28c   : > { %v3312_v50 = vadd.f32 %v3278_v23, %v3085_v49 }
 0x28e   : > { %v10036_v54 = vadd.f32 %v3433_v33, %v3312_v50  ;;  %v3283_v41 = vpop.f32.mrf.mxu1 }
 0x28f   : > { %v2897_v22 = vpop.f32.mrf.mxu3  ;;  %v3056_v39 = vpop.f32.mrf.mxu0 }
 0x290   : > { %v2930_v23 = vadd.f32 %v2897_v22, %v9840_v59  ;;  %v4167_v59 = vrot.slane %v4099_v63, 5  ;;  %v3720_v22 = vrot.slane %v7879_v36, 6 }
 0x291   : > { %7968 = vmatmul.msk.bf16.gmra.mxu1 %vm746_vm3, %v8574_v24 }
 0x292   : > { %v3086_v26 = vadd.f32 %v3053_v20, %v2930_v23  ;;  %v3435_v6 = vpop.f32.mrf.mxu2  ;;  %7905 = vmatmul.msk.bf16.gmra.mxu0 %vm746_vm3, %v3762_v19  ;;  %v4169_v20 = vrot.slane %v4167_v59, 4  ;;  %v4168_v49 = vsel %vm9946_vm10, %v7978_v37, %v4167_v59  ;;  %v3722_v63 = vrot.slane %v3720_v22, 4 }
 0x293   : > { %v4205_v24 = vunpack.c.l.b16 %v4168_v49  ;;  %v3721_v31 = vsel %vm9129_vm7, %v7892_v14, %v3720_v22  ;;  %v4105_v22 = vld [vmem:[%s9019_s27 + $0xb4] sm:$0xf]  ;;  %v4106_v14 = vld [vmem:[%s9019_s27 + $0xb8] sm:$0x1] }
 0x294   : > { %v3313_v55 = vadd.f32 %v3280_v32, %v3086_v26  ;;  %7858 = vmatmul.msk.bf16.gmra.mxu3 %vm746_vm3, %v8564_v12  ;;  %v4171_v33 = vsel %vm9946_vm10, %v4169_v20, %v4170_v27  ;;  %v3723_v26 = vrot.slane %v7880_v1, 6  ;;  %v3753_v37 = vunpack.c.l.b16 %v3721_v31 }
 0x295   : > { %v4206_v19 = vunpack.c.l.b16 %v4171_v33  ;;  %v4184_v31 = vrot.slane %v4106_v14, 5 }
 0x296   : > { %v10048_v16 = vadd.f32 %v3435_v6, %v3313_v55  ;;  %v3285_v8 = vpop.f32.mrf.mxu1  ;;  %v3724_v2 = vsel %vm9129_vm7, %v3722_v63, %v3723_v26 }
 0x297   : > { %7992 = vmatmul.msk.bf16.gmra.mxu2 %vm746_vm3, %v4216_v15  ;;  %v2900_v29 = vpop.f32.mrf.mxu3  ;;  %v3058_v51 = vpop.f32.mrf.mxu0  ;;  %v4217_v56 = vpack.c.b16 %v4206_v19, %v4205_v24  ;;  %v4101_v15 = vld [vmem:[%s9019_s27 + $0x94] sm:$0xe]  ;;  %v3754_v20 = vunpack.c.l.b16 %v3724_v2  ;;  %v7881_v24 = vld [vmem:[%s9013_s9 + $0x25c] sm:$0xc]  ;;  %v7883_v19 = vld [vmem:[%s9013_s9 + $0x264] sm:$0x3] }
 0x298   : > { %v2931_v32 = vadd.f32 %v2900_v29, %v9851_v44  ;;  %v8575_v44 = vld [vmem:[%s9013_s9 + $0x23c] sm:$0xff]  ;;  %v7979_v29 = vrot.slane %v4101_v15, 9  ;;  %v7893_v1 = vrot.slane %v7881_v24, 10 }
 0x299   : > { %v3764_v49 = vpack.c.b16 %v3754_v20, %v3753_v37  ;;  %v7885_v37 = vld [vmem:[%s9013_s9 + $0x274] sm:$0xf] }
 0x29a   : > { %v3087_v25 = vadd.f32 %v3056_v39, %v2931_v32  ;;  %v3438_v62 = vpop.f32.mrf.mxu2  ;;  %v8565_v39 = vld [vmem:[%s9013_s9 + $0x230] sm:$0xff] }
 0x29c   : > { %v3314_v38 = vadd.f32 %v3283_v41, %v3087_v25 }
 0x29e   : > { %v10062_v52 = vadd.f32 %v3438_v62, %v3314_v38  ;;  %v3288_v50 = vpop.f32.mrf.mxu1 }
 0x29f   : > { %v2902_v58 = vpop.f32.mrf.mxu3  ;;  %v3061_v18 = vpop.f32.mrf.mxu0 }
 0x2a0   : > { %v2932_v41 = vadd.f32 %v2902_v58, %v9862_v48  ;;  %v4174_v48 = vrot.slane %v4102_v0, 5  ;;  %v3727_v58 = vrot.slane %v7882_v40, 6 }
 0x2a1   : > { %7969 = vmatmul.msk.bf16.gmra.mxu1 %vm746_vm3, %v8575_v44 }
 0x2a2   : > { %v3088_v23 = vadd.f32 %v3058_v51, %v2932_v41  ;;  %v3440_v12 = vpop.f32.mrf.mxu2  ;;  %7906 = vmatmul.msk.bf16.gmra.mxu0 %vm746_vm3, %v3763_v9  ;;  %v4176_v51 = vrot.slane %v4174_v48, 4  ;;  %v4175_v25 = vsel %vm9946_vm10, %v7979_v29, %v4174_v48  ;;  %v3729_v0 = vrot.slane %v3727_v58, 4 }
 0x2a3   : > { %v4207_v44 = vunpack.c.l.b16 %v4175_v25  ;;  %v3728_v15 = vsel %vm9129_vm7, %v7893_v1, %v3727_v58  ;;  %v4108_v58 = vld [vmem:[%s9019_s27 + $0xd0] sm:$0xf]  ;;  %v4109_v1 = vld [vmem:[%s9019_s27 + $0xd4] sm:$0x1] }
 0x2a4   : > { %v3315_v6 = vadd.f32 %v3285_v8, %v3088_v23  ;;  %7859 = vmatmul.msk.bf16.gmra.mxu3 %vm746_vm3, %v8565_v39  ;;  %v4178_v62 = vsel %vm9946_vm10, %v4176_v51, %v4177_v13  ;;  %v3730_v23 = vrot.slane %v7883_v19, 6  ;;  %v3755_v29 = vunpack.c.l.b16 %v3728_v15 }
 0x2a5   : > { %v4208_v9 = vunpack.c.l.b16 %v4178_v62 }
 0x2a6   : > { %v10074_v21 = vadd.f32 %v3440_v12, %v3315_v6  ;;  %v3290_v4 = vpop.f32.mrf.mxu1  ;;  %v3731_v35 = vsel %vm9129_vm7, %v3729_v0, %v3730_v23 }
 0x2a7   : > { %7993 = vmatmul.msk.bf16.gmra.mxu2 %vm746_vm3, %v4217_v56  ;;  %v2905_v55 = vpop.f32.mrf.mxu3  ;;  %v3063_v59 = vpop.f32.mrf.mxu0  ;;  %v4218_v43 = vpack.c.b16 %v4208_v9, %v4207_v44  ;;  %v4104_v56 = vld [vmem:[%s9019_s27 + $0xb0] sm:$0xe]  ;;  %v3756_v51 = vunpack.c.l.b16 %v3731_v35  ;;  %v7886_v9 = vld [vmem:[%s9013_s9 + $0x278] sm:$0x3]  ;;  %v4191_v35 = vrot.slane %v4109_v1, 5 }
 0x2a8   : > { %v2933_v8 = vadd.f32 %v2905_v55, %v9873_v53  ;;  %v8576_v53 = vld [vmem:[%s9013_s9 + $0x250] sm:$0xff]  ;;  %v7980_v55 = vrot.slane %v4104_v56, 9 }
 0x2a9   : > { %v3765_v25 = vpack.c.b16 %v3756_v51, %v3755_v29  ;;  %v7884_v44 = vld [vmem:[%s9013_s9 + $0x270] sm:$0xc]  ;;  %v8578_v51 = vld [vmem:[%s9013_s9 + $0x278] sm:$0xff] }
 0x2aa   : > { %v3089_v11 = vadd.f32 %v3061_v18, %v2933_v8  ;;  %v3443_v32 = vpop.f32.mrf.mxu2  ;;  %v8566_v18 = vld [vmem:[%s9013_s9 + $0x244] sm:$0xff]  ;;  %v7894_v19 = vrot.slane %v7884_v44, 10  ;;  %v8612_v44 = vld [vmem:[%s9743_s12 + $0x38] sm:$0xff] }
 0x2ab   : > { %5581 = vmatpush.bf16.msra.mxu1 %v8612_v44 }
 0x2ac   : > { %v3316_v27 = vadd.f32 %v3288_v50, %v3089_v11 }
 0x2ae   : > { %v10088_v34 = vadd.f32 %v3443_v32, %v3316_v27  ;;  %v3293_v38 = vpop.f32.mrf.mxu1 }
 0x2af   : > { %v2907_v33 = vpop.f32.mrf.mxu3  ;;  %v3066_v36 = vpop.f32.mrf.mxu0 }
 0x2b0   : > { %v2934_v50 = vadd.f32 %v2907_v33, %v9884_v57  ;;  %v4181_v57 = vrot.slane %v4105_v22, 5  ;;  %v3734_v33 = vrot.slane %v7885_v37, 6 }
 0x2b1   : > { %7970 = vmatmul.msk.bf16.gmra.mxu1 %vm746_vm3, %v8576_v53 }
 0x2b2   : > { %v3090_v41 = vadd.f32 %v3063_v59, %v2934_v50  ;;  %v3445_v39 = vpop.f32.mrf.mxu2  ;;  %7907 = vmatmul.msk.bf16.gmra.mxu0 %vm746_vm3, %v3764_v49  ;;  %v4183_v59 = vrot.slane %v4181_v57, 4  ;;  %v4182_v11 = vsel %vm9946_vm10, %v7980_v55, %v4181_v57  ;;  %v3736_v22 = vrot.slane %v3734_v33, 4 }
 0x2b3   : > { %v4209_v53 = vunpack.c.l.b16 %v4182_v11  ;;  %v3735_v56 = vsel %vm9129_vm7, %v7894_v19, %v3734_v33 }
 0x2b4   : > { %v3317_v12 = vadd.f32 %v3290_v4, %v3090_v41  ;;  %7860 = vmatmul.msk.bf16.gmra.mxu3 %vm746_vm3, %v8566_v18  ;;  %v4185_v32 = vsel %vm9946_vm10, %v4183_v59, %v4184_v31  ;;  %v3737_v41 = vrot.slane %v7886_v9, 6  ;;  %v3757_v59 = vunpack.c.l.b16 %v3735_v56  ;;  %v8128_v9 = vld [vmem:[%s9019_s27 + $0x204] sm:$0xf] }
 0x2b5   : > { %v4210_v49 = vunpack.c.l.b16 %v4185_v32 }
 0x2b6   : > { %v10100_v63 = vadd.f32 %v3445_v39, %v3317_v12  ;;  %v3295_v26 = vpop.f32.mrf.mxu1  ;;  %v3738_v14 = vsel %vm9129_vm7, %v3736_v22, %v3737_v41  ;;  %v4852_v41 = vrot.slane %v8128_v9, 5 }
 0x2b7   : > { %7994 = vmatmul.msk.bf16.gmra.mxu2 %vm746_vm3, %v4218_v43  ;;  %v2910_v6 = vpop.f32.mrf.mxu3  ;;  %v3068_v48 = vpop.f32.mrf.mxu0  ;;  %v4219_v24 = vpack.c.b16 %v4210_v49, %v4209_v53  ;;  %v4107_v43 = vld [vmem:[%s9019_s27 + $0xcc] sm:$0xe]  ;;  %v3758_v31 = vunpack.c.l.b16 %v3738_v14  ;;  %v4421_v53 = vld [vmem:[%s9019_s27 + $0x18] sm:$0x3] }
 0x2b8   : > { %v2935_v4 = vadd.f32 %v2910_v6, %v9895_v60  ;;  %v8577_v60 = vld [vmem:[%s9013_s9 + $0x264] sm:$0xff]  ;;  %v4472_v22 = vrot.slane %v4421_v53, 6  ;;  %v4424_v53 = vld [vmem:[%s9019_s27 + $0x34] sm:$0x3] }
 0x2b9   : > { %v3766_v32 = vpack.c.b16 %v3758_v31, %v3757_v59 }
 0x2ba   : > { %v3091_v2 = vadd.f32 %v3066_v36, %v2935_v4  ;;  %v3448_v8 = vpop.f32.mrf.mxu2  ;;  %v8567_v36 = vld [vmem:[%s9013_s9 + $0x258] sm:$0xff] }
 0x2bc   : > { %v3318_v13 = vadd.f32 %v3293_v38, %v3091_v2 }
 0x2be   : > { %v10114_v20 = vadd.f32 %v3448_v8, %v3318_v13  ;;  %v3298_v27 = vpop.f32.mrf.mxu1 }
 0x2bf   : > { %v2912_v62 = vpop.f32.mrf.mxu3  ;;  %v3071_v40 = vpop.f32.mrf.mxu0 }
 0x2c0   : > { %v2936_v38 = vadd.f32 %v2912_v62, %v9906_v3  ;;  %v4188_v3 = vrot.slane %v4108_v58, 5 }
 0x2c1   : > { %7971 = vmatmul.msk.bf16.gmra.mxu1 %vm746_vm3, %v8577_v60 }
 0x2c2   : > { %v3092_v50 = vadd.f32 %v3068_v48, %v2936_v38  ;;  %v3450_v18 = vpop.f32.mrf.mxu2  ;;  %7908 = vmatmul.msk.bf16.gmra.mxu0 %vm746_vm3, %v3765_v25  ;;  %v7981_v48 = vrot.slane %v4107_v43, 9  ;;  %v4190_v15 = vrot.slane %v4188_v3, 4  ;;  %v8568_v25 = vld [vmem:[%s9013_s9 + $0x26c] sm:$0xff]  ;;  %v8613_v38 = vld [vmem:[%s9743_s12 + $0x40] sm:$0xff] }
 0x2c3   : > { %5808 = vmatpush.bf16.msra.mxu2 %v8613_v38 }
 0x2c4   : > { %v3319_v39 = vadd.f32 %v3295_v26, %v3092_v50  ;;  %7861 = vmatmul.msk.bf16.gmra.mxu3 %vm746_vm3, %v8567_v36  ;;  %v8602_v26 = vld [vmem:[%s9743_s12 + $0x28] sm:$0xff]  ;;  %v4189_v8 = vsel %vm9946_vm10, %v7981_v48, %v4188_v3  ;;  %v4192_v29 = vsel %vm9946_vm10, %v4190_v15, %v4191_v35  ;;  %v8611_v36 = vld [vmem:[%s9743_s12 + $0x30] sm:$0xff] }
 0x2c5   : > { %5198 = vmatpush.bf16.msra.mxu3 %v8602_v26  ;;  %v4212_v62 = vunpack.c.l.b16 %v4192_v29  ;;  %5354 = vmatpush.bf16.msra.mxu0 %v8611_v36  ;;  %v8129_v3 = vld [vmem:[%s9019_s27 + $0x208] sm:$0x1] }
 0x2c6   : > { %v10126_v0 = vadd.f32 %v3450_v18, %v3319_v39  ;;  %v3300_v23 = vpop.f32.mrf.mxu1  ;;  %v8127_v39 = vld [vmem:[%s9019_s27 + $0x200] sm:$0xe]  ;;  %v4855_v48 = vrot.slane %v8129_v3, 5 }
 0x2c7   : > { %7995 = vmatmul.msk.bf16.gmra.mxu2 %vm746_vm3, %v4219_v24  ;;  %v2915_v12 = vpop.f32.mrf.mxu3  ;;  %v3073_v57 = vpop.f32.mrf.mxu0  ;;  %v8151_v26 = vrot.slane %v8127_v39, 9 }
 0x2c8   : > { %v2937_v6 = vadd.f32 %v2915_v12, %v9918_v17  ;;  %v4420_v17 = vld [vmem:[%s9019_s27 + $0x14] sm:$0xf] }
 0x2c9   : > { %v4469_v49 = vrot.slane %v4420_v17, 6  ;;  %v4853_v31 = vsel %vm9946_vm10, %v8151_v26, %v4852_v41 }
 0x2ca   : > { %v3093_v4 = vadd.f32 %v3071_v40, %v2937_v6  ;;  %v3453_v55 = vpop.f32.mrf.mxu2  ;;  %v4419_v40 = vld [vmem:[%s9019_s27 + $0x10] sm:$0xc]  ;;  %v4854_v6 = vrot.slane %v4852_v41, 4 }
 0x2cb   : > { %v8041_v24 = vrot.slane %v4419_v40, 10  ;;  %v4471_v19 = vrot.slane %v4469_v49, 4  ;;  %v4422_v40 = vld [vmem:[%s9019_s27 + $0x2c] sm:$0xc] }
 0x2cc   : > { %v3320_v2 = vadd.f32 %v3298_v27, %v3093_v4  ;;  %v4211_v27 = vunpack.c.l.b16 %v4189_v8  ;;  %v4423_v8 = vld [vmem:[%s9019_s27 + $0x30] sm:$0xf]  ;;  %v8042_v44 = vrot.slane %v4422_v40, 10 }
 0x2cd   : > { %v4470_v56 = vsel %vm9129_vm7, %v8041_v24, %v4469_v49  ;;  %v8131_v49 = vld [vmem:[%s9019_s27 + $0x220] sm:$0xf]  ;;  %v8132_v24 = vld [vmem:[%s9019_s27 + $0x224] sm:$0x1] }
 0x2ce   : > { %v10141_v13 = vadd.f32 %v3453_v55, %v3320_v2  ;;  %v3303_v11 = vpop.f32.mrf.mxu1  ;;  %v4220_v18 = vpack.c.b16 %v4212_v62, %v4211_v27  ;;  %v4527_v4 = vunpack.c.l.b16 %v4470_v56  ;;  %v4856_v2 = vsel %vm9946_vm10, %v4854_v6, %v4855_v48  ;;  %v8580_v62 = vld [vmem:[%s9019_s27] sm:$0xff]  ;;  %v4018_v48 = vld [vmem:[#allocation2 + $0x80] sm:$0xff] }
 0x2cf   : > { %v2917_v37 = vpop.f32.mrf.mxu3  ;;  %v3076_v60 = vpop.f32.mrf.mxu0  ;;  %v4476_v27 = vrot.slane %v4423_v8, 6  ;;  %v4862_v56 = vrot.slane %v8132_v24, 5 }
 0x2d0   : > { %v2938_v33 = vadd.f32 %v2917_v37, %v9933_v45 }
 0x2d1   : > { %7972 = vmatmul.msk.bf16.gmra.mxu1 %vm746_vm3, %v8578_v51  ;;  %v4478_v9 = vrot.slane %v4476_v27, 4  ;;  %v4477_v39 = vsel %vm9129_vm7, %v8042_v44, %v4476_v27  ;;  %v4427_v27 = vld [vmem:[%s9019_s27 + $0x50] sm:$0x3] }
 0x2d2   : > { %v3094_v58 = vadd.f32 %v3073_v57, %v2938_v33  ;;  %v3455_v50 = vpop.f32.mrf.mxu2  ;;  %7909 = vmatmul.msk.bf16.gmra.mxu0 %vm746_vm3, %v3766_v32  ;;  %v4529_v26 = vunpack.c.l.b16 %v4477_v39 }
 0x2d4   : > { %v3321_v45 = vadd.f32 %v3300_v23, %v3094_v58  ;;  %7862 = vmatmul.msk.bf16.gmra.mxu3 %vm746_vm3, %v8568_v25  ;;  %v4473_v23 = vsel %vm9129_vm7, %v4471_v19, %v4472_v22  ;;  %v4911_v25 = vunpack.c.l.b16 %v4856_v2  ;;  %v4479_v58 = vrot.slane %v4424_v53, 6  ;;  %v4019_v53 = vld [vmem:[#allocation2 + $0x88] sm:$0xff] }
 0x2d5   : > { %v4528_v55 = vunpack.c.l.b16 %v4473_v23 }
 0x2d6   : > { %v10156_v43 = vadd.f32 %v3455_v50, %v3321_v45  ;;  %v3305_v1 = vpop.f32.mrf.mxu1  ;;  %v4480_v3 = vsel %vm9129_vm7, %v4478_v9, %v4479_v58  ;;  %v8133_v9 = vld [vmem:[%s9019_s27 + $0x238] sm:$0xe]  ;;  %v8135_v58 = vld [vmem:[%s9019_s27 + $0x240] sm:$0x1] }
 0x2d7   : > { %7996 = vmatmul.msk.bf16.gmra.mxu2 %vm746_vm3, %v4220_v18  ;;  %v2920_v12 = vpop.f32.mrf.mxu3  ;;  %v3078_v57 = vpop.f32.mrf.mxu0  ;;  %v4543_v51 = vpack.c.b16 %v4528_v55, %v4527_v4  ;;  %v8130_v18 = vld [vmem:[%s9019_s27 + $0x21c] sm:$0xe]  ;;  %v4530_v6 = vunpack.c.l.b16 %v4480_v3  ;;  %v8593_v55 = vld [vmem:[%s9019_s27 + $0x214] sm:$0xff]  ;;  %v8153_v39 = vrot.slane %v8133_v9, 9 }
 0x2d8   : > { %v2939_v14 = vadd.f32 %v2920_v12, %v9950_v47  ;;  %v8592_v47 = vld [vmem:[%s9019_s27 + $0x1f8] sm:$0xff]  ;;  %v8152_v12 = vrot.slane %v8130_v18, 9 }
 0x2d9   : > { %v4544_v2 = vpack.c.b16 %v4530_v6, %v4529_v26  ;;  %v4020_v26 = vld [vmem:[#allocation2 + $0x90] sm:$0xff] }
 0x2da   : > { %v3095_v15 = vadd.f32 %v3076_v60, %v2939_v14  ;;  %v3458_v35 = vpop.f32.mrf.mxu2  ;;  %v4910_v60 = vunpack.c.l.b16 %v4853_v31 }
 0x2dc   : > { %v3322_v59 = vadd.f32 %v3303_v11, %v3095_v15  ;;  %v4926_v36 = vpack.c.b16 %v4911_v25, %v4910_v60  ;;  %v8581_v60 = vld [vmem:[%s9019_s27 + $0x1c] sm:$0xff]  ;;  %v4425_v25 = vld [vmem:[%s9019_s27 + $0x48] sm:$0xc] }
 0x2de   : > { %v10170_v29 = vadd.f32 %v3458_v35, %v3322_v59  ;;  %v3961_v17 = vpop.f32.mrf.mxu1 }
 0x2df   : > { %v2922_v32 = vpop.f32.mrf.mxu3  ;;  %v3806_v37 = vpop.f32.mrf.mxu0 }
 0x2e0   : > { %v2940_v11 = vadd.f32 %v2922_v32, %v9966_v5  ;;  %v4859_v5 = vrot.slane %v8131_v49, 5 }
 0x2e1   : > { %8119 = vmatmul.msk.bf16.vlgmr.msrb.gmra.mxu1 %vm746_vm3, %v8592_v47 }
 0x2e2   : > { %v3096_v33 = vadd.f32 %v3078_v57, %v2940_v11  ;;  %v3460_v38 = vpop.f32.mrf.mxu2  ;;  %8056 = vmatmul.msk.bf16.vlgmr.msrb.gmra.mxu0 %vm746_vm3, %v4543_v51  ;;  %v4861_v57 = vrot.slane %v4859_v5, 4  ;;  %v4860_v35 = vsel %vm9946_vm10, %v8152_v12, %v4859_v5  ;;  %v8134_v11 = vld [vmem:[%s9019_s27 + $0x23c] sm:$0xf] }
 0x2e3   : > { %v4912_v51 = vunpack.c.l.b16 %v4860_v35  ;;  %v8594_v35 = vld [vmem:[%s9019_s27 + $0x230] sm:$0xff] }
 0x2e4   : > { %v3323_v50 = vadd.f32 %v3305_v1, %v3096_v33  ;;  %8033 = vmatmul.msk.bf16.vlgmr.msrb.gmra.mxu3 %vm746_vm3, %v8580_v62  ;;  %v4863_v4 = vsel %vm9946_vm10, %v4861_v57, %v4862_v56  ;;  %v8043_v33 = vrot.slane %v4425_v25, 10 }
 0x2e5   : > { %v4913_v32 = vunpack.c.l.b16 %v4863_v4 }
 0x2e6   : > { %v10182_v19 = vadd.f32 %v3460_v38, %v3323_v50  ;;  %v3963_v22 = vpop.f32.mrf.mxu1 }
 0x2e7   : > { %8166 = vmatmul.msk.bf16.vlgmr.msrb.gmra.mxu2 %vm746_vm3, %v4926_v36  ;;  %v3579_v45 = vpop.f32.mrf.mxu3  ;;  %v3808_v41 = vpop.f32.mrf.mxu0  ;;  %v4927_v49 = vpack.c.b16 %v4913_v32, %v4912_v51  ;;  %v4486_v36 = vrot.slane %v4427_v27, 6  ;;  %v8582_v32 = vld [vmem:[%s9019_s27 + $0x38] sm:$0xff] }
 0x2e8   : > { %v3619_v1 = vadd.f32 %v3579_v45, %v9984_v10  ;;  %v4426_v10 = vld [vmem:[%s9019_s27 + $0x4c] sm:$0xf] }
 0x2ea   : > { %v3846_v23 = vadd.f32 %v3806_v37, %v3619_v1  ;;  %v10190_v14 = vpop.f32.mrf.mxu2  ;;  %v4483_v37 = vrot.slane %v4426_v10, 6  ;;  %v4869_v1 = vrot.slane %v8135_v58, 5 }
 0x2ec   : > { %v4001_v15 = vadd.f32 %v3961_v17, %v3846_v23  ;;  %v4485_v38 = vrot.slane %v4483_v37, 4  ;;  %v4484_v45 = vsel %vm9129_vm7, %v8043_v33, %v4483_v37  ;;  %v4428_v37 = vld [vmem:[%s9019_s27 + $0x64] sm:$0xc] }
 0x2ed   : > { %v4531_v56 = vunpack.c.l.b16 %v4484_v45 }
 0x2ee   : > { %v4034_v59 = vadd.f32 %v4018_v48, %v4001_v15  ;;  %v3966_v31 = vpop.f32.mrf.mxu1 }
 0x2ef   : > { %v3581_v8 = vpop.f32.mrf.mxu3  ;;  %v3811_v47 = vpop.f32.mrf.mxu0 }
 0x2f0   : > { %4050 = vst.msk [vmem:[#allocation2 + $0x80] sm:$0xff] %vm746_vm3, %v4034_v59  ;;  %v3620_v17 = vadd.f32 %v3581_v8, %v9996_v42  ;;  %v4866_v42 = vrot.slane %v8134_v11, 5  ;;  %v4021_v11 = vld [vmem:[#allocation2 + $0x98] sm:$0xff] }
 0x2f1   : > { %8120 = vmatmul.msk.bf16.gmra.mxu1 %vm746_vm3, %v8593_v55 }
 0x2f2   : > { %v3847_v62 = vadd.f32 %v3808_v41, %v3620_v17  ;;  %v10205_v40 = vpop.f32.mrf.mxu2  ;;  %8057 = vmatmul.msk.bf16.gmra.mxu0 %vm746_vm3, %v4544_v2  ;;  %v4487_v41 = vsel %vm9129_vm7, %v4485_v38, %v4486_v36  ;;  %v4868_v3 = vrot.slane %v4866_v42, 4  ;;  %v4867_v48 = vsel %vm9946_vm10, %v8153_v39, %v4866_v42  ;;  %v4430_v17 = vld [vmem:[%s9019_s27 + $0x6c] sm:$0x3]  ;;  %v8136_v36 = vld [vmem:[%s9019_s27 + $0x254] sm:$0xe] }
 0x2f3   : > { %v4532_v23 = vunpack.c.l.b16 %v4487_v41  ;;  %v4914_v8 = vunpack.c.l.b16 %v4867_v48  ;;  %v4493_v33 = vrot.slane %v4430_v17, 6  ;;  %v8154_v45 = vrot.slane %v8136_v36, 9  ;;  %v8595_v48 = vld [vmem:[%s9019_s27 + $0x24c] sm:$0xff] }
 0x2f4   : > { %v4002_v44 = vadd.f32 %v3963_v22, %v3847_v62  ;;  %8034 = vmatmul.msk.bf16.gmra.mxu3 %vm746_vm3, %v8581_v60  ;;  %v4870_v15 = vsel %vm9946_vm10, %v4868_v3, %v4869_v1  ;;  %v8137_v60 = vld [vmem:[%s9019_s27 + $0x258] sm:$0xf] }
 0x2f5   : > { %v4545_v55 = vpack.c.b16 %v4532_v23, %v4531_v56  ;;  %v4022_v56 = vld [vmem:[#allocation2 + $0xa0] sm:$0xff] }
 0x2f6   : > { %v4035_v50 = vadd.f32 %v4019_v53, %v4002_v44  ;;  %v3968_v5 = vpop.f32.mrf.mxu1  ;;  %v8044_v53 = vrot.slane %v4428_v37, 10  ;;  %v8138_v44 = vld [vmem:[%s9019_s27 + $0x25c] sm:$0x1] }
 0x2f7   : > { %8167 = vmatmul.msk.bf16.gmra.mxu2 %vm746_vm3, %v4927_v49  ;;  %v3584_v18 = vpop.f32.mrf.mxu3  ;;  %v3813_v24 = vpop.f32.mrf.mxu0 }
 0x2f8   : > { %4051 = vst.msk [vmem:[#allocation2 + $0x88] sm:$0xff] %vm746_vm3, %v4035_v50  ;;  %v3621_v22 = vadd.f32 %v3584_v18, %v10010_v46  ;;  %v4429_v46 = vld [vmem:[%s9019_s27 + $0x68] sm:$0xf] }
 0x2f9   : > { %v4490_v51 = vrot.slane %v4429_v46, 6 }
 0x2fa   : > { %v3848_v12 = vadd.f32 %v3811_v47, %v3621_v22  ;;  %v10218_v57 = vpop.f32.mrf.mxu2  ;;  %v4915_v47 = vunpack.c.l.b16 %v4870_v15  ;;  %v4876_v22 = vrot.slane %v8138_v44, 5 }
 0x2fb   : > { %v4492_v49 = vrot.slane %v4490_v51, 4  ;;  %v4491_v18 = vsel %vm9129_vm7, %v8044_v53, %v4490_v51  ;;  %v4431_v51 = vld [vmem:[%s9019_s27 + $0x80] sm:$0xc] }
 0x2fc   : > { %v4003_v6 = vadd.f32 %v3966_v31, %v3848_v12  ;;  %v4928_v62 = vpack.c.b16 %v4915_v47, %v4914_v8  ;;  %v4533_v1 = vunpack.c.l.b16 %v4491_v18  ;;  %v8583_v47 = vld [vmem:[%s9019_s27 + $0x54] sm:$0xff] }
 0x2fe   : > { %v4036_v4 = vadd.f32 %v4020_v26, %v4003_v6  ;;  %v3971_v10 = vpop.f32.mrf.mxu1 }
 0x2ff   : > { %v3586_v59 = vpop.f32.mrf.mxu3  ;;  %v3816_v2 = vpop.f32.mrf.mxu0 }
 0x300   : > { %4052 = vst.msk [vmem:[#allocation2 + $0x90] sm:$0xff] %vm746_vm3, %v4036_v4  ;;  %v3622_v31 = vadd.f32 %v3586_v59, %v10022_v30  ;;  %v4873_v30 = vrot.slane %v8137_v60, 5  ;;  %v4023_v60 = vld [vmem:[#allocation2 + $0xa8] sm:$0xff] }
 0x301   : > { %8121 = vmatmul.msk.bf16.gmra.mxu1 %vm746_vm3, %v8594_v35 }
 0x302   : > { %v3849_v25 = vadd.f32 %v3813_v24, %v3622_v31  ;;  %v10233_v27 = vpop.f32.mrf.mxu2  ;;  %8058 = vmatmul.msk.bf16.gmra.mxu0 %vm746_vm3, %v4545_v55  ;;  %v4494_v24 = vsel %vm9129_vm7, %v4492_v49, %v4493_v33  ;;  %v4875_v41 = vrot.slane %v4873_v30, 4  ;;  %v4874_v26 = vsel %vm9946_vm10, %v8154_v45, %v4873_v30  ;;  %v4433_v31 = vld [vmem:[%s9019_s27 + $0x88] sm:$0x3]  ;;  %v8139_v33 = vld [vmem:[%s9019_s27 + $0x270] sm:$0xe] }
 0x303   : > { %v4534_v12 = vunpack.c.l.b16 %v4494_v24  ;;  %v4916_v59 = vunpack.c.l.b16 %v4874_v26  ;;  %v4500_v53 = vrot.slane %v4433_v31, 6  ;;  %v8155_v18 = vrot.slane %v8139_v33, 9  ;;  %v8596_v26 = vld [vmem:[%s9019_s27 + $0x268] sm:$0xff] }
 0x304   : > { %v4004_v38 = vadd.f32 %v3968_v5, %v3849_v25  ;;  %8035 = vmatmul.msk.bf16.gmra.mxu3 %vm746_vm3, %v8582_v32  ;;  %v4877_v6 = vsel %vm9946_vm10, %v4875_v41, %v4876_v22  ;;  %v8140_v32 = vld [vmem:[%s9019_s27 + $0x274] sm:$0xf] }
 0x305   : > { %v4546_v35 = vpack.c.b16 %v4534_v12, %v4533_v1  ;;  %v4024_v1 = vld [vmem:[#allocation2 + $0xb0] sm:$0xff] }
 0x306   : > { %v4037_v42 = vadd.f32 %v4021_v11, %v4004_v38  ;;  %v3973_v9 = vpop.f32.mrf.mxu1  ;;  %v8045_v11 = vrot.slane %v4431_v51, 10  ;;  %v8141_v38 = vld [vmem:[%s9019_s27 + $0x278] sm:$0x1] }
 0x307   : > { %8168 = vmatmul.msk.bf16.gmra.mxu2 %vm746_vm3, %v4928_v62  ;;  %v3589_v58 = vpop.f32.mrf.mxu3  ;;  %v3818_v50 = vpop.f32.mrf.mxu0 }
 0x308   : > { %4053 = vst.msk [vmem:[#allocation2 + $0x98] sm:$0xff] %vm746_vm3, %v4037_v42  ;;  %v3623_v5 = vadd.f32 %v3589_v58, %v10036_v54  ;;  %v4432_v54 = vld [vmem:[%s9019_s27 + $0x84] sm:$0xf] }
 0x309   : > { %v4497_v8 = vrot.slane %v4432_v54, 6 }
 0x30a   : > { %v3850_v39 = vadd.f32 %v3816_v2, %v3623_v5  ;;  %v10246_v3 = vpop.f32.mrf.mxu2  ;;  %v4917_v2 = vunpack.c.l.b16 %v4877_v6  ;;  %v4883_v5 = vrot.slane %v8141_v38, 5 }
 0x30b   : > { %v4499_v62 = vrot.slane %v4497_v8, 4  ;;  %v4498_v58 = vsel %vm9129_vm7, %v8045_v11, %v4497_v8  ;;  %v4434_v8 = vld [vmem:[%s9019_s27 + $0x9c] sm:$0xc] }
 0x30c   : > { %v4005_v23 = vadd.f32 %v3971_v10, %v3850_v39  ;;  %v4929_v25 = vpack.c.b16 %v4917_v2, %v4916_v59  ;;  %v4535_v22 = vunpack.c.l.b16 %v4498_v58  ;;  %v8584_v2 = vld [vmem:[%s9019_s27 + $0x70] sm:$0xff] }
 0x30e   : > { %v4038_v15 = vadd.f32 %v4022_v56, %v4005_v23  ;;  %v3976_v46 = vpop.f32.mrf.mxu1 }
 0x30f   : > { %v3591_v4 = vpop.f32.mrf.mxu3  ;;  %v3821_v55 = vpop.f32.mrf.mxu0 }
 0x310   : > { %4054 = vst.msk [vmem:[#allocation2 + $0xa0] sm:$0xff] %vm746_vm3, %v4038_v15  ;;  %v3624_v10 = vadd.f32 %v3591_v4, %v10048_v16  ;;  %v4880_v16 = vrot.slane %v8140_v32, 5  ;;  %v4025_v32 = vld [vmem:[#allocation2 + $0xb8] sm:$0xff] }
 0x311   : > { %8122 = vmatmul.msk.bf16.gmra.mxu1 %vm746_vm3, %v8595_v48 }
 0x312   : > { %v3851_v37 = vadd.f32 %v3818_v50, %v3624_v10  ;;  %v10261_v17 = vpop.f32.mrf.mxu2  ;;  %8059 = vmatmul.msk.bf16.gmra.mxu0 %vm746_vm3, %v4546_v35  ;;  %v4501_v50 = vsel %vm9129_vm7, %v4499_v62, %v4500_v53  ;;  %v4882_v24 = vrot.slane %v4880_v16, 4  ;;  %v4881_v56 = vsel %vm9946_vm10, %v8155_v18, %v4880_v16  ;;  %v4436_v10 = vld [vmem:[%s9019_s27 + $0xa4] sm:$0x3]  ;;  %v8142_v53 = vld [vmem:[%s9019_s27 + $0x28c] sm:$0xe] }
 0x313   : > { %v4536_v39 = vunpack.c.l.b16 %v4501_v50  ;;  %v4918_v4 = vunpack.c.l.b16 %v4881_v56  ;;  %v4507_v11 = vrot.slane %v4436_v10, 6  ;;  %v8156_v58 = vrot.slane %v8142_v53, 9  ;;  %v8597_v56 = vld [vmem:[%s9019_s27 + $0x284] sm:$0xff] }
 0x314   : > { %v4006_v49 = vadd.f32 %v3973_v9, %v3851_v37  ;;  %8036 = vmatmul.msk.bf16.gmra.mxu3 %vm746_vm3, %v8583_v47  ;;  %v4884_v23 = vsel %vm9946_vm10, %v4882_v24, %v4883_v5  ;;  %v8143_v47 = vld [vmem:[%s9019_s27 + $0x290] sm:$0xf] }
 0x315   : > { %v4547_v48 = vpack.c.b16 %v4536_v39, %v4535_v22  ;;  %v4026_v22 = vld [vmem:[#allocation2 + $0xc0] sm:$0xff] }
 0x316   : > { %v4039_v30 = vadd.f32 %v4023_v60, %v4006_v49  ;;  %v3978_v36 = vpop.f32.mrf.mxu1  ;;  %v8046_v60 = vrot.slane %v4434_v8, 10  ;;  %v8144_v49 = vld [vmem:[%s9019_s27 + $0x294] sm:$0x1] }
 0x317   : > { %8169 = vmatmul.msk.bf16.gmra.mxu2 %vm746_vm3, %v4929_v25  ;;  %v3594_v44 = vpop.f32.mrf.mxu3  ;;  %v3823_v42 = vpop.f32.mrf.mxu0 }
 0x318   : > { %4055 = vst.msk [vmem:[#allocation2 + $0xa8] sm:$0xff] %vm746_vm3, %v4039_v30  ;;  %v3625_v9 = vadd.f32 %v3594_v44, %v10062_v52  ;;  %v4435_v52 = vld [vmem:[%s9019_s27 + $0xa0] sm:$0xf] }
 0x319   : > { %v4504_v59 = vrot.slane %v4435_v52, 6 }
 0x31a   : > { %v3852_v45 = vadd.f32 %v3821_v55, %v3625_v9  ;;  %v10274_v41 = vpop.f32.mrf.mxu2  ;;  %v4919_v55 = vunpack.c.l.b16 %v4884_v23  ;;  %v4890_v9 = vrot.slane %v8144_v49, 5 }
 0x31b   : > { %v4506_v25 = vrot.slane %v4504_v59, 4  ;;  %v4505_v44 = vsel %vm9129_vm7, %v8046_v60, %v4504_v59  ;;  %v4437_v59 = vld [vmem:[%s9019_s27 + $0xb8] sm:$0xc] }
 0x31c   : > { %v4007_v12 = vadd.f32 %v3976_v46, %v3852_v45  ;;  %v4930_v37 = vpack.c.b16 %v4919_v55, %v4918_v4  ;;  %v4537_v5 = vunpack.c.l.b16 %v4505_v44  ;;  %v8585_v55 = vld [vmem:[%s9019_s27 + $0x8c] sm:$0xff] }
 0x31e   : > { %v4040_v6 = vadd.f32 %v4024_v1, %v4007_v12  ;;  %v3981_v54 = vpop.f32.mrf.mxu1 }
 0x31f   : > { %v3596_v15 = vpop.f32.mrf.mxu3  ;;  %v3826_v35 = vpop.f32.mrf.mxu0 }
 0x320   : > { %4056 = vst.msk [vmem:[#allocation2 + $0xb0] sm:$0xff] %vm746_vm3, %v4040_v6  ;;  %v3626_v46 = vadd.f32 %v3596_v15, %v10074_v21  ;;  %v4887_v21 = vrot.slane %v8143_v47, 5  ;;  %v4027_v47 = vld [vmem:[#allocation2 + $0xc8] sm:$0xff] }
 0x321   : > { %8123 = vmatmul.msk.bf16.gmra.mxu1 %vm746_vm3, %v8596_v26 }
 0x322   : > { %v3853_v51 = vadd.f32 %v3823_v42, %v3626_v46  ;;  %v10289_v31 = vpop.f32.mrf.mxu2  ;;  %8060 = vmatmul.msk.bf16.gmra.mxu0 %vm746_vm3, %v4547_v48  ;;  %v4508_v42 = vsel %vm9129_vm7, %v4506_v25, %v4507_v11  ;;  %v4889_v50 = vrot.slane %v4887_v21, 4  ;;  %v4888_v1 = vsel %vm9946_vm10, %v8156_v58, %v4887_v21  ;;  %v4439_v46 = vld [vmem:[%s9019_s27 + $0xc0] sm:$0x3]  ;;  %v8145_v11 = vld [vmem:[%s9019_s27 + $0x2a8] sm:$0xe] }
 0x323   : > { %v4538_v45 = vunpack.c.l.b16 %v4508_v42  ;;  %v4920_v15 = vunpack.c.l.b16 %v4888_v1  ;;  %v4514_v60 = vrot.slane %v4439_v46, 6  ;;  %v8157_v44 = vrot.slane %v8145_v11, 9  ;;  %v8598_v1 = vld [vmem:[%s9019_s27 + $0x2a0] sm:$0xff] }
 0x324   : > { %v4008_v62 = vadd.f32 %v3978_v36, %v3853_v51  ;;  %8037 = vmatmul.msk.bf16.gmra.mxu3 %vm746_vm3, %v8584_v2  ;;  %v4891_v12 = vsel %vm9946_vm10, %v4889_v50, %v4890_v9  ;;  %v8146_v2 = vld [vmem:[%s9019_s27 + $0x2ac] sm:$0xf] }
 0x325   : > { %v4548_v26 = vpack.c.b16 %v4538_v45, %v4537_v5  ;;  %v4028_v5 = vld [vmem:[#allocation2 + $0xd0] sm:$0xff] }
 0x326   : > { %v4041_v16 = vadd.f32 %v4025_v32, %v4008_v62  ;;  %v3983_v33 = vpop.f32.mrf.mxu1  ;;  %v8047_v32 = vrot.slane %v4437_v59, 10  ;;  %v8147_v62 = vld [vmem:[%s9019_s27 + $0x2b0] sm:$0x1] }
 0x327   : > { %8170 = vmatmul.msk.bf16.gmra.mxu2 %vm746_vm3, %v4930_v37  ;;  %v3599_v38 = vpop.f32.mrf.mxu3  ;;  %v3828_v30 = vpop.f32.mrf.mxu0 }
 0x328   : > { %4057 = vst.msk [vmem:[#allocation2 + $0xb8] sm:$0xff] %vm746_vm3, %v4041_v16  ;;  %v3627_v36 = vadd.f32 %v3599_v38, %v10088_v34  ;;  %v4438_v34 = vld [vmem:[%s9019_s27 + $0xbc] sm:$0xf] }
 0x329   : > { %v4511_v4 = vrot.slane %v4438_v34, 6 }
 0x32a   : > { %v3854_v18 = vadd.f32 %v3826_v35, %v3627_v36  ;;  %v10302_v24 = vpop.f32.mrf.mxu2  ;;  %v4921_v35 = vunpack.c.l.b16 %v4891_v12  ;;  %v4897_v36 = vrot.slane %v8147_v62, 5 }
 0x32b   : > { %v4513_v37 = vrot.slane %v4511_v4, 4  ;;  %v4512_v38 = vsel %vm9129_vm7, %v8047_v32, %v4511_v4  ;;  %v4440_v4 = vld [vmem:[%s9019_s27 + $0xd4] sm:$0xc] }
 0x32c   : > { %v4009_v39 = vadd.f32 %v3981_v54, %v3854_v18  ;;  %v4931_v51 = vpack.c.b16 %v4921_v35, %v4920_v15  ;;  %v4539_v9 = vunpack.c.l.b16 %v4512_v38  ;;  %v8586_v35 = vld [vmem:[%s9019_s27 + $0xa8] sm:$0xff] }
 0x32e   : > { %v4042_v23 = vadd.f32 %v4026_v22, %v4009_v39  ;;  %v3986_v52 = vpop.f32.mrf.mxu1 }
 0x32f   : > { %v3601_v6 = vpop.f32.mrf.mxu3  ;;  %v3831_v48 = vpop.f32.mrf.mxu0 }
 0x330   : > { %4058 = vst.msk [vmem:[#allocation2 + $0xc0] sm:$0xff] %vm746_vm3, %v4042_v23  ;;  %v3628_v54 = vadd.f32 %v3601_v6, %v10100_v63  ;;  %v4894_v63 = vrot.slane %v8146_v2, 5  ;;  %v4029_v2 = vld [vmem:[#allocation2 + $0xd8] sm:$0xff] }
 0x331   : > { %8124 = vmatmul.msk.bf16.gmra.mxu1 %vm746_vm3, %v8597_v56 }
 0x332   : > { %v3855_v8 = vadd.f32 %v3828_v30, %v3628_v54  ;;  %v10317_v10 = vpop.f32.mrf.mxu2  ;;  %8061 = vmatmul.msk.bf16.gmra.mxu0 %vm746_vm3, %v4548_v26  ;;  %v4515_v30 = vsel %vm9129_vm7, %v4513_v37, %v4514_v60  ;;  %v4896_v42 = vrot.slane %v4894_v63, 4  ;;  %v4895_v22 = vsel %vm9946_vm10, %v8157_v44, %v4894_v63  ;;  %v4442_v54 = vld [vmem:[%s9019_s27 + $0xdc] sm:$0x3]  ;;  %v8148_v60 = vld [vmem:[%s9019_s27 + $0x2c4] sm:$0xe] }
 0x333   : > { %v4540_v18 = vunpack.c.l.b16 %v4515_v30  ;;  %v4922_v6 = vunpack.c.l.b16 %v4895_v22  ;;  %v4521_v32 = vrot.slane %v4442_v54, 6  ;;  %v8158_v38 = vrot.slane %v8148_v60, 9  ;;  %v8599_v22 = vld [vmem:[%s9019_s27 + $0x2bc] sm:$0xff] }
 0x334   : > { %v4010_v25 = vadd.f32 %v3983_v33, %v3855_v8  ;;  %8038 = vmatmul.msk.bf16.gmra.mxu3 %vm746_vm3, %v8585_v55  ;;  %v4898_v39 = vsel %vm9946_vm10, %v4896_v42, %v4897_v36  ;;  %v8149_v55 = vld [vmem:[%s9019_s27 + $0x2c8] sm:$0xf] }
 0x335   : > { %v4549_v56 = vpack.c.b16 %v4540_v18, %v4539_v9  ;;  %v4030_v9 = vld [vmem:[#allocation2 + $0xe0] sm:$0xff]  ;;  %v8285_v18 = vld [vmem:[%s9019_s27 + $0x3fc] sm:$0xf] }
 0x336   : > { %v4043_v21 = vadd.f32 %v4027_v47, %v4010_v25  ;;  %v3988_v53 = vpop.f32.mrf.mxu1  ;;  %v8048_v47 = vrot.slane %v4440_v4, 10  ;;  %v8150_v25 = vld [vmem:[%s9019_s27 + $0x2cc] sm:$0x1]  ;;  %v8174_v4 = vld [vmem:[%s9019_s27 + $0x208] sm:$0xc] }
 0x337   : > { %8171 = vmatmul.msk.bf16.gmra.mxu2 %vm746_vm3, %v4931_v51  ;;  %v3604_v49 = vpop.f32.mrf.mxu3  ;;  %v3833_v16 = vpop.f32.mrf.mxu0  ;;  %v8198_v60 = vrot.slane %v8174_v4, 10 }
 0x338   : > { %4059 = vst.msk [vmem:[#allocation2 + $0xc8] sm:$0xff] %vm746_vm3, %v4043_v21  ;;  %v3629_v33 = vadd.f32 %v3604_v49, %v10114_v20  ;;  %v4441_v20 = vld [vmem:[%s9019_s27 + $0xd8] sm:$0xf] }
 0x339   : > { %v4518_v15 = vrot.slane %v4441_v20, 6 }
 0x33a   : > { %v3856_v58 = vadd.f32 %v3831_v48, %v3629_v33  ;;  %v10330_v50 = vpop.f32.mrf.mxu2  ;;  %v4923_v48 = vunpack.c.l.b16 %v4898_v39  ;;  %v4904_v33 = vrot.slane %v8150_v25, 5  ;;  %v8331_v25 = vld [vmem:[%s9019_s27 + $0x400] sm:$0xc] }
 0x33b   : > { %v4520_v51 = vrot.slane %v4518_v15, 4  ;;  %v4519_v49 = vsel %vm9129_vm7, %v8048_v47, %v4518_v15  ;;  %v8286_v15 = vld [vmem:[%s9019_s27 + $0x400] sm:$0x1] }
 0x33c   : > { %v4011_v45 = vadd.f32 %v3986_v52, %v3856_v58  ;;  %v4932_v8 = vpack.c.b16 %v4923_v48, %v4922_v6  ;;  %v4541_v36 = vunpack.c.l.b16 %v4519_v49  ;;  %v8284_v48 = vld [vmem:[%s9019_s27 + $0x3f8] sm:$0xe] }
 0x33d   : > { %v8308_v47 = vrot.slane %v8284_v48, 9 }
 0x33e   : > { %v4044_v12 = vadd.f32 %v4028_v5, %v4011_v45  ;;  %v3991_v34 = vpop.f32.mrf.mxu1 }
 0x33f   : > { %v3606_v23 = vpop.f32.mrf.mxu3  ;;  %v3836_v26 = vpop.f32.mrf.mxu0 }
 0x340   : > { %4060 = vst.msk [vmem:[#allocation2 + $0xd0] sm:$0xff] %vm746_vm3, %v4044_v12  ;;  %v3630_v52 = vadd.f32 %v3606_v23, %v10126_v0  ;;  %v4901_v0 = vrot.slane %v8149_v55, 5  ;;  %v8175_v12 = vld [vmem:[%s9019_s27 + $0x20c] sm:$0xf]  ;;  %v8332_v55 = vld [vmem:[%s9019_s27 + $0x404] sm:$0xf] }
 0x341   : > { %8125 = vmatmul.msk.bf16.gmra.mxu1 %vm746_vm3, %v8598_v1  ;;  %v5079_v54 = vrot.slane %v8175_v12, 6 }
 0x342   : > { %v3857_v59 = vadd.f32 %v3833_v16, %v3630_v52  ;;  %v10345_v46 = vpop.f32.mrf.mxu2  ;;  %8062 = vmatmul.msk.bf16.gmra.mxu0 %vm746_vm3, %v4549_v56  ;;  %v4522_v16 = vsel %vm9129_vm7, %v4520_v51, %v4521_v32  ;;  %v4903_v30 = vrot.slane %v4901_v0, 4  ;;  %v4902_v45 = vsel %vm9946_vm10, %v8158_v38, %v4901_v0 }
 0x343   : > { %v4542_v58 = vunpack.c.l.b16 %v4522_v16  ;;  %v5462_v56 = vrot.slane %v8285_v18, 5  ;;  %v4924_v6 = vunpack.c.l.b16 %v4902_v45  ;;  %v5465_v32 = vrot.slane %v8286_v15, 5 }
 0x344   : > { %v4012_v37 = vadd.f32 %v3988_v53, %v3857_v59  ;;  %8039 = vmatmul.msk.bf16.gmra.mxu3 %vm746_vm3, %v8586_v35  ;;  %v8587_v35 = vld [vmem:[%s9019_s27 + $0xc4] sm:$0xff] }
 0x345   : > { %v4550_v1 = vpack.c.b16 %v4542_v58, %v4541_v36  ;;  %v5464_v51 = vrot.slane %v5462_v56, 4  ;;  %v5463_v38 = vsel %vm9946_vm10, %v8308_v47, %v5462_v56  ;;  %v5080_v58 = vsel %vm9129_vm7, %v8198_v60, %v5079_v54  ;;  %v8288_v56 = vld [vmem:[%s9019_s27 + $0x418] sm:$0xf]  ;;  %v8289_v47 = vld [vmem:[%s9019_s27 + $0x41c] sm:$0x1] }
 0x346   : > { %v4045_v63 = vadd.f32 %v4029_v2, %v4012_v37  ;;  %v3993_v11 = vpop.f32.mrf.mxu1  ;;  %v4031_v37 = vld [vmem:[#allocation2 + $0xe8] sm:$0xff]  ;;  %v5520_v45 = vunpack.c.l.b16 %v5463_v38  ;;  %v5137_v12 = vunpack.c.l.b16 %v5080_v58  ;;  %v5469_v4 = vrot.slane %v8288_v56, 5 }
 0x347   : > { %8172 = vmatmul.msk.bf16.gmra.mxu2 %vm746_vm3, %v4932_v8  ;;  %v3609_v62 = vpop.f32.mrf.mxu3  ;;  %v3838_v21 = vpop.f32.mrf.mxu0  ;;  %v8176_v8 = vld [vmem:[%s9019_s27 + $0x210] sm:$0x3] }
 0x348   : > { %4061 = vst.msk [vmem:[#allocation2 + $0xd8] sm:$0xff] %vm746_vm3, %v4045_v63  ;;  %v3631_v53 = vadd.f32 %v3609_v62, %v10141_v13  ;;  %v4905_v13 = vsel %vm9946_vm10, %v4903_v30, %v4904_v33  ;;  %v5689_v63 = vrot.slane %v8332_v55, 6  ;;  %v5081_v62 = vrot.slane %v5079_v54, 4 }
 0x349   : > { %v5082_v49 = vrot.slane %v8176_v8, 6  ;;  %v5466_v30 = vsel %vm9946_vm10, %v5464_v51, %v5465_v32  ;;  %v8287_v8 = vld [vmem:[%s9019_s27 + $0x414] sm:$0xe] }
 0x34a   : > { %v3858_v44 = vadd.f32 %v3836_v26, %v3631_v53  ;;  %v10358_v42 = vpop.f32.mrf.mxu2 }
 0x34c   : > { %v4013_v5 = vadd.f32 %v3991_v34, %v3858_v44  ;;  %v4925_v34 = vunpack.c.l.b16 %v4905_v13  ;;  %v8355_v44 = vrot.slane %v8331_v25, 10  ;;  %v5521_v13 = vunpack.c.l.b16 %v5466_v30 }
 0x34e   : > { %v4046_v39 = vadd.f32 %v4030_v9, %v4013_v5  ;;  %v3996_v20 = vpop.f32.mrf.mxu1  ;;  %v4933_v0 = vpack.c.b16 %v4925_v34, %v4924_v6  ;;  %v5691_v9 = vrot.slane %v5689_v63, 4  ;;  %v5083_v5 = vsel %vm9129_vm7, %v5081_v62, %v5082_v49 }
 0x34f   : > { %v3611_v23 = vpop.f32.mrf.mxu3  ;;  %v3841_v26 = vpop.f32.mrf.mxu0  ;;  %v5690_v6 = vsel %vm9129_vm7, %v8355_v44, %v5689_v63  ;;  %v5536_v48 = vpack.c.b16 %v5521_v13, %v5520_v45  ;;  %v8179_v63 = vld [vmem:[%s9019_s27 + $0x22c] sm:$0x3]  ;;  %v8309_v62 = vrot.slane %v8287_v8, 9  ;;  %v5471_v49 = vrot.slane %v5469_v4, 4 }
 0x350   : > { %4062 = vst.msk [vmem:[#allocation2 + $0xe0] sm:$0xff] %vm746_vm3, %v4046_v39  ;;  %v3632_v52 = vadd.f32 %v3611_v23, %v10156_v43  ;;  %v5138_v23 = vunpack.c.l.b16 %v5083_v5  ;;  %v5089_v58 = vrot.slane %v8179_v63, 6  ;;  %v8292_v63 = vld [vmem:[%s9019_s27 + $0x438] sm:$0x1] }
 0x351   : > { %8126 = vmatmul.msk.bf16.gmra.mxu1 %vm746_vm3, %v8599_v22  ;;  %v5470_v5 = vsel %vm9946_vm10, %v8309_v62, %v5469_v4 }
 0x352   : > { %v3859_v59 = vadd.f32 %v3838_v21, %v3632_v52  ;;  %v10375_v2 = vpop.f32.mrf.mxu2  ;;  %8063 = vmatmul.msk.bf16.gmra.mxu0 %vm746_vm3, %v4550_v1  ;;  %v8333_v21 = vld [vmem:[%s9019_s27 + $0x408] sm:$0x3]  ;;  %v4032_v1 = vld [vmem:[#allocation2 + $0xf0] sm:$0xff]  ;;  %v5153_v32 = vpack.c.b16 %v5138_v23, %v5137_v12 }
 0x353   : > { %v5692_v18 = vrot.slane %v8333_v21, 6  ;;  %v5472_v21 = vrot.slane %v8289_v47, 5 }
 0x354   : > { %v4014_v43 = vadd.f32 %v3993_v11, %v3859_v59  ;;  %8040 = vmatmul.msk.bf16.gmra.mxu3 %vm746_vm3, %v8587_v35  ;;  %v8178_v35 = vld [vmem:[%s9019_s27 + $0x228] sm:$0xf]  ;;  %v5747_v59 = vunpack.c.l.b16 %v5690_v6  ;;  %v5522_v6 = vunpack.c.l.b16 %v5470_v5  ;;  %v8337_v5 = vld [vmem:[%s9019_s27 + $0x438] sm:$0xc] }
 0x355   : > { %v5693_v34 = vsel %vm9129_vm7, %v5691_v9, %v5692_v18  ;;  %v5473_v45 = vsel %vm9946_vm10, %v5471_v49, %v5472_v21  ;;  %v8180_v21 = vld [vmem:[%s9019_s27 + $0x240] sm:$0xc] }
 0x356   : > { %v4047_v16 = vadd.f32 %v4031_v37, %v4014_v43  ;;  %v3998_v53 = vpop.f32.mrf.mxu1  ;;  %v8177_v37 = vld [vmem:[%s9019_s27 + $0x224] sm:$0xc]  ;;  %v8335_v43 = vld [vmem:[%s9019_s27 + $0x420] sm:$0xf] }
 0x357   : > { %8173 = vmatmul.msk.bf16.gmra.mxu2 %vm746_vm3, %v4933_v0  ;;  %v3614_v11 = vpop.f32.mrf.mxu3  ;;  %v3843_v33 = vpop.f32.mrf.mxu0  ;;  %v5086_v0 = vrot.slane %v8178_v35, 6  ;;  %v8199_v30 = vrot.slane %v8177_v37, 10  ;;  %v5696_v44 = vrot.slane %v8335_v43, 6  ;;  %v8291_v35 = vld [vmem:[%s9019_s27 + $0x434] sm:$0xf] }
 0x358   : > { %4063 = vst.msk [vmem:[#allocation2 + $0xe8] sm:$0xff] %vm746_vm3, %v4047_v16  ;;  %v3633_v36 = vadd.f32 %v3614_v11, %v10170_v29  ;;  %v4033_v16 = vld [vmem:[#allocation2 + $0xf8] sm:$0xff]  ;;  %v8334_v11 = vld [vmem:[%s9019_s27 + $0x41c] sm:$0xc] }
 0x359   : > { %v5087_v12 = vsel %vm9129_vm7, %v8199_v30, %v5086_v0  ;;  %v5698_v56 = vrot.slane %v5696_v44, 4 }
 0x35a   : > { %v3860_v22 = vadd.f32 %v3841_v26, %v3633_v36  ;;  %v10393_v39 = vpop.f32.mrf.mxu2  ;;  %v8603_v26 = vld [vmem:[%s9019_s27 + $0x3f0] sm:$0xff]  ;;  %v5088_v36 = vrot.slane %v5086_v0, 4 }
 0x35c   : > { %v4015_v29 = vadd.f32 %v3996_v20, %v3860_v22  ;;  %v5748_v20 = vunpack.c.l.b16 %v5693_v34  ;;  %v8356_v22 = vrot.slane %v8334_v11, 10  ;;  %v5090_v23 = vsel %vm9129_vm7, %v5088_v36, %v5089_v58  ;;  %v8182_v11 = vld [vmem:[%s9019_s27 + $0x248] sm:$0x3] }
 0x35d   : > { %v5523_v34 = vunpack.c.l.b16 %v5473_v45  ;;  %v5479_v58 = vrot.slane %v8292_v63, 5  ;;  %v8184_v63 = vld [vmem:[%s9019_s27 + $0x260] sm:$0xf] }
 0x35e   : > { %v4048_v15 = vadd.f32 %v4032_v1, %v4015_v29  ;;  %v4746_v52 = vpop.f32.mrf.mxu1  ;;  %v5763_v38 = vpack.c.b16 %v5748_v20, %v5747_v59 }
 0x35f   : > { %v3616_v54 = vpop.f32.mrf.mxu3  ;;  %v4590_v55 = vpop.f32.mrf.mxu0  ;;  %v5537_v20 = vpack.c.b16 %v5523_v34, %v5522_v6  ;;  %v8357_v6 = vrot.slane %v8337_v5, 10 }
 0x360   : > { %4064 = vst.msk [vmem:[#allocation2 + $0xf0] sm:$0xff] %vm746_vm3, %v4048_v15  ;;  %v3634_v51 = vadd.f32 %v3616_v54, %v10182_v19  ;;  %v5697_v54 = vsel %vm9129_vm7, %v8356_v22, %v5696_v44  ;;  %v5096_v22 = vrot.slane %v8182_v11, 6 }
 0x361   : > { %8323 = vmatmul.msk.bf16.vlgmr.msra.gmra.mxu1 %vm746_vm3, %v5536_v48 }
 0x362   : > { %v3861_v60 = vadd.f32 %v3843_v33, %v3634_v51  ;;  %v10409_v25 = vpop.f32.mrf.mxu2  ;;  %8276 = vmatmul.msk.bf16.vlgmr.msra.gmra.mxu0 %vm746_vm3, %v8603_v26  ;;  %v8336_v33 = vld [vmem:[%s9019_s27 + $0x424] sm:$0x3]  ;;  %v5139_v26 = vunpack.c.l.b16 %v5087_v12 }
 0x363   : > { %v5699_v29 = vrot.slane %v8336_v33, 6  ;;  %v8181_v51 = vld [vmem:[%s9019_s27 + $0x244] sm:$0xf] }
 0x364   : > { %v4016_v19 = vadd.f32 %v3998_v53, %v3861_v60  ;;  %8213 = vmatmul.msk.bf16.vlgmr.msra.gmra.mxu3 %vm746_vm3, %v5153_v32  ;;  %v5476_v32 = vrot.slane %v8291_v35, 5  ;;  %v8290_v60 = vld [vmem:[%s9019_s27 + $0x430] sm:$0xe] }
 0x365   : > { %v5700_v59 = vsel %vm9129_vm7, %v5698_v56, %v5699_v29  ;;  %v8310_v44 = vrot.slane %v8290_v60, 9 }
 0x366   : > { %v4049_v9 = vadd.f32 %v4033_v16, %v4016_v19  ;;  %v4748_v18 = vpop.f32.mrf.mxu1  ;;  %v5750_v43 = vunpack.c.l.b16 %v5700_v59  ;;  %v5093_v16 = vrot.slane %v8181_v51, 6  ;;  %v5478_v36 = vrot.slane %v5476_v32, 4 }
 0x367   : > { %8370 = vmatmul.msk.bf16.vlgmr.msra.gmra.mxu2 %vm746_vm3, %v5763_v38  ;;  %v4379_v53 = vpop.f32.mrf.mxu3  ;;  %v4592_v13 = vpop.f32.mrf.mxu0  ;;  %v8338_v38 = vld [vmem:[%s9019_s27 + $0x43c] sm:$0xf]  ;;  %v5477_v56 = vsel %vm9946_vm10, %v8310_v44, %v5476_v32 }
 0x368   : > { %4065 = vst.msk [vmem:[#allocation2 + $0xf8] sm:$0xff] %vm746_vm3, %v4049_v9  ;;  %v4380_v1 = vadd.f32 %v4379_v53, %v10190_v14  ;;  %v5140_v14 = vunpack.c.l.b16 %v5090_v23  ;;  %v5703_v45 = vrot.slane %v8338_v38, 6  ;;  %v5095_v53 = vrot.slane %v5093_v16, 4  ;;  %v8293_v38 = vld [vmem:[%s9019_s27 + $0x44c] sm:$0xe] }
 0x369   : > { %v5480_v29 = vsel %vm9946_vm10, %v5478_v36, %v5479_v58  ;;  %v8183_v44 = vld [vmem:[%s9019_s27 + $0x25c] sm:$0xc]  ;;  %v5100_v36 = vrot.slane %v8184_v63, 6  ;;  %v8341_v58 = vld [vmem:[%s9019_s27 + $0x458] sm:$0xf]  ;;  %v8311_v5 = vrot.slane %v8293_v38, 9 }
 0x36a   : > { %v4630_v48 = vadd.f32 %v4590_v55, %v4380_v1  ;;  %v4973_v15 = vpop.f32.mrf.mxu2  ;;  %v8604_v55 = vld [vmem:[%s9019_s27 + $0x40c] sm:$0xff]  ;;  %v5154_v49 = vpack.c.b16 %v5140_v14, %v5139_v26  ;;  %v8339_v1 = vld [vmem:[%s9019_s27 + $0x440] sm:$0x3]  ;;  %v5097_v35 = vsel %vm9129_vm7, %v5095_v53, %v5096_v22  ;;  %v5525_v14 = vunpack.c.l.b16 %v5480_v29 }
 0x36b   : > { %v5706_v26 = vrot.slane %v8339_v1, 6  ;;  %v5704_v32 = vsel %vm9129_vm7, %v8357_v6, %v5703_v45  ;;  %v5710_v29 = vrot.slane %v8341_v58, 6  ;;  %v8296_v58 = vld [vmem:[%s9019_s27 + $0x468] sm:$0xe] }
 0x36c   : > { %v4786_v4 = vadd.f32 %v4746_v52, %v4630_v48  ;;  %v5749_v52 = vunpack.c.l.b16 %v5697_v54 }
 0x36e   : > { %v10432_v8 = vadd.f32 %v4973_v15, %v4786_v4  ;;  %v4751_v47 = vpop.f32.mrf.mxu1  ;;  %v5764_v33 = vpack.c.b16 %v5750_v43, %v5749_v52  ;;  %v5705_v15 = vrot.slane %v5703_v45, 4  ;;  %v5524_v4 = vunpack.c.l.b16 %v5477_v56  ;;  %v8340_v56 = vld [vmem:[%s9019_s27 + $0x454] sm:$0xc] }
 0x36f   : > { %v4381_v37 = vpop.f32.mrf.mxu3  ;;  %v4595_v0 = vpop.f32.mrf.mxu0 }
 0x370   : > { %v4382_v62 = vadd.f32 %v4381_v37, %v10205_v40  ;;  %v8200_v40 = vrot.slane %v8180_v21, 10  ;;  %v5707_v37 = vsel %vm9129_vm7, %v5705_v15, %v5706_v26  ;;  %v5538_v52 = vpack.c.b16 %v5525_v14, %v5524_v4 }
 0x371   : > { %8324 = vmatmul.msk.bf16.gmra.mxu1 %vm746_vm3, %v5537_v20  ;;  %v8358_v4 = vrot.slane %v8340_v56, 10  ;;  %v8312_v56 = vrot.slane %v8296_v58, 9 }
 0x372   : > { %v4631_v19 = vadd.f32 %v4592_v13, %v4382_v62  ;;  %v4975_v30 = vpop.f32.mrf.mxu2  ;;  %8277 = vmatmul.msk.bf16.gmra.mxu0 %vm746_vm3, %v8604_v55  ;;  %v5094_v48 = vsel %vm9129_vm7, %v8200_v40, %v5093_v16  ;;  %v8294_v55 = vld [vmem:[%s9019_s27 + $0x450] sm:$0xf]  ;;  %v5752_v16 = vunpack.c.l.b16 %v5707_v37  ;;  %v8185_v40 = vld [vmem:[%s9019_s27 + $0x264] sm:$0x3] }
 0x373   : > { %v5141_v20 = vunpack.c.l.b16 %v5094_v48  ;;  %v5483_v62 = vrot.slane %v8294_v55, 5  ;;  %v5103_v6 = vrot.slane %v8185_v40, 6 }
 0x374   : > { %v4787_v9 = vadd.f32 %v4748_v18, %v4631_v19  ;;  %8214 = vmatmul.msk.bf16.gmra.mxu3 %vm746_vm3, %v5154_v49  ;;  %v8295_v19 = vld [vmem:[%s9019_s27 + $0x454] sm:$0x1] }
 0x375   : > { %v5485_v45 = vrot.slane %v5483_v62, 4  ;;  %v5486_v53 = vrot.slane %v8295_v19, 5  ;;  %v5484_v15 = vsel %vm9946_vm10, %v8311_v5, %v5483_v62  ;;  %v5711_v62 = vsel %vm9129_vm7, %v8358_v4, %v5710_v29  ;;  %v8187_v19 = vld [vmem:[%s9019_s27 + $0x27c] sm:$0xf]  ;;  %v8186_v5 = vld [vmem:[%s9019_s27 + $0x278] sm:$0xc] }
 0x376   : > { %v10447_v12 = vadd.f32 %v4975_v30, %v4787_v9  ;;  %v4753_v13 = vpop.f32.mrf.mxu1 }
 0x377   : > { %8371 = vmatmul.msk.bf16.gmra.mxu2 %vm746_vm3, %v5764_v33  ;;  %v4384_v18 = vpop.f32.mrf.mxu3  ;;  %v4597_v23 = vpop.f32.mrf.mxu0  ;;  %v5487_v26 = vsel %vm9946_vm10, %v5485_v45, %v5486_v53  ;;  %v5107_v45 = vrot.slane %v8187_v19, 6  ;;  %v8344_v53 = vld [vmem:[%s9019_s27 + $0x474] sm:$0xf] }
 0x378   : > { %v4385_v34 = vadd.f32 %v4384_v18, %v10218_v57  ;;  %v5142_v57 = vunpack.c.l.b16 %v5097_v35  ;;  %v5102_v18 = vrot.slane %v5100_v36, 4 }
 0x37a   : > { %v4632_v54 = vadd.f32 %v4595_v0, %v4385_v34  ;;  %v4978_v59 = vpop.f32.mrf.mxu2  ;;  %v8605_v0 = vld [vmem:[%s9019_s27 + $0x428] sm:$0xff]  ;;  %v5155_v11 = vpack.c.b16 %v5142_v57, %v5141_v20  ;;  %v8342_v34 = vld [vmem:[%s9019_s27 + $0x45c] sm:$0x3]  ;;  %v5104_v55 = vsel %vm9129_vm7, %v5102_v18, %v5103_v6  ;;  %v5527_v57 = vunpack.c.l.b16 %v5487_v26 }
 0x37b   : > { %v5713_v20 = vrot.slane %v8342_v34, 6  ;;  %v5717_v26 = vrot.slane %v8344_v53, 6  ;;  %v8299_v53 = vld [vmem:[%s9019_s27 + $0x484] sm:$0xe] }
 0x37c   : > { %v4788_v51 = vadd.f32 %v4751_v47, %v4632_v54  ;;  %v5751_v47 = vunpack.c.l.b16 %v5704_v32 }
 0x37e   : > { %v10464_v43 = vadd.f32 %v4978_v59, %v4788_v51  ;;  %v4756_v60 = vpop.f32.mrf.mxu1  ;;  %v5765_v22 = vpack.c.b16 %v5752_v16, %v5751_v47  ;;  %v5712_v59 = vrot.slane %v5710_v29, 4  ;;  %v5526_v51 = vunpack.c.l.b16 %v5484_v15  ;;  %v8343_v15 = vld [vmem:[%s9019_s27 + $0x470] sm:$0xc] }
 0x37f   : > { %v4386_v49 = vpop.f32.mrf.mxu3  ;;  %v4600_v21 = vpop.f32.mrf.mxu0 }
 0x380   : > { %v4387_v30 = vadd.f32 %v4386_v49, %v10233_v27  ;;  %v8201_v27 = vrot.slane %v8183_v44, 10  ;;  %v5714_v49 = vsel %vm9129_vm7, %v5712_v59, %v5713_v20  ;;  %v5539_v47 = vpack.c.b16 %v5527_v57, %v5526_v51 }
 0x381   : > { %8325 = vmatmul.msk.bf16.gmra.mxu1 %vm746_vm3, %v5538_v52  ;;  %v8359_v51 = vrot.slane %v8343_v15, 10  ;;  %v8313_v15 = vrot.slane %v8299_v53, 9 }
 0x382   : > { %v4633_v33 = vadd.f32 %v4597_v23, %v4387_v30  ;;  %v4980_v9 = vpop.f32.mrf.mxu2  ;;  %8278 = vmatmul.msk.bf16.gmra.mxu0 %vm746_vm3, %v8605_v0  ;;  %v5101_v54 = vsel %vm9129_vm7, %v8201_v27, %v5100_v36  ;;  %v8297_v0 = vld [vmem:[%s9019_s27 + $0x46c] sm:$0xf]  ;;  %v5754_v36 = vunpack.c.l.b16 %v5714_v49  ;;  %v8188_v27 = vld [vmem:[%s9019_s27 + $0x280] sm:$0x3] }
 0x383   : > { %v5143_v52 = vunpack.c.l.b16 %v5101_v54  ;;  %v5490_v30 = vrot.slane %v8297_v0, 5  ;;  %v5110_v4 = vrot.slane %v8188_v27, 6 }
 0x384   : > { %v4789_v1 = vadd.f32 %v4753_v13, %v4633_v33  ;;  %8215 = vmatmul.msk.bf16.gmra.mxu3 %vm746_vm3, %v5155_v11  ;;  %v8298_v33 = vld [vmem:[%s9019_s27 + $0x470] sm:$0x1] }
 0x385   : > { %v5492_v29 = vrot.slane %v5490_v30, 4  ;;  %v5493_v18 = vrot.slane %v8298_v33, 5  ;;  %v5491_v59 = vsel %vm9946_vm10, %v8312_v56, %v5490_v30  ;;  %v5718_v30 = vsel %vm9129_vm7, %v8359_v51, %v5717_v26  ;;  %v8190_v33 = vld [vmem:[%s9019_s27 + $0x298] sm:$0xf]  ;;  %v8189_v56 = vld [vmem:[%s9019_s27 + $0x294] sm:$0xc] }
 0x386   : > { %v10479_v48 = vadd.f32 %v4980_v9, %v4789_v1  ;;  %v4758_v23 = vpop.f32.mrf.mxu1 }
 0x387   : > { %8372 = vmatmul.msk.bf16.gmra.mxu2 %vm746_vm3, %v5765_v22  ;;  %v4389_v13 = vpop.f32.mrf.mxu3  ;;  %v4602_v35 = vpop.f32.mrf.mxu0  ;;  %v5494_v20 = vsel %vm9946_vm10, %v5492_v29, %v5493_v18  ;;  %v5114_v29 = vrot.slane %v8190_v33, 6  ;;  %v8347_v18 = vld [vmem:[%s9019_s27 + $0x490] sm:$0xf] }
 0x388   : > { %v4390_v14 = vadd.f32 %v4389_v13, %v10246_v3  ;;  %v5144_v3 = vunpack.c.l.b16 %v5104_v55  ;;  %v5109_v13 = vrot.slane %v5107_v45, 4 }
 0x38a   : > { %v4634_v32 = vadd.f32 %v4600_v21, %v4390_v14  ;;  %v4983_v37 = vpop.f32.mrf.mxu2  ;;  %v8606_v21 = vld [vmem:[%s9019_s27 + $0x444] sm:$0xff]  ;;  %v5156_v40 = vpack.c.b16 %v5144_v3, %v5143_v52  ;;  %v8345_v14 = vld [vmem:[%s9019_s27 + $0x478] sm:$0x3]  ;;  %v5111_v0 = vsel %vm9129_vm7, %v5109_v13, %v5110_v4  ;;  %v5529_v3 = vunpack.c.l.b16 %v5494_v20 }
 0x38b   : > { %v5720_v52 = vrot.slane %v8345_v14, 6  ;;  %v5724_v20 = vrot.slane %v8347_v18, 6  ;;  %v8302_v18 = vld [vmem:[%s9019_s27 + $0x4a0] sm:$0xe] }
 0x38c   : > { %v4790_v63 = vadd.f32 %v4756_v60, %v4634_v32  ;;  %v5753_v60 = vunpack.c.l.b16 %v5711_v62 }
 0x38e   : > { %v10496_v16 = vadd.f32 %v4983_v37, %v4790_v63  ;;  %v4761_v38 = vpop.f32.mrf.mxu1  ;;  %v5766_v6 = vpack.c.b16 %v5754_v36, %v5753_v60  ;;  %v5719_v37 = vrot.slane %v5717_v26, 4  ;;  %v5528_v63 = vunpack.c.l.b16 %v5491_v59  ;;  %v8346_v59 = vld [vmem:[%s9019_s27 + $0x48c] sm:$0xc] }
 0x38f   : > { %v4391_v11 = vpop.f32.mrf.mxu3  ;;  %v4605_v44 = vpop.f32.mrf.mxu0 }
 0x390   : > { %v4392_v9 = vadd.f32 %v4391_v11, %v10261_v17  ;;  %v8202_v17 = vrot.slane %v8186_v5, 10  ;;  %v5721_v11 = vsel %vm9129_vm7, %v5719_v37, %v5720_v52  ;;  %v5540_v60 = vpack.c.b16 %v5529_v3, %v5528_v63 }
 0x391   : > { %8326 = vmatmul.msk.bf16.gmra.mxu1 %vm746_vm3, %v5539_v47  ;;  %v8360_v63 = vrot.slane %v8346_v59, 10  ;;  %v8314_v59 = vrot.slane %v8302_v18, 9 }
 0x392   : > { %v4635_v22 = vadd.f32 %v4602_v35, %v4392_v9  ;;  %v4985_v1 = vpop.f32.mrf.mxu2  ;;  %8279 = vmatmul.msk.bf16.gmra.mxu0 %vm746_vm3, %v8606_v21  ;;  %v5108_v32 = vsel %vm9129_vm7, %v8202_v17, %v5107_v45  ;;  %v8300_v21 = vld [vmem:[%s9019_s27 + $0x488] sm:$0xf]  ;;  %v5756_v45 = vunpack.c.l.b16 %v5721_v11  ;;  %v8191_v17 = vld [vmem:[%s9019_s27 + $0x29c] sm:$0x3] }
 0x393   : > { %v5145_v47 = vunpack.c.l.b16 %v5108_v32  ;;  %v5497_v9 = vrot.slane %v8300_v21, 5  ;;  %v5117_v51 = vrot.slane %v8191_v17, 6 }
 0x394   : > { %v4791_v34 = vadd.f32 %v4758_v23, %v4635_v22  ;;  %8216 = vmatmul.msk.bf16.gmra.mxu3 %vm746_vm3, %v5156_v40  ;;  %v8301_v22 = vld [vmem:[%s9019_s27 + $0x48c] sm:$0x1] }
 0x395   : > { %v5499_v26 = vrot.slane %v5497_v9, 4  ;;  %v5500_v13 = vrot.slane %v8301_v22, 5  ;;  %v5498_v37 = vsel %vm9946_vm10, %v8313_v15, %v5497_v9  ;;  %v5725_v9 = vsel %vm9129_vm7, %v8360_v63, %v5724_v20  ;;  %v8193_v22 = vld [vmem:[%s9019_s27 + $0x2b4] sm:$0xf]  ;;  %v8192_v15 = vld [vmem:[%s9019_s27 + $0x2b0] sm:$0xc] }
 0x396   : > { %v10511_v54 = vadd.f32 %v4985_v1, %v4791_v34  ;;  %v4763_v35 = vpop.f32.mrf.mxu1 }
 0x397   : > { %8373 = vmatmul.msk.bf16.gmra.mxu2 %vm746_vm3, %v5766_v6  ;;  %v4394_v23 = vpop.f32.mrf.mxu3  ;;  %v4607_v55 = vpop.f32.mrf.mxu0  ;;  %v5501_v52 = vsel %vm9946_vm10, %v5499_v26, %v5500_v13  ;;  %v5121_v26 = vrot.slane %v8193_v22, 6  ;;  %v8350_v13 = vld [vmem:[%s9019_s27 + $0x4ac] sm:$0xf] }
 0x398   : > { %v4395_v57 = vadd.f32 %v4394_v23, %v10274_v41  ;;  %v5146_v41 = vunpack.c.l.b16 %v5111_v0  ;;  %v5116_v23 = vrot.slane %v5114_v29, 4 }
 0x39a   : > { %v4636_v62 = vadd.f32 %v4605_v44, %v4395_v57  ;;  %v4988_v49 = vpop.f32.mrf.mxu2  ;;  %v8607_v44 = vld [vmem:[%s9019_s27 + $0x460] sm:$0xff]  ;;  %v5157_v27 = vpack.c.b16 %v5146_v41, %v5145_v47  ;;  %v8348_v57 = vld [vmem:[%s9019_s27 + $0x494] sm:$0x3]  ;;  %v5118_v21 = vsel %vm9129_vm7, %v5116_v23, %v5117_v51  ;;  %v5531_v41 = vunpack.c.l.b16 %v5501_v52 }
 0x39b   : > { %v5727_v47 = vrot.slane %v8348_v57, 6  ;;  %v5731_v52 = vrot.slane %v8350_v13, 6  ;;  %v8305_v13 = vld [vmem:[%s9019_s27 + $0x4bc] sm:$0xe] }
 0x39c   : > { %v4792_v19 = vadd.f32 %v4761_v38, %v4636_v62  ;;  %v5755_v38 = vunpack.c.l.b16 %v5718_v30 }
 0x39e   : > { %v10528_v36 = vadd.f32 %v4988_v49, %v4792_v19  ;;  %v4766_v58 = vpop.f32.mrf.mxu1  ;;  %v5767_v4 = vpack.c.b16 %v5756_v45, %v5755_v38  ;;  %v5726_v49 = vrot.slane %v5724_v20, 4  ;;  %v5530_v19 = vunpack.c.l.b16 %v5498_v37  ;;  %v8349_v37 = vld [vmem:[%s9019_s27 + $0x4a8] sm:$0xc] }
 0x39f   : > { %v4396_v40 = vpop.f32.mrf.mxu3  ;;  %v4610_v5 = vpop.f32.mrf.mxu0 }
 0x3a0   : > { %v4397_v1 = vadd.f32 %v4396_v40, %v10289_v31  ;;  %v8203_v31 = vrot.slane %v8189_v56, 10  ;;  %v5728_v40 = vsel %vm9129_vm7, %v5726_v49, %v5727_v47  ;;  %v5541_v38 = vpack.c.b16 %v5531_v41, %v5530_v19 }
 0x3a1   : > { %8327 = vmatmul.msk.bf16.gmra.mxu1 %vm746_vm3, %v5540_v60  ;;  %v8361_v19 = vrot.slane %v8349_v37, 10  ;;  %v8315_v37 = vrot.slane %v8305_v13, 9 }
 0x3a2   : > { %v4637_v6 = vadd.f32 %v4607_v55, %v4397_v1  ;;  %v4990_v34 = vpop.f32.mrf.mxu2  ;;  %8280 = vmatmul.msk.bf16.gmra.mxu0 %vm746_vm3, %v8607_v44  ;;  %v5115_v62 = vsel %vm9129_vm7, %v8203_v31, %v5114_v29  ;;  %v8303_v44 = vld [vmem:[%s9019_s27 + $0x4a4] sm:$0xf]  ;;  %v5758_v29 = vunpack.c.l.b16 %v5728_v40  ;;  %v8194_v31 = vld [vmem:[%s9019_s27 + $0x2b8] sm:$0x3] }
 0x3a3   : > { %v5147_v60 = vunpack.c.l.b16 %v5115_v62  ;;  %v5504_v1 = vrot.slane %v8303_v44, 5  ;;  %v5124_v63 = vrot.slane %v8194_v31, 6 }
 0x3a4   : > { %v4793_v14 = vadd.f32 %v4763_v35, %v4637_v6  ;;  %8217 = vmatmul.msk.bf16.gmra.mxu3 %vm746_vm3, %v5157_v27  ;;  %v8304_v6 = vld [vmem:[%s9019_s27 + $0x4a8] sm:$0x1] }
 0x3a5   : > { %v5506_v20 = vrot.slane %v5504_v1, 4  ;;  %v5507_v23 = vrot.slane %v8304_v6, 5  ;;  %v5505_v49 = vsel %vm9946_vm10, %v8314_v59, %v5504_v1  ;;  %v5732_v1 = vsel %vm9129_vm7, %v8361_v19, %v5731_v52  ;;  %v8196_v6 = vld [vmem:[%s9019_s27 + $0x2d0] sm:$0xf]  ;;  %v8195_v59 = vld [vmem:[%s9019_s27 + $0x2cc] sm:$0xc] }
 0x3a6   : > { %v10543_v32 = vadd.f32 %v4990_v34, %v4793_v14  ;;  %v4768_v55 = vpop.f32.mrf.mxu1 }
 0x3a7   : > { %8374 = vmatmul.msk.bf16.gmra.mxu2 %vm746_vm3, %v5767_v4  ;;  %v4399_v35 = vpop.f32.mrf.mxu3  ;;  %v4612_v0 = vpop.f32.mrf.mxu0  ;;  %v5508_v47 = vsel %vm9946_vm10, %v5506_v20, %v5507_v23  ;;  %v5128_v20 = vrot.slane %v8196_v6, 6  ;;  %v8353_v23 = vld [vmem:[%s9019_s27 + $0x4c8] sm:$0xf] }
 0x3a8   : > { %v4400_v3 = vadd.f32 %v4399_v35, %v10302_v24  ;;  %v5148_v24 = vunpack.c.l.b16 %v5118_v21  ;;  %v5123_v35 = vrot.slane %v5121_v26, 4 }
 0x3aa   : > { %v4638_v30 = vadd.f32 %v4610_v5, %v4400_v3  ;;  %v4993_v11 = vpop.f32.mrf.mxu2  ;;  %v8608_v5 = vld [vmem:[%s9019_s27 + $0x47c] sm:$0xff]  ;;  %v5158_v17 = vpack.c.b16 %v5148_v24, %v5147_v60  ;;  %v8351_v3 = vld [vmem:[%s9019_s27 + $0x4b0] sm:$0x3]  ;;  %v5125_v44 = vsel %vm9129_vm7, %v5123_v35, %v5124_v63  ;;  %v5533_v24 = vunpack.c.l.b16 %v5508_v47 }
 0x3ab   : > { %v5734_v60 = vrot.slane %v8351_v3, 6  ;;  %v5738_v47 = vrot.slane %v8353_v23, 6 }
 0x3ac   : > { %v4794_v33 = vadd.f32 %v4766_v58, %v4638_v30  ;;  %v5757_v58 = vunpack.c.l.b16 %v5725_v9 }
 0x3ae   : > { %v10560_v45 = vadd.f32 %v4993_v11, %v4794_v33  ;;  %v4771_v53 = vpop.f32.mrf.mxu1  ;;  %v5768_v51 = vpack.c.b16 %v5758_v29, %v5757_v58  ;;  %v5733_v11 = vrot.slane %v5731_v52, 4  ;;  %v5532_v33 = vunpack.c.l.b16 %v5505_v49  ;;  %v8352_v49 = vld [vmem:[%s9019_s27 + $0x4c4] sm:$0xc] }
 0x3af   : > { %v4401_v27 = vpop.f32.mrf.mxu3  ;;  %v4615_v56 = vpop.f32.mrf.mxu0 }
 0x3b0   : > { %v4402_v34 = vadd.f32 %v4401_v27, %v10317_v10  ;;  %v8204_v10 = vrot.slane %v8192_v15, 10  ;;  %v5735_v27 = vsel %vm9129_vm7, %v5733_v11, %v5734_v60  ;;  %v5542_v58 = vpack.c.b16 %v5533_v24, %v5532_v33 }
 0x3b1   : > { %8328 = vmatmul.msk.bf16.gmra.mxu1 %vm746_vm3, %v5541_v38  ;;  %v8362_v33 = vrot.slane %v8352_v49, 10 }
 0x3b2   : > { %v4639_v4 = vadd.f32 %v4612_v0, %v4402_v34  ;;  %v4995_v14 = vpop.f32.mrf.mxu2  ;;  %8281 = vmatmul.msk.bf16.gmra.mxu0 %vm746_vm3, %v8608_v5  ;;  %v5122_v30 = vsel %vm9129_vm7, %v8204_v10, %v5121_v26  ;;  %v8306_v5 = vld [vmem:[%s9019_s27 + $0x4c0] sm:$0xf]  ;;  %v5760_v26 = vunpack.c.l.b16 %v5735_v27  ;;  %v8197_v10 = vld [vmem:[%s9019_s27 + $0x2d4] sm:$0x3] }
 0x3b3   : > { %v5149_v38 = vunpack.c.l.b16 %v5122_v30  ;;  %v5511_v34 = vrot.slane %v8306_v5, 5  ;;  %v5131_v19 = vrot.slane %v8197_v10, 6  ;;  %v5739_v6 = vsel %vm9129_vm7, %v8362_v33, %v5738_v47 }
 0x3b4   : > { %v4795_v57 = vadd.f32 %v4768_v55, %v4639_v4  ;;  %8218 = vmatmul.msk.bf16.gmra.mxu3 %vm746_vm3, %v5158_v17  ;;  %v8307_v4 = vld [vmem:[%s9019_s27 + $0x4c4] sm:$0x1] }
 0x3b5   : > { %v5513_v52 = vrot.slane %v5511_v34, 4  ;;  %v5514_v35 = vrot.slane %v8307_v4, 5  ;;  %v5512_v11 = vsel %vm9946_vm10, %v8315_v37, %v5511_v34 }
 0x3b6   : > { %v10575_v62 = vadd.f32 %v4995_v14, %v4795_v57  ;;  %v4773_v0 = vpop.f32.mrf.mxu1 }
 0x3b7   : > { %8375 = vmatmul.msk.bf16.gmra.mxu2 %vm746_vm3, %v5768_v51  ;;  %v4404_v55 = vpop.f32.mrf.mxu3  ;;  %v4617_v21 = vpop.f32.mrf.mxu0  ;;  %v5515_v60 = vsel %vm9946_vm10, %v5513_v52, %v5514_v35 }
 0x3b8   : > { %v4405_v41 = vadd.f32 %v4404_v55, %v10330_v50  ;;  %v5150_v50 = vunpack.c.l.b16 %v5125_v44  ;;  %v5130_v55 = vrot.slane %v5128_v20, 4 }
 0x3ba   : > { %v4640_v9 = vadd.f32 %v4615_v56, %v4405_v41  ;;  %v4998_v40 = vpop.f32.mrf.mxu2  ;;  %v8609_v56 = vld [vmem:[%s9019_s27 + $0x498] sm:$0xff]  ;;  %v5159_v31 = vpack.c.b16 %v5150_v50, %v5149_v38  ;;  %v8354_v41 = vld [vmem:[%s9019_s27 + $0x4cc] sm:$0x3]  ;;  %v5132_v5 = vsel %vm9129_vm7, %v5130_v55, %v5131_v19  ;;  %v5535_v50 = vunpack.c.l.b16 %v5515_v60 }
 0x3bb   : > { %v5741_v38 = vrot.slane %v8354_v41, 6 }
 0x3bc   : > { %v4796_v22 = vadd.f32 %v4771_v53, %v4640_v9  ;;  %v5759_v53 = vunpack.c.l.b16 %v5732_v1 }
 0x3be   : > { %v10592_v29 = vadd.f32 %v4998_v40, %v4796_v22  ;;  %v4776_v18 = vpop.f32.mrf.mxu1  ;;  %v5769_v63 = vpack.c.b16 %v5760_v26, %v5759_v53  ;;  %v5740_v40 = vrot.slane %v5738_v47, 4  ;;  %v5534_v22 = vunpack.c.l.b16 %v5512_v11  ;;  %v8610_v26 = vld [vmem:[%s9019_s27 + $0x4b4] sm:$0xff] }
 0x3bf   : > { %v4406_v17 = vpop.f32.mrf.mxu3  ;;  %v4620_v15 = vpop.f32.mrf.mxu0 }
 0x3c0   : > { %v4407_v14 = vadd.f32 %v4406_v17, %v10345_v46  ;;  %v8205_v46 = vrot.slane %v8195_v59, 10  ;;  %v5543_v34 = vpack.c.b16 %v5535_v50, %v5534_v22 }
 0x3c1   : > { %8329 = vmatmul.msk.bf16.gmra.mxu1 %vm746_vm3, %v5542_v58 }
 0x3c2   : > { %v4641_v51 = vadd.f32 %v4617_v21, %v4407_v14  ;;  %v5000_v57 = vpop.f32.mrf.mxu2  ;;  %8282 = vmatmul.msk.bf16.gmra.mxu0 %vm746_vm3, %v8609_v56  ;;  %v5129_v9 = vsel %vm9129_vm7, %v8205_v46, %v5128_v20  ;;  %v5152_v56 = vunpack.c.l.b16 %v5132_v5  ;;  %v5761_v14 = vunpack.c.l.b16 %v5739_v6 }
 0x3c3   : > { %v5151_v27 = vunpack.c.l.b16 %v5129_v9 }
 0x3c4   : > { %v4797_v3 = vadd.f32 %v4773_v0, %v4641_v51  ;;  %8219 = vmatmul.msk.bf16.gmra.mxu3 %vm746_vm3, %v5159_v31 }
 0x3c5   : > { %v5160_v59 = vpack.c.b16 %v5152_v56, %v5151_v27  ;;  %v5868_v56 = vld [vmem:[#allocation2 + $0x108] sm:$0xff] }
 0x3c6   : > { %v10607_v30 = vadd.f32 %v5000_v57, %v4797_v3  ;;  %v4778_v21 = vpop.f32.mrf.mxu1 }
 0x3c7   : > { %8376 = vmatmul.msk.bf16.gmra.mxu2 %vm746_vm3, %v5769_v63  ;;  %v4409_v0 = vpop.f32.mrf.mxu3  ;;  %v4622_v44 = vpop.f32.mrf.mxu0 }
 0x3c8   : > { %v4410_v24 = vadd.f32 %v4409_v0, %v10358_v42  ;;  %v5742_v42 = vsel %vm9129_vm7, %v5740_v40, %v5741_v38  ;;  %v5867_v40 = vld [vmem:[#allocation2 + $0x100] sm:$0xff] }
 0x3c9   : > { %v5762_v31 = vunpack.c.l.b16 %v5742_v42 }
 0x3ca   : > { %v4642_v61 = vadd.f32 %v4620_v15, %v4410_v24  ;;  %v5003_v1 = vpop.f32.mrf.mxu2 }
 0x3cb   : > { %v5770_v28 = vpack.c.b16 %v5762_v31, %v5761_v14  ;;  %v5869_v31 = vld [vmem:[#allocation2 + $0x110] sm:$0xff] }
 0x3cc   : > { %v4798_v58 = vadd.f32 %v4776_v18, %v4642_v61 }
 0x3ce   : > { %v10623_v17 = vadd.f32 %v5003_v1, %v4798_v58  ;;  %v4781_v53 = vpop.f32.mrf.mxu1 }
 0x3cf   : > { %v4411_v13 = vpop.f32.mrf.mxu3  ;;  %v4625_v4 = vpop.f32.mrf.mxu0 }
 0x3d0   : > { %v4412_v15 = vadd.f32 %v4411_v13, %v10375_v2 }
 0x3d1   : > { %8330 = vmatmul.msk.bf16.gmra.mxu1 %vm746_vm3, %v5543_v34 }
 0x3d2   : > { %v4643_v18 = vadd.f32 %v4622_v44, %v4412_v15  ;;  %v5005_v20 = vpop.f32.mrf.mxu2  ;;  %8283 = vmatmul.msk.bf16.gmra.mxu0 %vm746_vm3, %v8610_v26 }
 0x3d4   : > { %v4799_v23 = vadd.f32 %v4778_v21, %v4643_v18  ;;  %8220 = vmatmul.msk.bf16.gmra.mxu3 %vm746_vm3, %v5160_v59 }
 0x3d6   : > { %v10630_v51 = vadd.f32 %v5005_v20, %v4799_v23  ;;  %v4783_v57 = vpop.f32.mrf.mxu1 }
 0x3d7   : > { %8377 = vmatmul.msk.bf16.gmra.mxu2 %vm746_vm3, %v5770_v28  ;;  %v4414_v10 = vpop.f32.mrf.mxu3  ;;  %v4627_v37 = vpop.f32.mrf.mxu0 }
 0x3d8   : > { %v4415_v2 = vadd.f32 %v4414_v10, %v10393_v39 }
 0x3da   : > { %v4644_v52 = vadd.f32 %v4625_v4, %v4415_v2  ;;  %v5008_v35 = vpop.f32.mrf.mxu2 }
 0x3dc   : > { %v4800_v63 = vadd.f32 %v4781_v53, %v4644_v52 }
 0x3de   : > { %v10634_v3 = vadd.f32 %v5008_v35, %v4800_v63  ;;  %v5583_v46 = vpop.f32.mrf.mxu1 }
 0x3df   : > { %v4416_v49 = vpop.f32.mrf.mxu3  ;;  %v5356_v47 = vpop.f32.mrf.mxu0 }
 0x3e0   : > { %v4417_v55 = vadd.f32 %v4416_v49, %v10409_v25 }
 0x3e2   : > { %v4645_v19 = vadd.f32 %v4627_v37, %v4417_v55  ;;  %v5010_v41 = vpop.f32.mrf.mxu2  ;;  %v5870_v37 = vld [vmem:[#allocation2 + $0x118] sm:$0xff] }
 0x3e4   : > { %v4801_v21 = vadd.f32 %v4783_v57, %v4645_v19  ;;  %v5871_v19 = vld [vmem:[#allocation2 + $0x120] sm:$0xff] }
 0x3e6   : > { %v10637_v11 = vadd.f32 %v5010_v41, %v4801_v21  ;;  %v5585_v60 = vpop.f32.mrf.mxu1 }
 0x3e7   : > { %v5200_v0 = vpop.f32.mrf.mxu3  ;;  %v5358_v44 = vpop.f32.mrf.mxu0 }
 0x3e8   : > { %v5240_v39 = vadd.f32 %v5200_v0, %v10432_v8 }
 0x3ea   : > { %v5396_v33 = vadd.f32 %v5356_v47, %v5240_v39  ;;  %v5810_v24 = vpop.f32.mrf.mxu2 }
 0x3ec   : > { %v5623_v9 = vadd.f32 %v5583_v46, %v5396_v33 }
 0x3ee   : > { %v5850_v38 = vadd.f32 %v5810_v24, %v5623_v9  ;;  %v5588_v5 = vpop.f32.mrf.mxu1  ;;  %v5872_v9 = vld [vmem:[#allocation2 + $0x128] sm:$0xff] }
 0x3ef   : > { %v5202_v22 = vpop.f32.mrf.mxu3  ;;  %v5361_v50 = vpop.f32.mrf.mxu0 }
 0x3f0   : > { %v5883_v61 = vadd.f32 %v5867_v40, %v5850_v38  ;;  %v5241_v25 = vadd.f32 %v5202_v22, %v10447_v12 }
 0x3f2   : > { %5899 = vst.msk [vmem:[#allocation2 + $0x100] sm:$0xff] %vm746_vm3, %v5883_v61  ;;  %v5397_v1 = vadd.f32 %v5358_v44, %v5241_v25  ;;  %v5812_v27 = vpop.f32.mrf.mxu2 }
 0x3f4   : > { %v5624_v58 = vadd.f32 %v5585_v60, %v5397_v1 }
 0x3f6   : > { %v5851_v6 = vadd.f32 %v5812_v27, %v5624_v58  ;;  %v5590_v42 = vpop.f32.mrf.mxu1  ;;  %v5873_v27 = vld [vmem:[#allocation2 + $0x130] sm:$0xff] }
 0x3f7   : > { %v5205_v8 = vpop.f32.mrf.mxu3  ;;  %v5363_v34 = vpop.f32.mrf.mxu0 }
 0x3f8   : > { %v5884_v53 = vadd.f32 %v5868_v56, %v5851_v6  ;;  %v5242_v26 = vadd.f32 %v5205_v8, %v10464_v43 }
 0x3fa   : > { %5900 = vst.msk [vmem:[#allocation2 + $0x108] sm:$0xff] %vm746_vm3, %v5884_v53  ;;  %v5398_v13 = vadd.f32 %v5361_v50, %v5242_v26  ;;  %v5815_v4 = vpop.f32.mrf.mxu2 }
 0x3fc   : > { %v5625_v14 = vadd.f32 %v5588_v5, %v5398_v13  ;;  %v5874_v13 = vld [vmem:[#allocation2 + $0x138] sm:$0xff] }
 0x3fe   : > { %v5852_v12 = vadd.f32 %v5815_v4, %v5625_v14  ;;  %v5593_v15 = vpop.f32.mrf.mxu1 }
 0x3ff   : > { %v5207_v59 = vpop.f32.mrf.mxu3  ;;  %v5366_v18 = vpop.f32.mrf.mxu0 }
 0x400   : > { %v5885_v20 = vadd.f32 %v5869_v31, %v5852_v12  ;;  %v5243_v28 = vadd.f32 %v5207_v59, %v10479_v48 }
 0x402   : > { %5901 = vst.msk [vmem:[#allocation2 + $0x110] sm:$0xff] %vm746_vm3, %v5885_v20  ;;  %v5399_v23 = vadd.f32 %v5363_v34, %v5243_v28  ;;  %v5817_v57 = vpop.f32.mrf.mxu2  ;;  %v5875_v28 = vld [vmem:[#allocation2 + $0x140] sm:$0xff] }
 0x404   : > { %v5626_v10 = vadd.f32 %v5590_v42, %v5399_v23 }
 0x406   : > { %v5853_v43 = vadd.f32 %v5817_v57, %v5626_v10  ;;  %v5595_v2 = vpop.f32.mrf.mxu1 }
 0x407   : > { %v5210_v52 = vpop.f32.mrf.mxu3  ;;  %v5368_v35 = vpop.f32.mrf.mxu0 }
 0x408   : > { %v5886_v63 = vadd.f32 %v5870_v37, %v5853_v43  ;;  %v5244_v46 = vadd.f32 %v5210_v52, %v10496_v16 }
 0x40a   : > { %5902 = vst.msk [vmem:[#allocation2 + $0x118] sm:$0xff] %vm746_vm3, %v5886_v63  ;;  %v5400_v49 = vadd.f32 %v5366_v18, %v5244_v46  ;;  %v5820_v47 = vpop.f32.mrf.mxu2  ;;  %v5876_v63 = vld [vmem:[#allocation2 + $0x148] sm:$0xff] }
 0x40c   : > { %v5627_v55 = vadd.f32 %v5593_v15, %v5400_v49 }
 0x40e   : > { %v5854_v48 = vadd.f32 %v5820_v47, %v5627_v55  ;;  %v5598_v41 = vpop.f32.mrf.mxu1 }
 0x40f   : > { %v5212_v21 = vpop.f32.mrf.mxu3  ;;  %v5371_v60 = vpop.f32.mrf.mxu0 }
 0x410   : > { %v5887_v0 = vadd.f32 %v5871_v19, %v5854_v48  ;;  %v5245_v44 = vadd.f32 %v5212_v21, %v10511_v54 }
 0x412   : > { %5903 = vst.msk [vmem:[#allocation2 + $0x120] sm:$0xff] %vm746_vm3, %v5887_v0  ;;  %v5401_v39 = vadd.f32 %v5368_v35, %v5245_v44  ;;  %v5822_v33 = vpop.f32.mrf.mxu2 }
 0x414   : > { %v5628_v24 = vadd.f32 %v5595_v2, %v5401_v39 }
 0x416   : > { %v5855_v16 = vadd.f32 %v5822_v33, %v5628_v24  ;;  %v5600_v40 = vpop.f32.mrf.mxu1 }
 0x417   : > { %v5215_v38 = vpop.f32.mrf.mxu3  ;;  %v5373_v5 = vpop.f32.mrf.mxu0 }
 0x418   : > { %v5888_v22 = vadd.f32 %v5872_v9, %v5855_v16  ;;  %v5246_v50 = vadd.f32 %v5215_v38, %v10528_v36 }
 0x41a   : > { %5904 = vst.msk [vmem:[#allocation2 + $0x128] sm:$0xff] %vm746_vm3, %v5888_v22  ;;  %v5402_v61 = vadd.f32 %v5371_v60, %v5246_v50  ;;  %v5825_v25 = vpop.f32.mrf.mxu2 }
 0x41c   : > { %v5629_v1 = vadd.f32 %v5598_v41, %v5402_v61 }
 0x41e   : > { %v5856_v54 = vadd.f32 %v5825_v25, %v5629_v1  ;;  %v5603_v58 = vpop.f32.mrf.mxu1 }
 0x41f   : > { %v5217_v56 = vpop.f32.mrf.mxu3  ;;  %v5376_v6 = vpop.f32.mrf.mxu0 }
 0x420   : > { %v5889_v42 = vadd.f32 %v5873_v27, %v5856_v54  ;;  %v5247_v8 = vadd.f32 %v5217_v56, %v10543_v32  ;;  %v5879_v27 = vld [vmem:[#allocation2 + $0x160] sm:$0xff] }
 0x422   : > { %5905 = vst.msk [vmem:[#allocation2 + $0x130] sm:$0xff] %vm746_vm3, %v5889_v42  ;;  %v5403_v34 = vadd.f32 %v5373_v5, %v5247_v8  ;;  %v5827_v53 = vpop.f32.mrf.mxu2 }
 0x424   : > { %v5630_v26 = vadd.f32 %v5600_v40, %v5403_v34 }
 0x426   : > { %v5857_v36 = vadd.f32 %v5827_v53, %v5630_v26  ;;  %v5605_v4 = vpop.f32.mrf.mxu1  ;;  %v5880_v26 = vld [vmem:[#allocation2 + $0x168] sm:$0xff] }
 0x427   : > { %v5220_v14 = vpop.f32.mrf.mxu3  ;;  %v5378_v31 = vpop.f32.mrf.mxu0 }
 0x428   : > { %v5890_v12 = vadd.f32 %v5874_v13, %v5857_v36  ;;  %v5248_v15 = vadd.f32 %v5220_v14, %v10560_v45 }
 0x42a   : > { %5906 = vst.msk [vmem:[#allocation2 + $0x138] sm:$0xff] %vm746_vm3, %v5890_v12  ;;  %v5404_v59 = vadd.f32 %v5376_v6, %v5248_v15  ;;  %v5830_v18 = vpop.f32.mrf.mxu2 }
 0x42c   : > { %v5631_v20 = vadd.f32 %v5603_v58, %v5404_v59 }
 0x42e   : > { %v5858_v32 = vadd.f32 %v5830_v18, %v5631_v20  ;;  %v5608_v43 = vpop.f32.mrf.mxu1  ;;  %v5881_v18 = vld [vmem:[#allocation2 + $0x170] sm:$0xff] }
 0x42f   : > { %v5222_v23 = vpop.f32.mrf.mxu3  ;;  %v5381_v57 = vpop.f32.mrf.mxu0 }
 0x430   : > { %v5891_v10 = vadd.f32 %v5875_v28, %v5858_v32  ;;  %v5249_v37 = vadd.f32 %v5222_v23, %v10575_v62  ;;  %v5877_v62 = vld [vmem:[#allocation2 + $0x150] sm:$0xff] }
 0x432   : > { %5907 = vst.msk [vmem:[#allocation2 + $0x140] sm:$0xff] %vm746_vm3, %v5891_v10  ;;  %v5405_v2 = vadd.f32 %v5378_v31, %v5249_v37  ;;  %v5832_v52 = vpop.f32.mrf.mxu2 }
 0x434   : > { %v5632_v35 = vadd.f32 %v5605_v4, %v5405_v2 }
 0x436   : > { %v5859_v45 = vadd.f32 %v5832_v52, %v5632_v35  ;;  %v5610_v41 = vpop.f32.mrf.mxu1 }
 0x437   : > { %v5225_v46 = vpop.f32.mrf.mxu3  ;;  %v5383_v55 = vpop.f32.mrf.mxu0 }
 0x438   : > { %v5892_v49 = vadd.f32 %v5876_v63, %v5859_v45  ;;  %v5250_v47 = vadd.f32 %v5225_v46, %v10592_v29  ;;  %v5878_v29 = vld [vmem:[#allocation2 + $0x158] sm:$0xff] }
 0x43a   : > { %5908 = vst.msk [vmem:[#allocation2 + $0x148] sm:$0xff] %vm746_vm3, %v5892_v49  ;;  %v5406_v19 = vadd.f32 %v5381_v57, %v5250_v47  ;;  %v5835_v48 = vpop.f32.mrf.mxu2 }
 0x43c   : > { %v5633_v21 = vadd.f32 %v5608_v43, %v5406_v19 }
 0x43e   : > { %v5860_v60 = vadd.f32 %v5835_v48, %v5633_v21  ;;  %v5613_v40 = vpop.f32.mrf.mxu1 }
 0x43f   : > { %v5227_v0 = vpop.f32.mrf.mxu3  ;;  %v5386_v9 = vpop.f32.mrf.mxu0 }
 0x440   : > { %v5893_v44 = vadd.f32 %v5877_v62, %v5860_v60  ;;  %v5251_v39 = vadd.f32 %v5227_v0, %v10607_v30 }
 0x442   : > { %5909 = vst.msk [vmem:[#allocation2 + $0x150] sm:$0xff] %vm746_vm3, %v5893_v44  ;;  %v5407_v33 = vadd.f32 %v5383_v55, %v5251_v39  ;;  %v5837_v24 = vpop.f32.mrf.mxu2 }
 0x444   : > { %v5634_v16 = vadd.f32 %v5610_v41, %v5407_v33 }
 0x446   : > { %v5861_v38 = vadd.f32 %v5837_v24, %v5634_v16  ;;  %v5615_v58 = vpop.f32.mrf.mxu1 }
 0x447   : > { %v5230_v5 = vpop.f32.mrf.mxu3  ;;  %v5388_v30 = vpop.f32.mrf.mxu0 }
 0x448   : > { %v5894_v22 = vadd.f32 %v5878_v29, %v5861_v38  ;;  %v5252_v50 = vadd.f32 %v5230_v5, %v10623_v17 }
 0x44a   : > { %5910 = vst.msk [vmem:[#allocation2 + $0x158] sm:$0xff] %vm746_vm3, %v5894_v22  ;;  %v5408_v61 = vadd.f32 %v5386_v9, %v5252_v50  ;;  %v5840_v25 = vpop.f32.mrf.mxu2 }
 0x44c   : > { %v5635_v1 = vadd.f32 %v5613_v40, %v5408_v61 }
 0x44e   : > { %v5862_v54 = vadd.f32 %v5840_v25, %v5635_v1  ;;  %v5618_v31 = vpop.f32.mrf.mxu1 }
 0x44f   : > { %v5232_v56 = vpop.f32.mrf.mxu3  ;;  %v5391_v13 = vpop.f32.mrf.mxu0 }
 0x450   : > { %v5895_v6 = vadd.f32 %v5879_v27, %v5862_v54  ;;  %v5253_v42 = vadd.f32 %v5232_v56, %v10630_v51 }
 0x452   : > { %5911 = vst.msk [vmem:[#allocation2 + $0x160] sm:$0xff] %vm746_vm3, %v5895_v6  ;;  %v5409_v8 = vadd.f32 %v5388_v30, %v5253_v42  ;;  %v5842_v34 = vpop.f32.mrf.mxu2 }
 0x454   : > { %v5636_v53 = vadd.f32 %v5615_v58, %v5409_v8 }
 0x456   : > { %v5863_v17 = vadd.f32 %v5842_v34, %v5636_v53  ;;  %v5620_v10 = vpop.f32.mrf.mxu1 }
 0x457   : > { %v5235_v36 = vpop.f32.mrf.mxu3  ;;  %v5393_v23 = vpop.f32.mrf.mxu0 }
 0x458   : > { %v5896_v4 = vadd.f32 %v5880_v26, %v5863_v17  ;;  %v5254_v14 = vadd.f32 %v5235_v36, %v10634_v3  ;;  %v5882_v3 = vld [vmem:[#allocation2 + $0x178] sm:$0xff] }
 0x45a   : > { %5912 = vst.msk [vmem:[#allocation2 + $0x168] sm:$0xff] %vm746_vm3, %v5896_v4  ;;  %v5410_v12 = vadd.f32 %v5391_v13, %v5254_v14  ;;  %v5845_v15 = vpop.f32.mrf.mxu2 }
 0x45c   : > { %v5637_v59 = vadd.f32 %v5618_v31, %v5410_v12 }
 0x45e   : > { %v5864_v51 = vadd.f32 %v5845_v15, %v5637_v59 }
 0x45f   : > { %v5237_v20 = vpop.f32.mrf.mxu3 }
 0x460   : > { %v5897_v28 = vadd.f32 %v5881_v18, %v5864_v51  ;;  %v5255_v32 = vadd.f32 %v5237_v20, %v10637_v11 }
 0x462   : > { %5913 = vst.msk [vmem:[#allocation2 + $0x170] sm:$0xff] %vm746_vm3, %v5897_v28  ;;  %v5411_v57 = vadd.f32 %v5393_v23, %v5255_v32  ;;  %v5847_v43 = vpop.f32.mrf.mxu2 }
 0x464   : > { %v5638_v37 = vadd.f32 %v5620_v10, %v5411_v57 }
 0x466   : > { %v5865_v2 = vadd.f32 %v5847_v43, %v5638_v37  ;;  %5918 = sbr.rel (%p8378_p4) target bundleno = 1480 (0x5c8), region = 68 }
 0x468   : > { %v5898_v52 = vadd.f32 %v5882_v3, %v5865_v2 }
 0x46a   : > { %5914 = vst.msk [vmem:[#allocation2 + $0x178] sm:$0xff] %vm746_vm3, %v5898_v52 }
 0x46b   : > { %v8614_v11 = vld [vmem:[%s10993_s7] sm:$0xff]  ;;  %v8381_v45 = vld [vmem:[%s9007_s28 + $0x68] sm:$0x7]  ;;  %v8383_v39 = vld [vmem:[%s9007_s28 + $0x74] sm:$0xf] }
 0x46c   : > { %v8379_v35 = vld [vmem:[%s9007_s28 + $0x60] sm:$0x8]  ;;  %v8380_v63 = vld [vmem:[%s9007_s28 + $0x64] sm:$0xf]  ;;  %6090 = vmatpush.bf16.msra.mxu0 %v8614_v11  ;;  %8622 = vmatpush.bf16.msra.mxu2 %v8614_v11  ;;  %v5972_v55 = vrot.slane %v8381_v45, 7  ;;  %v5976_v5 = vrot.slane %v8383_v39, 7 }
 0x46d   : > { %v8403_v46 = vrot.slane %v8379_v35, 11  ;;  %v5969_v49 = vrot.slane %v8380_v63, 7  ;;  %v8391_v47 = vld [vmem:[%s9007_s28 + $0xa0] sm:$0x8]  ;;  %v8392_v19 = vld [vmem:[%s9007_s28 + $0xa4] sm:$0xf] }
 0x46e   : > { %v8393_v48 = vld [vmem:[%s9007_s28 + $0xa8] sm:$0x7]  ;;  %v8407_v41 = vrot.slane %v8391_v47, 11  ;;  %v5997_v60 = vrot.slane %v8392_v19, 7  ;;  %v8395_v40 = vld [vmem:[%s9007_s28 + $0xb4] sm:$0xf] }
 0x46f   : > { %v5970_v21 = vsel %vm9106_vm4, %v8403_v46, %v5969_v49  ;;  %v5971_v62 = vrot.slane %v5969_v49, 4  ;;  %v6000_v0 = vrot.slane %v8393_v48, 7  ;;  %v8382_v61 = vld [vmem:[%s9007_s28 + $0x70] sm:$0x8]  ;;  %v8384_v25 = vld [vmem:[%s9007_s28 + $0x78] sm:$0x7] }
 0x470   : > { %v6029_v44 = vunpack.c.l.b16 %v5970_v21  ;;  %v5998_v24 = vsel %vm9106_vm4, %v8407_v41, %v5997_v60  ;;  %v5999_v9 = vrot.slane %v5997_v60, 4  ;;  %v6004_v1 = vrot.slane %v8395_v40, 7  ;;  %v8394_v30 = vld [vmem:[%s9007_s28 + $0xb0] sm:$0x8]  ;;  %v8396_v54 = vld [vmem:[%s9007_s28 + $0xb8] sm:$0x7] }
 0x471   : > { %v5973_v33 = vsel %vm9106_vm4, %v5971_v62, %v5972_v55  ;;  %v6037_v29 = vunpack.c.l.b16 %v5998_v24  ;;  %v8404_v58 = vrot.slane %v8382_v61, 11  ;;  %v5978_v56 = vrot.slane %v5976_v5, 4  ;;  %v8386_v12 = vld [vmem:[%s9007_s28 + $0x84] sm:$0xf]  ;;  %v8385_v20 = vld [vmem:[%s9007_s28 + $0x80] sm:$0x8] }
 0x472   : > { %v6030_v16 = vunpack.c.l.b16 %v5973_v33  ;;  %v6001_v38 = vsel %vm9106_vm4, %v5999_v9, %v6000_v0  ;;  %v5979_v6 = vrot.slane %v8384_v25, 7  ;;  %v8408_v42 = vrot.slane %v8394_v30, 11  ;;  %v8398_v59 = vld [vmem:[%s9007_s28 + $0xc4] sm:$0xf]  ;;  %v8387_v28 = vld [vmem:[%s9007_s28 + $0x88] sm:$0x7] }
 0x473   : > { %v6038_v50 = vunpack.c.l.b16 %v6001_v38  ;;  %v6006_v8 = vrot.slane %v6004_v1, 4  ;;  %v6007_v34 = vrot.slane %v8396_v54, 7  ;;  %v5977_v53 = vsel %vm9106_vm4, %v8404_v58, %v5976_v5  ;;  %v8397_v23 = vld [vmem:[%s9007_s28 + $0xc0] sm:$0x8]  ;;  %v8399_v57 = vld [vmem:[%s9007_s28 + $0xc8] sm:$0x7] }
 0x474   : > { %v6045_v22 = vpack.c.b16 %v6030_v16, %v6029_v44  ;;  %v5980_v26 = vsel %vm9106_vm4, %v5978_v56, %v5979_v6  ;;  %v6005_v17 = vsel %vm9106_vm4, %v8408_v42, %v6004_v1  ;;  %v6031_v36 = vunpack.c.l.b16 %v5977_v53  ;;  %v8389_v19 = vld [vmem:[%s9007_s28 + $0x94] sm:$0xf]  ;;  %v8388_v60 = vld [vmem:[%s9007_s28 + $0x90] sm:$0x8]  ;;  %v8390_v0 = vld [vmem:[%s9007_s28 + $0x98] sm:$0x7] }
 0x475   : > { %v6049_v27 = vpack.c.b16 %v6038_v50, %v6037_v29  ;;  %v6008_v13 = vsel %vm9106_vm4, %v6006_v8, %v6007_v34  ;;  %v6032_v4 = vunpack.c.l.b16 %v5980_v26  ;;  %v6039_v14 = vunpack.c.l.b16 %v6005_v17  ;;  %v8401_v41 = vld [vmem:[%s9007_s28 + $0xd4] sm:$0xf]  ;;  %v8400_v39 = vld [vmem:[%s9007_s28 + $0xd0] sm:$0x8]  ;;  %v8402_v33 = vld [vmem:[%s9007_s28 + $0xd8] sm:$0x7] }
 0x476   : > { %8415 = vmatmul.msk.bf16.vlgmr.msra.gmra.mxu0 %vm746_vm3, %v6045_v22  ;;  %v6040_v31 = vunpack.c.l.b16 %v6008_v13  ;;  %v5983_v18 = vrot.slane %v8386_v12, 7  ;;  %v6011_v32 = vrot.slane %v8398_v59, 7  ;;  %v8405_v10 = vrot.slane %v8385_v20, 11  ;;  %v8615_v56 = vld [vmem:[%s11041_s29] sm:$0xff] }
 0x477   : > { %8419 = vmatmul.msk.bf16.vlgmr.msra.gmra.mxu2 %vm746_vm3, %v6049_v27  ;;  %v6046_v15 = vpack.c.b16 %v6032_v4, %v6031_v36  ;;  %v5986_v43 = vrot.slane %v8387_v28, 7  ;;  %v8409_v3 = vrot.slane %v8397_v23, 11  ;;  %v6014_v52 = vrot.slane %v8399_v57, 7  ;;  %6211 = vmatpush.bf16.msra.mxu1 %v8615_v56  ;;  %v8724_v7 = vld [vmem:[%s11042_s8] ss:$0 sm:$0xff] }
 0x478   : > { %v6050_v51 = vpack.c.b16 %v6040_v31, %v6039_v14  ;;  %v5985_v37 = vrot.slane %v5983_v18, 4  ;;  %v6013_v2 = vrot.slane %v6011_v32, 4  ;;  %v5984_v11 = vsel %vm9106_vm4, %v8405_v10, %v5983_v18  ;;  %8623 = vmatpush.bf16.msra.mxu3 %v8615_v56  ;;  %v6156_v56 = vld [vmem:[#allocation3 + $0x40] sm:$0xff] }
 0x479   : > { %v6012_v63 = vsel %vm9106_vm4, %v8409_v3, %v6011_v32  ;;  %v6033_v46 = vunpack.c.l.b16 %v5984_v11  ;;  %v5990_v21 = vrot.slane %v8389_v19, 7  ;;  %v6018_v44 = vrot.slane %v8401_v41, 7 }
 0x47a   : > { %v5987_v35 = vsel %vm9106_vm4, %v5985_v37, %v5986_v43  ;;  %v6015_v45 = vsel %vm9106_vm4, %v6013_v2, %v6014_v52  ;;  %v6041_v47 = vunpack.c.l.b16 %v6012_v63  ;;  %v8406_v24 = vrot.slane %v8388_v60, 11 }
 0x47b   : > { %v6034_v49 = vunpack.c.l.b16 %v5987_v35  ;;  %v6042_v55 = vunpack.c.l.b16 %v6015_v45  ;;  %v5992_v9 = vrot.slane %v5990_v21, 4  ;;  %v5993_v16 = vrot.slane %v8390_v0, 7 }
 0x47c   : > { %v8410_v29 = vrot.slane %v8400_v39, 11  ;;  %v6020_v40 = vrot.slane %v6018_v44, 4  ;;  %v6021_v38 = vrot.slane %v8402_v33, 7  ;;  %v5991_v5 = vsel %vm9106_vm4, %v8406_v24, %v5990_v21 }
 0x47d   : > { %v6047_v48 = vpack.c.b16 %v6034_v49, %v6033_v46  ;;  %v6051_v62 = vpack.c.b16 %v6042_v55, %v6041_v47  ;;  %v5994_v22 = vsel %vm9106_vm4, %v5992_v9, %v5993_v16  ;;  %v6035_v25 = vunpack.c.l.b16 %v5991_v5 }
 0x47e   : > { %v6019_v50 = vsel %vm9106_vm4, %v8410_v29, %v6018_v44  ;;  %v6022_v61 = vsel %vm9106_vm4, %v6020_v40, %v6021_v38  ;;  %v6036_v1 = vunpack.c.l.b16 %v5994_v22 }
 0x47f   : > { %v6043_v27 = vunpack.c.l.b16 %v6019_v50  ;;  %v6044_v30 = vunpack.c.l.b16 %v6022_v61 }
 0x480   : > { %v6048_v54 = vpack.c.b16 %v6036_v1, %v6035_v25  ;;  %v6148_v25 = vld [vmem:[#allocation3] sm:$0xff] }
 0x481   : > { %v6052_v58 = vpack.c.b16 %v6044_v30, %v6043_v27  ;;  %v6149_v30 = vld [vmem:[#allocation3 + $0x8] sm:$0xff] }
 0x486   : > { %8416 = vmatmul.msk.bf16.gmra.mxu0 %vm746_vm3, %v6046_v15 }
 0x487   : > { %8420 = vmatmul.msk.bf16.gmra.mxu2 %vm746_vm3, %v6050_v51 }
 0x496   : > { %8417 = vmatmul.msk.bf16.gmra.mxu0 %vm746_vm3, %v6047_v48 }
 0x497   : > { %8421 = vmatmul.msk.bf16.gmra.mxu2 %vm746_vm3, %v6051_v62 }
 0x4a6   : > { %8418 = vmatmul.msk.bf16.gmra.mxu0 %vm746_vm3, %v6048_v54 }
 0x4a7   : > { %8422 = vmatmul.msk.bf16.gmra.mxu2 %vm746_vm3, %v6052_v58 }
 0x4f3   : > { %v6092_v6 = vpop.f32.mrf.mxu0 }
 0x4f4   : > { %v6093_v42 = vadd.f32 %v8724_v7, %v6092_v6 }
 0x4f6   : > { %v6132_v53 = vmax.f32 %v6093_v42, 0.0  ;;  %v6150_v42 = vld [vmem:[#allocation3 + $0x10] sm:$0xff] }
 0x4fa   : > { %v6112_v8 = vpop.f32.mrf.mxu2 }
 0x4fb   : > { %v6094_v34 = vpop.f32.mrf.mxu0  ;;  %v6113_v36 = vadd.f32 %v8724_v7, %v6112_v8 }
 0x4fc   : > { %v6095_v26 = vadd.f32 %v8724_v7, %v6094_v34 }
 0x4fd   : > { %v6140_v12 = vmax.f32 %v6113_v36, 0.0 }
 0x4fe   : > { %v6133_v17 = vmax.f32 %v6095_v26, 0.0 }
 0x500   : > { %v6164_v13 = vpack.c.bf16 %v6133_v17, %v6132_v53  ;;  %v6157_v53 = vld [vmem:[#allocation3 + $0x48] sm:$0xff]  ;;  %v6151_v17 = vld [vmem:[#allocation3 + $0x18] sm:$0xff] }
 0x502   : > { %8427 = vmatmul.msk.bf16.vlgmr.msra.gmra.mxu1 %vm746_vm3, %v6164_v13  ;;  %v6114_v4 = vpop.f32.mrf.mxu2 }
 0x503   : > { %v6097_v14 = vpop.f32.mrf.mxu0  ;;  %v6115_v31 = vadd.f32 %v8724_v7, %v6114_v4 }
 0x504   : > { %v6098_v59 = vadd.f32 %v8724_v7, %v6097_v14  ;;  %v6158_v14 = vld [vmem:[#allocation3 + $0x50] sm:$0xff] }
 0x505   : > { %v6141_v15 = vmax.f32 %v6115_v31, 0.0 }
 0x506   : > { %v6134_v28 = vmax.f32 %v6098_v59, 0.0 }
 0x507   : > { %v6168_v18 = vpack.c.bf16 %v6141_v15, %v6140_v12  ;;  %v6152_v12 = vld [vmem:[#allocation3 + $0x20] sm:$0xff] }
 0x509   : > { %8431 = vmatmul.msk.bf16.vlgmr.msra.gmra.mxu3 %vm746_vm3, %v6168_v18 }
 0x50a   : > { %v6117_v51 = vpop.f32.mrf.mxu2 }
 0x50b   : > { %v6099_v20 = vpop.f32.mrf.mxu0  ;;  %v6118_v10 = vadd.f32 %v8724_v7, %v6117_v51  ;;  %v6159_v51 = vld [vmem:[#allocation3 + $0x58] sm:$0xff] }
 0x50c   : > { %v6100_v32 = vadd.f32 %v8724_v7, %v6099_v20 }
 0x50d   : > { %v6142_v2 = vmax.f32 %v6118_v10, 0.0  ;;  %v6160_v10 = vld [vmem:[#allocation3 + $0x60] sm:$0xff] }
 0x50e   : > { %v6135_v23 = vmax.f32 %v6100_v32, 0.0 }
 0x510   : > { %v6165_v57 = vpack.c.bf16 %v6135_v23, %v6134_v28  ;;  %v6153_v28 = vld [vmem:[#allocation3 + $0x28] sm:$0xff] }
 0x512   : > { %8428 = vmatmul.msk.bf16.gmra.mxu1 %vm746_vm3, %v6165_v57  ;;  %v6119_v37 = vpop.f32.mrf.mxu2 }
 0x513   : > { %v6102_v43 = vpop.f32.mrf.mxu0  ;;  %v6120_v3 = vadd.f32 %v8724_v7, %v6119_v37 }
 0x514   : > { %v6103_v11 = vadd.f32 %v8724_v7, %v6102_v43  ;;  %v6154_v43 = vld [vmem:[#allocation3 + $0x30] sm:$0xff] }
 0x515   : > { %v6143_v52 = vmax.f32 %v6120_v3, 0.0 }
 0x516   : > { %v6136_v46 = vmax.f32 %v6103_v11, 0.0  ;;  %v6161_v11 = vld [vmem:[#allocation3 + $0x68] sm:$0xff] }
 0x517   : > { %v6169_v35 = vpack.c.bf16 %v6143_v52, %v6142_v2 }
 0x519   : > { %8432 = vmatmul.msk.bf16.gmra.mxu3 %vm746_vm3, %v6169_v35 }
 0x51a   : > { %v6122_v63 = vpop.f32.mrf.mxu2 }
 0x51b   : > { %v6104_v45 = vpop.f32.mrf.mxu0  ;;  %v6123_v19 = vadd.f32 %v8724_v7, %v6122_v63  ;;  %v6155_v63 = vld [vmem:[#allocation3 + $0x38] sm:$0xff] }
 0x51c   : > { %v6105_v49 = vadd.f32 %v8724_v7, %v6104_v45 }
 0x51d   : > { %v6144_v62 = vmax.f32 %v6123_v19, 0.0 }
 0x51e   : > { %v6137_v47 = vmax.f32 %v6105_v49, 0.0 }
 0x520   : > { %v6166_v55 = vpack.c.bf16 %v6137_v47, %v6136_v46  ;;  %v6162_v47 = vld [vmem:[#allocation3 + $0x70] sm:$0xff] }
 0x522   : > { %8429 = vmatmul.msk.bf16.gmra.mxu1 %vm746_vm3, %v6166_v55  ;;  %v6124_v48 = vpop.f32.mrf.mxu2 }
 0x523   : > { %v6107_v41 = vpop.f32.mrf.mxu0  ;;  %v6125_v21 = vadd.f32 %v8724_v7, %v6124_v48  ;;  %v6163_v48 = vld [vmem:[#allocation3 + $0x78] sm:$0xff] }
 0x524   : > { %v6108_v0 = vadd.f32 %v8724_v7, %v6107_v41 }
 0x525   : > { %v6145_v60 = vmax.f32 %v6125_v21, 0.0 }
 0x526   : > { %v6138_v24 = vmax.f32 %v6108_v0, 0.0 }
 0x527   : > { %v6170_v44 = vpack.c.bf16 %v6145_v60, %v6144_v62 }
 0x529   : > { %8433 = vmatmul.msk.bf16.gmra.mxu3 %vm746_vm3, %v6170_v44 }
 0x52a   : > { %v6127_v39 = vpop.f32.mrf.mxu2 }
 0x52b   : > { %v6109_v33 = vpop.f32.mrf.mxu0  ;;  %v6128_v40 = vadd.f32 %v8724_v7, %v6127_v39 }
 0x52c   : > { %v6110_v9 = vadd.f32 %v8724_v7, %v6109_v33 }
 0x52d   : > { %v6146_v22 = vmax.f32 %v6128_v40, 0.0 }
 0x52e   : > { %v6139_v16 = vmax.f32 %v6110_v9, 0.0 }
 0x530   : > { %v6167_v29 = vpack.c.bf16 %v6139_v16, %v6138_v24 }
 0x532   : > { %8430 = vmatmul.msk.bf16.gmra.mxu1 %vm746_vm3, %v6167_v29  ;;  %v6129_v38 = vpop.f32.mrf.mxu2 }
 0x533   : > { %v6130_v5 = vadd.f32 %v8724_v7, %v6129_v38 }
 0x535   : > { %v6147_v50 = vmax.f32 %v6130_v5, 0.0 }
 0x537   : > { %v6171_v61 = vpack.c.bf16 %v6147_v50, %v6146_v22 }
 0x539   : > { %8434 = vmatmul.msk.bf16.gmra.mxu3 %vm746_vm3, %v6171_v61 }
 0x57f   : > { %v6213_v1 = vpop.f32.mrf.mxu1 }
 0x580   : > { %v6253_v27 = vadd.f32 %v6213_v1, %v6148_v25 }
 0x582   : > { %6269 = vst.msk [vmem:[#allocation3] sm:$0xff] %vm746_vm3, %v6253_v27 }
 0x587   : > { %v6215_v54 = vpop.f32.mrf.mxu1 }
 0x588   : > { %v6254_v58 = vadd.f32 %v6215_v54, %v6149_v30 }
 0x58a   : > { %6270 = vst.msk [vmem:[#allocation3 + $0x8] sm:$0xff] %vm746_vm3, %v6254_v58 }
 0x58c   : > { %v6233_v6 = vpop.f32.mrf.mxu3 }
 0x58d   : > { %v6261_v8 = vadd.f32 %v6233_v6, %v6156_v56 }
 0x58f   : > { %v6218_v7 = vpop.f32.mrf.mxu1  ;;  %6277 = vst.msk [vmem:[#allocation3 + $0x40] sm:$0xff] %vm746_vm3, %v6261_v8 }
 0x590   : > { %v6255_v34 = vadd.f32 %v6218_v7, %v6150_v42 }
 0x592   : > { %6271 = vst.msk [vmem:[#allocation3 + $0x10] sm:$0xff] %vm746_vm3, %v6255_v34 }
 0x594   : > { %v6235_v26 = vpop.f32.mrf.mxu3 }
 0x595   : > { %v6262_v13 = vadd.f32 %v6235_v26, %v6157_v53 }
 0x597   : > { %v6220_v36 = vpop.f32.mrf.mxu1  ;;  %6278 = vst.msk [vmem:[#allocation3 + $0x48] sm:$0xff] %vm746_vm3, %v6262_v13 }
 0x598   : > { %v6256_v4 = vadd.f32 %v6220_v36, %v6151_v17 }
 0x59a   : > { %6272 = vst.msk [vmem:[#allocation3 + $0x18] sm:$0xff] %vm746_vm3, %v6256_v4 }
 0x59c   : > { %v6238_v31 = vpop.f32.mrf.mxu3 }
 0x59d   : > { %v6263_v15 = vadd.f32 %v6238_v31, %v6158_v14 }
 0x59f   : > { %v6223_v59 = vpop.f32.mrf.mxu1  ;;  %6279 = vst.msk [vmem:[#allocation3 + $0x50] sm:$0xff] %vm746_vm3, %v6263_v15 }
 0x5a0   : > { %v6257_v18 = vadd.f32 %v6223_v59, %v6152_v12 }
 0x5a2   : > { %6273 = vst.msk [vmem:[#allocation3 + $0x20] sm:$0xff] %vm746_vm3, %v6257_v18 }
 0x5a4   : > { %v6240_v20 = vpop.f32.mrf.mxu3 }
 0x5a5   : > { %v6264_v32 = vadd.f32 %v6240_v20, %v6159_v51 }
 0x5a7   : > { %v6225_v23 = vpop.f32.mrf.mxu1  ;;  %6280 = vst.msk [vmem:[#allocation3 + $0x58] sm:$0xff] %vm746_vm3, %v6264_v32 }
 0x5a8   : > { %v6258_v57 = vadd.f32 %v6225_v23, %v6153_v28 }
 0x5aa   : > { %6274 = vst.msk [vmem:[#allocation3 + $0x28] sm:$0xff] %vm746_vm3, %v6258_v57 }
 0x5ac   : > { %v6243_v37 = vpop.f32.mrf.mxu3 }
 0x5ad   : > { %v6265_v3 = vadd.f32 %v6243_v37, %v6160_v10 }
 0x5af   : > { %v6228_v2 = vpop.f32.mrf.mxu1  ;;  %6281 = vst.msk [vmem:[#allocation3 + $0x60] sm:$0xff] %vm746_vm3, %v6265_v3 }
 0x5b0   : > { %v6259_v52 = vadd.f32 %v6228_v2, %v6154_v43 }
 0x5b2   : > { %6275 = vst.msk [vmem:[#allocation3 + $0x30] sm:$0xff] %vm746_vm3, %v6259_v52 }
 0x5b4   : > { %v6245_v35 = vpop.f32.mrf.mxu3 }
 0x5b5   : > { %v6266_v45 = vadd.f32 %v6245_v35, %v6161_v11 }
 0x5b7   : > { %v6230_v46 = vpop.f32.mrf.mxu1  ;;  %6282 = vst.msk [vmem:[#allocation3 + $0x68] sm:$0xff] %vm746_vm3, %v6266_v45 }
 0x5b8   : > { %v6260_v49 = vadd.f32 %v6230_v46, %v6155_v63 }
 0x5ba   : > { %6276 = vst.msk [vmem:[#allocation3 + $0x38] sm:$0xff] %vm746_vm3, %v6260_v49 }
 0x5bc   : > { %v6248_v55 = vpop.f32.mrf.mxu3 }
 0x5bd   : > { %v6267_v19 = vadd.f32 %v6248_v55, %v6162_v47 }
 0x5bf   : > { %6283 = vst.msk [vmem:[#allocation3 + $0x70] sm:$0xff] %vm746_vm3, %v6267_v19 }
 0x5c4   : > { %v6250_v41 = vpop.f32.mrf.mxu3 }
 0x5c5   : > { %v6268_v21 = vadd.f32 %v6250_v41, %v6163_v48 }
 0x5c7   : > { %6284 = vst.msk [vmem:[#allocation3 + $0x78] sm:$0xff] %vm746_vm3, %v6268_v21 }
 0x5c8 PF: > { %p8435_p5 = scmp.ne.s32.totalorder %s8815_s16, 2 }
 0x5c9   : > { %s11043_s14 = sld [smem:[#allocation21_spill]] (!%p8435_p5) }
 0x5ca   : > { %6288 = sbr.rel (%p8435_p5) target bundleno = 1725 (0x6bd), region = 72  ;;  %s11044_s16 = sld [smem:[#allocation22_spill]] (!%p8435_p5) }
 0x5cf   : > { %v8616_v62 = vld [vmem:[%s11043_s14 + $0x8] sm:$0xff]  ;;  %v8617_v60 = vld [vmem:[%s11043_s14 + $0x10] sm:$0xff]  ;;  %v8618_v0 = vld [vmem:[%s11043_s14 + $0x18] sm:$0xff] }
 0x5d0   : > { %v6305_v44 = vld [vmem:[#allocation2] sm:$0xff]  ;;  %v6306_v39 = vld [vmem:[#allocation2 + $0x8] sm:$0xff]  ;;  %6406 = vmatpush.bf16.msra.mxu0 %v8616_v62  ;;  %8624 = vmatpush.bf16.msra.mxu3 %v8616_v62  ;;  %v10782_v33 = vld [vmem:[%s11044_s16 + $0x1] ss:$0 sm:$0xff] }
 0x5d1   : > { %v6317_v24 = vld [vmem:[#allocation2 + $0x60] sm:$0xff]  ;;  %v6318_v9 = vld [vmem:[#allocation2 + $0x68] sm:$0xff]  ;;  %6565 = vmatpush.bf16.msra.mxu1 %v8617_v60  ;;  %6724 = vmatpush.bf16.msra.mxu2 %v8618_v0  ;;  %v6326_v40 = vadd.f32 %v10782_v33, %v6305_v44  ;;  %v6327_v38 = vadd.f32 %v10782_v33, %v6306_v39  ;;  %v10791_v50 = vld [vmem:[%s11044_s16 + $0x2] ss:$0 sm:$0xff] }
 0x5d2   : > { %v6464_v16 = vld [vmem:[#allocation2 + $0x80] sm:$0xff]  ;;  %v6465_v29 = vld [vmem:[#allocation2 + $0x88] sm:$0xff]  ;;  %v6338_v5 = vadd.f32 %v10782_v33, %v6317_v24  ;;  %v6339_v22 = vadd.f32 %v10782_v33, %v6318_v9  ;;  %v10796_v1 = vld [vmem:[%s11044_s16 + $0x3] ss:$0 sm:$0xff] }
 0x5d3   : > { %v6623_v61 = vld [vmem:[#allocation2 + $0x100] sm:$0xff]  ;;  %v6624_v25 = vld [vmem:[#allocation2 + $0x108] sm:$0xff]  ;;  %v6342_v27 = vmax.f32 %v6326_v40, 0.0  ;;  %v6343_v30 = vmax.f32 %v6327_v38, 0.0  ;;  %v6485_v56 = vadd.f32 %v10791_v50, %v6464_v16  ;;  %v6486_v6 = vadd.f32 %v10791_v50, %v6465_v29  ;;  %v6307_v36 = vld [vmem:[#allocation2 + $0x10] sm:$0xff] }
 0x5d4   : > { %8625 = vmatpush.bf16.msrb.mxu3 %v8617_v60  ;;  %v6354_v54 = vmax.f32 %v6338_v5, 0.0  ;;  %v6355_v58 = vmax.f32 %v6339_v22, 0.0  ;;  %v6644_v42 = vadd.f32 %v10796_v1, %v6623_v61  ;;  %v6645_v8 = vadd.f32 %v10796_v1, %v6624_v25  ;;  %v6308_v4 = vld [vmem:[#allocation2 + $0x18] sm:$0xff]  ;;  %v6319_v12 = vld [vmem:[#allocation2 + $0x70] sm:$0xff]  ;;  %v6309_v41 = vld [vmem:[#allocation2 + $0x20] sm:$0xff] }
 0x5d5   : > { %v6358_v7 = vpack.c.bf16 %v6343_v30, %v6342_v27  ;;  %v6501_v53 = vmax.f32 %v6485_v56, 0.0  ;;  %v6502_v26 = vmax.f32 %v6486_v6, 0.0  ;;  %v6320_v15 = vld [vmem:[#allocation2 + $0x78] sm:$0xff]  ;;  %v6466_v59 = vld [vmem:[#allocation2 + $0x90] sm:$0xff]  ;;  %v6328_v18 = vadd.f32 %v10782_v33, %v6307_v36  ;;  %v6310_v21 = vld [vmem:[#allocation2 + $0x28] sm:$0xff] }
 0x5d6   : > { %v6364_v34 = vpack.c.bf16 %v6355_v58, %v6354_v54  ;;  %v6660_v17 = vmax.f32 %v6644_v42, 0.0  ;;  %v6661_v13 = vmax.f32 %v6645_v8, 0.0  ;;  %v6329_v51 = vadd.f32 %v10782_v33, %v6308_v4  ;;  %v6467_v32 = vld [vmem:[#allocation2 + $0x98] sm:$0xff]  ;;  %v6625_v23 = vld [vmem:[#allocation2 + $0x110] sm:$0xff]  ;;  %v6476_v62 = vld [vmem:[#allocation2 + $0xe0] sm:$0xff] }
 0x5d7   : > { %8443 = vmatmul.msk.bf16.vlgmr.msra.gmra.mxu0 %vm746_vm3, %v6358_v7  ;;  %v6517_v14 = vpack.c.bf16 %v6502_v26, %v6501_v53  ;;  %v6340_v20 = vadd.f32 %v10782_v33, %v6319_v12  ;;  %v6341_v28 = vadd.f32 %v10782_v33, %v6320_v15  ;;  %v6626_v57 = vld [vmem:[#allocation2 + $0x118] sm:$0xff]  ;;  %v6487_v10 = vadd.f32 %v10791_v50, %v6466_v59  ;;  %v6477_v60 = vld [vmem:[#allocation2 + $0xe8] sm:$0xff]  ;;  %v6627_v29 = vld [vmem:[#allocation2 + $0x120] sm:$0xff] }
 0x5d8   : > { %8449 = vmatmul.msk.bf16.vlgmr.msra.gmra.mxu3 %vm746_vm3, %v6364_v34  ;;  %v6676_v31 = vpack.c.bf16 %v6661_v13, %v6660_v17  ;;  %v6488_v37 = vadd.f32 %v10791_v50, %v6467_v32  ;;  %v6646_v43 = vadd.f32 %v10796_v1, %v6625_v23  ;;  %v6647_v3 = vadd.f32 %v10796_v1, %v6626_v57  ;;  %v6469_v24 = vld [vmem:[#allocation2 + $0xa8] sm:$0xff]  ;;  %v6311_v26 = vld [vmem:[#allocation2 + $0x30] sm:$0xff]  ;;  %v6312_v17 = vld [vmem:[#allocation2 + $0x38] sm:$0xff] }
 0x5d9   : > { %8626 = vmatpush.bf16.msra.mxu3 %v8618_v0  ;;  %8458 = vmatmul.msk.bf16.vlgmr.msra.gmra.mxu1 %vm746_vm3, %v6517_v14  ;;  %v6344_v2 = vmax.f32 %v6328_v18, 0.0  ;;  %v6345_v52 = vmax.f32 %v6329_v51, 0.0  ;;  %v6356_v11 = vmax.f32 %v6340_v20, 0.0  ;;  %v6357_v35 = vmax.f32 %v6341_v28, 0.0  ;;  %v6468_v0 = vld [vmem:[#allocation2 + $0xa0] sm:$0xff]  ;;  %v6628_v40 = vld [vmem:[#allocation2 + $0x128] sm:$0xff] }
 0x5da   : > { %8473 = vmatmul.msk.bf16.vlgmr.msra.gmra.mxu2 %vm746_vm3, %v6676_v31  ;;  %v6503_v63 = vmax.f32 %v6487_v10, 0.0  ;;  %v6504_v45 = vmax.f32 %v6488_v37, 0.0  ;;  %v6662_v46 = vmax.f32 %v6646_v43, 0.0  ;;  %v6663_v49 = vmax.f32 %v6647_v3, 0.0  ;;  %v6478_v13 = vld [vmem:[#allocation2 + $0xf0] sm:$0xff]  ;;  %v6479_v36 = vld [vmem:[#allocation2 + $0xf8] sm:$0xff] }
 0x5db   : > { %v6359_v47 = vpack.c.bf16 %v6345_v52, %v6344_v2  ;;  %v6365_v55 = vpack.c.bf16 %v6357_v35, %v6356_v11  ;;  %v6330_v44 = vadd.f32 %v10782_v33, %v6309_v41  ;;  %v6331_v39 = vadd.f32 %v10782_v33, %v6310_v21  ;;  %v6470_v4 = vld [vmem:[#allocation2 + $0xb0] sm:$0xff]  ;;  %v6471_v12 = vld [vmem:[#allocation2 + $0xb8] sm:$0xff] }
 0x5dc   : > { %v6518_v19 = vpack.c.bf16 %v6504_v45, %v6503_v63  ;;  %v6677_v48 = vpack.c.bf16 %v6663_v49, %v6662_v46  ;;  %v6497_v9 = vadd.f32 %v10791_v50, %v6476_v62  ;;  %v6498_v16 = vadd.f32 %v10791_v50, %v6477_v60  ;;  %v6629_v18 = vld [vmem:[#allocation2 + $0x130] sm:$0xff]  ;;  %v6630_v51 = vld [vmem:[#allocation2 + $0x138] sm:$0xff]  ;;  %v6313_v49 = vld [vmem:[#allocation2 + $0x40] sm:$0xff] }
 0x5dd   : > { %v6489_v38 = vadd.f32 %v10791_v50, %v6468_v0  ;;  %v6490_v5 = vadd.f32 %v10791_v50, %v6469_v24  ;;  %v6648_v22 = vadd.f32 %v10796_v1, %v6627_v29  ;;  %v6649_v61 = vadd.f32 %v10796_v1, %v6628_v40  ;;  %v6473_v62 = vld [vmem:[#allocation2 + $0xc8] sm:$0xff]  ;;  %v6631_v60 = vld [vmem:[#allocation2 + $0x140] sm:$0xff] }
 0x5de   : > { %v6346_v25 = vmax.f32 %v6330_v44, 0.0  ;;  %v6347_v27 = vmax.f32 %v6331_v39, 0.0  ;;  %v6513_v30 = vmax.f32 %v6497_v9, 0.0  ;;  %v6514_v54 = vmax.f32 %v6498_v16, 0.0  ;;  %v6632_v0 = vld [vmem:[#allocation2 + $0x148] sm:$0xff] }
 0x5df   : > { %v6505_v58 = vmax.f32 %v6489_v38, 0.0  ;;  %v6506_v56 = vmax.f32 %v6490_v5, 0.0  ;;  %v6664_v6 = vmax.f32 %v6648_v22, 0.0  ;;  %v6665_v42 = vmax.f32 %v6649_v61, 0.0 }
 0x5e0   : > { %v6360_v8 = vpack.c.bf16 %v6347_v27, %v6346_v25  ;;  %v6523_v7 = vpack.c.bf16 %v6514_v54, %v6513_v30  ;;  %v6332_v14 = vadd.f32 %v10782_v33, %v6311_v26  ;;  %v6333_v31 = vadd.f32 %v10782_v33, %v6312_v17 }
 0x5e1   : > { %v6519_v34 = vpack.c.bf16 %v6506_v56, %v6505_v58  ;;  %v6678_v53 = vpack.c.bf16 %v6665_v42, %v6664_v6  ;;  %v6499_v15 = vadd.f32 %v10791_v50, %v6478_v13  ;;  %v6500_v59 = vadd.f32 %v10791_v50, %v6479_v36  ;;  %v6315_v42 = vld [vmem:[#allocation2 + $0x50] sm:$0xff]  ;;  %v6475_v13 = vld [vmem:[#allocation2 + $0xd8] sm:$0xff] }
 0x5e2   : > { %v6491_v20 = vadd.f32 %v10791_v50, %v6470_v4  ;;  %v6492_v28 = vadd.f32 %v10791_v50, %v6471_v12  ;;  %v6650_v32 = vadd.f32 %v10796_v1, %v6629_v18  ;;  %v6651_v23 = vadd.f32 %v10796_v1, %v6630_v51  ;;  %v6633_v36 = vld [vmem:[#allocation2 + $0x150] sm:$0xff]  ;;  %v6634_v4 = vld [vmem:[#allocation2 + $0x158] sm:$0xff] }
 0x5e3   : > { %v6348_v57 = vmax.f32 %v6332_v14, 0.0  ;;  %v6349_v10 = vmax.f32 %v6333_v31, 0.0  ;;  %v6515_v37 = vmax.f32 %v6499_v15, 0.0  ;;  %v6516_v43 = vmax.f32 %v6500_v59, 0.0 }
 0x5e4   : > { %v6507_v3 = vmax.f32 %v6491_v20, 0.0  ;;  %v6508_v2 = vmax.f32 %v6492_v28, 0.0  ;;  %v6666_v52 = vmax.f32 %v6650_v32, 0.0  ;;  %v6667_v11 = vmax.f32 %v6651_v23, 0.0 }
 0x5e5   : > { %v6361_v35 = vpack.c.bf16 %v6349_v10, %v6348_v57  ;;  %v6524_v63 = vpack.c.bf16 %v6516_v43, %v6515_v37  ;;  %v6334_v41 = vadd.f32 %v10782_v33, %v6313_v49  ;;  %v6494_v9 = vadd.f32 %v10791_v50, %v6473_v62 }
 0x5e6   : > { %v6520_v45 = vpack.c.bf16 %v6508_v2, %v6507_v3  ;;  %v6679_v46 = vpack.c.bf16 %v6667_v11, %v6666_v52  ;;  %v6652_v16 = vadd.f32 %v10796_v1, %v6631_v60  ;;  %v6653_v29 = vadd.f32 %v10796_v1, %v6632_v0  ;;  %v6291_v60 = vld [vmem:[#allocation3 + $0x10] sm:$0xff] }
 0x5e7   : > { %8444 = vmatmul.msk.bf16.gmra.mxu0 %vm746_vm3, %v6359_v47  ;;  %v6314_v47 = vld [vmem:[#allocation2 + $0x48] sm:$0xff]  ;;  %v6350_v40 = vmax.f32 %v6334_v41, 0.0  ;;  %v6510_v25 = vmax.f32 %v6494_v9, 0.0  ;;  %v6336_v26 = vadd.f32 %v10782_v33, %v6315_v42  ;;  %v6496_v15 = vadd.f32 %v10791_v50, %v6475_v13  ;;  %v6293_v42 = vld [vmem:[#allocation3 + $0x20] sm:$0xff] }
 0x5e8   : > { %8450 = vmatmul.msk.bf16.gmra.mxu3 %vm746_vm3, %v6365_v55  ;;  %v6635_v55 = vld [vmem:[#allocation2 + $0x160] sm:$0xff]  ;;  %v6335_v21 = vadd.f32 %v10782_v33, %v6314_v47  ;;  %v6668_v27 = vmax.f32 %v6652_v16, 0.0  ;;  %v6669_v30 = vmax.f32 %v6653_v29, 0.0  ;;  %v6654_v59 = vadd.f32 %v10796_v1, %v6633_v36  ;;  %v6290_v47 = vld [vmem:[#allocation3 + $0x8] sm:$0xff] }
 0x5e9   : > { %8459 = vmatmul.msk.bf16.gmra.mxu1 %vm746_vm3, %v6518_v19  ;;  %v6636_v19 = vld [vmem:[#allocation2 + $0x168] sm:$0xff]  ;;  %v6656_v44 = vadd.f32 %v10796_v1, %v6635_v55  ;;  %v6655_v18 = vadd.f32 %v10796_v1, %v6634_v4  ;;  %v6352_v51 = vmax.f32 %v6336_v26, 0.0  ;;  %v6512_v23 = vmax.f32 %v6496_v15, 0.0 }
 0x5ea   : > { %8474 = vmatmul.msk.bf16.gmra.mxu2 %vm746_vm3, %v6677_v48  ;;  %v6472_v48 = vld [vmem:[#allocation2 + $0xc0] sm:$0xff]  ;;  %v6657_v39 = vadd.f32 %v10796_v1, %v6636_v19  ;;  %v6351_v38 = vmax.f32 %v6335_v21, 0.0  ;;  %v6680_v6 = vpack.c.bf16 %v6669_v30, %v6668_v27  ;;  %v6670_v57 = vmax.f32 %v6654_v59, 0.0  ;;  %v6294_v15 = vld [vmem:[#allocation3 + $0x28] sm:$0xff] }
 0x5eb   : > { %v6493_v24 = vadd.f32 %v10791_v50, %v6472_v48  ;;  %v6672_v5 = vmax.f32 %v6656_v44, 0.0  ;;  %v6671_v10 = vmax.f32 %v6655_v18, 0.0 }
 0x5ec   : > { %v6673_v22 = vmax.f32 %v6657_v39, 0.0  ;;  %v6362_v54 = vpack.c.bf16 %v6351_v38, %v6350_v40 }
 0x5ed   : > { %v6509_v61 = vmax.f32 %v6493_v24, 0.0  ;;  %v6681_v2 = vpack.c.bf16 %v6671_v10, %v6670_v57 }
 0x5ee   : > { %v6682_v58 = vpack.c.bf16 %v6673_v22, %v6672_v5 }
 0x5ef   : > { %v6521_v56 = vpack.c.bf16 %v6510_v25, %v6509_v61  ;;  %v6292_v25 = vld [vmem:[#allocation3 + $0x18] sm:$0xff] }
 0x5f7   : > { %8445 = vmatmul.msk.bf16.gmra.mxu0 %vm746_vm3, %v6360_v8  ;;  %v6316_v8 = vld [vmem:[#allocation2 + $0x58] sm:$0xff] }
 0x5f8   : > { %8464 = vmatmul.msk.bf16.vlgmr.msrb.gmra.mxu3 %vm746_vm3, %v6523_v7  ;;  %v6637_v7 = vld [vmem:[#allocation2 + $0x170] sm:$0xff]  ;;  %v6337_v17 = vadd.f32 %v10782_v33, %v6316_v8 }
 0x5f9   : > { %8460 = vmatmul.msk.bf16.gmra.mxu1 %vm746_vm3, %v6519_v34  ;;  %v6638_v34 = vld [vmem:[#allocation2 + $0x178] sm:$0xff]  ;;  %v6658_v14 = vadd.f32 %v10796_v1, %v6637_v7 }
 0x5fa   : > { %8475 = vmatmul.msk.bf16.gmra.mxu2 %vm746_vm3, %v6678_v53  ;;  %v6474_v53 = vld [vmem:[#allocation2 + $0xd0] sm:$0xff]  ;;  %v6659_v31 = vadd.f32 %v10796_v1, %v6638_v34  ;;  %v6353_v20 = vmax.f32 %v6337_v17, 0.0 }
 0x5fb   : > { %v6495_v12 = vadd.f32 %v10791_v50, %v6474_v53  ;;  %v6674_v28 = vmax.f32 %v6658_v14, 0.0  ;;  %v6289_v50 = vld [vmem:[#allocation3] sm:$0xff] }
 0x5fc   : > { %v6675_v32 = vmax.f32 %v6659_v31, 0.0  ;;  %v6363_v37 = vpack.c.bf16 %v6353_v20, %v6352_v51 }
 0x5fd   : > { %v6511_v33 = vmax.f32 %v6495_v12, 0.0 }
 0x5fe   : > { %v6683_v43 = vpack.c.bf16 %v6675_v32, %v6674_v28 }
 0x5ff   : > { %v6522_v3 = vpack.c.bf16 %v6512_v23, %v6511_v33  ;;  %v6295_v33 = vld [vmem:[#allocation3 + $0x30] sm:$0xff] }
 0x607   : > { %8446 = vmatmul.msk.bf16.gmra.mxu0 %vm746_vm3, %v6361_v35 }
 0x608   : > { %8465 = vmatmul.msk.bf16.gmra.mxu3 %vm746_vm3, %v6524_v63 }
 0x609   : > { %8461 = vmatmul.msk.bf16.gmra.mxu1 %vm746_vm3, %v6520_v45  ;;  %v10871_v45 = vld [vmem:[%s11044_s16 + $0x4] ss:$0 sm:$0xff] }
 0x60a   : > { %8476 = vmatmul.msk.bf16.gmra.mxu2 %vm746_vm3, %v6679_v46 }
 0x617   : > { %8447 = vmatmul.msk.bf16.gmra.mxu0 %vm746_vm3, %v6362_v54 }
 0x618   : > { %8479 = vmatmul.msk.bf16.vlgmr.msra.gmra.mxu3 %vm746_vm3, %v6682_v58 }
 0x619   : > { %8462 = vmatmul.msk.bf16.gmra.mxu1 %vm746_vm3, %v6521_v56 }
 0x61a   : > { %8477 = vmatmul.msk.bf16.gmra.mxu2 %vm746_vm3, %v6680_v6 }
 0x627   : > { %8448 = vmatmul.msk.bf16.gmra.mxu0 %vm746_vm3, %v6363_v37 }
 0x628   : > { %8480 = vmatmul.msk.bf16.gmra.mxu3 %vm746_vm3, %v6683_v43 }
 0x629   : > { %8463 = vmatmul.msk.bf16.gmra.mxu1 %vm746_vm3, %v6522_v3 }
 0x62a   : > { %8478 = vmatmul.msk.bf16.gmra.mxu2 %vm746_vm3, %v6681_v2 }
 0x654   : > { %v6408_v1 = vpop.f32.mrf.mxu0 }
 0x655   : > { %v6448_v52 = vadd.f32 %v6408_v1, %v6289_v50 }
 0x656   : > { %v6567_v11 = vpop.f32.mrf.mxu1 }
 0x657   : > { %v6607_v35 = vadd.f32 %v6567_v11, %v6448_v52 }
 0x65b   : > { %v10866_v63 = vpop.f32.mrf.mxu3 }
 0x65c   : > { %v6410_v46 = vpop.f32.mrf.mxu0 }
 0x65d   : > { %v6726_v49 = vpop.f32.mrf.mxu2  ;;  %v6449_v41 = vadd.f32 %v6410_v46, %v6290_v47  ;;  %v6296_v46 = vld [vmem:[#allocation3 + $0x38] sm:$0xff] }
 0x65e   : > { %v6766_v55 = vadd.f32 %v6726_v49, %v6607_v35  ;;  %v6569_v19 = vpop.f32.mrf.mxu1 }
 0x65f   : > { %v6608_v0 = vadd.f32 %v6569_v19, %v6449_v41 }
 0x660   : > { %v6787_v48 = vadd.f32 %v10871_v45, %v6766_v55 }
 0x662   : > { %v6803_v21 = vmax.f32 %v6787_v48, 0.0 }
 0x663   : > { %v10874_v62 = vpop.f32.mrf.mxu3 }
 0x664   : > { %6819 = vst.msk [vmem:[%s9022_s22] sm:$0xff] %vm746_vm3, %v6803_v21  ;;  %v6413_v44 = vpop.f32.mrf.mxu0  ;;  %v6297_v21 = vld [vmem:[#allocation3 + $0x40] sm:$0xff] }
 0x665   : > { %v6728_v39 = vpop.f32.mrf.mxu2  ;;  %v6450_v9 = vadd.f32 %v6413_v44, %v6291_v60  ;;  %v6301_v60 = vld [vmem:[#allocation3 + $0x60] sm:$0xff] }
 0x666   : > { %v6767_v24 = vadd.f32 %v6728_v39, %v6608_v0  ;;  %v6572_v16 = vpop.f32.mrf.mxu1 }
 0x667   : > { %v6609_v38 = vadd.f32 %v6572_v16, %v6450_v9  ;;  %v6460_v16 = vadd.f32 %v10866_v63, %v6301_v60 }
 0x668   : > { %v6788_v29 = vadd.f32 %v10871_v45, %v6767_v24 }
 0x66a   : > { %v6804_v40 = vmax.f32 %v6788_v29, 0.0 }
 0x66b   : > { %v10879_v5 = vpop.f32.mrf.mxu3 }
 0x66c   : > { %6820 = vst.msk [vmem:[%s9022_s22 + $0x8] sm:$0xff] %vm746_vm3, %v6804_v40  ;;  %v6415_v22 = vpop.f32.mrf.mxu0 }
 0x66d   : > { %v6731_v61 = vpop.f32.mrf.mxu2  ;;  %v6451_v58 = vadd.f32 %v6415_v22, %v6292_v25 }
 0x66e   : > { %v6768_v27 = vadd.f32 %v6731_v61, %v6609_v38  ;;  %v6574_v30 = vpop.f32.mrf.mxu1 }
 0x66f   : > { %v6610_v8 = vadd.f32 %v6574_v30, %v6451_v58  ;;  %v6302_v30 = vld [vmem:[#allocation3 + $0x68] sm:$0xff] }
 0x670   : > { %v6789_v54 = vadd.f32 %v10871_v45, %v6768_v27  ;;  %v6461_v63 = vadd.f32 %v10874_v62, %v6302_v30 }
 0x672   : > { %v6805_v56 = vmax.f32 %v6789_v54, 0.0 }
 0x673   : > { %v10884_v6 = vpop.f32.mrf.mxu3 }
 0x674   : > { %6821 = vst.msk [vmem:[%s9022_s22 + $0x10] sm:$0xff] %vm746_vm3, %v6805_v56  ;;  %v6418_v7 = vpop.f32.mrf.mxu0 }
 0x675   : > { %v6733_v34 = vpop.f32.mrf.mxu2  ;;  %v6452_v26 = vadd.f32 %v6418_v7, %v6293_v42  ;;  %v6298_v42 = vld [vmem:[#allocation3 + $0x48] sm:$0xff] }
 0x676   : > { %v6769_v53 = vadd.f32 %v6733_v34, %v6610_v8  ;;  %v6577_v17 = vpop.f32.mrf.mxu1 }
 0x677   : > { %v6611_v4 = vadd.f32 %v6577_v17, %v6452_v26 }
 0x678   : > { %v6790_v13 = vadd.f32 %v10871_v45, %v6769_v53 }
 0x67a   : > { %v6806_v36 = vmax.f32 %v6790_v13, 0.0 }
 0x67b   : > { %v6597_v14 = vpop.f32.mrf.mxu3 }
 0x67c   : > { %6822 = vst.msk [vmem:[%s9022_s22 + $0x18] sm:$0xff] %vm746_vm3, %v6806_v36  ;;  %v6420_v31 = vpop.f32.mrf.mxu0  ;;  %v6619_v38 = vadd.f32 %v6597_v14, %v6460_v16  ;;  %v6299_v14 = vld [vmem:[#allocation3 + $0x50] sm:$0xff] }
 0x67d   : > { %v6736_v12 = vpop.f32.mrf.mxu2  ;;  %v6453_v20 = vadd.f32 %v6420_v31, %v6294_v15  ;;  %v6303_v31 = vld [vmem:[#allocation3 + $0x70] sm:$0xff] }
 0x67e   : > { %v6770_v59 = vadd.f32 %v6736_v12, %v6611_v4  ;;  %v6579_v18 = vpop.f32.mrf.mxu1 }
 0x67f   : > { %v6612_v23 = vadd.f32 %v6579_v18, %v6453_v20  ;;  %v6462_v20 = vadd.f32 %v10879_v5, %v6303_v31  ;;  %v6300_v5 = vld [vmem:[#allocation3 + $0x58] sm:$0xff] }
 0x680   : > { %v6791_v51 = vadd.f32 %v10871_v45, %v6770_v59 }
 0x682   : > { %v6807_v28 = vmax.f32 %v6791_v51, 0.0 }
 0x683   : > { %v6599_v32 = vpop.f32.mrf.mxu3 }
 0x684   : > { %6823 = vst.msk [vmem:[%s9022_s22 + $0x20] sm:$0xff] %vm746_vm3, %v6807_v28  ;;  %v6423_v57 = vpop.f32.mrf.mxu0  ;;  %v6620_v17 = vadd.f32 %v6599_v32, %v6461_v63 }
 0x685   : > { %v6738_v10 = vpop.f32.mrf.mxu2  ;;  %v6454_v43 = vadd.f32 %v6423_v57, %v6295_v33 }
 0x686   : > { %v6771_v37 = vadd.f32 %v6738_v10, %v6612_v23  ;;  %v6582_v3 = vpop.f32.mrf.mxu1 }
 0x687   : > { %v6613_v1 = vadd.f32 %v6582_v3, %v6454_v43  ;;  %v6304_v3 = vld [vmem:[#allocation3 + $0x78] sm:$0xff] }
 0x688   : > { %v6792_v2 = vadd.f32 %v10871_v45, %v6771_v37 }
 0x68a   : > { %v6808_v50 = vmax.f32 %v6792_v2, 0.0 }
 0x68b   : > { %v6602_v52 = vpop.f32.mrf.mxu3 }
 0x68c   : > { %6824 = vst.msk [vmem:[%s9022_s22 + $0x28] sm:$0xff] %vm746_vm3, %v6808_v50  ;;  %v6425_v11 = vpop.f32.mrf.mxu0  ;;  %v6621_v33 = vadd.f32 %v6602_v52, %v6462_v20  ;;  %v6463_v52 = vadd.f32 %v10884_v6, %v6304_v3 }
 0x68d   : > { %v6741_v35 = vpop.f32.mrf.mxu2  ;;  %v6455_v19 = vadd.f32 %v6425_v11, %v6296_v46 }
 0x68e   : > { %v6772_v49 = vadd.f32 %v6741_v35, %v6613_v1  ;;  %v6584_v47 = vpop.f32.mrf.mxu1 }
 0x68f   : > { %v6614_v0 = vadd.f32 %v6584_v47, %v6455_v19 }
 0x690   : > { %v6793_v55 = vadd.f32 %v10871_v45, %v6772_v49 }
 0x692   : > { %v6809_v48 = vmax.f32 %v6793_v55, 0.0 }
 0x693   : > { %v10898_v41 = vpop.f32.mrf.mxu3 }
 0x694   : > { %6825 = vst.msk [vmem:[%s9022_s22 + $0x30] sm:$0xff] %vm746_vm3, %v6809_v48  ;;  %v6428_v44 = vpop.f32.mrf.mxu0  ;;  %v6622_v47 = vadd.f32 %v10898_v41, %v6463_v52 }
 0x695   : > { %v6743_v39 = vpop.f32.mrf.mxu2  ;;  %v6456_v9 = vadd.f32 %v6428_v44, %v6297_v21 }
 0x696   : > { %v6773_v24 = vadd.f32 %v6743_v39, %v6614_v0  ;;  %v6587_v29 = vpop.f32.mrf.mxu1 }
 0x697   : > { %v6615_v61 = vadd.f32 %v6587_v29, %v6456_v9 }
 0x698   : > { %v6794_v40 = vadd.f32 %v10871_v45, %v6773_v24 }
 0x69a   : > { %v6810_v22 = vmax.f32 %v6794_v40, 0.0 }
 0x69b   : > { %v6756_v25 = vpop.f32.mrf.mxu3 }
 0x69c   : > { %v6778_v27 = vadd.f32 %v6756_v25, %v6619_v38  ;;  %6826 = vst.msk [vmem:[%s9022_s22 + $0x38] sm:$0xff] %vm746_vm3, %v6810_v22  ;;  %v6430_v54 = vpop.f32.mrf.mxu0 }
 0x69d   : > { %v6746_v58 = vpop.f32.mrf.mxu2  ;;  %v6457_v26 = vadd.f32 %v6430_v54, %v6298_v42 }
 0x69e   : > { %v6799_v56 = vadd.f32 %v10871_v45, %v6778_v27  ;;  %v6774_v8 = vadd.f32 %v6746_v58, %v6615_v61  ;;  %v6589_v34 = vpop.f32.mrf.mxu1 }
 0x69f   : > { %v6616_v12 = vadd.f32 %v6589_v34, %v6457_v26 }
 0x6a0   : > { %v6815_v7 = vmax.f32 %v6799_v56, 0.0  ;;  %v6795_v53 = vadd.f32 %v10871_v45, %v6774_v8 }
 0x6a2   : > { %6831 = vst.msk [vmem:[%s9022_s22 + $0x60] sm:$0xff] %vm746_vm3, %v6815_v7  ;;  %v6811_v13 = vmax.f32 %v6795_v53, 0.0 }
 0x6a3   : > { %v6758_v36 = vpop.f32.mrf.mxu3 }
 0x6a4   : > { %v6779_v4 = vadd.f32 %v6758_v36, %v6620_v17  ;;  %6827 = vst.msk [vmem:[%s9022_s22 + $0x40] sm:$0xff] %vm746_vm3, %v6811_v13  ;;  %v6433_v15 = vpop.f32.mrf.mxu0 }
 0x6a5   : > { %v6748_v62 = vpop.f32.mrf.mxu2  ;;  %v6458_v51 = vadd.f32 %v6433_v15, %v6299_v14 }
 0x6a6   : > { %v6800_v59 = vadd.f32 %v10871_v45, %v6779_v4  ;;  %v6775_v18 = vadd.f32 %v6748_v62, %v6616_v12  ;;  %v6592_v23 = vpop.f32.mrf.mxu1 }
 0x6a7   : > { %v6617_v10 = vadd.f32 %v6592_v23, %v6458_v51 }
 0x6a8   : > { %v6816_v28 = vmax.f32 %v6800_v59, 0.0  ;;  %v6796_v32 = vadd.f32 %v10871_v45, %v6775_v18 }
 0x6aa   : > { %6832 = vst.msk [vmem:[%s9022_s22 + $0x68] sm:$0xff] %vm746_vm3, %v6816_v28  ;;  %v6812_v57 = vmax.f32 %v6796_v32, 0.0 }
 0x6ab   : > { %v6761_v37 = vpop.f32.mrf.mxu3 }
 0x6ac   : > { %v6780_v43 = vadd.f32 %v6761_v37, %v6621_v33  ;;  %6828 = vst.msk [vmem:[%s9022_s22 + $0x48] sm:$0xff] %vm746_vm3, %v6812_v57  ;;  %v6435_v1 = vpop.f32.mrf.mxu0 }
 0x6ad   : > { %v6751_v2 = vpop.f32.mrf.mxu2  ;;  %v6459_v49 = vadd.f32 %v6435_v1, %v6300_v5 }
 0x6ae   : > { %v6801_v50 = vadd.f32 %v10871_v45, %v6780_v43  ;;  %v6776_v11 = vadd.f32 %v6751_v2, %v6617_v10  ;;  %v6594_v48 = vpop.f32.mrf.mxu1 }
 0x6af   : > { %v6618_v60 = vadd.f32 %v6594_v48, %v6459_v49 }
 0x6b0   : > { %v6817_v35 = vmax.f32 %v6801_v50, 0.0  ;;  %v6797_v46 = vadd.f32 %v10871_v45, %v6776_v11 }
 0x6b2   : > { %6833 = vst.msk [vmem:[%s9022_s22 + $0x70] sm:$0xff] %vm746_vm3, %v6817_v35  ;;  %v6813_v55 = vmax.f32 %v6797_v46, 0.0 }
 0x6b3   : > { %v6763_v19 = vpop.f32.mrf.mxu3 }
 0x6b4   : > { %v6781_v21 = vadd.f32 %v6763_v19, %v6622_v47  ;;  %6829 = vst.msk [vmem:[%s9022_s22 + $0x50] sm:$0xff] %vm746_vm3, %v6813_v55 }
 0x6b5   : > { %v6753_v0 = vpop.f32.mrf.mxu2 }
 0x6b6   : > { %v6802_v6 = vadd.f32 %v10871_v45, %v6781_v21  ;;  %v6777_v44 = vadd.f32 %v6753_v0, %v6618_v60 }
 0x6b8   : > { %v6818_v39 = vmax.f32 %v6802_v6, 0.0  ;;  %v6798_v24 = vadd.f32 %v10871_v45, %v6777_v44 }
 0x6ba   : > { %6834 = vst.msk [vmem:[%s9022_s22 + $0x78] sm:$0xff] %vm746_vm3, %v6818_v39  ;;  %v6814_v9 = vmax.f32 %v6798_v24, 0.0 }
 0x6bc   : > { %6830 = vst.msk [vmem:[%s9022_s22 + $0x58] sm:$0xff] %vm746_vm3, %v6814_v9 }
 0x6bd PF: > { %s11045_s24 = sld [smem:[#allocation10_spill]]  ;;  %s8483_s27 = sshll.u32 %s8819_s17, 4 }
 0x6be   : > { %s11046_s29 = sld [smem:[#allocation8_spill]]  ;;  %s6850_s10 = sshll.u32 %s9022_s22, 4  ;;  %s6851_s10 = int_to_ptr.vmem [resolvable:$true] %s6850_s10 }
 0x6bf   : > { %s11048_s19 = sld [smem:[#allocation23_spill]] }
 0x6c3   : > { %s8484_s8 = sshll.u32 %s11045_s24, 7 }
 0x6c4   : > { %s6847_s13 = sadd.s32 %s8484_s8, %s8483_s27  ;;  %s11050_s16 = sand.u32 1, %s11046_s29  }
 0x6c5   : > { %s8485_s14 = sshll.u32 %s6847_s13, 3  ;;  %s11049_s25 = smov %s11048_s19 }
 0x6c6   : > { %s6849_s11 = scalar_lea.hbm %s11048_s19, %s8485_s14  ;;  %s6836_s20 = scalar_lea.sflag [#allocation5], %s11050_s16 }
 0x6c7   : > { %s6852_s30 = sshll.u32 %s6849_s11, 4  ;;  %s8749_s9 = scalar_lea.hbm %s11049_s25, 2048  ;;  %s6853_s30 = int_to_ptr.hbm [resolvable:$true] %s6852_s30 }
 0x6c8   : > { %s8743_s21 = sshra.s32 %s6853_s30, 4  ;;  %s8744_s21 = int_to_ptr.hbm [resolvable:$true] %s8743_s21 }
 0x6c9   : > { %s8745_s12 = scalar_lea.hbm %s8744_s21, 128  ;;  %p8750_p11 = scmp.lt.s32.totalorder %s8744_s21, %s11049_s25 }
 0x6ca   : > { %p8746_p8 = scmp.ne.s32.totalorder %s8744_s21, %s8745_s12  ;;  %p8751_p12 = scmp.lt.s32.totalorder %s8749_s9, %s8745_s12 }
 0x6cc   : > { %p8747_p9 = pnand %p8746_p8, %p8961_p6  ;;  %p8752_p13 = por %p8751_p12, %p8750_p11 }
 0x6ce   : > { %p8748_p10 = pneg %p8747_p9 }
 0x6d0   : > { %p8753_p0 = pnand %p8752_p13, %p8748_p10 }
 0x6d2   : > { %8756 = shalt.err (!%p8753_p0)
}
 0x6d3   : > { %s8842_s24 = smov 128   ;;  %s8843_s29 = smov 8  }
 0x6d4   : > { %8633 = dma.vmem_to_hbm [thread:$0]  (%p8961_p6), %s6851_s10, 2048, %s6853_s30, %s6836_s20, %s8842_s24, %s8842_s24, %s8843_s29  }
 0x6d5 PF: > { %s11051_s27 = sld [smem:[#allocation14_spill]] }
 0x6d6   : > { %s11052_s8 = sld [smem:[#allocation7_spill]] }
 0x6db   : > { %p8639_p1 = scmp.ge.s32.totalorder %s11051_s27, 2 }
 0x6dc   : > { %s6867_s14 = sand.u32 1, %s11052_s8  }
 0x6dd   : > { %p8636_p2 = pnand %p8639_p1, %p8968_p7  ;;  %s6868_s15 = scalar_lea.sflag [#allocation5], %s6867_s14 }
 0x6df   : > { %p8637_p3 = pneg %p8636_p2 }
 0x6e1   : > { %8798 = dma.done.wait (%p8637_p3), %s6868_s15, 2048  }
 0x6e2   : > { %8800 = vsyncadd (%p8637_p3), %s6868_s15, 4294965248  ;;  %s23_s22 = sadd.s32 1, %s11051_s27   ;;  %s11054_s13 = sld [smem:[#allocation8_spill]] }
 0x6e3   : > { %p20_p4 = scmp.ge.s32.totalorder %s23_s22, 50   ;;  %s11055_s14 = sld [smem:[#allocation9_spill]] }
 0x6e4   : > { %s11056_s15 = sld [smem:[#allocation20_spill]] }
 0x6e5   : > { %s11057_s16 = sld [smem:[#allocation11_spill]] }
 0x6e6   : > { %s11058_s17 = sld [smem:[#allocation12_spill]]  ;;  %22 = sbr.rel (!%p20_p4) target bundleno = 10 (0xa), region = 158 }
 0x6e7   : > { %s11059_s18 = sld [smem:[#allocation13_spill]] }
 0x6e8   : > { %s11060_s19 = sld [smem:[#allocation15_spill]] }
 0x6e9   : > { %s11061_s20 = sld [smem:[#allocation17_spill]] }
 0x6ea   : > { %s11062_s21 = sld [smem:[#allocation19_spill]] }
 0x6eb   :  { %6874 = vsyncpa [#allocation5], 1 }
 0x6ec   :  { %6876 = vsyncpa [#allocation5 + $0x1], 1 }

</bundles_post_ra>
